<compile_context>
chip_gen: v6e
topology: v6e:2x2x1
jax: 0.10.0
libtpu: 0.0.40
codegen_flags: <defaults>
</compile_context>

<pallas_src>
from functools import partial

import numpy as np
import jax
import jax.numpy as jnp
from jax.experimental import pallas as pl
from jax.experimental.pallas import tpu as pltpu


# ----------------------------- Pallas kernel ---------------------------------
def _bn_relu_pool(ys, gamma, beta):
    """BatchNorm(batch stats) + ReLU + 2x2 max-pool on 4 pool-window members.

    ys    : list of 4 conv outputs (one per 2x2-window member), each (Cout, Q) f32,
            member q-ordering == pooled-output position ordering (b, i, j).
    gamma : (Cout, 1) f32 BN weight
    beta  : (Cout, 1) f32 BN bias
    returns pooled activations (Cout, Q) f32.
    """
    q = ys[0].shape[1]
    n = 4.0 * q  # BN statistics over ALL B*H*W conv-output positions (training mode)
    tot = (ys[0] + ys[1]) + (ys[2] + ys[3])
    mean = jnp.sum(tot, axis=1, keepdims=True) / n                       # (Cout, 1)
    var = (jnp.sum(jnp.square(ys[0] - mean), axis=1, keepdims=True)
           + jnp.sum(jnp.square(ys[1] - mean), axis=1, keepdims=True)
           + jnp.sum(jnp.square(ys[2] - mean), axis=1, keepdims=True)
           + jnp.sum(jnp.square(ys[3] - mean), axis=1, keepdims=True)) / n
    scale = gamma * jax.lax.rsqrt(var + 1e-5)                            # biased var, eps=1e-5
    shift = beta - mean * scale
    zs = [jnp.maximum(y * scale + shift, 0.0) for y in ys]               # BN + ReLU
    return jnp.maximum(jnp.maximum(zs[0], zs[1]), jnp.maximum(zs[2], zs[3]))  # 2x2 max-pool


def conv4_fused_kernel(rows0_ref, w0_ref, w9_ref, m1_ref, m2_ref, m3_ref, bn_ref, o_ref):
    """Whole Conv4 forward (4 fused conv blocks) in one kernel invocation.

    rows0_ref : (4, K0p, Q0)       bf16  layer-0 im2col rows (pool-grouped, K padded)
    w0_ref    : (Cout, K0p)        bf16  layer-0 GEMM weight
    w9_ref    : (3, 9, Cout, Cin)  bf16  per-tap weights of layers 1..3
    m{1,2,3}  : (9, 4, P_in, Q)    bf16  0/1 selection matrices: 3x3 shift (zero pad) +
                                         2x2-pool member grouping for layers 1..3
    bn_ref    : (4, 2, Cout, 1)    f32   [layer, {gamma, beta}]
    o_ref     : (Cout, B)          f32   final 1x1-spatial features (transposed)
    """
    f32 = jnp.float32
    bf16 = jnp.bfloat16

    # ---- block 0: conv-as-GEMM on host-built, pool-grouped im2col rows ----------------------
    w0 = w0_ref[...]                                                     # (Cout, K0p) bf16
    ys = [jnp.dot(w0, rows0_ref[m], preferred_element_type=f32) for m in range(4)]
    act = _bn_relu_pool(ys, bn_ref[0, 0], bn_ref[0, 1])                  # (Cout, B*(H/2)*(W/2))

    # ---- blocks 1..3: per-tap matmuls + selection-matrix "im2col / pool reorder" ------------
    for layer, m_ref in ((1, m1_ref), (2, m2_ref), (3, m3_ref)):
        act_bf = act.astype(bf16)
        # u_k[c, p] = sum_ci W[c, ci, dh, dw] * act[ci, p]   (tap contribution per position)
        us = [jnp.dot(w9_ref[layer - 1, k], act_bf,
                      preferred_element_type=f32).astype(bf16) for k in range(9)]
        ys = []
        for m in range(4):                                               # 2x2-pool member
            y = jnp.dot(us[0], m_ref[0, m], preferred_element_type=f32)
            for k in range(1, 9):
                y = y + jnp.dot(us[k], m_ref[k, m], preferred_element_type=f32)
            ys.append(y)                                                 # (Cout, Q) f32
        act = _bn_relu_pool(ys, bn_ref[layer, 0], bn_ref[layer, 1])

    o_ref[...] = act                                                     # (Cout, B)


# --------------------------- host-side preparation ----------------------------
def _prep_rows0(x_nchw, k_pad):
    """NCHW input -> (4, k_pad, B*(H//2)*(W//2)) bf16 im2col rows for layer 0.

    Member m = wr*2 + wc is the 2x2 max-pool window member; within a member the lane
    (position) order is (b, i, j) row-major == the pooled-output ordering.
    K order is (dh, dw, ci); K is zero-padded 9*Cin -> k_pad.
    """
    B, Cin, H, W = x_nchw.shape
    x = jnp.transpose(x_nchw, (0, 2, 3, 1))                              # NHWC
    xp = jnp.pad(x, ((0, 0), (1, 1), (1, 1), (0, 0)))
    cols = [xp[:, dh:dh + H, dw:dw + W, :] for dh in range(3) for dw in range(3)]
    patches = jnp.concatenate(cols, axis=-1)                             # (B, H, W, 9*Cin)
    K = 9 * Cin
    p = patches.reshape(B, H // 2, 2, W // 2, 2, K)                      # (b, i, wr, j, wc, K)
    p = jnp.transpose(p, (2, 4, 0, 1, 3, 5))                             # (wr, wc, b, i, j, K)
    p = p.reshape(4, B * (H // 2) * (W // 2), K)                         # (4, Q0, K)
    p = jnp.transpose(p, (0, 2, 1))                                      # (4, K, Q0)
    p = jnp.pad(p, ((0, 0), (0, k_pad - K), (0, 0)))
    return p.astype(jnp.bfloat16)


def _prep_w0(w_oihw, k_pad):
    """(Cout, Cin, 3, 3) -> (Cout, k_pad) GEMM weight, K ordered (dh, dw, ci), zero-padded."""
    Cout, Cin = w_oihw.shape[0], w_oihw.shape[1]
    wt = jnp.transpose(w_oihw, (0, 2, 3, 1)).reshape(Cout, 9 * Cin)
    wt = jnp.pad(wt, ((0, 0), (0, k_pad - 9 * Cin)))
    return wt.astype(jnp.bfloat16)


def _prep_w9(w_oihw):
    """(Cout, Cin, 3, 3) -> (9, Cout, Cin), tap index k = dh*3 + dw."""
    Cout, Cin = w_oihw.shape[0], w_oihw.shape[1]
    return jnp.transpose(w_oihw, (2, 3, 0, 1)).reshape(9, Cout, Cin).astype(jnp.bfloat16)


def _pool_select_mats(B, H, W):
    """0/1 matrices doing zero-padded 3x3 shift + 2x2-pool member grouping in one matmul.

    Returns (9, 4, B*H*W, B*(H//2)*(W//2)) bf16.  For tap k=(dh,dw), member m=(wr,wc) and
    pooled position q=(b,i,j), column q selects input position (b, 2i+wr+dh-1, 2j+wc+dw-1)
    (all-zero column when that pixel falls in the zero padding).
    """
    Ho, Wo = H // 2, W // 2
    P, Q = B * H * W, B * Ho * Wo
    m = np.zeros((9, 4, P, Q), np.float32)
    for k in range(9):
        dh, dw = k // 3, k % 3
        for mem in range(4):
            wr, wc = mem // 2, mem % 2
            for b in range(B):
                for i in range(Ho):
                    for j in range(Wo):
                        hs = 2 * i + wr + dh - 1
                        ws = 2 * j + wc + dw - 1
                        if 0 <= hs < H and 0 <= ws < W:
                            q = (b * Ho + i) * Wo + j
                            p = (b * H + hs) * W + ws
                            m[k, mem, p, q] = 1.0
    return jnp.asarray(m, dtype=jnp.bfloat16)


# ------------------------------- forward pass ---------------------------------
@partial(jax.jit, static_argnames=("expand_dim",))
def conv4_forward(x_nchw, params, expand_dim):
    """Equivalent of Conv4.forward (training mode)."""
    B, Cin, H, W = x_nchw.shape
    Cout = params["w0"].shape[0]
    if H % 16 or W % 16:
        raise ValueError("Conv4 needs spatial dims divisible by 16 (4 pooling stages).")
    if (H // 16) * (W // 16) != 1:
        # For >1x1 final spatial the NHWC-style flatten below would diverge from PyTorch's
        # NCHW flatten order.
        raise ValueError("final spatial size must be 1x1 to match PyTorch's flatten order")

    k_pad = ((9 * Cin + 31) // 32) * 32                                  # 27 -> 32 for Cin=3
    rows0 = _prep_rows0(x_nchw, k_pad)                                   # (4, k_pad, B*64)
    w0t = _prep_w0(params["w0"], k_pad)                                  # (Cout, k_pad)
    w9 = jnp.stack([_prep_w9(params[f"w{l}"]) for l in (1, 2, 3)])       # (3, 9, Cout, Cout)
    m1 = _pool_select_mats(B, H // 2, W // 2)
    m2 = _pool_select_mats(B, H // 4, W // 4)
    m3 = _pool_select_mats(B, H // 8, W // 8)
    bn = jnp.stack([jnp.stack([params[f"g{l}"], params[f"beta{l}"]]) for l in range(4)])
    bn = bn.reshape(4, 2, Cout, 1).astype(jnp.float32)                   # (4, 2, Cout, 1)

    out_t = pl.pallas_call(
        conv4_fused_kernel,
        out_shape=jax.ShapeDtypeStruct((Cout, B), jnp.float32),
        in_specs=[pl.BlockSpec(memory_space=pltpu.MemorySpace.VMEM)] * 7,
        out_specs=pl.BlockSpec(memory_space=pltpu.MemorySpace.VMEM),
    )(rows0, w0t, w9, m1, m2, m3, bn)

    feat = out_t.T                                                       # (B, Cout)
    return jnp.broadcast_to(feat[None], (expand_dim, B, Cout))


def init_params(key, hid_dim=32, x_dim=3):
    """Deterministic parameter init matching Conv4.__init__ shapes."""
    params = {}
    cin = x_dim
    for l in range(4):
        key, kw, kb = jax.random.split(key, 3)
        fan_in = cin * 9
        params[f"w{l}"] = jax.random.normal(kw, (hid_dim, cin, 3, 3), jnp.float32) * fan_in ** -0.5
        # Conv biases exist in the PyTorch module but are exactly cancelled by BatchNorm's
        # batch-statistics mean subtraction, so the kernel never reads them (perf feedback).
        params[f"b{l}"] = jax.random.normal(kb, (hid_dim,), jnp.float32) * 0.01
        params[f"g{l}"] = jnp.ones((hid_dim,), jnp.float32)              # BN weight
        params[f"beta{l}"] = jnp.zeros((hid_dim,), jnp.float32)          # BN bias
        cin = hid_dim
    return params


if __name__ == "__main__":
    key = jax.random.PRNGKey(0)
    key, kx = jax.random.split(key)

    batch, x_dim, spatial = 2, 3, 16
    hid_dim = 32          # configs.model.conv4.num_filters
    expand_dim = 5        # configs.model.num_phi_samples

    x = jax.random.normal(kx, (batch, x_dim, spatial, spatial), jnp.float32)
    params = init_params(key, hid_dim=hid_dim, x_dim=x_dim)

    out = conv4_forward(x, params, expand_dim)
    out = jax.block_until_ready(out)

    assert out.shape == (expand_dim, batch, hid_dim), out.shape
    assert bool(jnp.all(jnp.isfinite(out)))
    print("KERNEL_OK")
</pallas_src>

<mosaic_0001>
module attributes {stable_mosaic.version = 11 : i64} {
  func.func @conv4_fused_kernel(%arg0: memref<4x32x128xbf16, #tpu.memory_space<vmem>>, %arg1: memref<32x32xbf16, #tpu.memory_space<vmem>>, %arg2: memref<3x9x32x32xbf16, #tpu.memory_space<vmem>>, %arg3: memref<9x4x128x32xbf16, #tpu.memory_space<vmem>>, %arg4: memref<9x4x32x8xbf16, #tpu.memory_space<vmem>>, %arg5: memref<9x4x8x2xbf16, #tpu.memory_space<vmem>>, %arg6: memref<4x2x32x1xf32, #tpu.memory_space<vmem>>, %arg7: memref<32x2xf32, #tpu.memory_space<vmem>>) attributes {dimension_semantics = [], scalar_prefetch = 0 : i64, scratch_operands = 0 : i64, tpu.core_type = #tpu.core_type<tc>} {
    %c0 = arith.constant 0 : index
    %c0_0 = arith.constant 0 : index
    %0 = vector.load %arg1[%c0, %c0_0] : memref<32x32xbf16, #tpu.memory_space<vmem>>, vector<32x32xbf16>
    %c0_1 = arith.constant 0 : index
    %c0_2 = arith.constant 0 : index
    %c0_3 = arith.constant 0 : index
    %1 = vector.load %arg0[%c0_1, %c0_2, %c0_3] : memref<4x32x128xbf16, #tpu.memory_space<vmem>>, vector<1x32x128xbf16>
    %2 = vector.shape_cast %1 : vector<1x32x128xbf16> to vector<32x128xbf16>
    %cst = arith.constant dense<0.000000e+00> : vector<32x128xf32>
    %3 = tpu.matmul %0, %2, %cst {dimension_numbers = #tpu.dot_dimension_numbers<[1], [0], [0], [1], [0, 0, 1, 1], [], []>} : vector<32x32xbf16>, vector<32x128xbf16>, vector<32x128xf32> -> vector<32x128xf32>
    %c1 = arith.constant 1 : index
    %c0_4 = arith.constant 0 : index
    %c0_5 = arith.constant 0 : index
    %4 = vector.load %arg0[%c1, %c0_4, %c0_5] : memref<4x32x128xbf16, #tpu.memory_space<vmem>>, vector<1x32x128xbf16>
    %5 = vector.shape_cast %4 : vector<1x32x128xbf16> to vector<32x128xbf16>
    %cst_6 = arith.constant dense<0.000000e+00> : vector<32x128xf32>
    %6 = tpu.matmul %0, %5, %cst_6 {dimension_numbers = #tpu.dot_dimension_numbers<[1], [0], [0], [1], [0, 0, 1, 1], [], []>} : vector<32x32xbf16>, vector<32x128xbf16>, vector<32x128xf32> -> vector<32x128xf32>
    %c2 = arith.constant 2 : index
    %c0_7 = arith.constant 0 : index
    %c0_8 = arith.constant 0 : index
    %7 = vector.load %arg0[%c2, %c0_7, %c0_8] : memref<4x32x128xbf16, #tpu.memory_space<vmem>>, vector<1x32x128xbf16>
    %8 = vector.shape_cast %7 : vector<1x32x128xbf16> to vector<32x128xbf16>
    %cst_9 = arith.constant dense<0.000000e+00> : vector<32x128xf32>
    %9 = tpu.matmul %0, %8, %cst_9 {dimension_numbers = #tpu.dot_dimension_numbers<[1], [0], [0], [1], [0, 0, 1, 1], [], []>} : vector<32x32xbf16>, vector<32x128xbf16>, vector<32x128xf32> -> vector<32x128xf32>
    %c3 = arith.constant 3 : index
    %c0_10 = arith.constant 0 : index
    %c0_11 = arith.constant 0 : index
    %10 = vector.load %arg0[%c3, %c0_10, %c0_11] : memref<4x32x128xbf16, #tpu.memory_space<vmem>>, vector<1x32x128xbf16>
    %11 = vector.shape_cast %10 : vector<1x32x128xbf16> to vector<32x128xbf16>
    %cst_12 = arith.constant dense<0.000000e+00> : vector<32x128xf32>
    %12 = tpu.matmul %0, %11, %cst_12 {dimension_numbers = #tpu.dot_dimension_numbers<[1], [0], [0], [1], [0, 0, 1, 1], [], []>} : vector<32x32xbf16>, vector<32x128xbf16>, vector<32x128xf32> -> vector<32x128xf32>
    %c0_13 = arith.constant 0 : index
    %c0_14 = arith.constant 0 : index
    %c0_15 = arith.constant 0 : index
    %c0_16 = arith.constant 0 : index
    %13 = vector.load %arg6[%c0_13, %c0_14, %c0_15, %c0_16] : memref<4x2x32x1xf32, #tpu.memory_space<vmem>>, vector<1x1x32x1xf32>
    %14 = vector.shape_cast %13 : vector<1x1x32x1xf32> to vector<32x1xf32>
    %c0_17 = arith.constant 0 : index
    %c1_18 = arith.constant 1 : index
    %c0_19 = arith.constant 0 : index
    %c0_20 = arith.constant 0 : index
    %15 = vector.load %arg6[%c0_17, %c1_18, %c0_19, %c0_20] : memref<4x2x32x1xf32, #tpu.memory_space<vmem>>, vector<1x1x32x1xf32>
    %16 = vector.shape_cast %15 : vector<1x1x32x1xf32> to vector<32x1xf32>
    %17 = arith.addf %3, %6 : vector<32x128xf32>
    %18 = arith.addf %9, %12 : vector<32x128xf32>
    %19 = arith.addf %17, %18 : vector<32x128xf32>
    %cst_21 = arith.constant dense<0.000000e+00> : vector<32xf32>
    %20 = vector.multi_reduction <add>, %19, %cst_21 [1] : vector<32x128xf32> to vector<32xf32>
    %21 = vector.shape_cast %20 : vector<32xf32> to vector<32x1xf32>
    %cst_22 = arith.constant 5.120000e+02 : f32
    %22 = vector.broadcast %cst_22 : f32 to vector<32x1xf32>
    %23 = arith.divf %21, %22 : vector<32x1xf32>
    %24 = vector.broadcast %23 : vector<32x1xf32> to vector<32x128xf32>
    %25 = arith.subf %3, %24 : vector<32x128xf32>
    %26 = arith.mulf %25, %25 : vector<32x128xf32>
    %cst_23 = arith.constant dense<0.000000e+00> : vector<32xf32>
    %27 = vector.multi_reduction <add>, %26, %cst_23 [1] : vector<32x128xf32> to vector<32xf32>
    %28 = vector.shape_cast %27 : vector<32xf32> to vector<32x1xf32>
    %29 = vector.broadcast %23 : vector<32x1xf32> to vector<32x128xf32>
    %30 = arith.subf %6, %29 : vector<32x128xf32>
    %31 = arith.mulf %30, %30 : vector<32x128xf32>
    %cst_24 = arith.constant dense<0.000000e+00> : vector<32xf32>
    %32 = vector.multi_reduction <add>, %31, %cst_24 [1] : vector<32x128xf32> to vector<32xf32>
    %33 = vector.shape_cast %32 : vector<32xf32> to vector<32x1xf32>
    %34 = arith.addf %28, %33 : vector<32x1xf32>
    %35 = vector.broadcast %23 : vector<32x1xf32> to vector<32x128xf32>
    %36 = arith.subf %9, %35 : vector<32x128xf32>
    %37 = arith.mulf %36, %36 : vector<32x128xf32>
    %cst_25 = arith.constant dense<0.000000e+00> : vector<32xf32>
    %38 = vector.multi_reduction <add>, %37, %cst_25 [1] : vector<32x128xf32> to vector<32xf32>
    %39 = vector.shape_cast %38 : vector<32xf32> to vector<32x1xf32>
    %40 = arith.addf %34, %39 : vector<32x1xf32>
    %41 = vector.broadcast %23 : vector<32x1xf32> to vector<32x128xf32>
    %42 = arith.subf %12, %41 : vector<32x128xf32>
    %43 = arith.mulf %42, %42 : vector<32x128xf32>
    %cst_26 = arith.constant dense<0.000000e+00> : vector<32xf32>
    %44 = vector.multi_reduction <add>, %43, %cst_26 [1] : vector<32x128xf32> to vector<32xf32>
    %45 = vector.shape_cast %44 : vector<32xf32> to vector<32x1xf32>
    %46 = arith.addf %40, %45 : vector<32x1xf32>
    %cst_27 = arith.constant 5.120000e+02 : f32
    %47 = vector.broadcast %cst_27 : f32 to vector<32x1xf32>
    %48 = arith.divf %46, %47 : vector<32x1xf32>
    %cst_28 = arith.constant 9.99999974E-6 : f32
    %49 = vector.broadcast %cst_28 : f32 to vector<32x1xf32>
    %50 = arith.addf %48, %49 : vector<32x1xf32>
    %51 = math.rsqrt %50 : vector<32x1xf32>
    %52 = arith.mulf %14, %51 : vector<32x1xf32>
    %53 = arith.mulf %23, %52 : vector<32x1xf32>
    %54 = arith.subf %16, %53 : vector<32x1xf32>
    %55 = vector.broadcast %52 : vector<32x1xf32> to vector<32x128xf32>
    %56 = arith.mulf %3, %55 : vector<32x128xf32>
    %57 = vector.broadcast %54 : vector<32x1xf32> to vector<32x128xf32>
    %58 = arith.addf %56, %57 : vector<32x128xf32>
    %cst_29 = arith.constant 0.000000e+00 : f32
    %59 = vector.broadcast %cst_29 : f32 to vector<32x128xf32>
    %60 = arith.maximumf %58, %59 : vector<32x128xf32>
    %61 = vector.broadcast %52 : vector<32x1xf32> to vector<32x128xf32>
    %62 = arith.mulf %6, %61 : vector<32x128xf32>
    %63 = vector.broadcast %54 : vector<32x1xf32> to vector<32x128xf32>
    %64 = arith.addf %62, %63 : vector<32x128xf32>
    %cst_30 = arith.constant 0.000000e+00 : f32
    %65 = vector.broadcast %cst_30 : f32 to vector<32x128xf32>
    %66 = arith.maximumf %64, %65 : vector<32x128xf32>
    %67 = vector.broadcast %52 : vector<32x1xf32> to vector<32x128xf32>
    %68 = arith.mulf %9, %67 : vector<32x128xf32>
    %69 = vector.broadcast %54 : vector<32x1xf32> to vector<32x128xf32>
    %70 = arith.addf %68, %69 : vector<32x128xf32>
    %cst_31 = arith.constant 0.000000e+00 : f32
    %71 = vector.broadcast %cst_31 : f32 to vector<32x128xf32>
    %72 = arith.maximumf %70, %71 : vector<32x128xf32>
    %73 = vector.broadcast %52 : vector<32x1xf32> to vector<32x128xf32>
    %74 = arith.mulf %12, %73 : vector<32x128xf32>
    %75 = vector.broadcast %54 : vector<32x1xf32> to vector<32x128xf32>
    %76 = arith.addf %74, %75 : vector<32x128xf32>
    %cst_32 = arith.constant 0.000000e+00 : f32
    %77 = vector.broadcast %cst_32 : f32 to vector<32x128xf32>
    %78 = arith.maximumf %76, %77 : vector<32x128xf32>
    %79 = arith.maximumf %60, %66 : vector<32x128xf32>
    %80 = arith.maximumf %72, %78 : vector<32x128xf32>
    %81 = arith.maximumf %79, %80 : vector<32x128xf32>
    %82 = arith.truncf %81 : vector<32x128xf32> to vector<32x128xbf16>
    %c0_33 = arith.constant 0 : index
    %c0_34 = arith.constant 0 : index
    %c0_35 = arith.constant 0 : index
    %c0_36 = arith.constant 0 : index
    %83 = vector.load %arg2[%c0_33, %c0_34, %c0_35, %c0_36] : memref<3x9x32x32xbf16, #tpu.memory_space<vmem>>, vector<1x1x32x32xbf16>
    %84 = vector.shape_cast %83 : vector<1x1x32x32xbf16> to vector<32x32xbf16>
    %cst_37 = arith.constant dense<0.000000e+00> : vector<32x128xf32>
    %85 = tpu.matmul %84, %82, %cst_37 {dimension_numbers = #tpu.dot_dimension_numbers<[1], [0], [0], [1], [0, 0, 1, 1], [], []>} : vector<32x32xbf16>, vector<32x128xbf16>, vector<32x128xf32> -> vector<32x128xf32>
    %86 = arith.truncf %85 : vector<32x128xf32> to vector<32x128xbf16>
    %c0_38 = arith.constant 0 : index
    %c1_39 = arith.constant 1 : index
    %c0_40 = arith.constant 0 : index
    %c0_41 = arith.constant 0 : index
    %87 = vector.load %arg2[%c0_38, %c1_39, %c0_40, %c0_41] : memref<3x9x32x32xbf16, #tpu.memory_space<vmem>>, vector<1x1x32x32xbf16>
    %88 = vector.shape_cast %87 : vector<1x1x32x32xbf16> to vector<32x32xbf16>
    %cst_42 = arith.constant dense<0.000000e+00> : vector<32x128xf32>
    %89 = tpu.matmul %88, %82, %cst_42 {dimension_numbers = #tpu.dot_dimension_numbers<[1], [0], [0], [1], [0, 0, 1, 1], [], []>} : vector<32x32xbf16>, vector<32x128xbf16>, vector<32x128xf32> -> vector<32x128xf32>
    %90 = arith.truncf %89 : vector<32x128xf32> to vector<32x128xbf16>
    %c0_43 = arith.constant 0 : index
    %c2_44 = arith.constant 2 : index
    %c0_45 = arith.constant 0 : index
    %c0_46 = arith.constant 0 : index
    %91 = vector.load %arg2[%c0_43, %c2_44, %c0_45, %c0_46] : memref<3x9x32x32xbf16, #tpu.memory_space<vmem>>, vector<1x1x32x32xbf16>
    %92 = vector.shape_cast %91 : vector<1x1x32x32xbf16> to vector<32x32xbf16>
    %cst_47 = arith.constant dense<0.000000e+00> : vector<32x128xf32>
    %93 = tpu.matmul %92, %82, %cst_47 {dimension_numbers = #tpu.dot_dimension_numbers<[1], [0], [0], [1], [0, 0, 1, 1], [], []>} : vector<32x32xbf16>, vector<32x128xbf16>, vector<32x128xf32> -> vector<32x128xf32>
    %94 = arith.truncf %93 : vector<32x128xf32> to vector<32x128xbf16>
    %c0_48 = arith.constant 0 : index
    %c3_49 = arith.constant 3 : index
    %c0_50 = arith.constant 0 : index
    %c0_51 = arith.constant 0 : index
    %95 = vector.load %arg2[%c0_48, %c3_49, %c0_50, %c0_51] : memref<3x9x32x32xbf16, #tpu.memory_space<vmem>>, vector<1x1x32x32xbf16>
    %96 = vector.shape_cast %95 : vector<1x1x32x32xbf16> to vector<32x32xbf16>
    %cst_52 = arith.constant dense<0.000000e+00> : vector<32x128xf32>
    %97 = tpu.matmul %96, %82, %cst_52 {dimension_numbers = #tpu.dot_dimension_numbers<[1], [0], [0], [1], [0, 0, 1, 1], [], []>} : vector<32x32xbf16>, vector<32x128xbf16>, vector<32x128xf32> -> vector<32x128xf32>
    %98 = arith.truncf %97 : vector<32x128xf32> to vector<32x128xbf16>
    %c0_53 = arith.constant 0 : index
    %c4 = arith.constant 4 : index
    %c0_54 = arith.constant 0 : index
    %c0_55 = arith.constant 0 : index
    %99 = vector.load %arg2[%c0_53, %c4, %c0_54, %c0_55] : memref<3x9x32x32xbf16, #tpu.memory_space<vmem>>, vector<1x1x32x32xbf16>
    %100 = vector.shape_cast %99 : vector<1x1x32x32xbf16> to vector<32x32xbf16>
    %cst_56 = arith.constant dense<0.000000e+00> : vector<32x128xf32>
    %101 = tpu.matmul %100, %82, %cst_56 {dimension_numbers = #tpu.dot_dimension_numbers<[1], [0], [0], [1], [0, 0, 1, 1], [], []>} : vector<32x32xbf16>, vector<32x128xbf16>, vector<32x128xf32> -> vector<32x128xf32>
    %102 = arith.truncf %101 : vector<32x128xf32> to vector<32x128xbf16>
    %c0_57 = arith.constant 0 : index
    %c5 = arith.constant 5 : index
    %c0_58 = arith.constant 0 : index
    %c0_59 = arith.constant 0 : index
    %103 = vector.load %arg2[%c0_57, %c5, %c0_58, %c0_59] : memref<3x9x32x32xbf16, #tpu.memory_space<vmem>>, vector<1x1x32x32xbf16>
    %104 = vector.shape_cast %103 : vector<1x1x32x32xbf16> to vector<32x32xbf16>
    %cst_60 = arith.constant dense<0.000000e+00> : vector<32x128xf32>
    %105 = tpu.matmul %104, %82, %cst_60 {dimension_numbers = #tpu.dot_dimension_numbers<[1], [0], [0], [1], [0, 0, 1, 1], [], []>} : vector<32x32xbf16>, vector<32x128xbf16>, vector<32x128xf32> -> vector<32x128xf32>
    %106 = arith.truncf %105 : vector<32x128xf32> to vector<32x128xbf16>
    %c0_61 = arith.constant 0 : index
    %c6 = arith.constant 6 : index
    %c0_62 = arith.constant 0 : index
    %c0_63 = arith.constant 0 : index
    %107 = vector.load %arg2[%c0_61, %c6, %c0_62, %c0_63] : memref<3x9x32x32xbf16, #tpu.memory_space<vmem>>, vector<1x1x32x32xbf16>
    %108 = vector.shape_cast %107 : vector<1x1x32x32xbf16> to vector<32x32xbf16>
    %cst_64 = arith.constant dense<0.000000e+00> : vector<32x128xf32>
    %109 = tpu.matmul %108, %82, %cst_64 {dimension_numbers = #tpu.dot_dimension_numbers<[1], [0], [0], [1], [0, 0, 1, 1], [], []>} : vector<32x32xbf16>, vector<32x128xbf16>, vector<32x128xf32> -> vector<32x128xf32>
    %110 = arith.truncf %109 : vector<32x128xf32> to vector<32x128xbf16>
    %c0_65 = arith.constant 0 : index
    %c7 = arith.constant 7 : index
    %c0_66 = arith.constant 0 : index
    %c0_67 = arith.constant 0 : index
    %111 = vector.load %arg2[%c0_65, %c7, %c0_66, %c0_67] : memref<3x9x32x32xbf16, #tpu.memory_space<vmem>>, vector<1x1x32x32xbf16>
    %112 = vector.shape_cast %111 : vector<1x1x32x32xbf16> to vector<32x32xbf16>
    %cst_68 = arith.constant dense<0.000000e+00> : vector<32x128xf32>
    %113 = tpu.matmul %112, %82, %cst_68 {dimension_numbers = #tpu.dot_dimension_numbers<[1], [0], [0], [1], [0, 0, 1, 1], [], []>} : vector<32x32xbf16>, vector<32x128xbf16>, vector<32x128xf32> -> vector<32x128xf32>
    %114 = arith.truncf %113 : vector<32x128xf32> to vector<32x128xbf16>
    %c0_69 = arith.constant 0 : index
    %c8 = arith.constant 8 : index
    %c0_70 = arith.constant 0 : index
    %c0_71 = arith.constant 0 : index
    %115 = vector.load %arg2[%c0_69, %c8, %c0_70, %c0_71] : memref<3x9x32x32xbf16, #tpu.memory_space<vmem>>, vector<1x1x32x32xbf16>
    %116 = vector.shape_cast %115 : vector<1x1x32x32xbf16> to vector<32x32xbf16>
    %cst_72 = arith.constant dense<0.000000e+00> : vector<32x128xf32>
    %117 = tpu.matmul %116, %82, %cst_72 {dimension_numbers = #tpu.dot_dimension_numbers<[1], [0], [0], [1], [0, 0, 1, 1], [], []>} : vector<32x32xbf16>, vector<32x128xbf16>, vector<32x128xf32> -> vector<32x128xf32>
    %118 = arith.truncf %117 : vector<32x128xf32> to vector<32x128xbf16>
    %c0_73 = arith.constant 0 : index
    %c0_74 = arith.constant 0 : index
    %c0_75 = arith.constant 0 : index
    %c0_76 = arith.constant 0 : index
    %119 = vector.load %arg3[%c0_73, %c0_74, %c0_75, %c0_76] : memref<9x4x128x32xbf16, #tpu.memory_space<vmem>>, vector<1x1x128x32xbf16>
    %120 = vector.shape_cast %119 : vector<1x1x128x32xbf16> to vector<128x32xbf16>
    %cst_77 = arith.constant dense<0.000000e+00> : vector<32x32xf32>
    %121 = tpu.matmul %86, %120, %cst_77 {dimension_numbers = #tpu.dot_dimension_numbers<[1], [0], [0], [1], [0, 0, 1, 1], [], []>} : vector<32x128xbf16>, vector<128x32xbf16>, vector<32x32xf32> -> vector<32x32xf32>
    %c1_78 = arith.constant 1 : index
    %c0_79 = arith.constant 0 : index
    %c0_80 = arith.constant 0 : index
    %c0_81 = arith.constant 0 : index
    %122 = vector.load %arg3[%c1_78, %c0_79, %c0_80, %c0_81] : memref<9x4x128x32xbf16, #tpu.memory_space<vmem>>, vector<1x1x128x32xbf16>
    %123 = vector.shape_cast %122 : vector<1x1x128x32xbf16> to vector<128x32xbf16>
    %cst_82 = arith.constant dense<0.000000e+00> : vector<32x32xf32>
    %124 = tpu.matmul %90, %123, %cst_82 {dimension_numbers = #tpu.dot_dimension_numbers<[1], [0], [0], [1], [0, 0, 1, 1], [], []>} : vector<32x128xbf16>, vector<128x32xbf16>, vector<32x32xf32> -> vector<32x32xf32>
    %125 = arith.addf %121, %124 : vector<32x32xf32>
    %c2_83 = arith.constant 2 : index
    %c0_84 = arith.constant 0 : index
    %c0_85 = arith.constant 0 : index
    %c0_86 = arith.constant 0 : index
    %126 = vector.load %arg3[%c2_83, %c0_84, %c0_85, %c0_86] : memref<9x4x128x32xbf16, #tpu.memory_space<vmem>>, vector<1x1x128x32xbf16>
    %127 = vector.shape_cast %126 : vector<1x1x128x32xbf16> to vector<128x32xbf16>
    %cst_87 = arith.constant dense<0.000000e+00> : vector<32x32xf32>
    %128 = tpu.matmul %94, %127, %cst_87 {dimension_numbers = #tpu.dot_dimension_numbers<[1], [0], [0], [1], [0, 0, 1, 1], [], []>} : vector<32x128xbf16>, vector<128x32xbf16>, vector<32x32xf32> -> vector<32x32xf32>
    %129 = arith.addf %125, %128 : vector<32x32xf32>
    %c3_88 = arith.constant 3 : index
    %c0_89 = arith.constant 0 : index
    %c0_90 = arith.constant 0 : index
    %c0_91 = arith.constant 0 : index
    %130 = vector.load %arg3[%c3_88, %c0_89, %c0_90, %c0_91] : memref<9x4x128x32xbf16, #tpu.memory_space<vmem>>, vector<1x1x128x32xbf16>
    %131 = vector.shape_cast %130 : vector<1x1x128x32xbf16> to vector<128x32xbf16>
    %cst_92 = arith.constant dense<0.000000e+00> : vector<32x32xf32>
    %132 = tpu.matmul %98, %131, %cst_92 {dimension_numbers = #tpu.dot_dimension_numbers<[1], [0], [0], [1], [0, 0, 1, 1], [], []>} : vector<32x128xbf16>, vector<128x32xbf16>, vector<32x32xf32> -> vector<32x32xf32>
    %133 = arith.addf %129, %132 : vector<32x32xf32>
    %c4_93 = arith.constant 4 : index
    %c0_94 = arith.constant 0 : index
    %c0_95 = arith.constant 0 : index
    %c0_96 = arith.constant 0 : index
    %134 = vector.load %arg3[%c4_93, %c0_94, %c0_95, %c0_96] : memref<9x4x128x32xbf16, #tpu.memory_space<vmem>>, vector<1x1x128x32xbf16>
    %135 = vector.shape_cast %134 : vector<1x1x128x32xbf16> to vector<128x32xbf16>
    %cst_97 = arith.constant dense<0.000000e+00> : vector<32x32xf32>
    %136 = tpu.matmul %102, %135, %cst_97 {dimension_numbers = #tpu.dot_dimension_numbers<[1], [0], [0], [1], [0, 0, 1, 1], [], []>} : vector<32x128xbf16>, vector<128x32xbf16>, vector<32x32xf32> -> vector<32x32xf32>
    %137 = arith.addf %133, %136 : vector<32x32xf32>
    %c5_98 = arith.constant 5 : index
    %c0_99 = arith.constant 0 : index
    %c0_100 = arith.constant 0 : index
    %c0_101 = arith.constant 0 : index
    %138 = vector.load %arg3[%c5_98, %c0_99, %c0_100, %c0_101] : memref<9x4x128x32xbf16, #tpu.memory_space<vmem>>, vector<1x1x128x32xbf16>
    %139 = vector.shape_cast %138 : vector<1x1x128x32xbf16> to vector<128x32xbf16>
    %cst_102 = arith.constant dense<0.000000e+00> : vector<32x32xf32>
    %140 = tpu.matmul %106, %139, %cst_102 {dimension_numbers = #tpu.dot_dimension_numbers<[1], [0], [0], [1], [0, 0, 1, 1], [], []>} : vector<32x128xbf16>, vector<128x32xbf16>, vector<32x32xf32> -> vector<32x32xf32>
    %141 = arith.addf %137, %140 : vector<32x32xf32>
    %c6_103 = arith.constant 6 : index
    %c0_104 = arith.constant 0 : index
    %c0_105 = arith.constant 0 : index
    %c0_106 = arith.constant 0 : index
    %142 = vector.load %arg3[%c6_103, %c0_104, %c0_105, %c0_106] : memref<9x4x128x32xbf16, #tpu.memory_space<vmem>>, vector<1x1x128x32xbf16>
    %143 = vector.shape_cast %142 : vector<1x1x128x32xbf16> to vector<128x32xbf16>
    %cst_107 = arith.constant dense<0.000000e+00> : vector<32x32xf32>
    %144 = tpu.matmul %110, %143, %cst_107 {dimension_numbers = #tpu.dot_dimension_numbers<[1], [0], [0], [1], [0, 0, 1, 1], [], []>} : vector<32x128xbf16>, vector<128x32xbf16>, vector<32x32xf32> -> vector<32x32xf32>
    %145 = arith.addf %141, %144 : vector<32x32xf32>
    %c7_108 = arith.constant 7 : index
    %c0_109 = arith.constant 0 : index
    %c0_110 = arith.constant 0 : index
    %c0_111 = arith.constant 0 : index
    %146 = vector.load %arg3[%c7_108, %c0_109, %c0_110, %c0_111] : memref<9x4x128x32xbf16, #tpu.memory_space<vmem>>, vector<1x1x128x32xbf16>
    %147 = vector.shape_cast %146 : vector<1x1x128x32xbf16> to vector<128x32xbf16>
    %cst_112 = arith.constant dense<0.000000e+00> : vector<32x32xf32>
    %148 = tpu.matmul %114, %147, %cst_112 {dimension_numbers = #tpu.dot_dimension_numbers<[1], [0], [0], [1], [0, 0, 1, 1], [], []>} : vector<32x128xbf16>, vector<128x32xbf16>, vector<32x32xf32> -> vector<32x32xf32>
    %149 = arith.addf %145, %148 : vector<32x32xf32>
    %c8_113 = arith.constant 8 : index
    %c0_114 = arith.constant 0 : index
    %c0_115 = arith.constant 0 : index
    %c0_116 = arith.constant 0 : index
    %150 = vector.load %arg3[%c8_113, %c0_114, %c0_115, %c0_116] : memref<9x4x128x32xbf16, #tpu.memory_space<vmem>>, vector<1x1x128x32xbf16>
    %151 = vector.shape_cast %150 : vector<1x1x128x32xbf16> to vector<128x32xbf16>
    %cst_117 = arith.constant dense<0.000000e+00> : vector<32x32xf32>
    %152 = tpu.matmul %118, %151, %cst_117 {dimension_numbers = #tpu.dot_dimension_numbers<[1], [0], [0], [1], [0, 0, 1, 1], [], []>} : vector<32x128xbf16>, vector<128x32xbf16>, vector<32x32xf32> -> vector<32x32xf32>
    %153 = arith.addf %149, %152 : vector<32x32xf32>
    %c0_118 = arith.constant 0 : index
    %c1_119 = arith.constant 1 : index
    %c0_120 = arith.constant 0 : index
    %c0_121 = arith.constant 0 : index
    %154 = vector.load %arg3[%c0_118, %c1_119, %c0_120, %c0_121] : memref<9x4x128x32xbf16, #tpu.memory_space<vmem>>, vector<1x1x128x32xbf16>
    %155 = vector.shape_cast %154 : vector<1x1x128x32xbf16> to vector<128x32xbf16>
    %cst_122 = arith.constant dense<0.000000e+00> : vector<32x32xf32>
    %156 = tpu.matmul %86, %155, %cst_122 {dimension_numbers = #tpu.dot_dimension_numbers<[1], [0], [0], [1], [0, 0, 1, 1], [], []>} : vector<32x128xbf16>, vector<128x32xbf16>, vector<32x32xf32> -> vector<32x32xf32>
    %c1_123 = arith.constant 1 : index
    %c1_124 = arith.constant 1 : index
    %c0_125 = arith.constant 0 : index
    %c0_126 = arith.constant 0 : index
    %157 = vector.load %arg3[%c1_123, %c1_124, %c0_125, %c0_126] : memref<9x4x128x32xbf16, #tpu.memory_space<vmem>>, vector<1x1x128x32xbf16>
    %158 = vector.shape_cast %157 : vector<1x1x128x32xbf16> to vector<128x32xbf16>
    %cst_127 = arith.constant dense<0.000000e+00> : vector<32x32xf32>
    %159 = tpu.matmul %90, %158, %cst_127 {dimension_numbers = #tpu.dot_dimension_numbers<[1], [0], [0], [1], [0, 0, 1, 1], [], []>} : vector<32x128xbf16>, vector<128x32xbf16>, vector<32x32xf32> -> vector<32x32xf32>
    %160 = arith.addf %156, %159 : vector<32x32xf32>
    %c2_128 = arith.constant 2 : index
    %c1_129 = arith.constant 1 : index
    %c0_130 = arith.constant 0 : index
    %c0_131 = arith.constant 0 : index
    %161 = vector.load %arg3[%c2_128, %c1_129, %c0_130, %c0_131] : memref<9x4x128x32xbf16, #tpu.memory_space<vmem>>, vector<1x1x128x32xbf16>
    %162 = vector.shape_cast %161 : vector<1x1x128x32xbf16> to vector<128x32xbf16>
    %cst_132 = arith.constant dense<0.000000e+00> : vector<32x32xf32>
    %163 = tpu.matmul %94, %162, %cst_132 {dimension_numbers = #tpu.dot_dimension_numbers<[1], [0], [0], [1], [0, 0, 1, 1], [], []>} : vector<32x128xbf16>, vector<128x32xbf16>, vector<32x32xf32> -> vector<32x32xf32>
    %164 = arith.addf %160, %163 : vector<32x32xf32>
    %c3_133 = arith.constant 3 : index
    %c1_134 = arith.constant 1 : index
    %c0_135 = arith.constant 0 : index
    %c0_136 = arith.constant 0 : index
    %165 = vector.load %arg3[%c3_133, %c1_134, %c0_135, %c0_136] : memref<9x4x128x32xbf16, #tpu.memory_space<vmem>>, vector<1x1x128x32xbf16>
    %166 = vector.shape_cast %165 : vector<1x1x128x32xbf16> to vector<128x32xbf16>
    %cst_137 = arith.constant dense<0.000000e+00> : vector<32x32xf32>
    %167 = tpu.matmul %98, %166, %cst_137 {dimension_numbers = #tpu.dot_dimension_numbers<[1], [0], [0], [1], [0, 0, 1, 1], [], []>} : vector<32x128xbf16>, vector<128x32xbf16>, vector<32x32xf32> -> vector<32x32xf32>
    %168 = arith.addf %164, %167 : vector<32x32xf32>
    %c4_138 = arith.constant 4 : index
    %c1_139 = arith.constant 1 : index
    %c0_140 = arith.constant 0 : index
    %c0_141 = arith.constant 0 : index
    %169 = vector.load %arg3[%c4_138, %c1_139, %c0_140, %c0_141] : memref<9x4x128x32xbf16, #tpu.memory_space<vmem>>, vector<1x1x128x32xbf16>
    %170 = vector.shape_cast %169 : vector<1x1x128x32xbf16> to vector<128x32xbf16>
    %cst_142 = arith.constant dense<0.000000e+00> : vector<32x32xf32>
    %171 = tpu.matmul %102, %170, %cst_142 {dimension_numbers = #tpu.dot_dimension_numbers<[1], [0], [0], [1], [0, 0, 1, 1], [], []>} : vector<32x128xbf16>, vector<128x32xbf16>, vector<32x32xf32> -> vector<32x32xf32>
    %172 = arith.addf %168, %171 : vector<32x32xf32>
    %c5_143 = arith.constant 5 : index
    %c1_144 = arith.constant 1 : index
    %c0_145 = arith.constant 0 : index
    %c0_146 = arith.constant 0 : index
    %173 = vector.load %arg3[%c5_143, %c1_144, %c0_145, %c0_146] : memref<9x4x128x32xbf16, #tpu.memory_space<vmem>>, vector<1x1x128x32xbf16>
    %174 = vector.shape_cast %173 : vector<1x1x128x32xbf16> to vector<128x32xbf16>
    %cst_147 = arith.constant dense<0.000000e+00> : vector<32x32xf32>
    %175 = tpu.matmul %106, %174, %cst_147 {dimension_numbers = #tpu.dot_dimension_numbers<[1], [0], [0], [1], [0, 0, 1, 1], [], []>} : vector<32x128xbf16>, vector<128x32xbf16>, vector<32x32xf32> -> vector<32x32xf32>
    %176 = arith.addf %172, %175 : vector<32x32xf32>
    %c6_148 = arith.constant 6 : index
    %c1_149 = arith.constant 1 : index
    %c0_150 = arith.constant 0 : index
    %c0_151 = arith.constant 0 : index
    %177 = vector.load %arg3[%c6_148, %c1_149, %c0_150, %c0_151] : memref<9x4x128x32xbf16, #tpu.memory_space<vmem>>, vector<1x1x128x32xbf16>
    %178 = vector.shape_cast %177 : vector<1x1x128x32xbf16> to vector<128x32xbf16>
    %cst_152 = arith.constant dense<0.000000e+00> : vector<32x32xf32>
    %179 = tpu.matmul %110, %178, %cst_152 {dimension_numbers = #tpu.dot_dimension_numbers<[1], [0], [0], [1], [0, 0, 1, 1], [], []>} : vector<32x128xbf16>, vector<128x32xbf16>, vector<32x32xf32> -> vector<32x32xf32>
    %180 = arith.addf %176, %179 : vector<32x32xf32>
    %c7_153 = arith.constant 7 : index
    %c1_154 = arith.constant 1 : index
    %c0_155 = arith.constant 0 : index
    %c0_156 = arith.constant 0 : index
    %181 = vector.load %arg3[%c7_153, %c1_154, %c0_155, %c0_156] : memref<9x4x128x32xbf16, #tpu.memory_space<vmem>>, vector<1x1x128x32xbf16>
    %182 = vector.shape_cast %181 : vector<1x1x128x32xbf16> to vector<128x32xbf16>
    %cst_157 = arith.constant dense<0.000000e+00> : vector<32x32xf32>
    %183 = tpu.matmul %114, %182, %cst_157 {dimension_numbers = #tpu.dot_dimension_numbers<[1], [0], [0], [1], [0, 0, 1, 1], [], []>} : vector<32x128xbf16>, vector<128x32xbf16>, vector<32x32xf32> -> vector<32x32xf32>
    %184 = arith.addf %180, %183 : vector<32x32xf32>
    %c8_158 = arith.constant 8 : index
    %c1_159 = arith.constant 1 : index
    %c0_160 = arith.constant 0 : index
    %c0_161 = arith.constant 0 : index
    %185 = vector.load %arg3[%c8_158, %c1_159, %c0_160, %c0_161] : memref<9x4x128x32xbf16, #tpu.memory_space<vmem>>, vector<1x1x128x32xbf16>
    %186 = vector.shape_cast %185 : vector<1x1x128x32xbf16> to vector<128x32xbf16>
    %cst_162 = arith.constant dense<0.000000e+00> : vector<32x32xf32>
    %187 = tpu.matmul %118, %186, %cst_162 {dimension_numbers = #tpu.dot_dimension_numbers<[1], [0], [0], [1], [0, 0, 1, 1], [], []>} : vector<32x128xbf16>, vector<128x32xbf16>, vector<32x32xf32> -> vector<32x32xf32>
    %188 = arith.addf %184, %187 : vector<32x32xf32>
    %c0_163 = arith.constant 0 : index
    %c2_164 = arith.constant 2 : index
    %c0_165 = arith.constant 0 : index
    %c0_166 = arith.constant 0 : index
    %189 = vector.load %arg3[%c0_163, %c2_164, %c0_165, %c0_166] : memref<9x4x128x32xbf16, #tpu.memory_space<vmem>>, vector<1x1x128x32xbf16>
    %190 = vector.shape_cast %189 : vector<1x1x128x32xbf16> to vector<128x32xbf16>
    %cst_167 = arith.constant dense<0.000000e+00> : vector<32x32xf32>
    %191 = tpu.matmul %86, %190, %cst_167 {dimension_numbers = #tpu.dot_dimension_numbers<[1], [0], [0], [1], [0, 0, 1, 1], [], []>} : vector<32x128xbf16>, vector<128x32xbf16>, vector<32x32xf32> -> vector<32x32xf32>
    %c1_168 = arith.constant 1 : index
    %c2_169 = arith.constant 2 : index
    %c0_170 = arith.constant 0 : index
    %c0_171 = arith.constant 0 : index
    %192 = vector.load %arg3[%c1_168, %c2_169, %c0_170, %c0_171] : memref<9x4x128x32xbf16, #tpu.memory_space<vmem>>, vector<1x1x128x32xbf16>
    %193 = vector.shape_cast %192 : vector<1x1x128x32xbf16> to vector<128x32xbf16>
    %cst_172 = arith.constant dense<0.000000e+00> : vector<32x32xf32>
    %194 = tpu.matmul %90, %193, %cst_172 {dimension_numbers = #tpu.dot_dimension_numbers<[1], [0], [0], [1], [0, 0, 1, 1], [], []>} : vector<32x128xbf16>, vector<128x32xbf16>, vector<32x32xf32> -> vector<32x32xf32>
    %195 = arith.addf %191, %194 : vector<32x32xf32>
    %c2_173 = arith.constant 2 : index
    %c2_174 = arith.constant 2 : index
    %c0_175 = arith.constant 0 : index
    %c0_176 = arith.constant 0 : index
    %196 = vector.load %arg3[%c2_173, %c2_174, %c0_175, %c0_176] : memref<9x4x128x32xbf16, #tpu.memory_space<vmem>>, vector<1x1x128x32xbf16>
    %197 = vector.shape_cast %196 : vector<1x1x128x32xbf16> to vector<128x32xbf16>
    %cst_177 = arith.constant dense<0.000000e+00> : vector<32x32xf32>
    %198 = tpu.matmul %94, %197, %cst_177 {dimension_numbers = #tpu.dot_dimension_numbers<[1], [0], [0], [1], [0, 0, 1, 1], [], []>} : vector<32x128xbf16>, vector<128x32xbf16>, vector<32x32xf32> -> vector<32x32xf32>
    %199 = arith.addf %195, %198 : vector<32x32xf32>
    %c3_178 = arith.constant 3 : index
    %c2_179 = arith.constant 2 : index
    %c0_180 = arith.constant 0 : index
    %c0_181 = arith.constant 0 : index
    %200 = vector.load %arg3[%c3_178, %c2_179, %c0_180, %c0_181] : memref<9x4x128x32xbf16, #tpu.memory_space<vmem>>, vector<1x1x128x32xbf16>
    %201 = vector.shape_cast %200 : vector<1x1x128x32xbf16> to vector<128x32xbf16>
    %cst_182 = arith.constant dense<0.000000e+00> : vector<32x32xf32>
    %202 = tpu.matmul %98, %201, %cst_182 {dimension_numbers = #tpu.dot_dimension_numbers<[1], [0], [0], [1], [0, 0, 1, 1], [], []>} : vector<32x128xbf16>, vector<128x32xbf16>, vector<32x32xf32> -> vector<32x32xf32>
    %203 = arith.addf %199, %202 : vector<32x32xf32>
    %c4_183 = arith.constant 4 : index
    %c2_184 = arith.constant 2 : index
    %c0_185 = arith.constant 0 : index
    %c0_186 = arith.constant 0 : index
    %204 = vector.load %arg3[%c4_183, %c2_184, %c0_185, %c0_186] : memref<9x4x128x32xbf16, #tpu.memory_space<vmem>>, vector<1x1x128x32xbf16>
    %205 = vector.shape_cast %204 : vector<1x1x128x32xbf16> to vector<128x32xbf16>
    %cst_187 = arith.constant dense<0.000000e+00> : vector<32x32xf32>
    %206 = tpu.matmul %102, %205, %cst_187 {dimension_numbers = #tpu.dot_dimension_numbers<[1], [0], [0], [1], [0, 0, 1, 1], [], []>} : vector<32x128xbf16>, vector<128x32xbf16>, vector<32x32xf32> -> vector<32x32xf32>
    %207 = arith.addf %203, %206 : vector<32x32xf32>
    %c5_188 = arith.constant 5 : index
    %c2_189 = arith.constant 2 : index
    %c0_190 = arith.constant 0 : index
    %c0_191 = arith.constant 0 : index
    %208 = vector.load %arg3[%c5_188, %c2_189, %c0_190, %c0_191] : memref<9x4x128x32xbf16, #tpu.memory_space<vmem>>, vector<1x1x128x32xbf16>
    %209 = vector.shape_cast %208 : vector<1x1x128x32xbf16> to vector<128x32xbf16>
    %cst_192 = arith.constant dense<0.000000e+00> : vector<32x32xf32>
    %210 = tpu.matmul %106, %209, %cst_192 {dimension_numbers = #tpu.dot_dimension_numbers<[1], [0], [0], [1], [0, 0, 1, 1], [], []>} : vector<32x128xbf16>, vector<128x32xbf16>, vector<32x32xf32> -> vector<32x32xf32>
    %211 = arith.addf %207, %210 : vector<32x32xf32>
    %c6_193 = arith.constant 6 : index
    %c2_194 = arith.constant 2 : index
    %c0_195 = arith.constant 0 : index
    %c0_196 = arith.constant 0 : index
    %212 = vector.load %arg3[%c6_193, %c2_194, %c0_195, %c0_196] : memref<9x4x128x32xbf16, #tpu.memory_space<vmem>>, vector<1x1x128x32xbf16>
    %213 = vector.shape_cast %212 : vector<1x1x128x32xbf16> to vector<128x32xbf16>
    %cst_197 = arith.constant dense<0.000000e+00> : vector<32x32xf32>
    %214 = tpu.matmul %110, %213, %cst_197 {dimension_numbers = #tpu.dot_dimension_numbers<[1], [0], [0], [1], [0, 0, 1, 1], [], []>} : vector<32x128xbf16>, vector<128x32xbf16>, vector<32x32xf32> -> vector<32x32xf32>
    %215 = arith.addf %211, %214 : vector<32x32xf32>
    %c7_198 = arith.constant 7 : index
    %c2_199 = arith.constant 2 : index
    %c0_200 = arith.constant 0 : index
    %c0_201 = arith.constant 0 : index
    %216 = vector.load %arg3[%c7_198, %c2_199, %c0_200, %c0_201] : memref<9x4x128x32xbf16, #tpu.memory_space<vmem>>, vector<1x1x128x32xbf16>
    %217 = vector.shape_cast %216 : vector<1x1x128x32xbf16> to vector<128x32xbf16>
    %cst_202 = arith.constant dense<0.000000e+00> : vector<32x32xf32>
    %218 = tpu.matmul %114, %217, %cst_202 {dimension_numbers = #tpu.dot_dimension_numbers<[1], [0], [0], [1], [0, 0, 1, 1], [], []>} : vector<32x128xbf16>, vector<128x32xbf16>, vector<32x32xf32> -> vector<32x32xf32>
    %219 = arith.addf %215, %218 : vector<32x32xf32>
    %c8_203 = arith.constant 8 : index
    %c2_204 = arith.constant 2 : index
    %c0_205 = arith.constant 0 : index
    %c0_206 = arith.constant 0 : index
    %220 = vector.load %arg3[%c8_203, %c2_204, %c0_205, %c0_206] : memref<9x4x128x32xbf16, #tpu.memory_space<vmem>>, vector<1x1x128x32xbf16>
    %221 = vector.shape_cast %220 : vector<1x1x128x32xbf16> to vector<128x32xbf16>
    %cst_207 = arith.constant dense<0.000000e+00> : vector<32x32xf32>
    %222 = tpu.matmul %118, %221, %cst_207 {dimension_numbers = #tpu.dot_dimension_numbers<[1], [0], [0], [1], [0, 0, 1, 1], [], []>} : vector<32x128xbf16>, vector<128x32xbf16>, vector<32x32xf32> -> vector<32x32xf32>
    %223 = arith.addf %219, %222 : vector<32x32xf32>
    %c0_208 = arith.constant 0 : index
    %c3_209 = arith.constant 3 : index
    %c0_210 = arith.constant 0 : index
    %c0_211 = arith.constant 0 : index
    %224 = vector.load %arg3[%c0_208, %c3_209, %c0_210, %c0_211] : memref<9x4x128x32xbf16, #tpu.memory_space<vmem>>, vector<1x1x128x32xbf16>
    %225 = vector.shape_cast %224 : vector<1x1x128x32xbf16> to vector<128x32xbf16>
    %cst_212 = arith.constant dense<0.000000e+00> : vector<32x32xf32>
    %226 = tpu.matmul %86, %225, %cst_212 {dimension_numbers = #tpu.dot_dimension_numbers<[1], [0], [0], [1], [0, 0, 1, 1], [], []>} : vector<32x128xbf16>, vector<128x32xbf16>, vector<32x32xf32> -> vector<32x32xf32>
    %c1_213 = arith.constant 1 : index
    %c3_214 = arith.constant 3 : index
    %c0_215 = arith.constant 0 : index
    %c0_216 = arith.constant 0 : index
    %227 = vector.load %arg3[%c1_213, %c3_214, %c0_215, %c0_216] : memref<9x4x128x32xbf16, #tpu.memory_space<vmem>>, vector<1x1x128x32xbf16>
    %228 = vector.shape_cast %227 : vector<1x1x128x32xbf16> to vector<128x32xbf16>
    %cst_217 = arith.constant dense<0.000000e+00> : vector<32x32xf32>
    %229 = tpu.matmul %90, %228, %cst_217 {dimension_numbers = #tpu.dot_dimension_numbers<[1], [0], [0], [1], [0, 0, 1, 1], [], []>} : vector<32x128xbf16>, vector<128x32xbf16>, vector<32x32xf32> -> vector<32x32xf32>
    %230 = arith.addf %226, %229 : vector<32x32xf32>
    %c2_218 = arith.constant 2 : index
    %c3_219 = arith.constant 3 : index
    %c0_220 = arith.constant 0 : index
    %c0_221 = arith.constant 0 : index
    %231 = vector.load %arg3[%c2_218, %c3_219, %c0_220, %c0_221] : memref<9x4x128x32xbf16, #tpu.memory_space<vmem>>, vector<1x1x128x32xbf16>
    %232 = vector.shape_cast %231 : vector<1x1x128x32xbf16> to vector<128x32xbf16>
    %cst_222 = arith.constant dense<0.000000e+00> : vector<32x32xf32>
    %233 = tpu.matmul %94, %232, %cst_222 {dimension_numbers = #tpu.dot_dimension_numbers<[1], [0], [0], [1], [0, 0, 1, 1], [], []>} : vector<32x128xbf16>, vector<128x32xbf16>, vector<32x32xf32> -> vector<32x32xf32>
    %234 = arith.addf %230, %233 : vector<32x32xf32>
    %c3_223 = arith.constant 3 : index
    %c3_224 = arith.constant 3 : index
    %c0_225 = arith.constant 0 : index
    %c0_226 = arith.constant 0 : index
    %235 = vector.load %arg3[%c3_223, %c3_224, %c0_225, %c0_226] : memref<9x4x128x32xbf16, #tpu.memory_space<vmem>>, vector<1x1x128x32xbf16>
    %236 = vector.shape_cast %235 : vector<1x1x128x32xbf16> to vector<128x32xbf16>
    %cst_227 = arith.constant dense<0.000000e+00> : vector<32x32xf32>
    %237 = tpu.matmul %98, %236, %cst_227 {dimension_numbers = #tpu.dot_dimension_numbers<[1], [0], [0], [1], [0, 0, 1, 1], [], []>} : vector<32x128xbf16>, vector<128x32xbf16>, vector<32x32xf32> -> vector<32x32xf32>
    %238 = arith.addf %234, %237 : vector<32x32xf32>
    %c4_228 = arith.constant 4 : index
    %c3_229 = arith.constant 3 : index
    %c0_230 = arith.constant 0 : index
    %c0_231 = arith.constant 0 : index
    %239 = vector.load %arg3[%c4_228, %c3_229, %c0_230, %c0_231] : memref<9x4x128x32xbf16, #tpu.memory_space<vmem>>, vector<1x1x128x32xbf16>
    %240 = vector.shape_cast %239 : vector<1x1x128x32xbf16> to vector<128x32xbf16>
    %cst_232 = arith.constant dense<0.000000e+00> : vector<32x32xf32>
    %241 = tpu.matmul %102, %240, %cst_232 {dimension_numbers = #tpu.dot_dimension_numbers<[1], [0], [0], [1], [0, 0, 1, 1], [], []>} : vector<32x128xbf16>, vector<128x32xbf16>, vector<32x32xf32> -> vector<32x32xf32>
    %242 = arith.addf %238, %241 : vector<32x32xf32>
    %c5_233 = arith.constant 5 : index
    %c3_234 = arith.constant 3 : index
    %c0_235 = arith.constant 0 : index
    %c0_236 = arith.constant 0 : index
    %243 = vector.load %arg3[%c5_233, %c3_234, %c0_235, %c0_236] : memref<9x4x128x32xbf16, #tpu.memory_space<vmem>>, vector<1x1x128x32xbf16>
    %244 = vector.shape_cast %243 : vector<1x1x128x32xbf16> to vector<128x32xbf16>
    %cst_237 = arith.constant dense<0.000000e+00> : vector<32x32xf32>
    %245 = tpu.matmul %106, %244, %cst_237 {dimension_numbers = #tpu.dot_dimension_numbers<[1], [0], [0], [1], [0, 0, 1, 1], [], []>} : vector<32x128xbf16>, vector<128x32xbf16>, vector<32x32xf32> -> vector<32x32xf32>
    %246 = arith.addf %242, %245 : vector<32x32xf32>
    %c6_238 = arith.constant 6 : index
    %c3_239 = arith.constant 3 : index
    %c0_240 = arith.constant 0 : index
    %c0_241 = arith.constant 0 : index
    %247 = vector.load %arg3[%c6_238, %c3_239, %c0_240, %c0_241] : memref<9x4x128x32xbf16, #tpu.memory_space<vmem>>, vector<1x1x128x32xbf16>
    %248 = vector.shape_cast %247 : vector<1x1x128x32xbf16> to vector<128x32xbf16>
    %cst_242 = arith.constant dense<0.000000e+00> : vector<32x32xf32>
    %249 = tpu.matmul %110, %248, %cst_242 {dimension_numbers = #tpu.dot_dimension_numbers<[1], [0], [0], [1], [0, 0, 1, 1], [], []>} : vector<32x128xbf16>, vector<128x32xbf16>, vector<32x32xf32> -> vector<32x32xf32>
    %250 = arith.addf %246, %249 : vector<32x32xf32>
    %c7_243 = arith.constant 7 : index
    %c3_244 = arith.constant 3 : index
    %c0_245 = arith.constant 0 : index
    %c0_246 = arith.constant 0 : index
    %251 = vector.load %arg3[%c7_243, %c3_244, %c0_245, %c0_246] : memref<9x4x128x32xbf16, #tpu.memory_space<vmem>>, vector<1x1x128x32xbf16>
    %252 = vector.shape_cast %251 : vector<1x1x128x32xbf16> to vector<128x32xbf16>
    %cst_247 = arith.constant dense<0.000000e+00> : vector<32x32xf32>
    %253 = tpu.matmul %114, %252, %cst_247 {dimension_numbers = #tpu.dot_dimension_numbers<[1], [0], [0], [1], [0, 0, 1, 1], [], []>} : vector<32x128xbf16>, vector<128x32xbf16>, vector<32x32xf32> -> vector<32x32xf32>
    %254 = arith.addf %250, %253 : vector<32x32xf32>
    %c8_248 = arith.constant 8 : index
    %c3_249 = arith.constant 3 : index
    %c0_250 = arith.constant 0 : index
    %c0_251 = arith.constant 0 : index
    %255 = vector.load %arg3[%c8_248, %c3_249, %c0_250, %c0_251] : memref<9x4x128x32xbf16, #tpu.memory_space<vmem>>, vector<1x1x128x32xbf16>
    %256 = vector.shape_cast %255 : vector<1x1x128x32xbf16> to vector<128x32xbf16>
    %cst_252 = arith.constant dense<0.000000e+00> : vector<32x32xf32>
    %257 = tpu.matmul %118, %256, %cst_252 {dimension_numbers = #tpu.dot_dimension_numbers<[1], [0], [0], [1], [0, 0, 1, 1], [], []>} : vector<32x128xbf16>, vector<128x32xbf16>, vector<32x32xf32> -> vector<32x32xf32>
    %258 = arith.addf %254, %257 : vector<32x32xf32>
    %c1_253 = arith.constant 1 : index
    %c0_254 = arith.constant 0 : index
    %c0_255 = arith.constant 0 : index
    %c0_256 = arith.constant 0 : index
    %259 = vector.load %arg6[%c1_253, %c0_254, %c0_255, %c0_256] : memref<4x2x32x1xf32, #tpu.memory_space<vmem>>, vector<1x1x32x1xf32>
    %260 = vector.shape_cast %259 : vector<1x1x32x1xf32> to vector<32x1xf32>
    %c1_257 = arith.constant 1 : index
    %c1_258 = arith.constant 1 : index
    %c0_259 = arith.constant 0 : index
    %c0_260 = arith.constant 0 : index
    %261 = vector.load %arg6[%c1_257, %c1_258, %c0_259, %c0_260] : memref<4x2x32x1xf32, #tpu.memory_space<vmem>>, vector<1x1x32x1xf32>
    %262 = vector.shape_cast %261 : vector<1x1x32x1xf32> to vector<32x1xf32>
    %263 = arith.addf %153, %188 : vector<32x32xf32>
    %264 = arith.addf %223, %258 : vector<32x32xf32>
    %265 = arith.addf %263, %264 : vector<32x32xf32>
    %cst_261 = arith.constant dense<0.000000e+00> : vector<32xf32>
    %266 = vector.multi_reduction <add>, %265, %cst_261 [1] : vector<32x32xf32> to vector<32xf32>
    %267 = vector.shape_cast %266 : vector<32xf32> to vector<32x1xf32>
    %cst_262 = arith.constant 1.280000e+02 : f32
    %268 = vector.broadcast %cst_262 : f32 to vector<32x1xf32>
    %269 = arith.divf %267, %268 : vector<32x1xf32>
    %270 = vector.broadcast %269 : vector<32x1xf32> to vector<32x32xf32>
    %271 = arith.subf %153, %270 : vector<32x32xf32>
    %272 = arith.mulf %271, %271 : vector<32x32xf32>
    %cst_263 = arith.constant dense<0.000000e+00> : vector<32xf32>
    %273 = vector.multi_reduction <add>, %272, %cst_263 [1] : vector<32x32xf32> to vector<32xf32>
    %274 = vector.shape_cast %273 : vector<32xf32> to vector<32x1xf32>
    %275 = vector.broadcast %269 : vector<32x1xf32> to vector<32x32xf32>
    %276 = arith.subf %188, %275 : vector<32x32xf32>
    %277 = arith.mulf %276, %276 : vector<32x32xf32>
    %cst_264 = arith.constant dense<0.000000e+00> : vector<32xf32>
    %278 = vector.multi_reduction <add>, %277, %cst_264 [1] : vector<32x32xf32> to vector<32xf32>
    %279 = vector.shape_cast %278 : vector<32xf32> to vector<32x1xf32>
    %280 = arith.addf %274, %279 : vector<32x1xf32>
    %281 = vector.broadcast %269 : vector<32x1xf32> to vector<32x32xf32>
    %282 = arith.subf %223, %281 : vector<32x32xf32>
    %283 = arith.mulf %282, %282 : vector<32x32xf32>
    %cst_265 = arith.constant dense<0.000000e+00> : vector<32xf32>
    %284 = vector.multi_reduction <add>, %283, %cst_265 [1] : vector<32x32xf32> to vector<32xf32>
    %285 = vector.shape_cast %284 : vector<32xf32> to vector<32x1xf32>
    %286 = arith.addf %280, %285 : vector<32x1xf32>
    %287 = vector.broadcast %269 : vector<32x1xf32> to vector<32x32xf32>
    %288 = arith.subf %258, %287 : vector<32x32xf32>
    %289 = arith.mulf %288, %288 : vector<32x32xf32>
    %cst_266 = arith.constant dense<0.000000e+00> : vector<32xf32>
    %290 = vector.multi_reduction <add>, %289, %cst_266 [1] : vector<32x32xf32> to vector<32xf32>
    %291 = vector.shape_cast %290 : vector<32xf32> to vector<32x1xf32>
    %292 = arith.addf %286, %291 : vector<32x1xf32>
    %cst_267 = arith.constant 1.280000e+02 : f32
    %293 = vector.broadcast %cst_267 : f32 to vector<32x1xf32>
    %294 = arith.divf %292, %293 : vector<32x1xf32>
    %cst_268 = arith.constant 9.99999974E-6 : f32
    %295 = vector.broadcast %cst_268 : f32 to vector<32x1xf32>
    %296 = arith.addf %294, %295 : vector<32x1xf32>
    %297 = math.rsqrt %296 : vector<32x1xf32>
    %298 = arith.mulf %260, %297 : vector<32x1xf32>
    %299 = arith.mulf %269, %298 : vector<32x1xf32>
    %300 = arith.subf %262, %299 : vector<32x1xf32>
    %301 = vector.broadcast %298 : vector<32x1xf32> to vector<32x32xf32>
    %302 = arith.mulf %153, %301 : vector<32x32xf32>
    %303 = vector.broadcast %300 : vector<32x1xf32> to vector<32x32xf32>
    %304 = arith.addf %302, %303 : vector<32x32xf32>
    %cst_269 = arith.constant 0.000000e+00 : f32
    %305 = vector.broadcast %cst_269 : f32 to vector<32x32xf32>
    %306 = arith.maximumf %304, %305 : vector<32x32xf32>
    %307 = vector.broadcast %298 : vector<32x1xf32> to vector<32x32xf32>
    %308 = arith.mulf %188, %307 : vector<32x32xf32>
    %309 = vector.broadcast %300 : vector<32x1xf32> to vector<32x32xf32>
    %310 = arith.addf %308, %309 : vector<32x32xf32>
    %cst_270 = arith.constant 0.000000e+00 : f32
    %311 = vector.broadcast %cst_270 : f32 to vector<32x32xf32>
    %312 = arith.maximumf %310, %311 : vector<32x32xf32>
    %313 = vector.broadcast %298 : vector<32x1xf32> to vector<32x32xf32>
    %314 = arith.mulf %223, %313 : vector<32x32xf32>
    %315 = vector.broadcast %300 : vector<32x1xf32> to vector<32x32xf32>
    %316 = arith.addf %314, %315 : vector<32x32xf32>
    %cst_271 = arith.constant 0.000000e+00 : f32
    %317 = vector.broadcast %cst_271 : f32 to vector<32x32xf32>
    %318 = arith.maximumf %316, %317 : vector<32x32xf32>
    %319 = vector.broadcast %298 : vector<32x1xf32> to vector<32x32xf32>
    %320 = arith.mulf %258, %319 : vector<32x32xf32>
    %321 = vector.broadcast %300 : vector<32x1xf32> to vector<32x32xf32>
    %322 = arith.addf %320, %321 : vector<32x32xf32>
    %cst_272 = arith.constant 0.000000e+00 : f32
    %323 = vector.broadcast %cst_272 : f32 to vector<32x32xf32>
    %324 = arith.maximumf %322, %323 : vector<32x32xf32>
    %325 = arith.maximumf %306, %312 : vector<32x32xf32>
    %326 = arith.maximumf %318, %324 : vector<32x32xf32>
    %327 = arith.maximumf %325, %326 : vector<32x32xf32>
    %328 = arith.truncf %327 : vector<32x32xf32> to vector<32x32xbf16>
    %c1_273 = arith.constant 1 : index
    %c0_274 = arith.constant 0 : index
    %c0_275 = arith.constant 0 : index
    %c0_276 = arith.constant 0 : index
    %329 = vector.load %arg2[%c1_273, %c0_274, %c0_275, %c0_276] : memref<3x9x32x32xbf16, #tpu.memory_space<vmem>>, vector<1x1x32x32xbf16>
    %330 = vector.shape_cast %329 : vector<1x1x32x32xbf16> to vector<32x32xbf16>
    %cst_277 = arith.constant dense<0.000000e+00> : vector<32x32xf32>
    %331 = tpu.matmul %330, %328, %cst_277 {dimension_numbers = #tpu.dot_dimension_numbers<[1], [0], [0], [1], [0, 0, 1, 1], [], []>} : vector<32x32xbf16>, vector<32x32xbf16>, vector<32x32xf32> -> vector<32x32xf32>
    %332 = arith.truncf %331 : vector<32x32xf32> to vector<32x32xbf16>
    %c1_278 = arith.constant 1 : index
    %c1_279 = arith.constant 1 : index
    %c0_280 = arith.constant 0 : index
    %c0_281 = arith.constant 0 : index
    %333 = vector.load %arg2[%c1_278, %c1_279, %c0_280, %c0_281] : memref<3x9x32x32xbf16, #tpu.memory_space<vmem>>, vector<1x1x32x32xbf16>
    %334 = vector.shape_cast %333 : vector<1x1x32x32xbf16> to vector<32x32xbf16>
    %cst_282 = arith.constant dense<0.000000e+00> : vector<32x32xf32>
    %335 = tpu.matmul %334, %328, %cst_282 {dimension_numbers = #tpu.dot_dimension_numbers<[1], [0], [0], [1], [0, 0, 1, 1], [], []>} : vector<32x32xbf16>, vector<32x32xbf16>, vector<32x32xf32> -> vector<32x32xf32>
    %336 = arith.truncf %335 : vector<32x32xf32> to vector<32x32xbf16>
    %c1_283 = arith.constant 1 : index
    %c2_284 = arith.constant 2 : index
    %c0_285 = arith.constant 0 : index
    %c0_286 = arith.constant 0 : index
    %337 = vector.load %arg2[%c1_283, %c2_284, %c0_285, %c0_286] : memref<3x9x32x32xbf16, #tpu.memory_space<vmem>>, vector<1x1x32x32xbf16>
    %338 = vector.shape_cast %337 : vector<1x1x32x32xbf16> to vector<32x32xbf16>
    %cst_287 = arith.constant dense<0.000000e+00> : vector<32x32xf32>
    %339 = tpu.matmul %338, %328, %cst_287 {dimension_numbers = #tpu.dot_dimension_numbers<[1], [0], [0], [1], [0, 0, 1, 1], [], []>} : vector<32x32xbf16>, vector<32x32xbf16>, vector<32x32xf32> -> vector<32x32xf32>
    %340 = arith.truncf %339 : vector<32x32xf32> to vector<32x32xbf16>
    %c1_288 = arith.constant 1 : index
    %c3_289 = arith.constant 3 : index
    %c0_290 = arith.constant 0 : index
    %c0_291 = arith.constant 0 : index
    %341 = vector.load %arg2[%c1_288, %c3_289, %c0_290, %c0_291] : memref<3x9x32x32xbf16, #tpu.memory_space<vmem>>, vector<1x1x32x32xbf16>
    %342 = vector.shape_cast %341 : vector<1x1x32x32xbf16> to vector<32x32xbf16>
    %cst_292 = arith.constant dense<0.000000e+00> : vector<32x32xf32>
    %343 = tpu.matmul %342, %328, %cst_292 {dimension_numbers = #tpu.dot_dimension_numbers<[1], [0], [0], [1], [0, 0, 1, 1], [], []>} : vector<32x32xbf16>, vector<32x32xbf16>, vector<32x32xf32> -> vector<32x32xf32>
    %344 = arith.truncf %343 : vector<32x32xf32> to vector<32x32xbf16>
    %c1_293 = arith.constant 1 : index
    %c4_294 = arith.constant 4 : index
    %c0_295 = arith.constant 0 : index
    %c0_296 = arith.constant 0 : index
    %345 = vector.load %arg2[%c1_293, %c4_294, %c0_295, %c0_296] : memref<3x9x32x32xbf16, #tpu.memory_space<vmem>>, vector<1x1x32x32xbf16>
    %346 = vector.shape_cast %345 : vector<1x1x32x32xbf16> to vector<32x32xbf16>
    %cst_297 = arith.constant dense<0.000000e+00> : vector<32x32xf32>
    %347 = tpu.matmul %346, %328, %cst_297 {dimension_numbers = #tpu.dot_dimension_numbers<[1], [0], [0], [1], [0, 0, 1, 1], [], []>} : vector<32x32xbf16>, vector<32x32xbf16>, vector<32x32xf32> -> vector<32x32xf32>
    %348 = arith.truncf %347 : vector<32x32xf32> to vector<32x32xbf16>
    %c1_298 = arith.constant 1 : index
    %c5_299 = arith.constant 5 : index
    %c0_300 = arith.constant 0 : index
    %c0_301 = arith.constant 0 : index
    %349 = vector.load %arg2[%c1_298, %c5_299, %c0_300, %c0_301] : memref<3x9x32x32xbf16, #tpu.memory_space<vmem>>, vector<1x1x32x32xbf16>
    %350 = vector.shape_cast %349 : vector<1x1x32x32xbf16> to vector<32x32xbf16>
    %cst_302 = arith.constant dense<0.000000e+00> : vector<32x32xf32>
    %351 = tpu.matmul %350, %328, %cst_302 {dimension_numbers = #tpu.dot_dimension_numbers<[1], [0], [0], [1], [0, 0, 1, 1], [], []>} : vector<32x32xbf16>, vector<32x32xbf16>, vector<32x32xf32> -> vector<32x32xf32>
    %352 = arith.truncf %351 : vector<32x32xf32> to vector<32x32xbf16>
    %c1_303 = arith.constant 1 : index
    %c6_304 = arith.constant 6 : index
    %c0_305 = arith.constant 0 : index
    %c0_306 = arith.constant 0 : index
    %353 = vector.load %arg2[%c1_303, %c6_304, %c0_305, %c0_306] : memref<3x9x32x32xbf16, #tpu.memory_space<vmem>>, vector<1x1x32x32xbf16>
    %354 = vector.shape_cast %353 : vector<1x1x32x32xbf16> to vector<32x32xbf16>
    %cst_307 = arith.constant dense<0.000000e+00> : vector<32x32xf32>
    %355 = tpu.matmul %354, %328, %cst_307 {dimension_numbers = #tpu.dot_dimension_numbers<[1], [0], [0], [1], [0, 0, 1, 1], [], []>} : vector<32x32xbf16>, vector<32x32xbf16>, vector<32x32xf32> -> vector<32x32xf32>
    %356 = arith.truncf %355 : vector<32x32xf32> to vector<32x32xbf16>
    %c1_308 = arith.constant 1 : index
    %c7_309 = arith.constant 7 : index
    %c0_310 = arith.constant 0 : index
    %c0_311 = arith.constant 0 : index
    %357 = vector.load %arg2[%c1_308, %c7_309, %c0_310, %c0_311] : memref<3x9x32x32xbf16, #tpu.memory_space<vmem>>, vector<1x1x32x32xbf16>
    %358 = vector.shape_cast %357 : vector<1x1x32x32xbf16> to vector<32x32xbf16>
    %cst_312 = arith.constant dense<0.000000e+00> : vector<32x32xf32>
    %359 = tpu.matmul %358, %328, %cst_312 {dimension_numbers = #tpu.dot_dimension_numbers<[1], [0], [0], [1], [0, 0, 1, 1], [], []>} : vector<32x32xbf16>, vector<32x32xbf16>, vector<32x32xf32> -> vector<32x32xf32>
    %360 = arith.truncf %359 : vector<32x32xf32> to vector<32x32xbf16>
    %c1_313 = arith.constant 1 : index
    %c8_314 = arith.constant 8 : index
    %c0_315 = arith.constant 0 : index
    %c0_316 = arith.constant 0 : index
    %361 = vector.load %arg2[%c1_313, %c8_314, %c0_315, %c0_316] : memref<3x9x32x32xbf16, #tpu.memory_space<vmem>>, vector<1x1x32x32xbf16>
    %362 = vector.shape_cast %361 : vector<1x1x32x32xbf16> to vector<32x32xbf16>
    %cst_317 = arith.constant dense<0.000000e+00> : vector<32x32xf32>
    %363 = tpu.matmul %362, %328, %cst_317 {dimension_numbers = #tpu.dot_dimension_numbers<[1], [0], [0], [1], [0, 0, 1, 1], [], []>} : vector<32x32xbf16>, vector<32x32xbf16>, vector<32x32xf32> -> vector<32x32xf32>
    %364 = arith.truncf %363 : vector<32x32xf32> to vector<32x32xbf16>
    %c0_318 = arith.constant 0 : index
    %c0_319 = arith.constant 0 : index
    %c0_320 = arith.constant 0 : index
    %c0_321 = arith.constant 0 : index
    %365 = vector.load %arg4[%c0_318, %c0_319, %c0_320, %c0_321] : memref<9x4x32x8xbf16, #tpu.memory_space<vmem>>, vector<1x1x32x8xbf16>
    %366 = vector.shape_cast %365 : vector<1x1x32x8xbf16> to vector<32x8xbf16>
    %cst_322 = arith.constant dense<0.000000e+00> : vector<32x8xf32>
    %367 = tpu.matmul %332, %366, %cst_322 {dimension_numbers = #tpu.dot_dimension_numbers<[1], [0], [0], [1], [0, 0, 1, 1], [], []>} : vector<32x32xbf16>, vector<32x8xbf16>, vector<32x8xf32> -> vector<32x8xf32>
    %c1_323 = arith.constant 1 : index
    %c0_324 = arith.constant 0 : index
    %c0_325 = arith.constant 0 : index
    %c0_326 = arith.constant 0 : index
    %368 = vector.load %arg4[%c1_323, %c0_324, %c0_325, %c0_326] : memref<9x4x32x8xbf16, #tpu.memory_space<vmem>>, vector<1x1x32x8xbf16>
    %369 = vector.shape_cast %368 : vector<1x1x32x8xbf16> to vector<32x8xbf16>
    %cst_327 = arith.constant dense<0.000000e+00> : vector<32x8xf32>
    %370 = tpu.matmul %336, %369, %cst_327 {dimension_numbers = #tpu.dot_dimension_numbers<[1], [0], [0], [1], [0, 0, 1, 1], [], []>} : vector<32x32xbf16>, vector<32x8xbf16>, vector<32x8xf32> -> vector<32x8xf32>
    %371 = arith.addf %367, %370 : vector<32x8xf32>
    %c2_328 = arith.constant 2 : index
    %c0_329 = arith.constant 0 : index
    %c0_330 = arith.constant 0 : index
    %c0_331 = arith.constant 0 : index
    %372 = vector.load %arg4[%c2_328, %c0_329, %c0_330, %c0_331] : memref<9x4x32x8xbf16, #tpu.memory_space<vmem>>, vector<1x1x32x8xbf16>
    %373 = vector.shape_cast %372 : vector<1x1x32x8xbf16> to vector<32x8xbf16>
    %cst_332 = arith.constant dense<0.000000e+00> : vector<32x8xf32>
    %374 = tpu.matmul %340, %373, %cst_332 {dimension_numbers = #tpu.dot_dimension_numbers<[1], [0], [0], [1], [0, 0, 1, 1], [], []>} : vector<32x32xbf16>, vector<32x8xbf16>, vector<32x8xf32> -> vector<32x8xf32>
    %375 = arith.addf %371, %374 : vector<32x8xf32>
    %c3_333 = arith.constant 3 : index
    %c0_334 = arith.constant 0 : index
    %c0_335 = arith.constant 0 : index
    %c0_336 = arith.constant 0 : index
    %376 = vector.load %arg4[%c3_333, %c0_334, %c0_335, %c0_336] : memref<9x4x32x8xbf16, #tpu.memory_space<vmem>>, vector<1x1x32x8xbf16>
    %377 = vector.shape_cast %376 : vector<1x1x32x8xbf16> to vector<32x8xbf16>
    %cst_337 = arith.constant dense<0.000000e+00> : vector<32x8xf32>
    %378 = tpu.matmul %344, %377, %cst_337 {dimension_numbers = #tpu.dot_dimension_numbers<[1], [0], [0], [1], [0, 0, 1, 1], [], []>} : vector<32x32xbf16>, vector<32x8xbf16>, vector<32x8xf32> -> vector<32x8xf32>
    %379 = arith.addf %375, %378 : vector<32x8xf32>
    %c4_338 = arith.constant 4 : index
    %c0_339 = arith.constant 0 : index
    %c0_340 = arith.constant 0 : index
    %c0_341 = arith.constant 0 : index
    %380 = vector.load %arg4[%c4_338, %c0_339, %c0_340, %c0_341] : memref<9x4x32x8xbf16, #tpu.memory_space<vmem>>, vector<1x1x32x8xbf16>
    %381 = vector.shape_cast %380 : vector<1x1x32x8xbf16> to vector<32x8xbf16>
    %cst_342 = arith.constant dense<0.000000e+00> : vector<32x8xf32>
    %382 = tpu.matmul %348, %381, %cst_342 {dimension_numbers = #tpu.dot_dimension_numbers<[1], [0], [0], [1], [0, 0, 1, 1], [], []>} : vector<32x32xbf16>, vector<32x8xbf16>, vector<32x8xf32> -> vector<32x8xf32>
    %383 = arith.addf %379, %382 : vector<32x8xf32>
    %c5_343 = arith.constant 5 : index
    %c0_344 = arith.constant 0 : index
    %c0_345 = arith.constant 0 : index
    %c0_346 = arith.constant 0 : index
    %384 = vector.load %arg4[%c5_343, %c0_344, %c0_345, %c0_346] : memref<9x4x32x8xbf16, #tpu.memory_space<vmem>>, vector<1x1x32x8xbf16>
    %385 = vector.shape_cast %384 : vector<1x1x32x8xbf16> to vector<32x8xbf16>
    %cst_347 = arith.constant dense<0.000000e+00> : vector<32x8xf32>
    %386 = tpu.matmul %352, %385, %cst_347 {dimension_numbers = #tpu.dot_dimension_numbers<[1], [0], [0], [1], [0, 0, 1, 1], [], []>} : vector<32x32xbf16>, vector<32x8xbf16>, vector<32x8xf32> -> vector<32x8xf32>
    %387 = arith.addf %383, %386 : vector<32x8xf32>
    %c6_348 = arith.constant 6 : index
    %c0_349 = arith.constant 0 : index
    %c0_350 = arith.constant 0 : index
    %c0_351 = arith.constant 0 : index
    %388 = vector.load %arg4[%c6_348, %c0_349, %c0_350, %c0_351] : memref<9x4x32x8xbf16, #tpu.memory_space<vmem>>, vector<1x1x32x8xbf16>
    %389 = vector.shape_cast %388 : vector<1x1x32x8xbf16> to vector<32x8xbf16>
    %cst_352 = arith.constant dense<0.000000e+00> : vector<32x8xf32>
    %390 = tpu.matmul %356, %389, %cst_352 {dimension_numbers = #tpu.dot_dimension_numbers<[1], [0], [0], [1], [0, 0, 1, 1], [], []>} : vector<32x32xbf16>, vector<32x8xbf16>, vector<32x8xf32> -> vector<32x8xf32>
    %391 = arith.addf %387, %390 : vector<32x8xf32>
    %c7_353 = arith.constant 7 : index
    %c0_354 = arith.constant 0 : index
    %c0_355 = arith.constant 0 : index
    %c0_356 = arith.constant 0 : index
    %392 = vector.load %arg4[%c7_353, %c0_354, %c0_355, %c0_356] : memref<9x4x32x8xbf16, #tpu.memory_space<vmem>>, vector<1x1x32x8xbf16>
    %393 = vector.shape_cast %392 : vector<1x1x32x8xbf16> to vector<32x8xbf16>
    %cst_357 = arith.constant dense<0.000000e+00> : vector<32x8xf32>
    %394 = tpu.matmul %360, %393, %cst_357 {dimension_numbers = #tpu.dot_dimension_numbers<[1], [0], [0], [1], [0, 0, 1, 1], [], []>} : vector<32x32xbf16>, vector<32x8xbf16>, vector<32x8xf32> -> vector<32x8xf32>
    %395 = arith.addf %391, %394 : vector<32x8xf32>
    %c8_358 = arith.constant 8 : index
    %c0_359 = arith.constant 0 : index
    %c0_360 = arith.constant 0 : index
    %c0_361 = arith.constant 0 : index
    %396 = vector.load %arg4[%c8_358, %c0_359, %c0_360, %c0_361] : memref<9x4x32x8xbf16, #tpu.memory_space<vmem>>, vector<1x1x32x8xbf16>
    %397 = vector.shape_cast %396 : vector<1x1x32x8xbf16> to vector<32x8xbf16>
    %cst_362 = arith.constant dense<0.000000e+00> : vector<32x8xf32>
    %398 = tpu.matmul %364, %397, %cst_362 {dimension_numbers = #tpu.dot_dimension_numbers<[1], [0], [0], [1], [0, 0, 1, 1], [], []>} : vector<32x32xbf16>, vector<32x8xbf16>, vector<32x8xf32> -> vector<32x8xf32>
    %399 = arith.addf %395, %398 : vector<32x8xf32>
    %c0_363 = arith.constant 0 : index
    %c1_364 = arith.constant 1 : index
    %c0_365 = arith.constant 0 : index
    %c0_366 = arith.constant 0 : index
    %400 = vector.load %arg4[%c0_363, %c1_364, %c0_365, %c0_366] : memref<9x4x32x8xbf16, #tpu.memory_space<vmem>>, vector<1x1x32x8xbf16>
    %401 = vector.shape_cast %400 : vector<1x1x32x8xbf16> to vector<32x8xbf16>
    %cst_367 = arith.constant dense<0.000000e+00> : vector<32x8xf32>
    %402 = tpu.matmul %332, %401, %cst_367 {dimension_numbers = #tpu.dot_dimension_numbers<[1], [0], [0], [1], [0, 0, 1, 1], [], []>} : vector<32x32xbf16>, vector<32x8xbf16>, vector<32x8xf32> -> vector<32x8xf32>
    %c1_368 = arith.constant 1 : index
    %c1_369 = arith.constant 1 : index
    %c0_370 = arith.constant 0 : index
    %c0_371 = arith.constant 0 : index
    %403 = vector.load %arg4[%c1_368, %c1_369, %c0_370, %c0_371] : memref<9x4x32x8xbf16, #tpu.memory_space<vmem>>, vector<1x1x32x8xbf16>
    %404 = vector.shape_cast %403 : vector<1x1x32x8xbf16> to vector<32x8xbf16>
    %cst_372 = arith.constant dense<0.000000e+00> : vector<32x8xf32>
    %405 = tpu.matmul %336, %404, %cst_372 {dimension_numbers = #tpu.dot_dimension_numbers<[1], [0], [0], [1], [0, 0, 1, 1], [], []>} : vector<32x32xbf16>, vector<32x8xbf16>, vector<32x8xf32> -> vector<32x8xf32>
    %406 = arith.addf %402, %405 : vector<32x8xf32>
    %c2_373 = arith.constant 2 : index
    %c1_374 = arith.constant 1 : index
    %c0_375 = arith.constant 0 : index
    %c0_376 = arith.constant 0 : index
    %407 = vector.load %arg4[%c2_373, %c1_374, %c0_375, %c0_376] : memref<9x4x32x8xbf16, #tpu.memory_space<vmem>>, vector<1x1x32x8xbf16>
    %408 = vector.shape_cast %407 : vector<1x1x32x8xbf16> to vector<32x8xbf16>
    %cst_377 = arith.constant dense<0.000000e+00> : vector<32x8xf32>
    %409 = tpu.matmul %340, %408, %cst_377 {dimension_numbers = #tpu.dot_dimension_numbers<[1], [0], [0], [1], [0, 0, 1, 1], [], []>} : vector<32x32xbf16>, vector<32x8xbf16>, vector<32x8xf32> -> vector<32x8xf32>
    %410 = arith.addf %406, %409 : vector<32x8xf32>
    %c3_378 = arith.constant 3 : index
    %c1_379 = arith.constant 1 : index
    %c0_380 = arith.constant 0 : index
    %c0_381 = arith.constant 0 : index
    %411 = vector.load %arg4[%c3_378, %c1_379, %c0_380, %c0_381] : memref<9x4x32x8xbf16, #tpu.memory_space<vmem>>, vector<1x1x32x8xbf16>
    %412 = vector.shape_cast %411 : vector<1x1x32x8xbf16> to vector<32x8xbf16>
    %cst_382 = arith.constant dense<0.000000e+00> : vector<32x8xf32>
    %413 = tpu.matmul %344, %412, %cst_382 {dimension_numbers = #tpu.dot_dimension_numbers<[1], [0], [0], [1], [0, 0, 1, 1], [], []>} : vector<32x32xbf16>, vector<32x8xbf16>, vector<32x8xf32> -> vector<32x8xf32>
    %414 = arith.addf %410, %413 : vector<32x8xf32>
    %c4_383 = arith.constant 4 : index
    %c1_384 = arith.constant 1 : index
    %c0_385 = arith.constant 0 : index
    %c0_386 = arith.constant 0 : index
    %415 = vector.load %arg4[%c4_383, %c1_384, %c0_385, %c0_386] : memref<9x4x32x8xbf16, #tpu.memory_space<vmem>>, vector<1x1x32x8xbf16>
    %416 = vector.shape_cast %415 : vector<1x1x32x8xbf16> to vector<32x8xbf16>
    %cst_387 = arith.constant dense<0.000000e+00> : vector<32x8xf32>
    %417 = tpu.matmul %348, %416, %cst_387 {dimension_numbers = #tpu.dot_dimension_numbers<[1], [0], [0], [1], [0, 0, 1, 1], [], []>} : vector<32x32xbf16>, vector<32x8xbf16>, vector<32x8xf32> -> vector<32x8xf32>
    %418 = arith.addf %414, %417 : vector<32x8xf32>
    %c5_388 = arith.constant 5 : index
    %c1_389 = arith.constant 1 : index
    %c0_390 = arith.constant 0 : index
    %c0_391 = arith.constant 0 : index
    %419 = vector.load %arg4[%c5_388, %c1_389, %c0_390, %c0_391] : memref<9x4x32x8xbf16, #tpu.memory_space<vmem>>, vector<1x1x32x8xbf16>
    %420 = vector.shape_cast %419 : vector<1x1x32x8xbf16> to vector<32x8xbf16>
    %cst_392 = arith.constant dense<0.000000e+00> : vector<32x8xf32>
    %421 = tpu.matmul %352, %420, %cst_392 {dimension_numbers = #tpu.dot_dimension_numbers<[1], [0], [0], [1], [0, 0, 1, 1], [], []>} : vector<32x32xbf16>, vector<32x8xbf16>, vector<32x8xf32> -> vector<32x8xf32>
    %422 = arith.addf %418, %421 : vector<32x8xf32>
    %c6_393 = arith.constant 6 : index
    %c1_394 = arith.constant 1 : index
    %c0_395 = arith.constant 0 : index
    %c0_396 = arith.constant 0 : index
    %423 = vector.load %arg4[%c6_393, %c1_394, %c0_395, %c0_396] : memref<9x4x32x8xbf16, #tpu.memory_space<vmem>>, vector<1x1x32x8xbf16>
    %424 = vector.shape_cast %423 : vector<1x1x32x8xbf16> to vector<32x8xbf16>
    %cst_397 = arith.constant dense<0.000000e+00> : vector<32x8xf32>
    %425 = tpu.matmul %356, %424, %cst_397 {dimension_numbers = #tpu.dot_dimension_numbers<[1], [0], [0], [1], [0, 0, 1, 1], [], []>} : vector<32x32xbf16>, vector<32x8xbf16>, vector<32x8xf32> -> vector<32x8xf32>
    %426 = arith.addf %422, %425 : vector<32x8xf32>
    %c7_398 = arith.constant 7 : index
    %c1_399 = arith.constant 1 : index
    %c0_400 = arith.constant 0 : index
    %c0_401 = arith.constant 0 : index
    %427 = vector.load %arg4[%c7_398, %c1_399, %c0_400, %c0_401] : memref<9x4x32x8xbf16, #tpu.memory_space<vmem>>, vector<1x1x32x8xbf16>
    %428 = vector.shape_cast %427 : vector<1x1x32x8xbf16> to vector<32x8xbf16>
    %cst_402 = arith.constant dense<0.000000e+00> : vector<32x8xf32>
    %429 = tpu.matmul %360, %428, %cst_402 {dimension_numbers = #tpu.dot_dimension_numbers<[1], [0], [0], [1], [0, 0, 1, 1], [], []>} : vector<32x32xbf16>, vector<32x8xbf16>, vector<32x8xf32> -> vector<32x8xf32>
    %430 = arith.addf %426, %429 : vector<32x8xf32>
    %c8_403 = arith.constant 8 : index
    %c1_404 = arith.constant 1 : index
    %c0_405 = arith.constant 0 : index
    %c0_406 = arith.constant 0 : index
    %431 = vector.load %arg4[%c8_403, %c1_404, %c0_405, %c0_406] : memref<9x4x32x8xbf16, #tpu.memory_space<vmem>>, vector<1x1x32x8xbf16>
    %432 = vector.shape_cast %431 : vector<1x1x32x8xbf16> to vector<32x8xbf16>
    %cst_407 = arith.constant dense<0.000000e+00> : vector<32x8xf32>
    %433 = tpu.matmul %364, %432, %cst_407 {dimension_numbers = #tpu.dot_dimension_numbers<[1], [0], [0], [1], [0, 0, 1, 1], [], []>} : vector<32x32xbf16>, vector<32x8xbf16>, vector<32x8xf32> -> vector<32x8xf32>
    %434 = arith.addf %430, %433 : vector<32x8xf32>
    %c0_408 = arith.constant 0 : index
    %c2_409 = arith.constant 2 : index
    %c0_410 = arith.constant 0 : index
    %c0_411 = arith.constant 0 : index
    %435 = vector.load %arg4[%c0_408, %c2_409, %c0_410, %c0_411] : memref<9x4x32x8xbf16, #tpu.memory_space<vmem>>, vector<1x1x32x8xbf16>
    %436 = vector.shape_cast %435 : vector<1x1x32x8xbf16> to vector<32x8xbf16>
    %cst_412 = arith.constant dense<0.000000e+00> : vector<32x8xf32>
    %437 = tpu.matmul %332, %436, %cst_412 {dimension_numbers = #tpu.dot_dimension_numbers<[1], [0], [0], [1], [0, 0, 1, 1], [], []>} : vector<32x32xbf16>, vector<32x8xbf16>, vector<32x8xf32> -> vector<32x8xf32>
    %c1_413 = arith.constant 1 : index
    %c2_414 = arith.constant 2 : index
    %c0_415 = arith.constant 0 : index
    %c0_416 = arith.constant 0 : index
    %438 = vector.load %arg4[%c1_413, %c2_414, %c0_415, %c0_416] : memref<9x4x32x8xbf16, #tpu.memory_space<vmem>>, vector<1x1x32x8xbf16>
    %439 = vector.shape_cast %438 : vector<1x1x32x8xbf16> to vector<32x8xbf16>
    %cst_417 = arith.constant dense<0.000000e+00> : vector<32x8xf32>
    %440 = tpu.matmul %336, %439, %cst_417 {dimension_numbers = #tpu.dot_dimension_numbers<[1], [0], [0], [1], [0, 0, 1, 1], [], []>} : vector<32x32xbf16>, vector<32x8xbf16>, vector<32x8xf32> -> vector<32x8xf32>
    %441 = arith.addf %437, %440 : vector<32x8xf32>
    %c2_418 = arith.constant 2 : index
    %c2_419 = arith.constant 2 : index
    %c0_420 = arith.constant 0 : index
    %c0_421 = arith.constant 0 : index
    %442 = vector.load %arg4[%c2_418, %c2_419, %c0_420, %c0_421] : memref<9x4x32x8xbf16, #tpu.memory_space<vmem>>, vector<1x1x32x8xbf16>
    %443 = vector.shape_cast %442 : vector<1x1x32x8xbf16> to vector<32x8xbf16>
    %cst_422 = arith.constant dense<0.000000e+00> : vector<32x8xf32>
    %444 = tpu.matmul %340, %443, %cst_422 {dimension_numbers = #tpu.dot_dimension_numbers<[1], [0], [0], [1], [0, 0, 1, 1], [], []>} : vector<32x32xbf16>, vector<32x8xbf16>, vector<32x8xf32> -> vector<32x8xf32>
    %445 = arith.addf %441, %444 : vector<32x8xf32>
    %c3_423 = arith.constant 3 : index
    %c2_424 = arith.constant 2 : index
    %c0_425 = arith.constant 0 : index
    %c0_426 = arith.constant 0 : index
    %446 = vector.load %arg4[%c3_423, %c2_424, %c0_425, %c0_426] : memref<9x4x32x8xbf16, #tpu.memory_space<vmem>>, vector<1x1x32x8xbf16>
    %447 = vector.shape_cast %446 : vector<1x1x32x8xbf16> to vector<32x8xbf16>
    %cst_427 = arith.constant dense<0.000000e+00> : vector<32x8xf32>
    %448 = tpu.matmul %344, %447, %cst_427 {dimension_numbers = #tpu.dot_dimension_numbers<[1], [0], [0], [1], [0, 0, 1, 1], [], []>} : vector<32x32xbf16>, vector<32x8xbf16>, vector<32x8xf32> -> vector<32x8xf32>
    %449 = arith.addf %445, %448 : vector<32x8xf32>
    %c4_428 = arith.constant 4 : index
    %c2_429 = arith.constant 2 : index
    %c0_430 = arith.constant 0 : index
    %c0_431 = arith.constant 0 : index
    %450 = vector.load %arg4[%c4_428, %c2_429, %c0_430, %c0_431] : memref<9x4x32x8xbf16, #tpu.memory_space<vmem>>, vector<1x1x32x8xbf16>
    %451 = vector.shape_cast %450 : vector<1x1x32x8xbf16> to vector<32x8xbf16>
    %cst_432 = arith.constant dense<0.000000e+00> : vector<32x8xf32>
    %452 = tpu.matmul %348, %451, %cst_432 {dimension_numbers = #tpu.dot_dimension_numbers<[1], [0], [0], [1], [0, 0, 1, 1], [], []>} : vector<32x32xbf16>, vector<32x8xbf16>, vector<32x8xf32> -> vector<32x8xf32>
    %453 = arith.addf %449, %452 : vector<32x8xf32>
    %c5_433 = arith.constant 5 : index
    %c2_434 = arith.constant 2 : index
    %c0_435 = arith.constant 0 : index
    %c0_436 = arith.constant 0 : index
    %454 = vector.load %arg4[%c5_433, %c2_434, %c0_435, %c0_436] : memref<9x4x32x8xbf16, #tpu.memory_space<vmem>>, vector<1x1x32x8xbf16>
    %455 = vector.shape_cast %454 : vector<1x1x32x8xbf16> to vector<32x8xbf16>
    %cst_437 = arith.constant dense<0.000000e+00> : vector<32x8xf32>
    %456 = tpu.matmul %352, %455, %cst_437 {dimension_numbers = #tpu.dot_dimension_numbers<[1], [0], [0], [1], [0, 0, 1, 1], [], []>} : vector<32x32xbf16>, vector<32x8xbf16>, vector<32x8xf32> -> vector<32x8xf32>
    %457 = arith.addf %453, %456 : vector<32x8xf32>
    %c6_438 = arith.constant 6 : index
    %c2_439 = arith.constant 2 : index
    %c0_440 = arith.constant 0 : index
    %c0_441 = arith.constant 0 : index
    %458 = vector.load %arg4[%c6_438, %c2_439, %c0_440, %c0_441] : memref<9x4x32x8xbf16, #tpu.memory_space<vmem>>, vector<1x1x32x8xbf16>
    %459 = vector.shape_cast %458 : vector<1x1x32x8xbf16> to vector<32x8xbf16>
    %cst_442 = arith.constant dense<0.000000e+00> : vector<32x8xf32>
    %460 = tpu.matmul %356, %459, %cst_442 {dimension_numbers = #tpu.dot_dimension_numbers<[1], [0], [0], [1], [0, 0, 1, 1], [], []>} : vector<32x32xbf16>, vector<32x8xbf16>, vector<32x8xf32> -> vector<32x8xf32>
    %461 = arith.addf %457, %460 : vector<32x8xf32>
    %c7_443 = arith.constant 7 : index
    %c2_444 = arith.constant 2 : index
    %c0_445 = arith.constant 0 : index
    %c0_446 = arith.constant 0 : index
    %462 = vector.load %arg4[%c7_443, %c2_444, %c0_445, %c0_446] : memref<9x4x32x8xbf16, #tpu.memory_space<vmem>>, vector<1x1x32x8xbf16>
    %463 = vector.shape_cast %462 : vector<1x1x32x8xbf16> to vector<32x8xbf16>
    %cst_447 = arith.constant dense<0.000000e+00> : vector<32x8xf32>
    %464 = tpu.matmul %360, %463, %cst_447 {dimension_numbers = #tpu.dot_dimension_numbers<[1], [0], [0], [1], [0, 0, 1, 1], [], []>} : vector<32x32xbf16>, vector<32x8xbf16>, vector<32x8xf32> -> vector<32x8xf32>
    %465 = arith.addf %461, %464 : vector<32x8xf32>
    %c8_448 = arith.constant 8 : index
    %c2_449 = arith.constant 2 : index
    %c0_450 = arith.constant 0 : index
    %c0_451 = arith.constant 0 : index
    %466 = vector.load %arg4[%c8_448, %c2_449, %c0_450, %c0_451] : memref<9x4x32x8xbf16, #tpu.memory_space<vmem>>, vector<1x1x32x8xbf16>
    %467 = vector.shape_cast %466 : vector<1x1x32x8xbf16> to vector<32x8xbf16>
    %cst_452 = arith.constant dense<0.000000e+00> : vector<32x8xf32>
    %468 = tpu.matmul %364, %467, %cst_452 {dimension_numbers = #tpu.dot_dimension_numbers<[1], [0], [0], [1], [0, 0, 1, 1], [], []>} : vector<32x32xbf16>, vector<32x8xbf16>, vector<32x8xf32> -> vector<32x8xf32>
    %469 = arith.addf %465, %468 : vector<32x8xf32>
    %c0_453 = arith.constant 0 : index
    %c3_454 = arith.constant 3 : index
    %c0_455 = arith.constant 0 : index
    %c0_456 = arith.constant 0 : index
    %470 = vector.load %arg4[%c0_453, %c3_454, %c0_455, %c0_456] : memref<9x4x32x8xbf16, #tpu.memory_space<vmem>>, vector<1x1x32x8xbf16>
    %471 = vector.shape_cast %470 : vector<1x1x32x8xbf16> to vector<32x8xbf16>
    %cst_457 = arith.constant dense<0.000000e+00> : vector<32x8xf32>
    %472 = tpu.matmul %332, %471, %cst_457 {dimension_numbers = #tpu.dot_dimension_numbers<[1], [0], [0], [1], [0, 0, 1, 1], [], []>} : vector<32x32xbf16>, vector<32x8xbf16>, vector<32x8xf32> -> vector<32x8xf32>
    %c1_458 = arith.constant 1 : index
    %c3_459 = arith.constant 3 : index
    %c0_460 = arith.constant 0 : index
    %c0_461 = arith.constant 0 : index
    %473 = vector.load %arg4[%c1_458, %c3_459, %c0_460, %c0_461] : memref<9x4x32x8xbf16, #tpu.memory_space<vmem>>, vector<1x1x32x8xbf16>
    %474 = vector.shape_cast %473 : vector<1x1x32x8xbf16> to vector<32x8xbf16>
    %cst_462 = arith.constant dense<0.000000e+00> : vector<32x8xf32>
    %475 = tpu.matmul %336, %474, %cst_462 {dimension_numbers = #tpu.dot_dimension_numbers<[1], [0], [0], [1], [0, 0, 1, 1], [], []>} : vector<32x32xbf16>, vector<32x8xbf16>, vector<32x8xf32> -> vector<32x8xf32>
    %476 = arith.addf %472, %475 : vector<32x8xf32>
    %c2_463 = arith.constant 2 : index
    %c3_464 = arith.constant 3 : index
    %c0_465 = arith.constant 0 : index
    %c0_466 = arith.constant 0 : index
    %477 = vector.load %arg4[%c2_463, %c3_464, %c0_465, %c0_466] : memref<9x4x32x8xbf16, #tpu.memory_space<vmem>>, vector<1x1x32x8xbf16>
    %478 = vector.shape_cast %477 : vector<1x1x32x8xbf16> to vector<32x8xbf16>
    %cst_467 = arith.constant dense<0.000000e+00> : vector<32x8xf32>
    %479 = tpu.matmul %340, %478, %cst_467 {dimension_numbers = #tpu.dot_dimension_numbers<[1], [0], [0], [1], [0, 0, 1, 1], [], []>} : vector<32x32xbf16>, vector<32x8xbf16>, vector<32x8xf32> -> vector<32x8xf32>
    %480 = arith.addf %476, %479 : vector<32x8xf32>
    %c3_468 = arith.constant 3 : index
    %c3_469 = arith.constant 3 : index
    %c0_470 = arith.constant 0 : index
    %c0_471 = arith.constant 0 : index
    %481 = vector.load %arg4[%c3_468, %c3_469, %c0_470, %c0_471] : memref<9x4x32x8xbf16, #tpu.memory_space<vmem>>, vector<1x1x32x8xbf16>
    %482 = vector.shape_cast %481 : vector<1x1x32x8xbf16> to vector<32x8xbf16>
    %cst_472 = arith.constant dense<0.000000e+00> : vector<32x8xf32>
    %483 = tpu.matmul %344, %482, %cst_472 {dimension_numbers = #tpu.dot_dimension_numbers<[1], [0], [0], [1], [0, 0, 1, 1], [], []>} : vector<32x32xbf16>, vector<32x8xbf16>, vector<32x8xf32> -> vector<32x8xf32>
    %484 = arith.addf %480, %483 : vector<32x8xf32>
    %c4_473 = arith.constant 4 : index
    %c3_474 = arith.constant 3 : index
    %c0_475 = arith.constant 0 : index
    %c0_476 = arith.constant 0 : index
    %485 = vector.load %arg4[%c4_473, %c3_474, %c0_475, %c0_476] : memref<9x4x32x8xbf16, #tpu.memory_space<vmem>>, vector<1x1x32x8xbf16>
    %486 = vector.shape_cast %485 : vector<1x1x32x8xbf16> to vector<32x8xbf16>
    %cst_477 = arith.constant dense<0.000000e+00> : vector<32x8xf32>
    %487 = tpu.matmul %348, %486, %cst_477 {dimension_numbers = #tpu.dot_dimension_numbers<[1], [0], [0], [1], [0, 0, 1, 1], [], []>} : vector<32x32xbf16>, vector<32x8xbf16>, vector<32x8xf32> -> vector<32x8xf32>
    %488 = arith.addf %484, %487 : vector<32x8xf32>
    %c5_478 = arith.constant 5 : index
    %c3_479 = arith.constant 3 : index
    %c0_480 = arith.constant 0 : index
    %c0_481 = arith.constant 0 : index
    %489 = vector.load %arg4[%c5_478, %c3_479, %c0_480, %c0_481] : memref<9x4x32x8xbf16, #tpu.memory_space<vmem>>, vector<1x1x32x8xbf16>
    %490 = vector.shape_cast %489 : vector<1x1x32x8xbf16> to vector<32x8xbf16>
    %cst_482 = arith.constant dense<0.000000e+00> : vector<32x8xf32>
    %491 = tpu.matmul %352, %490, %cst_482 {dimension_numbers = #tpu.dot_dimension_numbers<[1], [0], [0], [1], [0, 0, 1, 1], [], []>} : vector<32x32xbf16>, vector<32x8xbf16>, vector<32x8xf32> -> vector<32x8xf32>
    %492 = arith.addf %488, %491 : vector<32x8xf32>
    %c6_483 = arith.constant 6 : index
    %c3_484 = arith.constant 3 : index
    %c0_485 = arith.constant 0 : index
    %c0_486 = arith.constant 0 : index
    %493 = vector.load %arg4[%c6_483, %c3_484, %c0_485, %c0_486] : memref<9x4x32x8xbf16, #tpu.memory_space<vmem>>, vector<1x1x32x8xbf16>
    %494 = vector.shape_cast %493 : vector<1x1x32x8xbf16> to vector<32x8xbf16>
    %cst_487 = arith.constant dense<0.000000e+00> : vector<32x8xf32>
    %495 = tpu.matmul %356, %494, %cst_487 {dimension_numbers = #tpu.dot_dimension_numbers<[1], [0], [0], [1], [0, 0, 1, 1], [], []>} : vector<32x32xbf16>, vector<32x8xbf16>, vector<32x8xf32> -> vector<32x8xf32>
    %496 = arith.addf %492, %495 : vector<32x8xf32>
    %c7_488 = arith.constant 7 : index
    %c3_489 = arith.constant 3 : index
    %c0_490 = arith.constant 0 : index
    %c0_491 = arith.constant 0 : index
    %497 = vector.load %arg4[%c7_488, %c3_489, %c0_490, %c0_491] : memref<9x4x32x8xbf16, #tpu.memory_space<vmem>>, vector<1x1x32x8xbf16>
    %498 = vector.shape_cast %497 : vector<1x1x32x8xbf16> to vector<32x8xbf16>
    %cst_492 = arith.constant dense<0.000000e+00> : vector<32x8xf32>
    %499 = tpu.matmul %360, %498, %cst_492 {dimension_numbers = #tpu.dot_dimension_numbers<[1], [0], [0], [1], [0, 0, 1, 1], [], []>} : vector<32x32xbf16>, vector<32x8xbf16>, vector<32x8xf32> -> vector<32x8xf32>
    %500 = arith.addf %496, %499 : vector<32x8xf32>
    %c8_493 = arith.constant 8 : index
    %c3_494 = arith.constant 3 : index
    %c0_495 = arith.constant 0 : index
    %c0_496 = arith.constant 0 : index
    %501 = vector.load %arg4[%c8_493, %c3_494, %c0_495, %c0_496] : memref<9x4x32x8xbf16, #tpu.memory_space<vmem>>, vector<1x1x32x8xbf16>
    %502 = vector.shape_cast %501 : vector<1x1x32x8xbf16> to vector<32x8xbf16>
    %cst_497 = arith.constant dense<0.000000e+00> : vector<32x8xf32>
    %503 = tpu.matmul %364, %502, %cst_497 {dimension_numbers = #tpu.dot_dimension_numbers<[1], [0], [0], [1], [0, 0, 1, 1], [], []>} : vector<32x32xbf16>, vector<32x8xbf16>, vector<32x8xf32> -> vector<32x8xf32>
    %504 = arith.addf %500, %503 : vector<32x8xf32>
    %c2_498 = arith.constant 2 : index
    %c0_499 = arith.constant 0 : index
    %c0_500 = arith.constant 0 : index
    %c0_501 = arith.constant 0 : index
    %505 = vector.load %arg6[%c2_498, %c0_499, %c0_500, %c0_501] : memref<4x2x32x1xf32, #tpu.memory_space<vmem>>, vector<1x1x32x1xf32>
    %506 = vector.shape_cast %505 : vector<1x1x32x1xf32> to vector<32x1xf32>
    %c2_502 = arith.constant 2 : index
    %c1_503 = arith.constant 1 : index
    %c0_504 = arith.constant 0 : index
    %c0_505 = arith.constant 0 : index
    %507 = vector.load %arg6[%c2_502, %c1_503, %c0_504, %c0_505] : memref<4x2x32x1xf32, #tpu.memory_space<vmem>>, vector<1x1x32x1xf32>
    %508 = vector.shape_cast %507 : vector<1x1x32x1xf32> to vector<32x1xf32>
    %509 = arith.addf %399, %434 : vector<32x8xf32>
    %510 = arith.addf %469, %504 : vector<32x8xf32>
    %511 = arith.addf %509, %510 : vector<32x8xf32>
    %cst_506 = arith.constant dense<0.000000e+00> : vector<32xf32>
    %512 = vector.multi_reduction <add>, %511, %cst_506 [1] : vector<32x8xf32> to vector<32xf32>
    %513 = vector.shape_cast %512 : vector<32xf32> to vector<32x1xf32>
    %cst_507 = arith.constant 3.200000e+01 : f32
    %514 = vector.broadcast %cst_507 : f32 to vector<32x1xf32>
    %515 = arith.divf %513, %514 : vector<32x1xf32>
    %516 = vector.broadcast %515 : vector<32x1xf32> to vector<32x8xf32>
    %517 = arith.subf %399, %516 : vector<32x8xf32>
    %518 = arith.mulf %517, %517 : vector<32x8xf32>
    %cst_508 = arith.constant dense<0.000000e+00> : vector<32xf32>
    %519 = vector.multi_reduction <add>, %518, %cst_508 [1] : vector<32x8xf32> to vector<32xf32>
    %520 = vector.shape_cast %519 : vector<32xf32> to vector<32x1xf32>
    %521 = vector.broadcast %515 : vector<32x1xf32> to vector<32x8xf32>
    %522 = arith.subf %434, %521 : vector<32x8xf32>
    %523 = arith.mulf %522, %522 : vector<32x8xf32>
    %cst_509 = arith.constant dense<0.000000e+00> : vector<32xf32>
    %524 = vector.multi_reduction <add>, %523, %cst_509 [1] : vector<32x8xf32> to vector<32xf32>
    %525 = vector.shape_cast %524 : vector<32xf32> to vector<32x1xf32>
    %526 = arith.addf %520, %525 : vector<32x1xf32>
    %527 = vector.broadcast %515 : vector<32x1xf32> to vector<32x8xf32>
    %528 = arith.subf %469, %527 : vector<32x8xf32>
    %529 = arith.mulf %528, %528 : vector<32x8xf32>
    %cst_510 = arith.constant dense<0.000000e+00> : vector<32xf32>
    %530 = vector.multi_reduction <add>, %529, %cst_510 [1] : vector<32x8xf32> to vector<32xf32>
    %531 = vector.shape_cast %530 : vector<32xf32> to vector<32x1xf32>
    %532 = arith.addf %526, %531 : vector<32x1xf32>
    %533 = vector.broadcast %515 : vector<32x1xf32> to vector<32x8xf32>
    %534 = arith.subf %504, %533 : vector<32x8xf32>
    %535 = arith.mulf %534, %534 : vector<32x8xf32>
    %cst_511 = arith.constant dense<0.000000e+00> : vector<32xf32>
    %536 = vector.multi_reduction <add>, %535, %cst_511 [1] : vector<32x8xf32> to vector<32xf32>
    %537 = vector.shape_cast %536 : vector<32xf32> to vector<32x1xf32>
    %538 = arith.addf %532, %537 : vector<32x1xf32>
    %cst_512 = arith.constant 3.200000e+01 : f32
    %539 = vector.broadcast %cst_512 : f32 to vector<32x1xf32>
    %540 = arith.divf %538, %539 : vector<32x1xf32>
    %cst_513 = arith.constant 9.99999974E-6 : f32
    %541 = vector.broadcast %cst_513 : f32 to vector<32x1xf32>
    %542 = arith.addf %540, %541 : vector<32x1xf32>
    %543 = math.rsqrt %542 : vector<32x1xf32>
    %544 = arith.mulf %506, %543 : vector<32x1xf32>
    %545 = arith.mulf %515, %544 : vector<32x1xf32>
    %546 = arith.subf %508, %545 : vector<32x1xf32>
    %547 = vector.broadcast %544 : vector<32x1xf32> to vector<32x8xf32>
    %548 = arith.mulf %399, %547 : vector<32x8xf32>
    %549 = vector.broadcast %546 : vector<32x1xf32> to vector<32x8xf32>
    %550 = arith.addf %548, %549 : vector<32x8xf32>
    %cst_514 = arith.constant 0.000000e+00 : f32
    %551 = vector.broadcast %cst_514 : f32 to vector<32x8xf32>
    %552 = arith.maximumf %550, %551 : vector<32x8xf32>
    %553 = vector.broadcast %544 : vector<32x1xf32> to vector<32x8xf32>
    %554 = arith.mulf %434, %553 : vector<32x8xf32>
    %555 = vector.broadcast %546 : vector<32x1xf32> to vector<32x8xf32>
    %556 = arith.addf %554, %555 : vector<32x8xf32>
    %cst_515 = arith.constant 0.000000e+00 : f32
    %557 = vector.broadcast %cst_515 : f32 to vector<32x8xf32>
    %558 = arith.maximumf %556, %557 : vector<32x8xf32>
    %559 = vector.broadcast %544 : vector<32x1xf32> to vector<32x8xf32>
    %560 = arith.mulf %469, %559 : vector<32x8xf32>
    %561 = vector.broadcast %546 : vector<32x1xf32> to vector<32x8xf32>
    %562 = arith.addf %560, %561 : vector<32x8xf32>
    %cst_516 = arith.constant 0.000000e+00 : f32
    %563 = vector.broadcast %cst_516 : f32 to vector<32x8xf32>
    %564 = arith.maximumf %562, %563 : vector<32x8xf32>
    %565 = vector.broadcast %544 : vector<32x1xf32> to vector<32x8xf32>
    %566 = arith.mulf %504, %565 : vector<32x8xf32>
    %567 = vector.broadcast %546 : vector<32x1xf32> to vector<32x8xf32>
    %568 = arith.addf %566, %567 : vector<32x8xf32>
    %cst_517 = arith.constant 0.000000e+00 : f32
    %569 = vector.broadcast %cst_517 : f32 to vector<32x8xf32>
    %570 = arith.maximumf %568, %569 : vector<32x8xf32>
    %571 = arith.maximumf %552, %558 : vector<32x8xf32>
    %572 = arith.maximumf %564, %570 : vector<32x8xf32>
    %573 = arith.maximumf %571, %572 : vector<32x8xf32>
    %574 = arith.truncf %573 : vector<32x8xf32> to vector<32x8xbf16>
    %c2_518 = arith.constant 2 : index
    %c0_519 = arith.constant 0 : index
    %c0_520 = arith.constant 0 : index
    %c0_521 = arith.constant 0 : index
    %575 = vector.load %arg2[%c2_518, %c0_519, %c0_520, %c0_521] : memref<3x9x32x32xbf16, #tpu.memory_space<vmem>>, vector<1x1x32x32xbf16>
    %576 = vector.shape_cast %575 : vector<1x1x32x32xbf16> to vector<32x32xbf16>
    %cst_522 = arith.constant dense<0.000000e+00> : vector<32x8xf32>
    %577 = tpu.matmul %576, %574, %cst_522 {dimension_numbers = #tpu.dot_dimension_numbers<[1], [0], [0], [1], [0, 0, 1, 1], [], []>} : vector<32x32xbf16>, vector<32x8xbf16>, vector<32x8xf32> -> vector<32x8xf32>
    %578 = arith.truncf %577 : vector<32x8xf32> to vector<32x8xbf16>
    %c2_523 = arith.constant 2 : index
    %c1_524 = arith.constant 1 : index
    %c0_525 = arith.constant 0 : index
    %c0_526 = arith.constant 0 : index
    %579 = vector.load %arg2[%c2_523, %c1_524, %c0_525, %c0_526] : memref<3x9x32x32xbf16, #tpu.memory_space<vmem>>, vector<1x1x32x32xbf16>
    %580 = vector.shape_cast %579 : vector<1x1x32x32xbf16> to vector<32x32xbf16>
    %cst_527 = arith.constant dense<0.000000e+00> : vector<32x8xf32>
    %581 = tpu.matmul %580, %574, %cst_527 {dimension_numbers = #tpu.dot_dimension_numbers<[1], [0], [0], [1], [0, 0, 1, 1], [], []>} : vector<32x32xbf16>, vector<32x8xbf16>, vector<32x8xf32> -> vector<32x8xf32>
    %582 = arith.truncf %581 : vector<32x8xf32> to vector<32x8xbf16>
    %c2_528 = arith.constant 2 : index
    %c2_529 = arith.constant 2 : index
    %c0_530 = arith.constant 0 : index
    %c0_531 = arith.constant 0 : index
    %583 = vector.load %arg2[%c2_528, %c2_529, %c0_530, %c0_531] : memref<3x9x32x32xbf16, #tpu.memory_space<vmem>>, vector<1x1x32x32xbf16>
    %584 = vector.shape_cast %583 : vector<1x1x32x32xbf16> to vector<32x32xbf16>
    %cst_532 = arith.constant dense<0.000000e+00> : vector<32x8xf32>
    %585 = tpu.matmul %584, %574, %cst_532 {dimension_numbers = #tpu.dot_dimension_numbers<[1], [0], [0], [1], [0, 0, 1, 1], [], []>} : vector<32x32xbf16>, vector<32x8xbf16>, vector<32x8xf32> -> vector<32x8xf32>
    %586 = arith.truncf %585 : vector<32x8xf32> to vector<32x8xbf16>
    %c2_533 = arith.constant 2 : index
    %c3_534 = arith.constant 3 : index
    %c0_535 = arith.constant 0 : index
    %c0_536 = arith.constant 0 : index
    %587 = vector.load %arg2[%c2_533, %c3_534, %c0_535, %c0_536] : memref<3x9x32x32xbf16, #tpu.memory_space<vmem>>, vector<1x1x32x32xbf16>
    %588 = vector.shape_cast %587 : vector<1x1x32x32xbf16> to vector<32x32xbf16>
    %cst_537 = arith.constant dense<0.000000e+00> : vector<32x8xf32>
    %589 = tpu.matmul %588, %574, %cst_537 {dimension_numbers = #tpu.dot_dimension_numbers<[1], [0], [0], [1], [0, 0, 1, 1], [], []>} : vector<32x32xbf16>, vector<32x8xbf16>, vector<32x8xf32> -> vector<32x8xf32>
    %590 = arith.truncf %589 : vector<32x8xf32> to vector<32x8xbf16>
    %c2_538 = arith.constant 2 : index
    %c4_539 = arith.constant 4 : index
    %c0_540 = arith.constant 0 : index
    %c0_541 = arith.constant 0 : index
    %591 = vector.load %arg2[%c2_538, %c4_539, %c0_540, %c0_541] : memref<3x9x32x32xbf16, #tpu.memory_space<vmem>>, vector<1x1x32x32xbf16>
    %592 = vector.shape_cast %591 : vector<1x1x32x32xbf16> to vector<32x32xbf16>
    %cst_542 = arith.constant dense<0.000000e+00> : vector<32x8xf32>
    %593 = tpu.matmul %592, %574, %cst_542 {dimension_numbers = #tpu.dot_dimension_numbers<[1], [0], [0], [1], [0, 0, 1, 1], [], []>} : vector<32x32xbf16>, vector<32x8xbf16>, vector<32x8xf32> -> vector<32x8xf32>
    %594 = arith.truncf %593 : vector<32x8xf32> to vector<32x8xbf16>
    %c2_543 = arith.constant 2 : index
    %c5_544 = arith.constant 5 : index
    %c0_545 = arith.constant 0 : index
    %c0_546 = arith.constant 0 : index
    %595 = vector.load %arg2[%c2_543, %c5_544, %c0_545, %c0_546] : memref<3x9x32x32xbf16, #tpu.memory_space<vmem>>, vector<1x1x32x32xbf16>
    %596 = vector.shape_cast %595 : vector<1x1x32x32xbf16> to vector<32x32xbf16>
    %cst_547 = arith.constant dense<0.000000e+00> : vector<32x8xf32>
    %597 = tpu.matmul %596, %574, %cst_547 {dimension_numbers = #tpu.dot_dimension_numbers<[1], [0], [0], [1], [0, 0, 1, 1], [], []>} : vector<32x32xbf16>, vector<32x8xbf16>, vector<32x8xf32> -> vector<32x8xf32>
    %598 = arith.truncf %597 : vector<32x8xf32> to vector<32x8xbf16>
    %c2_548 = arith.constant 2 : index
    %c6_549 = arith.constant 6 : index
    %c0_550 = arith.constant 0 : index
    %c0_551 = arith.constant 0 : index
    %599 = vector.load %arg2[%c2_548, %c6_549, %c0_550, %c0_551] : memref<3x9x32x32xbf16, #tpu.memory_space<vmem>>, vector<1x1x32x32xbf16>
    %600 = vector.shape_cast %599 : vector<1x1x32x32xbf16> to vector<32x32xbf16>
    %cst_552 = arith.constant dense<0.000000e+00> : vector<32x8xf32>
    %601 = tpu.matmul %600, %574, %cst_552 {dimension_numbers = #tpu.dot_dimension_numbers<[1], [0], [0], [1], [0, 0, 1, 1], [], []>} : vector<32x32xbf16>, vector<32x8xbf16>, vector<32x8xf32> -> vector<32x8xf32>
    %602 = arith.truncf %601 : vector<32x8xf32> to vector<32x8xbf16>
    %c2_553 = arith.constant 2 : index
    %c7_554 = arith.constant 7 : index
    %c0_555 = arith.constant 0 : index
    %c0_556 = arith.constant 0 : index
    %603 = vector.load %arg2[%c2_553, %c7_554, %c0_555, %c0_556] : memref<3x9x32x32xbf16, #tpu.memory_space<vmem>>, vector<1x1x32x32xbf16>
    %604 = vector.shape_cast %603 : vector<1x1x32x32xbf16> to vector<32x32xbf16>
    %cst_557 = arith.constant dense<0.000000e+00> : vector<32x8xf32>
    %605 = tpu.matmul %604, %574, %cst_557 {dimension_numbers = #tpu.dot_dimension_numbers<[1], [0], [0], [1], [0, 0, 1, 1], [], []>} : vector<32x32xbf16>, vector<32x8xbf16>, vector<32x8xf32> -> vector<32x8xf32>
    %606 = arith.truncf %605 : vector<32x8xf32> to vector<32x8xbf16>
    %c2_558 = arith.constant 2 : index
    %c8_559 = arith.constant 8 : index
    %c0_560 = arith.constant 0 : index
    %c0_561 = arith.constant 0 : index
    %607 = vector.load %arg2[%c2_558, %c8_559, %c0_560, %c0_561] : memref<3x9x32x32xbf16, #tpu.memory_space<vmem>>, vector<1x1x32x32xbf16>
    %608 = vector.shape_cast %607 : vector<1x1x32x32xbf16> to vector<32x32xbf16>
    %cst_562 = arith.constant dense<0.000000e+00> : vector<32x8xf32>
    %609 = tpu.matmul %608, %574, %cst_562 {dimension_numbers = #tpu.dot_dimension_numbers<[1], [0], [0], [1], [0, 0, 1, 1], [], []>} : vector<32x32xbf16>, vector<32x8xbf16>, vector<32x8xf32> -> vector<32x8xf32>
    %610 = arith.truncf %609 : vector<32x8xf32> to vector<32x8xbf16>
    %c0_563 = arith.constant 0 : index
    %c0_564 = arith.constant 0 : index
    %c0_565 = arith.constant 0 : index
    %c0_566 = arith.constant 0 : index
    %611 = vector.load %arg5[%c0_563, %c0_564, %c0_565, %c0_566] : memref<9x4x8x2xbf16, #tpu.memory_space<vmem>>, vector<1x1x8x2xbf16>
    %612 = vector.shape_cast %611 : vector<1x1x8x2xbf16> to vector<8x2xbf16>
    %cst_567 = arith.constant dense<0.000000e+00> : vector<32x2xf32>
    %613 = tpu.matmul %578, %612, %cst_567 {dimension_numbers = #tpu.dot_dimension_numbers<[1], [0], [0], [1], [0, 0, 1, 1], [], []>} : vector<32x8xbf16>, vector<8x2xbf16>, vector<32x2xf32> -> vector<32x2xf32>
    %c1_568 = arith.constant 1 : index
    %c0_569 = arith.constant 0 : index
    %c0_570 = arith.constant 0 : index
    %c0_571 = arith.constant 0 : index
    %614 = vector.load %arg5[%c1_568, %c0_569, %c0_570, %c0_571] : memref<9x4x8x2xbf16, #tpu.memory_space<vmem>>, vector<1x1x8x2xbf16>
    %615 = vector.shape_cast %614 : vector<1x1x8x2xbf16> to vector<8x2xbf16>
    %cst_572 = arith.constant dense<0.000000e+00> : vector<32x2xf32>
    %616 = tpu.matmul %582, %615, %cst_572 {dimension_numbers = #tpu.dot_dimension_numbers<[1], [0], [0], [1], [0, 0, 1, 1], [], []>} : vector<32x8xbf16>, vector<8x2xbf16>, vector<32x2xf32> -> vector<32x2xf32>
    %617 = arith.addf %613, %616 : vector<32x2xf32>
    %c2_573 = arith.constant 2 : index
    %c0_574 = arith.constant 0 : index
    %c0_575 = arith.constant 0 : index
    %c0_576 = arith.constant 0 : index
    %618 = vector.load %arg5[%c2_573, %c0_574, %c0_575, %c0_576] : memref<9x4x8x2xbf16, #tpu.memory_space<vmem>>, vector<1x1x8x2xbf16>
    %619 = vector.shape_cast %618 : vector<1x1x8x2xbf16> to vector<8x2xbf16>
    %cst_577 = arith.constant dense<0.000000e+00> : vector<32x2xf32>
    %620 = tpu.matmul %586, %619, %cst_577 {dimension_numbers = #tpu.dot_dimension_numbers<[1], [0], [0], [1], [0, 0, 1, 1], [], []>} : vector<32x8xbf16>, vector<8x2xbf16>, vector<32x2xf32> -> vector<32x2xf32>
    %621 = arith.addf %617, %620 : vector<32x2xf32>
    %c3_578 = arith.constant 3 : index
    %c0_579 = arith.constant 0 : index
    %c0_580 = arith.constant 0 : index
    %c0_581 = arith.constant 0 : index
    %622 = vector.load %arg5[%c3_578, %c0_579, %c0_580, %c0_581] : memref<9x4x8x2xbf16, #tpu.memory_space<vmem>>, vector<1x1x8x2xbf16>
    %623 = vector.shape_cast %622 : vector<1x1x8x2xbf16> to vector<8x2xbf16>
    %cst_582 = arith.constant dense<0.000000e+00> : vector<32x2xf32>
    %624 = tpu.matmul %590, %623, %cst_582 {dimension_numbers = #tpu.dot_dimension_numbers<[1], [0], [0], [1], [0, 0, 1, 1], [], []>} : vector<32x8xbf16>, vector<8x2xbf16>, vector<32x2xf32> -> vector<32x2xf32>
    %625 = arith.addf %621, %624 : vector<32x2xf32>
    %c4_583 = arith.constant 4 : index
    %c0_584 = arith.constant 0 : index
    %c0_585 = arith.constant 0 : index
    %c0_586 = arith.constant 0 : index
    %626 = vector.load %arg5[%c4_583, %c0_584, %c0_585, %c0_586] : memref<9x4x8x2xbf16, #tpu.memory_space<vmem>>, vector<1x1x8x2xbf16>
    %627 = vector.shape_cast %626 : vector<1x1x8x2xbf16> to vector<8x2xbf16>
    %cst_587 = arith.constant dense<0.000000e+00> : vector<32x2xf32>
    %628 = tpu.matmul %594, %627, %cst_587 {dimension_numbers = #tpu.dot_dimension_numbers<[1], [0], [0], [1], [0, 0, 1, 1], [], []>} : vector<32x8xbf16>, vector<8x2xbf16>, vector<32x2xf32> -> vector<32x2xf32>
    %629 = arith.addf %625, %628 : vector<32x2xf32>
    %c5_588 = arith.constant 5 : index
    %c0_589 = arith.constant 0 : index
    %c0_590 = arith.constant 0 : index
    %c0_591 = arith.constant 0 : index
    %630 = vector.load %arg5[%c5_588, %c0_589, %c0_590, %c0_591] : memref<9x4x8x2xbf16, #tpu.memory_space<vmem>>, vector<1x1x8x2xbf16>
    %631 = vector.shape_cast %630 : vector<1x1x8x2xbf16> to vector<8x2xbf16>
    %cst_592 = arith.constant dense<0.000000e+00> : vector<32x2xf32>
    %632 = tpu.matmul %598, %631, %cst_592 {dimension_numbers = #tpu.dot_dimension_numbers<[1], [0], [0], [1], [0, 0, 1, 1], [], []>} : vector<32x8xbf16>, vector<8x2xbf16>, vector<32x2xf32> -> vector<32x2xf32>
    %633 = arith.addf %629, %632 : vector<32x2xf32>
    %c6_593 = arith.constant 6 : index
    %c0_594 = arith.constant 0 : index
    %c0_595 = arith.constant 0 : index
    %c0_596 = arith.constant 0 : index
    %634 = vector.load %arg5[%c6_593, %c0_594, %c0_595, %c0_596] : memref<9x4x8x2xbf16, #tpu.memory_space<vmem>>, vector<1x1x8x2xbf16>
    %635 = vector.shape_cast %634 : vector<1x1x8x2xbf16> to vector<8x2xbf16>
    %cst_597 = arith.constant dense<0.000000e+00> : vector<32x2xf32>
    %636 = tpu.matmul %602, %635, %cst_597 {dimension_numbers = #tpu.dot_dimension_numbers<[1], [0], [0], [1], [0, 0, 1, 1], [], []>} : vector<32x8xbf16>, vector<8x2xbf16>, vector<32x2xf32> -> vector<32x2xf32>
    %637 = arith.addf %633, %636 : vector<32x2xf32>
    %c7_598 = arith.constant 7 : index
    %c0_599 = arith.constant 0 : index
    %c0_600 = arith.constant 0 : index
    %c0_601 = arith.constant 0 : index
    %638 = vector.load %arg5[%c7_598, %c0_599, %c0_600, %c0_601] : memref<9x4x8x2xbf16, #tpu.memory_space<vmem>>, vector<1x1x8x2xbf16>
    %639 = vector.shape_cast %638 : vector<1x1x8x2xbf16> to vector<8x2xbf16>
    %cst_602 = arith.constant dense<0.000000e+00> : vector<32x2xf32>
    %640 = tpu.matmul %606, %639, %cst_602 {dimension_numbers = #tpu.dot_dimension_numbers<[1], [0], [0], [1], [0, 0, 1, 1], [], []>} : vector<32x8xbf16>, vector<8x2xbf16>, vector<32x2xf32> -> vector<32x2xf32>
    %641 = arith.addf %637, %640 : vector<32x2xf32>
    %c8_603 = arith.constant 8 : index
    %c0_604 = arith.constant 0 : index
    %c0_605 = arith.constant 0 : index
    %c0_606 = arith.constant 0 : index
    %642 = vector.load %arg5[%c8_603, %c0_604, %c0_605, %c0_606] : memref<9x4x8x2xbf16, #tpu.memory_space<vmem>>, vector<1x1x8x2xbf16>
    %643 = vector.shape_cast %642 : vector<1x1x8x2xbf16> to vector<8x2xbf16>
    %cst_607 = arith.constant dense<0.000000e+00> : vector<32x2xf32>
    %644 = tpu.matmul %610, %643, %cst_607 {dimension_numbers = #tpu.dot_dimension_numbers<[1], [0], [0], [1], [0, 0, 1, 1], [], []>} : vector<32x8xbf16>, vector<8x2xbf16>, vector<32x2xf32> -> vector<32x2xf32>
    %645 = arith.addf %641, %644 : vector<32x2xf32>
    %c0_608 = arith.constant 0 : index
    %c1_609 = arith.constant 1 : index
    %c0_610 = arith.constant 0 : index
    %c0_611 = arith.constant 0 : index
    %646 = vector.load %arg5[%c0_608, %c1_609, %c0_610, %c0_611] : memref<9x4x8x2xbf16, #tpu.memory_space<vmem>>, vector<1x1x8x2xbf16>
    %647 = vector.shape_cast %646 : vector<1x1x8x2xbf16> to vector<8x2xbf16>
    %cst_612 = arith.constant dense<0.000000e+00> : vector<32x2xf32>
    %648 = tpu.matmul %578, %647, %cst_612 {dimension_numbers = #tpu.dot_dimension_numbers<[1], [0], [0], [1], [0, 0, 1, 1], [], []>} : vector<32x8xbf16>, vector<8x2xbf16>, vector<32x2xf32> -> vector<32x2xf32>
    %c1_613 = arith.constant 1 : index
    %c1_614 = arith.constant 1 : index
    %c0_615 = arith.constant 0 : index
    %c0_616 = arith.constant 0 : index
    %649 = vector.load %arg5[%c1_613, %c1_614, %c0_615, %c0_616] : memref<9x4x8x2xbf16, #tpu.memory_space<vmem>>, vector<1x1x8x2xbf16>
    %650 = vector.shape_cast %649 : vector<1x1x8x2xbf16> to vector<8x2xbf16>
    %cst_617 = arith.constant dense<0.000000e+00> : vector<32x2xf32>
    %651 = tpu.matmul %582, %650, %cst_617 {dimension_numbers = #tpu.dot_dimension_numbers<[1], [0], [0], [1], [0, 0, 1, 1], [], []>} : vector<32x8xbf16>, vector<8x2xbf16>, vector<32x2xf32> -> vector<32x2xf32>
    %652 = arith.addf %648, %651 : vector<32x2xf32>
    %c2_618 = arith.constant 2 : index
    %c1_619 = arith.constant 1 : index
    %c0_620 = arith.constant 0 : index
    %c0_621 = arith.constant 0 : index
    %653 = vector.load %arg5[%c2_618, %c1_619, %c0_620, %c0_621] : memref<9x4x8x2xbf16, #tpu.memory_space<vmem>>, vector<1x1x8x2xbf16>
    %654 = vector.shape_cast %653 : vector<1x1x8x2xbf16> to vector<8x2xbf16>
    %cst_622 = arith.constant dense<0.000000e+00> : vector<32x2xf32>
    %655 = tpu.matmul %586, %654, %cst_622 {dimension_numbers = #tpu.dot_dimension_numbers<[1], [0], [0], [1], [0, 0, 1, 1], [], []>} : vector<32x8xbf16>, vector<8x2xbf16>, vector<32x2xf32> -> vector<32x2xf32>
    %656 = arith.addf %652, %655 : vector<32x2xf32>
    %c3_623 = arith.constant 3 : index
    %c1_624 = arith.constant 1 : index
    %c0_625 = arith.constant 0 : index
    %c0_626 = arith.constant 0 : index
    %657 = vector.load %arg5[%c3_623, %c1_624, %c0_625, %c0_626] : memref<9x4x8x2xbf16, #tpu.memory_space<vmem>>, vector<1x1x8x2xbf16>
    %658 = vector.shape_cast %657 : vector<1x1x8x2xbf16> to vector<8x2xbf16>
    %cst_627 = arith.constant dense<0.000000e+00> : vector<32x2xf32>
    %659 = tpu.matmul %590, %658, %cst_627 {dimension_numbers = #tpu.dot_dimension_numbers<[1], [0], [0], [1], [0, 0, 1, 1], [], []>} : vector<32x8xbf16>, vector<8x2xbf16>, vector<32x2xf32> -> vector<32x2xf32>
    %660 = arith.addf %656, %659 : vector<32x2xf32>
    %c4_628 = arith.constant 4 : index
    %c1_629 = arith.constant 1 : index
    %c0_630 = arith.constant 0 : index
    %c0_631 = arith.constant 0 : index
    %661 = vector.load %arg5[%c4_628, %c1_629, %c0_630, %c0_631] : memref<9x4x8x2xbf16, #tpu.memory_space<vmem>>, vector<1x1x8x2xbf16>
    %662 = vector.shape_cast %661 : vector<1x1x8x2xbf16> to vector<8x2xbf16>
    %cst_632 = arith.constant dense<0.000000e+00> : vector<32x2xf32>
    %663 = tpu.matmul %594, %662, %cst_632 {dimension_numbers = #tpu.dot_dimension_numbers<[1], [0], [0], [1], [0, 0, 1, 1], [], []>} : vector<32x8xbf16>, vector<8x2xbf16>, vector<32x2xf32> -> vector<32x2xf32>
    %664 = arith.addf %660, %663 : vector<32x2xf32>
    %c5_633 = arith.constant 5 : index
    %c1_634 = arith.constant 1 : index
    %c0_635 = arith.constant 0 : index
    %c0_636 = arith.constant 0 : index
    %665 = vector.load %arg5[%c5_633, %c1_634, %c0_635, %c0_636] : memref<9x4x8x2xbf16, #tpu.memory_space<vmem>>, vector<1x1x8x2xbf16>
    %666 = vector.shape_cast %665 : vector<1x1x8x2xbf16> to vector<8x2xbf16>
    %cst_637 = arith.constant dense<0.000000e+00> : vector<32x2xf32>
    %667 = tpu.matmul %598, %666, %cst_637 {dimension_numbers = #tpu.dot_dimension_numbers<[1], [0], [0], [1], [0, 0, 1, 1], [], []>} : vector<32x8xbf16>, vector<8x2xbf16>, vector<32x2xf32> -> vector<32x2xf32>
    %668 = arith.addf %664, %667 : vector<32x2xf32>
    %c6_638 = arith.constant 6 : index
    %c1_639 = arith.constant 1 : index
    %c0_640 = arith.constant 0 : index
    %c0_641 = arith.constant 0 : index
    %669 = vector.load %arg5[%c6_638, %c1_639, %c0_640, %c0_641] : memref<9x4x8x2xbf16, #tpu.memory_space<vmem>>, vector<1x1x8x2xbf16>
    %670 = vector.shape_cast %669 : vector<1x1x8x2xbf16> to vector<8x2xbf16>
    %cst_642 = arith.constant dense<0.000000e+00> : vector<32x2xf32>
    %671 = tpu.matmul %602, %670, %cst_642 {dimension_numbers = #tpu.dot_dimension_numbers<[1], [0], [0], [1], [0, 0, 1, 1], [], []>} : vector<32x8xbf16>, vector<8x2xbf16>, vector<32x2xf32> -> vector<32x2xf32>
    %672 = arith.addf %668, %671 : vector<32x2xf32>
    %c7_643 = arith.constant 7 : index
    %c1_644 = arith.constant 1 : index
    %c0_645 = arith.constant 0 : index
    %c0_646 = arith.constant 0 : index
    %673 = vector.load %arg5[%c7_643, %c1_644, %c0_645, %c0_646] : memref<9x4x8x2xbf16, #tpu.memory_space<vmem>>, vector<1x1x8x2xbf16>
    %674 = vector.shape_cast %673 : vector<1x1x8x2xbf16> to vector<8x2xbf16>
    %cst_647 = arith.constant dense<0.000000e+00> : vector<32x2xf32>
    %675 = tpu.matmul %606, %674, %cst_647 {dimension_numbers = #tpu.dot_dimension_numbers<[1], [0], [0], [1], [0, 0, 1, 1], [], []>} : vector<32x8xbf16>, vector<8x2xbf16>, vector<32x2xf32> -> vector<32x2xf32>
    %676 = arith.addf %672, %675 : vector<32x2xf32>
    %c8_648 = arith.constant 8 : index
    %c1_649 = arith.constant 1 : index
    %c0_650 = arith.constant 0 : index
    %c0_651 = arith.constant 0 : index
    %677 = vector.load %arg5[%c8_648, %c1_649, %c0_650, %c0_651] : memref<9x4x8x2xbf16, #tpu.memory_space<vmem>>, vector<1x1x8x2xbf16>
    %678 = vector.shape_cast %677 : vector<1x1x8x2xbf16> to vector<8x2xbf16>
    %cst_652 = arith.constant dense<0.000000e+00> : vector<32x2xf32>
    %679 = tpu.matmul %610, %678, %cst_652 {dimension_numbers = #tpu.dot_dimension_numbers<[1], [0], [0], [1], [0, 0, 1, 1], [], []>} : vector<32x8xbf16>, vector<8x2xbf16>, vector<32x2xf32> -> vector<32x2xf32>
    %680 = arith.addf %676, %679 : vector<32x2xf32>
    %c0_653 = arith.constant 0 : index
    %c2_654 = arith.constant 2 : index
    %c0_655 = arith.constant 0 : index
    %c0_656 = arith.constant 0 : index
    %681 = vector.load %arg5[%c0_653, %c2_654, %c0_655, %c0_656] : memref<9x4x8x2xbf16, #tpu.memory_space<vmem>>, vector<1x1x8x2xbf16>
    %682 = vector.shape_cast %681 : vector<1x1x8x2xbf16> to vector<8x2xbf16>
    %cst_657 = arith.constant dense<0.000000e+00> : vector<32x2xf32>
    %683 = tpu.matmul %578, %682, %cst_657 {dimension_numbers = #tpu.dot_dimension_numbers<[1], [0], [0], [1], [0, 0, 1, 1], [], []>} : vector<32x8xbf16>, vector<8x2xbf16>, vector<32x2xf32> -> vector<32x2xf32>
    %c1_658 = arith.constant 1 : index
    %c2_659 = arith.constant 2 : index
    %c0_660 = arith.constant 0 : index
    %c0_661 = arith.constant 0 : index
    %684 = vector.load %arg5[%c1_658, %c2_659, %c0_660, %c0_661] : memref<9x4x8x2xbf16, #tpu.memory_space<vmem>>, vector<1x1x8x2xbf16>
    %685 = vector.shape_cast %684 : vector<1x1x8x2xbf16> to vector<8x2xbf16>
    %cst_662 = arith.constant dense<0.000000e+00> : vector<32x2xf32>
    %686 = tpu.matmul %582, %685, %cst_662 {dimension_numbers = #tpu.dot_dimension_numbers<[1], [0], [0], [1], [0, 0, 1, 1], [], []>} : vector<32x8xbf16>, vector<8x2xbf16>, vector<32x2xf32> -> vector<32x2xf32>
    %687 = arith.addf %683, %686 : vector<32x2xf32>
    %c2_663 = arith.constant 2 : index
    %c2_664 = arith.constant 2 : index
    %c0_665 = arith.constant 0 : index
    %c0_666 = arith.constant 0 : index
    %688 = vector.load %arg5[%c2_663, %c2_664, %c0_665, %c0_666] : memref<9x4x8x2xbf16, #tpu.memory_space<vmem>>, vector<1x1x8x2xbf16>
    %689 = vector.shape_cast %688 : vector<1x1x8x2xbf16> to vector<8x2xbf16>
    %cst_667 = arith.constant dense<0.000000e+00> : vector<32x2xf32>
    %690 = tpu.matmul %586, %689, %cst_667 {dimension_numbers = #tpu.dot_dimension_numbers<[1], [0], [0], [1], [0, 0, 1, 1], [], []>} : vector<32x8xbf16>, vector<8x2xbf16>, vector<32x2xf32> -> vector<32x2xf32>
    %691 = arith.addf %687, %690 : vector<32x2xf32>
    %c3_668 = arith.constant 3 : index
    %c2_669 = arith.constant 2 : index
    %c0_670 = arith.constant 0 : index
    %c0_671 = arith.constant 0 : index
    %692 = vector.load %arg5[%c3_668, %c2_669, %c0_670, %c0_671] : memref<9x4x8x2xbf16, #tpu.memory_space<vmem>>, vector<1x1x8x2xbf16>
    %693 = vector.shape_cast %692 : vector<1x1x8x2xbf16> to vector<8x2xbf16>
    %cst_672 = arith.constant dense<0.000000e+00> : vector<32x2xf32>
    %694 = tpu.matmul %590, %693, %cst_672 {dimension_numbers = #tpu.dot_dimension_numbers<[1], [0], [0], [1], [0, 0, 1, 1], [], []>} : vector<32x8xbf16>, vector<8x2xbf16>, vector<32x2xf32> -> vector<32x2xf32>
    %695 = arith.addf %691, %694 : vector<32x2xf32>
    %c4_673 = arith.constant 4 : index
    %c2_674 = arith.constant 2 : index
    %c0_675 = arith.constant 0 : index
    %c0_676 = arith.constant 0 : index
    %696 = vector.load %arg5[%c4_673, %c2_674, %c0_675, %c0_676] : memref<9x4x8x2xbf16, #tpu.memory_space<vmem>>, vector<1x1x8x2xbf16>
    %697 = vector.shape_cast %696 : vector<1x1x8x2xbf16> to vector<8x2xbf16>
    %cst_677 = arith.constant dense<0.000000e+00> : vector<32x2xf32>
    %698 = tpu.matmul %594, %697, %cst_677 {dimension_numbers = #tpu.dot_dimension_numbers<[1], [0], [0], [1], [0, 0, 1, 1], [], []>} : vector<32x8xbf16>, vector<8x2xbf16>, vector<32x2xf32> -> vector<32x2xf32>
    %699 = arith.addf %695, %698 : vector<32x2xf32>
    %c5_678 = arith.constant 5 : index
    %c2_679 = arith.constant 2 : index
    %c0_680 = arith.constant 0 : index
    %c0_681 = arith.constant 0 : index
    %700 = vector.load %arg5[%c5_678, %c2_679, %c0_680, %c0_681] : memref<9x4x8x2xbf16, #tpu.memory_space<vmem>>, vector<1x1x8x2xbf16>
    %701 = vector.shape_cast %700 : vector<1x1x8x2xbf16> to vector<8x2xbf16>
    %cst_682 = arith.constant dense<0.000000e+00> : vector<32x2xf32>
    %702 = tpu.matmul %598, %701, %cst_682 {dimension_numbers = #tpu.dot_dimension_numbers<[1], [0], [0], [1], [0, 0, 1, 1], [], []>} : vector<32x8xbf16>, vector<8x2xbf16>, vector<32x2xf32> -> vector<32x2xf32>
    %703 = arith.addf %699, %702 : vector<32x2xf32>
    %c6_683 = arith.constant 6 : index
    %c2_684 = arith.constant 2 : index
    %c0_685 = arith.constant 0 : index
    %c0_686 = arith.constant 0 : index
    %704 = vector.load %arg5[%c6_683, %c2_684, %c0_685, %c0_686] : memref<9x4x8x2xbf16, #tpu.memory_space<vmem>>, vector<1x1x8x2xbf16>
    %705 = vector.shape_cast %704 : vector<1x1x8x2xbf16> to vector<8x2xbf16>
    %cst_687 = arith.constant dense<0.000000e+00> : vector<32x2xf32>
    %706 = tpu.matmul %602, %705, %cst_687 {dimension_numbers = #tpu.dot_dimension_numbers<[1], [0], [0], [1], [0, 0, 1, 1], [], []>} : vector<32x8xbf16>, vector<8x2xbf16>, vector<32x2xf32> -> vector<32x2xf32>
    %707 = arith.addf %703, %706 : vector<32x2xf32>
    %c7_688 = arith.constant 7 : index
    %c2_689 = arith.constant 2 : index
    %c0_690 = arith.constant 0 : index
    %c0_691 = arith.constant 0 : index
    %708 = vector.load %arg5[%c7_688, %c2_689, %c0_690, %c0_691] : memref<9x4x8x2xbf16, #tpu.memory_space<vmem>>, vector<1x1x8x2xbf16>
    %709 = vector.shape_cast %708 : vector<1x1x8x2xbf16> to vector<8x2xbf16>
    %cst_692 = arith.constant dense<0.000000e+00> : vector<32x2xf32>
    %710 = tpu.matmul %606, %709, %cst_692 {dimension_numbers = #tpu.dot_dimension_numbers<[1], [0], [0], [1], [0, 0, 1, 1], [], []>} : vector<32x8xbf16>, vector<8x2xbf16>, vector<32x2xf32> -> vector<32x2xf32>
    %711 = arith.addf %707, %710 : vector<32x2xf32>
    %c8_693 = arith.constant 8 : index
    %c2_694 = arith.constant 2 : index
    %c0_695 = arith.constant 0 : index
    %c0_696 = arith.constant 0 : index
    %712 = vector.load %arg5[%c8_693, %c2_694, %c0_695, %c0_696] : memref<9x4x8x2xbf16, #tpu.memory_space<vmem>>, vector<1x1x8x2xbf16>
    %713 = vector.shape_cast %712 : vector<1x1x8x2xbf16> to vector<8x2xbf16>
    %cst_697 = arith.constant dense<0.000000e+00> : vector<32x2xf32>
    %714 = tpu.matmul %610, %713, %cst_697 {dimension_numbers = #tpu.dot_dimension_numbers<[1], [0], [0], [1], [0, 0, 1, 1], [], []>} : vector<32x8xbf16>, vector<8x2xbf16>, vector<32x2xf32> -> vector<32x2xf32>
    %715 = arith.addf %711, %714 : vector<32x2xf32>
    %c0_698 = arith.constant 0 : index
    %c3_699 = arith.constant 3 : index
    %c0_700 = arith.constant 0 : index
    %c0_701 = arith.constant 0 : index
    %716 = vector.load %arg5[%c0_698, %c3_699, %c0_700, %c0_701] : memref<9x4x8x2xbf16, #tpu.memory_space<vmem>>, vector<1x1x8x2xbf16>
    %717 = vector.shape_cast %716 : vector<1x1x8x2xbf16> to vector<8x2xbf16>
    %cst_702 = arith.constant dense<0.000000e+00> : vector<32x2xf32>
    %718 = tpu.matmul %578, %717, %cst_702 {dimension_numbers = #tpu.dot_dimension_numbers<[1], [0], [0], [1], [0, 0, 1, 1], [], []>} : vector<32x8xbf16>, vector<8x2xbf16>, vector<32x2xf32> -> vector<32x2xf32>
    %c1_703 = arith.constant 1 : index
    %c3_704 = arith.constant 3 : index
    %c0_705 = arith.constant 0 : index
    %c0_706 = arith.constant 0 : index
    %719 = vector.load %arg5[%c1_703, %c3_704, %c0_705, %c0_706] : memref<9x4x8x2xbf16, #tpu.memory_space<vmem>>, vector<1x1x8x2xbf16>
    %720 = vector.shape_cast %719 : vector<1x1x8x2xbf16> to vector<8x2xbf16>
    %cst_707 = arith.constant dense<0.000000e+00> : vector<32x2xf32>
    %721 = tpu.matmul %582, %720, %cst_707 {dimension_numbers = #tpu.dot_dimension_numbers<[1], [0], [0], [1], [0, 0, 1, 1], [], []>} : vector<32x8xbf16>, vector<8x2xbf16>, vector<32x2xf32> -> vector<32x2xf32>
    %722 = arith.addf %718, %721 : vector<32x2xf32>
    %c2_708 = arith.constant 2 : index
    %c3_709 = arith.constant 3 : index
    %c0_710 = arith.constant 0 : index
    %c0_711 = arith.constant 0 : index
    %723 = vector.load %arg5[%c2_708, %c3_709, %c0_710, %c0_711] : memref<9x4x8x2xbf16, #tpu.memory_space<vmem>>, vector<1x1x8x2xbf16>
    %724 = vector.shape_cast %723 : vector<1x1x8x2xbf16> to vector<8x2xbf16>
    %cst_712 = arith.constant dense<0.000000e+00> : vector<32x2xf32>
    %725 = tpu.matmul %586, %724, %cst_712 {dimension_numbers = #tpu.dot_dimension_numbers<[1], [0], [0], [1], [0, 0, 1, 1], [], []>} : vector<32x8xbf16>, vector<8x2xbf16>, vector<32x2xf32> -> vector<32x2xf32>
    %726 = arith.addf %722, %725 : vector<32x2xf32>
    %c3_713 = arith.constant 3 : index
    %c3_714 = arith.constant 3 : index
    %c0_715 = arith.constant 0 : index
    %c0_716 = arith.constant 0 : index
    %727 = vector.load %arg5[%c3_713, %c3_714, %c0_715, %c0_716] : memref<9x4x8x2xbf16, #tpu.memory_space<vmem>>, vector<1x1x8x2xbf16>
    %728 = vector.shape_cast %727 : vector<1x1x8x2xbf16> to vector<8x2xbf16>
    %cst_717 = arith.constant dense<0.000000e+00> : vector<32x2xf32>
    %729 = tpu.matmul %590, %728, %cst_717 {dimension_numbers = #tpu.dot_dimension_numbers<[1], [0], [0], [1], [0, 0, 1, 1], [], []>} : vector<32x8xbf16>, vector<8x2xbf16>, vector<32x2xf32> -> vector<32x2xf32>
    %730 = arith.addf %726, %729 : vector<32x2xf32>
    %c4_718 = arith.constant 4 : index
    %c3_719 = arith.constant 3 : index
    %c0_720 = arith.constant 0 : index
    %c0_721 = arith.constant 0 : index
    %731 = vector.load %arg5[%c4_718, %c3_719, %c0_720, %c0_721] : memref<9x4x8x2xbf16, #tpu.memory_space<vmem>>, vector<1x1x8x2xbf16>
    %732 = vector.shape_cast %731 : vector<1x1x8x2xbf16> to vector<8x2xbf16>
    %cst_722 = arith.constant dense<0.000000e+00> : vector<32x2xf32>
    %733 = tpu.matmul %594, %732, %cst_722 {dimension_numbers = #tpu.dot_dimension_numbers<[1], [0], [0], [1], [0, 0, 1, 1], [], []>} : vector<32x8xbf16>, vector<8x2xbf16>, vector<32x2xf32> -> vector<32x2xf32>
    %734 = arith.addf %730, %733 : vector<32x2xf32>
    %c5_723 = arith.constant 5 : index
    %c3_724 = arith.constant 3 : index
    %c0_725 = arith.constant 0 : index
    %c0_726 = arith.constant 0 : index
    %735 = vector.load %arg5[%c5_723, %c3_724, %c0_725, %c0_726] : memref<9x4x8x2xbf16, #tpu.memory_space<vmem>>, vector<1x1x8x2xbf16>
    %736 = vector.shape_cast %735 : vector<1x1x8x2xbf16> to vector<8x2xbf16>
    %cst_727 = arith.constant dense<0.000000e+00> : vector<32x2xf32>
    %737 = tpu.matmul %598, %736, %cst_727 {dimension_numbers = #tpu.dot_dimension_numbers<[1], [0], [0], [1], [0, 0, 1, 1], [], []>} : vector<32x8xbf16>, vector<8x2xbf16>, vector<32x2xf32> -> vector<32x2xf32>
    %738 = arith.addf %734, %737 : vector<32x2xf32>
    %c6_728 = arith.constant 6 : index
    %c3_729 = arith.constant 3 : index
    %c0_730 = arith.constant 0 : index
    %c0_731 = arith.constant 0 : index
    %739 = vector.load %arg5[%c6_728, %c3_729, %c0_730, %c0_731] : memref<9x4x8x2xbf16, #tpu.memory_space<vmem>>, vector<1x1x8x2xbf16>
    %740 = vector.shape_cast %739 : vector<1x1x8x2xbf16> to vector<8x2xbf16>
    %cst_732 = arith.constant dense<0.000000e+00> : vector<32x2xf32>
    %741 = tpu.matmul %602, %740, %cst_732 {dimension_numbers = #tpu.dot_dimension_numbers<[1], [0], [0], [1], [0, 0, 1, 1], [], []>} : vector<32x8xbf16>, vector<8x2xbf16>, vector<32x2xf32> -> vector<32x2xf32>
    %742 = arith.addf %738, %741 : vector<32x2xf32>
    %c7_733 = arith.constant 7 : index
    %c3_734 = arith.constant 3 : index
    %c0_735 = arith.constant 0 : index
    %c0_736 = arith.constant 0 : index
    %743 = vector.load %arg5[%c7_733, %c3_734, %c0_735, %c0_736] : memref<9x4x8x2xbf16, #tpu.memory_space<vmem>>, vector<1x1x8x2xbf16>
    %744 = vector.shape_cast %743 : vector<1x1x8x2xbf16> to vector<8x2xbf16>
    %cst_737 = arith.constant dense<0.000000e+00> : vector<32x2xf32>
    %745 = tpu.matmul %606, %744, %cst_737 {dimension_numbers = #tpu.dot_dimension_numbers<[1], [0], [0], [1], [0, 0, 1, 1], [], []>} : vector<32x8xbf16>, vector<8x2xbf16>, vector<32x2xf32> -> vector<32x2xf32>
    %746 = arith.addf %742, %745 : vector<32x2xf32>
    %c8_738 = arith.constant 8 : index
    %c3_739 = arith.constant 3 : index
    %c0_740 = arith.constant 0 : index
    %c0_741 = arith.constant 0 : index
    %747 = vector.load %arg5[%c8_738, %c3_739, %c0_740, %c0_741] : memref<9x4x8x2xbf16, #tpu.memory_space<vmem>>, vector<1x1x8x2xbf16>
    %748 = vector.shape_cast %747 : vector<1x1x8x2xbf16> to vector<8x2xbf16>
    %cst_742 = arith.constant dense<0.000000e+00> : vector<32x2xf32>
    %749 = tpu.matmul %610, %748, %cst_742 {dimension_numbers = #tpu.dot_dimension_numbers<[1], [0], [0], [1], [0, 0, 1, 1], [], []>} : vector<32x8xbf16>, vector<8x2xbf16>, vector<32x2xf32> -> vector<32x2xf32>
    %750 = arith.addf %746, %749 : vector<32x2xf32>
    %c3_743 = arith.constant 3 : index
    %c0_744 = arith.constant 0 : index
    %c0_745 = arith.constant 0 : index
    %c0_746 = arith.constant 0 : index
    %751 = vector.load %arg6[%c3_743, %c0_744, %c0_745, %c0_746] : memref<4x2x32x1xf32, #tpu.memory_space<vmem>>, vector<1x1x32x1xf32>
    %752 = vector.shape_cast %751 : vector<1x1x32x1xf32> to vector<32x1xf32>
    %c3_747 = arith.constant 3 : index
    %c1_748 = arith.constant 1 : index
    %c0_749 = arith.constant 0 : index
    %c0_750 = arith.constant 0 : index
    %753 = vector.load %arg6[%c3_747, %c1_748, %c0_749, %c0_750] : memref<4x2x32x1xf32, #tpu.memory_space<vmem>>, vector<1x1x32x1xf32>
    %754 = vector.shape_cast %753 : vector<1x1x32x1xf32> to vector<32x1xf32>
    %755 = arith.addf %645, %680 : vector<32x2xf32>
    %756 = arith.addf %715, %750 : vector<32x2xf32>
    %757 = arith.addf %755, %756 : vector<32x2xf32>
    %cst_751 = arith.constant dense<0.000000e+00> : vector<32xf32>
    %758 = vector.multi_reduction <add>, %757, %cst_751 [1] : vector<32x2xf32> to vector<32xf32>
    %759 = vector.shape_cast %758 : vector<32xf32> to vector<32x1xf32>
    %cst_752 = arith.constant 8.000000e+00 : f32
    %760 = vector.broadcast %cst_752 : f32 to vector<32x1xf32>
    %761 = arith.divf %759, %760 : vector<32x1xf32>
    %762 = vector.broadcast %761 : vector<32x1xf32> to vector<32x2xf32>
    %763 = arith.subf %645, %762 : vector<32x2xf32>
    %764 = arith.mulf %763, %763 : vector<32x2xf32>
    %cst_753 = arith.constant dense<0.000000e+00> : vector<32xf32>
    %765 = vector.multi_reduction <add>, %764, %cst_753 [1] : vector<32x2xf32> to vector<32xf32>
    %766 = vector.shape_cast %765 : vector<32xf32> to vector<32x1xf32>
    %767 = vector.broadcast %761 : vector<32x1xf32> to vector<32x2xf32>
    %768 = arith.subf %680, %767 : vector<32x2xf32>
    %769 = arith.mulf %768, %768 : vector<32x2xf32>
    %cst_754 = arith.constant dense<0.000000e+00> : vector<32xf32>
    %770 = vector.multi_reduction <add>, %769, %cst_754 [1] : vector<32x2xf32> to vector<32xf32>
    %771 = vector.shape_cast %770 : vector<32xf32> to vector<32x1xf32>
    %772 = arith.addf %766, %771 : vector<32x1xf32>
    %773 = vector.broadcast %761 : vector<32x1xf32> to vector<32x2xf32>
    %774 = arith.subf %715, %773 : vector<32x2xf32>
    %775 = arith.mulf %774, %774 : vector<32x2xf32>
    %cst_755 = arith.constant dense<0.000000e+00> : vector<32xf32>
    %776 = vector.multi_reduction <add>, %775, %cst_755 [1] : vector<32x2xf32> to vector<32xf32>
    %777 = vector.shape_cast %776 : vector<32xf32> to vector<32x1xf32>
    %778 = arith.addf %772, %777 : vector<32x1xf32>
    %779 = vector.broadcast %761 : vector<32x1xf32> to vector<32x2xf32>
    %780 = arith.subf %750, %779 : vector<32x2xf32>
    %781 = arith.mulf %780, %780 : vector<32x2xf32>
    %cst_756 = arith.constant dense<0.000000e+00> : vector<32xf32>
    %782 = vector.multi_reduction <add>, %781, %cst_756 [1] : vector<32x2xf32> to vector<32xf32>
    %783 = vector.shape_cast %782 : vector<32xf32> to vector<32x1xf32>
    %784 = arith.addf %778, %783 : vector<32x1xf32>
    %cst_757 = arith.constant 8.000000e+00 : f32
    %785 = vector.broadcast %cst_757 : f32 to vector<32x1xf32>
    %786 = arith.divf %784, %785 : vector<32x1xf32>
    %cst_758 = arith.constant 9.99999974E-6 : f32
    %787 = vector.broadcast %cst_758 : f32 to vector<32x1xf32>
    %788 = arith.addf %786, %787 : vector<32x1xf32>
    %789 = math.rsqrt %788 : vector<32x1xf32>
    %790 = arith.mulf %752, %789 : vector<32x1xf32>
    %791 = arith.mulf %761, %790 : vector<32x1xf32>
    %792 = arith.subf %754, %791 : vector<32x1xf32>
    %793 = vector.broadcast %790 : vector<32x1xf32> to vector<32x2xf32>
    %794 = arith.mulf %645, %793 : vector<32x2xf32>
    %795 = vector.broadcast %792 : vector<32x1xf32> to vector<32x2xf32>
    %796 = arith.addf %794, %795 : vector<32x2xf32>
    %cst_759 = arith.constant 0.000000e+00 : f32
    %797 = vector.broadcast %cst_759 : f32 to vector<32x2xf32>
    %798 = arith.maximumf %796, %797 : vector<32x2xf32>
    %799 = vector.broadcast %790 : vector<32x1xf32> to vector<32x2xf32>
    %800 = arith.mulf %680, %799 : vector<32x2xf32>
    %801 = vector.broadcast %792 : vector<32x1xf32> to vector<32x2xf32>
    %802 = arith.addf %800, %801 : vector<32x2xf32>
    %cst_760 = arith.constant 0.000000e+00 : f32
    %803 = vector.broadcast %cst_760 : f32 to vector<32x2xf32>
    %804 = arith.maximumf %802, %803 : vector<32x2xf32>
    %805 = vector.broadcast %790 : vector<32x1xf32> to vector<32x2xf32>
    %806 = arith.mulf %715, %805 : vector<32x2xf32>
    %807 = vector.broadcast %792 : vector<32x1xf32> to vector<32x2xf32>
    %808 = arith.addf %806, %807 : vector<32x2xf32>
    %cst_761 = arith.constant 0.000000e+00 : f32
    %809 = vector.broadcast %cst_761 : f32 to vector<32x2xf32>
    %810 = arith.maximumf %808, %809 : vector<32x2xf32>
    %811 = vector.broadcast %790 : vector<32x1xf32> to vector<32x2xf32>
    %812 = arith.mulf %750, %811 : vector<32x2xf32>
    %813 = vector.broadcast %792 : vector<32x1xf32> to vector<32x2xf32>
    %814 = arith.addf %812, %813 : vector<32x2xf32>
    %cst_762 = arith.constant 0.000000e+00 : f32
    %815 = vector.broadcast %cst_762 : f32 to vector<32x2xf32>
    %816 = arith.maximumf %814, %815 : vector<32x2xf32>
    %817 = arith.maximumf %798, %804 : vector<32x2xf32>
    %818 = arith.maximumf %810, %816 : vector<32x2xf32>
    %819 = arith.maximumf %817, %818 : vector<32x2xf32>
    %c0_763 = arith.constant 0 : index
    %c0_764 = arith.constant 0 : index
    %820 = vector.load %arg7[%c0_763, %c0_764] : memref<32x2xf32, #tpu.memory_space<vmem>>, vector<32x2xf32>
    tpu.vector_store %arg7[%c0_763, %c0_764], %819 {strides = array<i32>} : memref<32x2xf32, #tpu.memory_space<vmem>>, vector<32x2xf32>,
    return
  }
}

</mosaic_0001>

<bundles_post_ra>
// kernel: conv4_forward.1
= control target key start
LH: loop header
LB: loop body
LE: loop exit
PB: predicated region body
PF: predicated region fallthrough
CT: control target
= control target key end

     0   :  { %vm57_vm0 = vcmask 261120   ;;  %vm8877_vm1 = vcmask 64512   ;;  %vm9770_vm2 = vcmask 1043456   ;;  %vm11893_vm3 = vcmask 15360   ;;  %s19411_s0 = inlined_call_operand.vmem [shape: bf16[4,32,128], index: 0, kind: input, shape index: {}]   ;;  %s19412_s1 = inlined_call_operand.vmem [shape: bf16[32,32], index: 1, kind: input, shape index: {}]   ;;  %s19413_s6 = inlined_call_operand.vmem [shape: f32[4,2,32,1], index: 6, kind: input, shape index: {}]   ;;  %s19414_s2 = inlined_call_operand.vmem [shape: bf16[3,9,32,32], index: 2, kind: input, shape index: {}]   ;;  %s19415_s3 = inlined_call_operand.vmem [shape: bf16[9,4,128,32], index: 3, kind: input, shape index: {}]   ;;  %s19416_s4 = inlined_call_operand.vmem [shape: bf16[9,4,32,8], index: 4, kind: input, shape index: {}]   ;;  %s19417_s5 = inlined_call_operand.vmem [shape: bf16[9,4,8,2], index: 5, kind: input, shape index: {}]   ;;  %s19418_s7 = inlined_call_operand.vmem [shape: f32[32,2], index: 7, kind: output, shape index: {}]  }
   0x1   :  { %v15891_v0 = vld [vmem:[%s19411_s0 + $0x8] sm:$0xff]   ;;  %v15892_v1 = vld [vmem:[%s19411_s0 + $0x18] sm:$0xff]   ;;  %v15893_v2 = vld [vmem:[%s19411_s0] sm:$0xff]  }
   0x2   :  { %14380 = vmatprep.subr.bf16.mxu0 %v15891_v0  ;;  %14388 = vmatprep.subr.bf16.mxu1 %v15892_v1  ;;  %v15894_v3 = vld [vmem:[%s19411_s0 + $0x10] sm:$0xff]   ;;  %v15895_v4 = vld [vmem:[%s19412_s1] sm:$0xff]   ;;  %v15896_v5 = vld [vmem:[%s19412_s1 + $0x8] sm:$0xff]  }
   0x3   :  { %14381 = vmatpush3.bf16.msra.mxu0 %v15891_v0  ;;  %14389 = vmatpush3.bf16.msra.mxu1 %v15892_v1  ;;  %v15897_v6 = vld [vmem:[%s19411_s0 + $0x28] sm:$0xff]   ;;  %v15898_v7 = vld [vmem:[%s19411_s0 + $0x38] sm:$0xff]   ;;  %v15899_v8 = vld [vmem:[%s19411_s0 + $0x20] sm:$0xff]  }
   0x4   :  { %14382 = vmatprep.subr.bf16.mxu0 %v15893_v2  ;;  %14390 = vmatprep.subr.bf16.mxu1 %v15894_v3  ;;  %v15900_v9 = vld [vmem:[%s19411_s0 + $0x30] sm:$0xff]  }
   0x5   :  { %14384 = vmatprep.mubr.msk.bf16.mxu0 %vm57_vm0, %v15895_v4  ;;  %14392 = vmatprep.mubr.msk.bf16.mxu1 %vm57_vm0, %v15895_v4 }
   0x7   :  { %14383 = vmatpush3.bf16.msra.mxu0 %v15893_v2  ;;  %14391 = vmatpush3.bf16.msra.mxu1 %v15894_v3 }
   0x8   :  { %14396 = vmatprep.subr.bf16.mxu0 %v15897_v6  ;;  %14404 = vmatprep.subr.bf16.mxu1 %v15898_v7 }
   0xa   :  { %14385 = vmatmul.mubr.msk.bf16.vlgmr.msra.gmra.mxu0 %vm57_vm0, %v15896_v5  ;;  %14393 = vmatmul.mubr.msk.bf16.vlgmr.msra.gmra.mxu1 %vm57_vm0, %v15896_v5 }
   0xb   :  { %14397 = vmatpush3.bf16.msra.mxu0 %v15897_v6  ;;  %14405 = vmatpush3.bf16.msra.mxu1 %v15898_v7 }
   0xc   :  { %14398 = vmatprep.subr.bf16.mxu0 %v15899_v8  ;;  %14406 = vmatprep.subr.bf16.mxu1 %v15900_v9 }
   0xd   :  { %14400 = vmatprep.mubr.msk.bf16.mxu0 %vm57_vm0, %v15895_v4  ;;  %14408 = vmatprep.mubr.msk.bf16.mxu1 %vm57_vm0, %v15895_v4 }
   0xf   :  { %14399 = vmatpush3.bf16.msra.mxu0 %v15899_v8  ;;  %14407 = vmatpush3.bf16.msra.mxu1 %v15900_v9 }
  0x12   :  { %14401 = vmatmul.mubr.msk.bf16.vlgmr.msra.gmra.mxu0 %vm57_vm0, %v15896_v5  ;;  %14409 = vmatmul.mubr.msk.bf16.vlgmr.msra.gmra.mxu1 %vm57_vm0, %v15896_v5 }
  0xca   :  { %v16426_v10 = vpop.f32.mrf.mxu0  ;;  %v16428_v11 = vpop.f32.mrf.mxu1 }
  0xcb   :  { %v322_v21 = vadd.f32 %v16428_v11, %v16426_v10 }
  0xcc   :  { %v16430_v12 = vpop.f32.mrf.mxu0  ;;  %v16432_v13 = vpop.f32.mrf.mxu1 }
  0xcd   :  { %v320_v26 = vadd.f32 %v16432_v13, %v16430_v12 }
  0xce   :  { %v16434_v14 = vpop.f32.mrf.mxu0  ;;  %v16436_v15 = vpop.f32.mrf.mxu1 }
  0xcf   :  { %v323_v31 = vadd.f32 %v16436_v15, %v16434_v14 }
  0xd0   :  { %v16438_v16 = vpop.f32.mrf.mxu0  ;;  %v16440_v17 = vpop.f32.mrf.mxu1 }
  0xd1   :  { %v321_v35 = vadd.f32 %v16440_v17, %v16438_v16 }
  0xd2   :  { %v16442_v18 = vpop.f32.mrf.mxu0  ;;  %v16444_v19 = vpop.f32.mrf.mxu1 }
  0xd3   :  { %v326_v22 = vadd.f32 %v16444_v19, %v16442_v18 }
  0xd4   :  { %v16446_v20 = vpop.f32.mrf.mxu0  ;;  %v16452_v23 = vpop.f32.mrf.mxu1 }
  0xd5   :  { %v330_v25 = vadd.f32 %v326_v22, %v322_v21  ;;  %v324_v27 = vadd.f32 %v16452_v23, %v16446_v20 }
  0xd6   :  { %v16454_v24 = vpop.f32.mrf.mxu0  ;;  %v16460_v28 = vpop.f32.mrf.mxu1 }
  0xd7   :  { %336 = vadd.xlane.f32.xlu0 %v330_v25  ;;  %v328_v30 = vadd.f32 %v324_v27, %v320_v26  ;;  %v327_v32 = vadd.f32 %v16460_v28, %v16454_v24  ;;  %v16347_v27 = vmov 0  }
  0xd8   :  { %v16462_v29 = vpop.f32.mrf.mxu0  ;;  %v16468_v33 = vpop.f32.mrf.mxu1  ;;  %15889 = vset.pattern.permute.xlu0 %v16347_v27  ;;  %15890 = vset.pattern.permute.xlu1 %v16347_v27  ;;  %v314_v27 = vld [vmem:[%s19413_s6 + $0x18] sm:$0xff] }
  0xd9   :  { %332 = vadd.xlane.f32.xlu1 %v328_v30  ;;  %v331_v34 = vadd.f32 %v327_v32, %v323_v31  ;;  %v325_v36 = vadd.f32 %v16468_v33, %v16462_v29 }
  0xdb   :  { %338 = vadd.xlane.f32.xlu0 %v331_v34  ;;  %v329_v37 = vadd.f32 %v325_v36, %v321_v35 }
  0xdd   :  { %334 = vadd.xlane.f32.xlu1 %v329_v37 }
 0x160   :  { %v337_v38 = vpop.xlane.xlu0 %336 }
 0x161   :  { %v16474_v39 = vmul.f32 0.001953125, %v337_v38 }
 0x162   :  { %v333_v46 = vpop.xlane.xlu1 %332 }
 0x163   :  { %v347_v40 = vsub.f32 %v16426_v10, %v16474_v39  ;;  %v363_v44 = vsub.f32 %v16428_v11, %v16474_v39  ;;  %v383_v49 = vsub.f32 %v16442_v18, %v16474_v39  ;;  %v403_v51 = vsub.f32 %v16444_v19, %v16474_v39 }
 0x164   :  { %v339_v41 = vpop.xlane.xlu0 %338  ;;  %v16490_v52 = vmul.f32 0.001953125, %v333_v46 }
 0x165   :  { %v16478_v42 = vmul.f32 0.001953125, %v339_v41  ;;  %v351_v43 = vmul.f32 %v347_v40, %v347_v40  ;;  %v367_v47 = vmul.f32 %v363_v44, %v363_v44  ;;  %v387_v53 = vmul.f32 %v383_v49, %v383_v49 }
 0x166   :  { %v335_v56 = vpop.xlane.xlu1 %334  ;;  %v407_v57 = vmul.f32 %v403_v51, %v403_v51  ;;  %v345_v60 = vsub.f32 %v16430_v12, %v16490_v52  ;;  %v361_v0 = vsub.f32 %v16432_v13, %v16490_v52  ;;  %v381_v4 = vsub.f32 %v16446_v20, %v16490_v52 }
 0x167   :  { %357 = vadd.xlane.f32.xlu0 %v351_v43  ;;  %v348_v45 = vsub.f32 %v16434_v14, %v16478_v42  ;;  %v364_v50 = vsub.f32 %v16436_v15, %v16478_v42  ;;  %v384_v55 = vsub.f32 %v16454_v24, %v16478_v42  ;;  %v16494_v58 = vmul.f32 0.001953125, %v335_v56 }
 0x168   :  { %v404_v61 = vsub.f32 %v16460_v28, %v16478_v42  ;;  %v349_v62 = vmul.f32 %v345_v60, %v345_v60  ;;  %v365_v2 = vmul.f32 %v361_v0, %v361_v0  ;;  %v385_v6 = vmul.f32 %v381_v4, %v381_v4 }
 0x169   :  { %v352_v48 = vmul.f32 %v348_v45, %v348_v45  ;;  %v368_v54 = vmul.f32 %v364_v50, %v364_v50  ;;  %v388_v59 = vmul.f32 %v384_v55, %v384_v55  ;;  %v346_v1 = vsub.f32 %v16438_v16, %v16494_v58 }
 0x16a   :  { %v408_v63 = vmul.f32 %v404_v61, %v404_v61  ;;  %v362_v5 = vsub.f32 %v16440_v17, %v16494_v58  ;;  %v401_v8 = vsub.f32 %v16452_v23, %v16490_v52  ;;  %v382_v9 = vsub.f32 %v16462_v29, %v16494_v58 }
 0x16b   :  { %373 = vadd.xlane.f32.xlu0 %v367_v47  ;;  %359 = vadd.xlane.f32.xlu1 %v352_v48  ;;  %v350_v3 = vmul.f32 %v346_v1, %v346_v1  ;;  %v402_v25 = vsub.f32 %v16468_v33, %v16494_v58 }
 0x16c   :  { %v366_v7 = vmul.f32 %v362_v5, %v362_v5  ;;  %v405_v21 = vmul.f32 %v401_v8, %v401_v8  ;;  %v386_v22 = vmul.f32 %v382_v9, %v382_v9 }
 0x16d   :  { %v406_v26 = vmul.f32 %v402_v25, %v402_v25 }
 0x16f   :  { %393 = vadd.xlane.f32.xlu0 %v387_v53  ;;  %375 = vadd.xlane.f32.xlu1 %v368_v54 }
 0x173   :  { %413 = vadd.xlane.f32.xlu0 %v407_v57  ;;  %395 = vadd.xlane.f32.xlu1 %v388_v59 }
 0x177   :  { %353 = vadd.xlane.f32.xlu0 %v349_v62  ;;  %415 = vadd.xlane.f32.xlu1 %v408_v63  ;;  %v313_v63 = vld [vmem:[%s19413_s6 + $0x10] sm:$0xff] }
 0x17b   :  { %369 = vadd.xlane.f32.xlu0 %v365_v2  ;;  %355 = vadd.xlane.f32.xlu1 %v350_v3 }
 0x17f   :  { %389 = vadd.xlane.f32.xlu0 %v385_v6  ;;  %371 = vadd.xlane.f32.xlu1 %v366_v7 }
 0x183   :  { %409 = vadd.xlane.f32.xlu0 %v405_v21  ;;  %391 = vadd.xlane.f32.xlu1 %v386_v22  ;;  %v311_v21 = vld [vmem:[%s19413_s6] sm:$0xff] }
 0x187   :  { %411 = vadd.xlane.f32.xlu1 %v406_v26 }
 0x1f0   :  { %v358_v30 = vpop.xlane.xlu0 %357 }
 0x1f4   :  { %v374_v31 = vpop.xlane.xlu0 %373  ;;  %v360_v32 = vpop.xlane.xlu1 %359 }
 0x1f5   :  { %v379_v36 = vadd.f32 %v374_v31, %v358_v30 }
 0x1f8   :  { %v394_v34 = vpop.xlane.xlu0 %393  ;;  %v376_v35 = vpop.xlane.xlu1 %375 }
 0x1f9   :  { %v399_v37 = vadd.f32 %v394_v34, %v379_v36  ;;  %v380_v49 = vadd.f32 %v376_v35, %v360_v32  ;;  %v12167_v32 = vld [vmem:[%s19413_s6 + $0x30] sm:$0xff]  ;;  %v312_v36 = vld [vmem:[%s19413_s6 + $0x8] sm:$0xff] }
 0x1fc   :  { %v414_v38 = vpop.xlane.xlu0 %413  ;;  %v396_v40 = vpop.xlane.xlu1 %395 }
 0x1fd   :  { %v419_v41 = vadd.f32 %v414_v38, %v399_v37  ;;  %v400_v50 = vadd.f32 %v396_v40, %v380_v49  ;;  %v12165_v40 = vld [vmem:[%s19413_s6 + $0x20] sm:$0xff] }
 0x1ff   :  { %v423_v43 = vmul.f32 0.001953125, %v419_v41 }
 0x200   :  { %v354_v44 = vpop.xlane.xlu0 %353  ;;  %v416_v45 = vpop.xlane.xlu1 %415 }
 0x201   :  { %v427_v46 = vadd.f32 1e-05, %v423_v43  ;;  %v420_v54 = vadd.f32 %v416_v45, %v400_v50  ;;  %v12168_v43 = vld [vmem:[%s19413_s6 + $0x38] sm:$0xff] }
 0x203   :  { %16315 = vrsqrt.f32 %v427_v46  ;;  %v424_v60 = vmul.f32 0.001953125, %v420_v54 }
 0x204   :  { %v370_v47 = vpop.xlane.xlu0 %369  ;;  %v356_v48 = vpop.xlane.xlu1 %355 }
 0x205   :  { %v377_v55 = vadd.f32 %v370_v47, %v354_v44  ;;  %v428_v4 = vadd.f32 1e-05, %v424_v60  ;;  %v15901_v47 = vld [vmem:[%s19414_s2] sm:$0xff]  }
 0x206   :  { %14416 = vmatprep.mubr.msk.bf16.mxu0 %vm57_vm0, %v15901_v47 }
 0x208   :  { %v390_v51 = vpop.xlane.xlu0 %389  ;;  %v372_v53 = vpop.xlane.xlu1 %371 }
 0x209   :  { %v397_v56 = vadd.f32 %v390_v51, %v377_v55  ;;  %v378_v61 = vadd.f32 %v372_v53, %v356_v48 }
 0x20c   :  { %v410_v57 = vpop.xlane.xlu0 %409  ;;  %v392_v59 = vpop.xlane.xlu1 %391 }
 0x20d   :  { %v417_v62 = vadd.f32 %v410_v57, %v397_v56  ;;  %v398_v1 = vadd.f32 %v392_v59, %v378_v61 }
 0x20f   :  { %v421_v0 = vmul.f32 0.001953125, %v417_v62 }
 0x210   :  { %v16316_v2 = vpop.eup %16315  ;;  %v412_v3 = vpop.xlane.xlu1 %411 }
 0x211   :  { %v425_v5 = vadd.f32 1e-05, %v421_v0  ;;  %v418_v6 = vadd.f32 %v412_v3, %v398_v1  ;;  %v435_v7 = vmul.f32 %v16316_v2, %v313_v63 }
 0x213   :  { %16317 = vrsqrt.f32 %v425_v5  ;;  %457 = vperm.xlu0 %15889, %v435_v7   ;;  %v422_v8 = vmul.f32 0.001953125, %v418_v6  ;;  %v439_v31 = vmul.f32 %v435_v7, %v16474_v39 }
 0x214   :  { %16319 = vrsqrt.f32 %v428_v4 }
 0x215   :  { %v426_v9 = vadd.f32 1e-05, %v422_v8  ;;  %v443_v34 = vsub.f32 %v12167_v32, %v439_v31 }
 0x217   :  { %16321 = vrsqrt.f32 %v426_v9 }
 0x220   :  { %v16318_v22 = vpop.eup %16317 }
 0x221   :  { %v433_v25 = vmul.f32 %v16318_v22, %v311_v21  ;;  %v16320_v26 = vpop.eup %16319 }
 0x222   :  { %v436_v30 = vmul.f32 %v16320_v26, %v314_v27 }
 0x223   :  { %447 = vperm.xlu1 %15890, %v433_v25   ;;  %v437_v38 = vmul.f32 %v433_v25, %v16490_v52  ;;  %v12166_v52 = vld [vmem:[%s19413_s6 + $0x28] sm:$0xff] }
 0x224   :  { %v16322_v35 = vpop.eup %16321  ;;  %v440_v41 = vmul.f32 %v436_v30, %v16478_v42  ;;  %v15902_v42 = vld [vmem:[%s19414_s2 + $0x10] sm:$0xff]  }
 0x225   :  { %v434_v37 = vmul.f32 %v16322_v35, %v312_v36  ;;  %v441_v39 = vsub.f32 %v12165_v40, %v437_v38  ;;  %14424 = vmatprep.mubr.msk.bf16.mxu1 %vm57_vm0, %v15902_v42 }
 0x226   :  { %v444_v44 = vsub.f32 %v12168_v43, %v440_v41 }
 0x227   :  { %462 = vperm.xlu1 %15890, %v436_v30   ;;  %v438_v45 = vmul.f32 %v434_v37, %v16494_v58 }
 0x229   :  { %v442_v46 = vsub.f32 %v12166_v52, %v438_v45 }
 0x22b   :  { %481 = vperm.xlu1 %15890, %v443_v34  }
 0x22f   :  { %452 = vperm.xlu1 %15890, %v434_v37  }
 0x233   :  { %471 = vperm.xlu1 %15890, %v441_v39  }
 0x237   :  { %486 = vperm.xlu1 %15890, %v444_v44  }
 0x23b   :  { %476 = vperm.xlu1 %15890, %v442_v46  }
 0x28e   :  { %v458_v48 = vpop.permute.xlu0 %457 }
 0x28f   :  { %v467_v50 = vmul.f32 %v16426_v10, %v458_v48  ;;  %v499_v51 = vmul.f32 %v16428_v11, %v458_v48  ;;  %v511_v53 = vmul.f32 %v16442_v18, %v458_v48  ;;  %v523_v54 = vmul.f32 %v16444_v19, %v458_v48 }
 0x29e   :  { %v448_v58 = vpop.permute.xlu1 %447 }
 0x29f   :  { %v465_v2 = vmul.f32 %v448_v58, %v16430_v12  ;;  %v497_v10 = vmul.f32 %v448_v58, %v16432_v13  ;;  %v509_v11 = vmul.f32 %v448_v58, %v16446_v20  ;;  %v521_v18 = vmul.f32 %v448_v58, %v16452_v23 }
 0x2a2   :  { %v463_v49 = vpop.permute.xlu1 %462 }
 0x2a3   :  { %v468_v7 = vmul.f32 %v16434_v14, %v463_v49  ;;  %v500_v8 = vmul.f32 %v16436_v15, %v463_v49  ;;  %v512_v12 = vmul.f32 %v16454_v24, %v463_v49  ;;  %v524_v13 = vmul.f32 %v16460_v28, %v463_v49 }
 0x2a6   :  { %v482_v55 = vpop.permute.xlu1 %481 }
 0x2a7   :  { %v491_v56 = vadd.f32 %v482_v55, %v467_v50  ;;  %v503_v57 = vadd.f32 %v499_v51, %v482_v55  ;;  %v515_v59 = vadd.f32 %v511_v53, %v482_v55  ;;  %v527_v60 = vadd.f32 %v523_v54, %v482_v55  ;;  %v15903_v54 = vld [vmem:[%s19414_s2 + $0x8] sm:$0xff]   ;;  %v15904_v55 = vld [vmem:[%s19414_s2 + $0x18] sm:$0xff]  }
 0x2a9   :  { %v495_v61 = vmax.f32 %v491_v56, 0.0  ;;  %v507_v62 = vmax.f32 %v503_v57, 0.0  ;;  %v519_v63 = vmax.f32 %v515_v59, 0.0  ;;  %v531_v0 = vmax.f32 %v527_v60, 0.0  ;;  %v15905_v56 = vld [vmem:[%s19414_s2 + $0x20] sm:$0xff]   ;;  %v15906_v57 = vld [vmem:[%s19414_s2 + $0x30] sm:$0xff]  }
 0x2aa   :  { %v453_v1 = vpop.permute.xlu1 %452  ;;  %v15907_v59 = vld [vmem:[%s19414_s2 + $0x28] sm:$0xff]   ;;  %v15908_v60 = vld [vmem:[%s19414_s2 + $0x38] sm:$0xff]  }
 0x2ab   :  { %v535_v26 = vmax.f32 %v495_v61, %v507_v62  ;;  %v539_v30 = vmax.f32 %v519_v63, %v531_v0  ;;  %v466_v31 = vmul.f32 %v453_v1, %v16438_v16  ;;  %v498_v14 = vmul.f32 %v453_v1, %v16440_v17  ;;  %v15909_v61 = vld [vmem:[%s19414_s2 + $0x40] sm:$0xff]   ;;  %v15910_v62 = vld [vmem:[%s19414_s2 + $0x50] sm:$0xff]   ;;  %v15911_v63 = vld [vmem:[%s19414_s2 + $0x48] sm:$0xff]  }
 0x2ac   :  { %v510_v15 = vmul.f32 %v453_v1, %v16462_v29  ;;  %v522_v37 = vmul.f32 %v453_v1, %v16468_v33  ;;  %v15912_v0 = vld [vmem:[%s19414_s2 + $0x58] sm:$0xff]   ;;  %v15913_v1 = vld [vmem:[%s19414_s2 + $0x60] sm:$0xff]  }
 0x2ad   :  { %v543_v16 = vmax.f32 %v535_v26, %v539_v30  ;;  %v15932_v26 = vld [vmem:[%s19415_s3 + $0x8] sm:$0xff]   ;;  %v15935_v30 = vld [vmem:[%s19415_s3 + $0x238] sm:$0xff]  }
 0x2ae   :  { %v472_v3 = vpop.permute.xlu1 %471 }
 0x2af   :  { %v489_v19 = vadd.f32 %v472_v3, %v465_v2  ;;  %v501_v4 = vadd.f32 %v497_v10, %v472_v3  ;;  %v513_v5 = vadd.f32 %v509_v11, %v472_v3  ;;  %v525_v6 = vadd.f32 %v521_v18, %v472_v3  ;;  %v15915_v2 = vld [vmem:[%s19414_s2 + $0x70] sm:$0xff]   ;;  %v15919_v10 = vld [vmem:[%s19415_s3 + $0x138] sm:$0xff]   ;;  %v15914_v11 = vld [vmem:[%s19414_s2 + $0x68] sm:$0xff]  }
 0x2b0   :  { %v15916_v18 = vld [vmem:[%s19414_s2 + $0x78] sm:$0xff]   ;;  %v15917_v3 = vld [vmem:[%s19414_s2 + $0x80] sm:$0xff]  }
 0x2b1   :  { %v493_v9 = vmax.f32 %v489_v19, 0.0  ;;  %v505_v21 = vmax.f32 %v501_v4, 0.0  ;;  %v517_v22 = vmax.f32 %v513_v5, 0.0  ;;  %v529_v25 = vmax.f32 %v525_v6, 0.0  ;;  %v15921_v19 = vld [vmem:[%s19415_s3 + $0x130] sm:$0xff]   ;;  %v15920_v4 = vld [vmem:[%s19415_s3 + $0x38] sm:$0xff]  }
 0x2b2   :  { %v487_v20 = vpop.permute.xlu1 %486  ;;  %v15923_v5 = vld [vmem:[%s19415_s3 + $0x128] sm:$0xff]  }
 0x2b3   :  { %v492_v23 = vadd.f32 %v487_v20, %v468_v7  ;;  %v504_v27 = vadd.f32 %v500_v8, %v487_v20  ;;  %v516_v32 = vadd.f32 %v512_v12, %v487_v20  ;;  %v528_v34 = vadd.f32 %v524_v13, %v487_v20  ;;  %v15918_v6 = vld [vmem:[%s19414_s2 + $0x88] sm:$0xff]   ;;  %v15922_v7 = vld [vmem:[%s19415_s3 + $0x30] sm:$0xff]   ;;  %v15925_v8 = vld [vmem:[%s19415_s3 + $0x120] sm:$0xff]  }
 0x2b4   :  { %v533_v17 = vmax.f32 %v493_v9, %v505_v21  ;;  %v537_v42 = vmax.f32 %v517_v22, %v529_v25  ;;  %v15924_v9 = vld [vmem:[%s19415_s3 + $0x28] sm:$0xff]   ;;  %v15927_v21 = vld [vmem:[%s19415_s3 + $0x118] sm:$0xff]   ;;  %v15926_v22 = vld [vmem:[%s19415_s3 + $0x20] sm:$0xff]  }
 0x2b5   :  { %v496_v35 = vmax.f32 %v492_v23, 0.0  ;;  %v508_v36 = vmax.f32 %v504_v27, 0.0  ;;  %v520_v24 = vmax.f32 %v516_v32, 0.0  ;;  %v532_v38 = vmax.f32 %v528_v34, 0.0  ;;  %v15929_v25 = vld [vmem:[%s19415_s3 + $0x110] sm:$0xff]   ;;  %v15928_v12 = vld [vmem:[%s19415_s3 + $0x18] sm:$0xff]  }
 0x2b6   :  { %v477_v28 = vpop.permute.xlu1 %476  ;;  %v541_v50 = vmax.f32 %v533_v17, %v537_v42  ;;  %v15930_v13 = vld [vmem:[%s19415_s3 + $0x10] sm:$0xff]   ;;  %v15931_v20 = vld [vmem:[%s19415_s3 + $0x108] sm:$0xff]   ;;  %v15933_v23 = vld [vmem:[%s19415_s3 + $0x100] sm:$0xff]  }
 0x2b7   :  { %v536_v40 = vmax.f32 %v496_v35, %v508_v36  ;;  %v490_v39 = vadd.f32 %v477_v28, %v466_v31  ;;  %v502_v41 = vadd.f32 %v498_v14, %v477_v28  ;;  %v514_v43 = vadd.f32 %v510_v15, %v477_v28  ;;  %v15934_v27 = vld [vmem:[%s19415_s3] sm:$0xff]   ;;  %v15936_v31 = vld [vmem:[%s19415_s3 + $0x338] sm:$0xff]  }
 0x2b8   :  { %v540_v44 = vmax.f32 %v520_v24, %v532_v38  ;;  %v526_v45 = vadd.f32 %v522_v37, %v477_v28 }
 0x2b9   :  { %v494_v52 = vmax.f32 %v490_v39, 0.0  ;;  %v506_v46 = vmax.f32 %v502_v41, 0.0  ;;  %v518_v47 = vmax.f32 %v514_v43, 0.0  ;;  %v15937_v41 = vld [vmem:[%s19415_s3 + $0x230] sm:$0xff]  }
 0x2ba   :  { %v544_v29 = vmax.f32 %v536_v40, %v540_v44  ;;  %v530_v58 = vmax.f32 %v526_v45, 0.0  ;;  %v15938_v43 = vld [vmem:[%s19415_s3 + $0x330] sm:$0xff]  }
 0x2bb   :  { %v534_v48 = vmax.f32 %v494_v52, %v506_v46  ;;  %v15939_v46 = vld [vmem:[%s19415_s3 + $0x228] sm:$0xff]  }
 0x2bc   :  { %v16566_v49 = vpack.c.bf16 %v544_v29, %v543_v16  ;;  %v538_v33 = vmax.f32 %v518_v47, %v530_v58  ;;  %v15940_v47 = vld [vmem:[%s19415_s3 + $0x328] sm:$0xff]  }
 0x2be   :  { %v542_v51 = vmax.f32 %v534_v48, %v538_v33  ;;  %14412 = vmatprep.subr.bf16.mxu0 %v16566_v49  ;;  %14420 = vmatprep.subr.bf16.mxu1 %v16566_v49  ;;  %v15941_v33 = vld [vmem:[%s19415_s3 + $0x220] sm:$0xff]  }
 0x2bf   :  { %14413 = vmatpush3.bf16.msra.mxu0 %v16566_v49  ;;  %14421 = vmatpush3.bf16.msra.mxu1 %v16566_v49 }
 0x2c0   :  { %v16572_v53 = vpack.c.bf16 %v542_v51, %v541_v50  ;;  %v15942_v50 = vld [vmem:[%s19415_s3 + $0x320] sm:$0xff]   ;;  %v15943_v51 = vld [vmem:[%s19415_s3 + $0x218] sm:$0xff]  }
 0x2c2   :  { %14414 = vmatprep.subr.bf16.mxu0 %v16572_v53  ;;  %14422 = vmatprep.subr.bf16.mxu1 %v16572_v53 }
 0x2c3   :  { %14415 = vmatpush3.bf16.msra.mxu0 %v16572_v53  ;;  %14423 = vmatpush3.bf16.msra.mxu1 %v16572_v53 }
 0x2c4   :  { %14428 = vmatprep.subr.bf16.mxu0 %v16566_v49  ;;  %14436 = vmatprep.subr.bf16.mxu1 %v16566_v49 }
 0x2c6   :  { %14417 = vmatmul.mubr.msk.bf16.vlgmr.msra.gmra.mxu0 %vm57_vm0, %v15903_v54  ;;  %14425 = vmatmul.mubr.msk.bf16.vlgmr.msra.gmra.mxu1 %vm57_vm0, %v15904_v55  ;;  %v15945_v54 = vld [vmem:[%s19415_s3 + $0x210] sm:$0xff]  }
 0x2c7   :  { %14429 = vmatpush3.bf16.msra.mxu0 %v16566_v49  ;;  %14437 = vmatpush3.bf16.msra.mxu1 %v16566_v49  ;;  %v15946_v55 = vld [vmem:[%s19415_s3 + $0x310] sm:$0xff]  }
 0x2c8   :  { %14430 = vmatprep.subr.bf16.mxu0 %v16572_v53  ;;  %14438 = vmatprep.subr.bf16.mxu1 %v16572_v53 }
 0x2c9   :  { %14432 = vmatprep.mubr.msk.bf16.mxu0 %vm57_vm0, %v15905_v56  ;;  %14440 = vmatprep.mubr.msk.bf16.mxu1 %vm57_vm0, %v15906_v57 }
 0x2cb   :  { %14431 = vmatpush3.bf16.msra.mxu0 %v16572_v53  ;;  %14439 = vmatpush3.bf16.msra.mxu1 %v16572_v53 }
 0x2cc   :  { %14444 = vmatprep.subr.bf16.mxu0 %v16566_v49  ;;  %14452 = vmatprep.subr.bf16.mxu1 %v16566_v49 }
 0x2ce   :  { %14433 = vmatmul.mubr.msk.bf16.vlgmr.msra.gmra.mxu0 %vm57_vm0, %v15907_v59  ;;  %14441 = vmatmul.mubr.msk.bf16.vlgmr.msra.gmra.mxu1 %vm57_vm0, %v15908_v60  ;;  %v15947_v59 = vld [vmem:[%s19415_s3 + $0x208] sm:$0xff]  }
 0x2cf   :  { %14445 = vmatpush3.bf16.msra.mxu0 %v16566_v49  ;;  %14453 = vmatpush3.bf16.msra.mxu1 %v16566_v49  ;;  %v15948_v60 = vld [vmem:[%s19415_s3 + $0x308] sm:$0xff]  }
 0x2d0   :  { %14446 = vmatprep.subr.bf16.mxu0 %v16572_v53  ;;  %14454 = vmatprep.subr.bf16.mxu1 %v16572_v53 }
 0x2d1   :  { %14448 = vmatprep.mubr.msk.bf16.mxu0 %vm57_vm0, %v15909_v61  ;;  %14456 = vmatprep.mubr.msk.bf16.mxu1 %vm57_vm0, %v15910_v62 }
 0x2d3   :  { %14447 = vmatpush3.bf16.msra.mxu0 %v16572_v53  ;;  %14455 = vmatpush3.bf16.msra.mxu1 %v16572_v53 }
 0x2d4   :  { %14460 = vmatprep.subr.bf16.mxu0 %v16566_v49  ;;  %14468 = vmatprep.subr.bf16.mxu1 %v16566_v49 }
 0x2d6   :  { %14449 = vmatmul.mubr.msk.bf16.vlgmr.msra.gmra.mxu0 %vm57_vm0, %v15911_v63  ;;  %14457 = vmatmul.mubr.msk.bf16.vlgmr.msra.gmra.mxu1 %vm57_vm0, %v15912_v0  ;;  %v15949_v63 = vld [vmem:[%s19415_s3 + $0x200] sm:$0xff]  }
 0x2d7   :  { %14461 = vmatpush3.bf16.msra.mxu0 %v16566_v49  ;;  %14469 = vmatpush3.bf16.msra.mxu1 %v16566_v49  ;;  %v15950_v0 = vld [vmem:[%s19415_s3 + $0x300] sm:$0xff]  }
 0x2d8   :  { %14462 = vmatprep.subr.bf16.mxu0 %v16572_v53  ;;  %14470 = vmatprep.subr.bf16.mxu1 %v16572_v53 }
 0x2d9   :  { %14464 = vmatprep.mubr.msk.bf16.mxu0 %vm57_vm0, %v15913_v1  ;;  %14472 = vmatprep.mubr.msk.bf16.mxu1 %vm57_vm0, %v15915_v2 }
 0x2db   :  { %14463 = vmatpush3.bf16.msra.mxu0 %v16572_v53  ;;  %14471 = vmatpush3.bf16.msra.mxu1 %v16572_v53 }
 0x2dc   :  { %14476 = vmatprep.subr.bf16.mxu0 %v16566_v49  ;;  %14484 = vmatprep.subr.bf16.mxu1 %v15919_v10 }
 0x2de   :  { %14465 = vmatmul.mubr.msk.bf16.vlgmr.msra.gmra.mxu0 %vm57_vm0, %v15914_v11  ;;  %14473 = vmatmul.mubr.msk.bf16.vlgmr.msra.gmra.mxu1 %vm57_vm0, %v15916_v18  ;;  %v15952_v11 = vld [vmem:[%s19415_s3 + $0x538] sm:$0xff]  }
 0x2df   :  { %14477 = vmatpush3.bf16.msra.mxu0 %v16566_v49  ;;  %14480 = vmatprep.mubr.msk.bf16.mxu0 %vm57_vm0, %v15917_v3 }
 0x2e0   :  { %14478 = vmatprep.subr.bf16.mxu0 %v16572_v53  ;;  %14485 = vmatpush3.bf16.msra.mxu1 %v15919_v10  ;;  %v15951_v10 = vld [vmem:[%s19415_s3 + $0x438] sm:$0xff]  }
 0x2e1   :  { %14486 = vmatprep.subr.bf16.mxu1 %v15921_v19 }
 0x2e3   :  { %14479 = vmatpush3.bf16.msra.mxu0 %v16572_v53  ;;  %v15944_v53 = vld [vmem:[%s19415_s3 + $0x318] sm:$0xff]  }
 0x2e4   :  { %14504 = vmatprep.subr.bf16.mxu0 %v15920_v4  ;;  %14487 = vmatpush3.bf16.msra.mxu1 %v15921_v19 }
 0x2e5   :  { %14488 = vmatprep.subr.bf16.mxu1 %v15923_v5 }
 0x2e6   :  { %14481 = vmatmul.mubr.msk.bf16.vlgmr.msra.gmra.mxu0 %vm57_vm0, %v15918_v6  ;;  %v15954_v6 = vld [vmem:[%s19415_s3 + $0x530] sm:$0xff]  }
 0x2e7   :  { %14505 = vmatpush3.bf16.msra.mxu0 %v15920_v4 }
 0x2e8   :  { %14506 = vmatprep.subr.bf16.mxu0 %v15922_v7  ;;  %14489 = vmatpush3.bf16.msra.mxu1 %v15923_v5  ;;  %v15953_v5 = vld [vmem:[%s19415_s3 + $0x430] sm:$0xff]  }
 0x2e9   :  { %14490 = vmatprep.subr.bf16.mxu1 %v15925_v8 }
 0x2eb   :  { %14507 = vmatpush3.bf16.msra.mxu0 %v15922_v7 }
 0x2ec   :  { %14508 = vmatprep.subr.bf16.mxu0 %v15924_v9  ;;  %14491 = vmatpush3.bf16.msra.mxu1 %v15925_v8 }
 0x2ed   :  { %14492 = vmatprep.subr.bf16.mxu1 %v15927_v21 }
 0x2ef   :  { %14509 = vmatpush3.bf16.msra.mxu0 %v15924_v9  ;;  %v15955_v9 = vld [vmem:[%s19415_s3 + $0x428] sm:$0xff]  }
 0x2f0   :  { %14510 = vmatprep.subr.bf16.mxu0 %v15926_v22  ;;  %14493 = vmatpush3.bf16.msra.mxu1 %v15927_v21  ;;  %v15956_v21 = vld [vmem:[%s19415_s3 + $0x528] sm:$0xff]  }
 0x2f1   :  { %14494 = vmatprep.subr.bf16.mxu1 %v15929_v25 }
 0x2f3   :  { %14511 = vmatpush3.bf16.msra.mxu0 %v15926_v22  ;;  %v15957_v22 = vld [vmem:[%s19415_s3 + $0x420] sm:$0xff]  }
 0x2f4   :  { %14512 = vmatprep.subr.bf16.mxu0 %v15928_v12  ;;  %14495 = vmatpush3.bf16.msra.mxu1 %v15929_v25  ;;  %v15958_v25 = vld [vmem:[%s19415_s3 + $0x520] sm:$0xff]  }
 0x2f5   :  { %14496 = vmatprep.subr.bf16.mxu1 %v15931_v20 }
 0x2f7   :  { %14513 = vmatpush3.bf16.msra.mxu0 %v15928_v12  ;;  %v15959_v12 = vld [vmem:[%s19415_s3 + $0x418] sm:$0xff]  }
 0x2f8   :  { %14514 = vmatprep.subr.bf16.mxu0 %v15930_v13  ;;  %14497 = vmatpush3.bf16.msra.mxu1 %v15931_v20  ;;  %v15961_v20 = vld [vmem:[%s19415_s3 + $0x410] sm:$0xff]  }
 0x2f9   :  { %14498 = vmatprep.subr.bf16.mxu1 %v15933_v23 }
 0x2fb   :  { %14515 = vmatpush3.bf16.msra.mxu0 %v15930_v13  ;;  %v15960_v13 = vld [vmem:[%s19415_s3 + $0x518] sm:$0xff]  }
 0x2fc   :  { %14516 = vmatprep.subr.bf16.mxu0 %v15932_v26  ;;  %14499 = vmatpush3.bf16.msra.mxu1 %v15933_v23 }
 0x2fd   :  { %14524 = vmatprep.subr.bf16.mxu1 %v15935_v30 }
 0x2ff   :  { %14517 = vmatpush3.bf16.msra.mxu0 %v15932_v26  ;;  %v15962_v26 = vld [vmem:[%s19415_s3 + $0x510] sm:$0xff]  }
 0x300   :  { %14518 = vmatprep.subr.bf16.mxu0 %v15934_v27 }
 0x303   :  { %14519 = vmatpush3.bf16.msra.mxu0 %v15934_v27 }
 0x304   :  { %14544 = vmatprep.subr.bf16.mxu0 %v15936_v31 }
 0x386   :  { %v14418_v32 = vpop.f32.mrf.mxu0  ;;  %v14426_v34 = vpop.f32.mrf.mxu1 }
 0x388   :  { %v601_v14 = vpop.f32.mrf.mxu0  ;;  %v673_v15 = vpop.f32.mrf.mxu1 }
 0x38a   :  { %v14419_v35 = vpop.f32.mrf.mxu0  ;;  %v14427_v36 = vpop.f32.mrf.mxu1 }
 0x38b   :  { %v16728_v40 = vpack.c.bf16 %v14419_v35, %v14418_v32  ;;  %v16730_v39 = vpack.c.bf16 %v14427_v36, %v14426_v34 }
 0x38c   :  { %v604_v37 = vpop.f32.mrf.mxu0  ;;  %v676_v24 = vpop.f32.mrf.mxu1 }
 0x38d   :  { %v16724_v38 = vpack.c.bf16 %v604_v37, %v601_v14  ;;  %v16726_v28 = vpack.c.bf16 %v676_v24, %v673_v15  ;;  %v15965_v14 = vld [vmem:[%s19415_s3 + $0x400] sm:$0xff]   ;;  %v15967_v37 = vld [vmem:[%s19415_s3 + $0x638] sm:$0xff]  }
 0x38e   :  { %v16738_v44 = vpop.f32.mrf.mxu0  ;;  %v16740_v45 = vpop.f32.mrf.mxu1  ;;  %v15966_v15 = vld [vmem:[%s19415_s3 + $0x500] sm:$0xff]   ;;  %v15968_v24 = vld [vmem:[%s19415_s3 + $0x738] sm:$0xff]  }
 0x38f   :  { %14500 = vmatprep.mubr.bf16.mxu1 %v16726_v28  ;;  %14520 = vmatprep.mubr.bf16.mxu0 %v16724_v38 }
 0x390   :  { %14501 = vmatmul.mubr.bf16.vlgmr.msra.gmra.mxu1 %v16730_v39  ;;  %14521 = vmatmul.mubr.bf16.vlgmr.msra.gmra.mxu0 %v16728_v40  ;;  %v745_v16 = vpop.f32.mrf.mxu0  ;;  %v817_v52 = vpop.f32.mrf.mxu1 }
 0x391   :  { %14525 = vmatpush3.bf16.msra.mxu1 %v15935_v30  ;;  %14545 = vmatpush3.bf16.msra.mxu0 %v15936_v31  ;;  %v15963_v30 = vld [vmem:[%s19415_s3 + $0x408] sm:$0xff]  }
 0x392   :  { %14526 = vmatprep.subr.bf16.mxu1 %v15937_v41  ;;  %14546 = vmatprep.subr.bf16.mxu0 %v15938_v43  ;;  %v14435_v17 = vpop.f32.mrf.mxu0  ;;  %v14443_v42 = vpop.f32.mrf.mxu1  ;;  %v15964_v31 = vld [vmem:[%s19415_s3 + $0x508] sm:$0xff]  }
 0x393   :  { %v16803_v19 = vpack.c.bf16 %v14435_v17, %v16738_v44  ;;  %v16806_v4 = vpack.c.bf16 %v14443_v42, %v16740_v45  ;;  %v15971_v17 = vld [vmem:[%s19415_s3 + $0x628] sm:$0xff]  }
 0x394   :  { %v748_v29 = vpop.f32.mrf.mxu0  ;;  %v820_v58 = vpop.f32.mrf.mxu1  ;;  %v15972_v42 = vld [vmem:[%s19415_s3 + $0x728] sm:$0xff]  }
 0x395   :  { %14527 = vmatpush3.bf16.msra.mxu1 %v15937_v41  ;;  %14547 = vmatpush3.bf16.msra.mxu0 %v15938_v43  ;;  %v16752_v48 = vpack.c.bf16 %v748_v29, %v745_v16  ;;  %v16754_v49 = vpack.c.bf16 %v820_v58, %v817_v52  ;;  %v15969_v16 = vld [vmem:[%s19415_s3 + $0x630] sm:$0xff]   ;;  %v15973_v29 = vld [vmem:[%s19415_s3 + $0x620] sm:$0xff]  }
 0x396   :  { %14528 = vmatprep.subr.bf16.mxu1 %v15939_v46  ;;  %14548 = vmatprep.subr.bf16.mxu0 %v15940_v47  ;;  %v16776_v56 = vpop.f32.mrf.mxu0  ;;  %v16778_v57 = vpop.f32.mrf.mxu1  ;;  %v15970_v52 = vld [vmem:[%s19415_s3 + $0x730] sm:$0xff]   ;;  %v15974_v58 = vld [vmem:[%s19415_s3 + $0x720] sm:$0xff]  }
 0x397   :  { %14540 = vmatprep.mubr.bf16.mxu1 %v16752_v48  ;;  %14560 = vmatprep.mubr.bf16.mxu0 %v16754_v49 }
 0x398   :  { %v889_v61 = vpop.f32.mrf.mxu0  ;;  %v961_v62 = vpop.f32.mrf.mxu1 }
 0x399   :  { %14529 = vmatpush3.bf16.msra.mxu1 %v15939_v46  ;;  %14549 = vmatpush3.bf16.msra.mxu0 %v15940_v47 }
 0x39a   :  { %14530 = vmatprep.subr.bf16.mxu1 %v15941_v33  ;;  %14550 = vmatprep.subr.bf16.mxu0 %v15942_v50  ;;  %v16792_v1 = vpop.f32.mrf.mxu0  ;;  %v16794_v2 = vpop.f32.mrf.mxu1 }
 0x39b   :  { %v16874_v44 = vpack.c.bf16 %v16792_v1, %v16776_v56  ;;  %v16878_v45 = vpack.c.bf16 %v16794_v2, %v16778_v57  ;;  %v15980_v56 = vld [vmem:[%s19415_s3 + $0x708] sm:$0xff]  }
 0x39c   :  { %v892_v18 = vpop.f32.mrf.mxu0  ;;  %v964_v3 = vpop.f32.mrf.mxu1 }
 0x39d   :  { %14531 = vmatpush3.bf16.msra.mxu1 %v15941_v33  ;;  %14551 = vmatpush3.bf16.msra.mxu0 %v15942_v50  ;;  %v16814_v7 = vpack.c.bf16 %v892_v18, %v889_v61  ;;  %v16816_v8 = vpack.c.bf16 %v964_v3, %v961_v62  ;;  %v15975_v33 = vld [vmem:[%s19415_s3 + $0x618] sm:$0xff]   ;;  %v15987_v3 = vld [vmem:[%s19415_s3 + $0x828] sm:$0xff]  }
 0x39e   :  { %14532 = vmatprep.subr.bf16.mxu1 %v15943_v51  ;;  %14552 = vmatprep.subr.bf16.mxu0 %v15944_v53  ;;  %v16846_v23 = vpop.f32.mrf.mxu0  ;;  %v16848_v27 = vpop.f32.mrf.mxu1  ;;  %v15976_v50 = vld [vmem:[%s19415_s3 + $0x718] sm:$0xff]  }
 0x39f   :  { %v15983_v62 = vld [vmem:[%s19415_s3 + $0x838] sm:$0xff]  }
 0x3a0   :  { %v1033_v32 = vpop.f32.mrf.mxu0  ;;  %v1105_v34 = vpop.f32.mrf.mxu1 }
 0x3a1   :  { %14533 = vmatpush3.bf16.msra.mxu1 %v15943_v51  ;;  %14553 = vmatpush3.bf16.msra.mxu0 %v15944_v53  ;;  %v15977_v51 = vld [vmem:[%s19415_s3 + $0x610] sm:$0xff]  }
 0x3a2   :  { %14534 = vmatprep.subr.bf16.mxu1 %v15945_v54  ;;  %14554 = vmatprep.subr.bf16.mxu0 %v15946_v55  ;;  %v16862_v35 = vpop.f32.mrf.mxu0  ;;  %v16864_v36 = vpop.f32.mrf.mxu1  ;;  %v15978_v53 = vld [vmem:[%s19415_s3 + $0x710] sm:$0xff]  }
 0x3a3   :  { %v16942_v1 = vpack.c.bf16 %v16862_v35, %v16846_v23  ;;  %v16946_v2 = vpack.c.bf16 %v16864_v36, %v16848_v27  ;;  %v15998_v23 = vld [vmem:[%s19415_s3 + $0x140] sm:$0xff]   ;;  %v15999_v27 = vld [vmem:[%s19415_s3 + $0x78] sm:$0xff]  }
 0x3a4   :  { %v1036_v41 = vpop.f32.mrf.mxu0  ;;  %v1108_v43 = vpop.f32.mrf.mxu1  ;;  %v16005_v35 = vld [vmem:[%s19415_s3 + $0x60] sm:$0xff]  }
 0x3a5   :  { %14535 = vmatpush3.bf16.msra.mxu1 %v15945_v54  ;;  %14555 = vmatpush3.bf16.msra.mxu0 %v15946_v55  ;;  %v16886_v46 = vpack.c.bf16 %v1036_v41, %v1033_v32  ;;  %v16888_v47 = vpack.c.bf16 %v1108_v43, %v1105_v34  ;;  %v15979_v55 = vld [vmem:[%s19415_s3 + $0x608] sm:$0xff]   ;;  %v16001_v32 = vld [vmem:[%s19415_s3 + $0x70] sm:$0xff]   ;;  %v16006_v36 = vld [vmem:[%s19415_s3 + $0x260] sm:$0xff]  }
 0x3a6   :  { %14536 = vmatprep.subr.bf16.mxu1 %v15947_v59  ;;  %14556 = vmatprep.subr.bf16.mxu0 %v15948_v60  ;;  %v16918_v54 = vpop.f32.mrf.mxu0  ;;  %v16002_v34 = vld [vmem:[%s19415_s3 + $0x270] sm:$0xff]  }
 0x3a7   :  { %v16009_v41 = vld [vmem:[%s19415_s3 + $0x50] sm:$0xff]  }
 0x3a8   :  { %v1177_v57 = vpop.f32.mrf.mxu0  ;;  %v16010_v43 = vld [vmem:[%s19415_s3 + $0x250] sm:$0xff]  }
 0x3a9   :  { %14537 = vmatpush3.bf16.msra.mxu1 %v15947_v59  ;;  %14557 = vmatpush3.bf16.msra.mxu0 %v15948_v60  ;;  %v15981_v59 = vld [vmem:[%s19415_s3 + $0x600] sm:$0xff]  }
 0x3aa   :  { %14538 = vmatprep.subr.bf16.mxu1 %v15949_v63  ;;  %14558 = vmatprep.subr.bf16.mxu0 %v15950_v0  ;;  %v15982_v60 = vld [vmem:[%s19415_s3 + $0x700] sm:$0xff]   ;;  %v16932_v61 = vpop.f32.mrf.mxu0 }
 0x3ad   :  { %14539 = vmatpush3.bf16.msra.mxu1 %v15949_v63  ;;  %14559 = vmatpush3.bf16.msra.mxu0 %v15950_v0  ;;  %v15984_v63 = vld [vmem:[%s19415_s3 + $0x178] sm:$0xff]   ;;  %v1180_v0 = vpop.f32.mrf.mxu0 }
 0x3ae   :  { %14564 = vmatprep.subr.bf16.mxu1 %v15951_v10  ;;  %14584 = vmatprep.subr.bf16.mxu0 %v15952_v11  ;;  %v16954_v18 = vpack.c.bf16 %v1180_v0, %v1177_v57  ;;  %v16024_v57 = vld [vmem:[%s19415_s3 + $0x458] sm:$0xff]   ;;  %v16030_v0 = vld [vmem:[%s19415_s3 + $0x440] sm:$0xff]  }
 0x3b0   :  { %14541 = vmatmul.mubr.bf16.vlgmr.msra.gmra.mxu1 %v16803_v19  ;;  %14561 = vmatmul.mubr.bf16.vlgmr.msra.gmra.mxu0 %v16806_v4 }
 0x3b1   :  { %14565 = vmatpush3.bf16.msra.mxu1 %v15951_v10  ;;  %14585 = vmatpush3.bf16.msra.mxu0 %v15952_v11  ;;  %v15985_v10 = vld [vmem:[%s19415_s3 + $0x830] sm:$0xff]  }
 0x3b2   :  { %14566 = vmatprep.subr.bf16.mxu1 %v15953_v5  ;;  %14586 = vmatprep.subr.bf16.mxu0 %v15954_v6  ;;  %v15986_v11 = vld [vmem:[%s19415_s3 + $0x170] sm:$0xff]  }
 0x3b3   :  { %14580 = vmatprep.mubr.bf16.mxu1 %v16814_v7  ;;  %14600 = vmatprep.mubr.bf16.mxu0 %v16816_v8 }
 0x3b5   :  { %14567 = vmatpush3.bf16.msra.mxu1 %v15953_v5  ;;  %14587 = vmatpush3.bf16.msra.mxu0 %v15954_v6  ;;  %v15988_v5 = vld [vmem:[%s19415_s3 + $0x168] sm:$0xff]   ;;  %v15989_v6 = vld [vmem:[%s19415_s3 + $0x820] sm:$0xff]  }
 0x3b6   :  { %14568 = vmatprep.subr.bf16.mxu1 %v15955_v9  ;;  %14588 = vmatprep.subr.bf16.mxu0 %v15956_v21 }
 0x3b9   :  { %14569 = vmatpush3.bf16.msra.mxu1 %v15955_v9  ;;  %14589 = vmatpush3.bf16.msra.mxu0 %v15956_v21  ;;  %v15990_v9 = vld [vmem:[%s19415_s3 + $0x160] sm:$0xff]   ;;  %v15991_v21 = vld [vmem:[%s19415_s3 + $0x818] sm:$0xff]  }
 0x3ba   :  { %14570 = vmatprep.subr.bf16.mxu1 %v15957_v22  ;;  %14590 = vmatprep.subr.bf16.mxu0 %v15958_v25 }
 0x3bd   :  { %14571 = vmatpush3.bf16.msra.mxu1 %v15957_v22  ;;  %14591 = vmatpush3.bf16.msra.mxu0 %v15958_v25  ;;  %v15992_v22 = vld [vmem:[%s19415_s3 + $0x158] sm:$0xff]   ;;  %v15993_v25 = vld [vmem:[%s19415_s3 + $0x810] sm:$0xff]  }
 0x3be   :  { %14572 = vmatprep.subr.bf16.mxu1 %v15959_v12  ;;  %14592 = vmatprep.subr.bf16.mxu0 %v15960_v13 }
 0x3c1   :  { %14573 = vmatpush3.bf16.msra.mxu1 %v15959_v12  ;;  %14593 = vmatpush3.bf16.msra.mxu0 %v15960_v13  ;;  %v15994_v12 = vld [vmem:[%s19415_s3 + $0x150] sm:$0xff]   ;;  %v15995_v13 = vld [vmem:[%s19415_s3 + $0x808] sm:$0xff]  }
 0x3c2   :  { %14574 = vmatprep.subr.bf16.mxu1 %v15961_v20  ;;  %14594 = vmatprep.subr.bf16.mxu0 %v15962_v26 }
 0x3c5   :  { %14575 = vmatpush3.bf16.msra.mxu1 %v15961_v20  ;;  %14595 = vmatpush3.bf16.msra.mxu0 %v15962_v26  ;;  %v15996_v20 = vld [vmem:[%s19415_s3 + $0x148] sm:$0xff]   ;;  %v15997_v26 = vld [vmem:[%s19415_s3 + $0x800] sm:$0xff]  }
 0x3c6   :  { %14576 = vmatprep.subr.bf16.mxu1 %v15963_v30  ;;  %14596 = vmatprep.subr.bf16.mxu0 %v15964_v31 }
 0x3c9   :  { %14577 = vmatpush3.bf16.msra.mxu1 %v15963_v30  ;;  %14597 = vmatpush3.bf16.msra.mxu0 %v15964_v31  ;;  %v16000_v30 = vld [vmem:[%s19415_s3 + $0x278] sm:$0xff]   ;;  %v17004_v31 = vpack.c.bf16 %v16932_v61, %v16918_v54  ;;  %v16021_v54 = vld [vmem:[%s19415_s3 + $0x360] sm:$0xff]   ;;  %v16027_v61 = vld [vmem:[%s19415_s3 + $0x348] sm:$0xff]  }
 0x3ca   :  { %14578 = vmatprep.subr.bf16.mxu1 %v15965_v14  ;;  %14598 = vmatprep.subr.bf16.mxu0 %v15966_v15 }
 0x3cd   :  { %14579 = vmatpush3.bf16.msra.mxu1 %v15965_v14  ;;  %14599 = vmatpush3.bf16.msra.mxu0 %v15966_v15  ;;  %v16003_v14 = vld [vmem:[%s19415_s3 + $0x68] sm:$0xff]  }
 0x3ce   :  { %14604 = vmatprep.subr.bf16.mxu1 %v15967_v37  ;;  %14624 = vmatprep.subr.bf16.mxu0 %v15968_v24  ;;  %v16004_v15 = vld [vmem:[%s19415_s3 + $0x268] sm:$0xff]  }
 0x3d0   :  { %14581 = vmatmul.mubr.bf16.vlgmr.msra.gmra.mxu1 %v16874_v44  ;;  %14601 = vmatmul.mubr.bf16.vlgmr.msra.gmra.mxu0 %v16878_v45 }
 0x3d1   :  { %14605 = vmatpush3.bf16.msra.mxu1 %v15967_v37  ;;  %14625 = vmatpush3.bf16.msra.mxu0 %v15968_v24  ;;  %v16007_v37 = vld [vmem:[%s19415_s3 + $0x58] sm:$0xff]  }
 0x3d2   :  { %14606 = vmatprep.subr.bf16.mxu1 %v15969_v16  ;;  %14626 = vmatprep.subr.bf16.mxu0 %v15970_v52  ;;  %v16008_v24 = vld [vmem:[%s19415_s3 + $0x258] sm:$0xff]  }
 0x3d3   :  { %14620 = vmatprep.mubr.bf16.mxu1 %v16886_v46  ;;  %14640 = vmatprep.mubr.bf16.mxu0 %v16888_v47 }
 0x3d5   :  { %14607 = vmatpush3.bf16.msra.mxu1 %v15969_v16  ;;  %14627 = vmatpush3.bf16.msra.mxu0 %v15970_v52  ;;  %v16011_v16 = vld [vmem:[%s19415_s3 + $0x48] sm:$0xff]  }
 0x3d6   :  { %14608 = vmatprep.subr.bf16.mxu1 %v15971_v17  ;;  %14628 = vmatprep.subr.bf16.mxu0 %v15972_v42  ;;  %v16012_v52 = vld [vmem:[%s19415_s3 + $0x248] sm:$0xff]  }
 0x3d9   :  { %14609 = vmatpush3.bf16.msra.mxu1 %v15971_v17  ;;  %14629 = vmatpush3.bf16.msra.mxu0 %v15972_v42  ;;  %v16013_v17 = vld [vmem:[%s19415_s3 + $0x40] sm:$0xff]  }
 0x3da   :  { %14610 = vmatprep.subr.bf16.mxu1 %v15973_v29  ;;  %14630 = vmatprep.subr.bf16.mxu0 %v15974_v58  ;;  %v16014_v42 = vld [vmem:[%s19415_s3 + $0x240] sm:$0xff]  }
 0x3dd   :  { %14611 = vmatpush3.bf16.msra.mxu1 %v15973_v29  ;;  %14631 = vmatpush3.bf16.msra.mxu0 %v15974_v58  ;;  %v16015_v29 = vld [vmem:[%s19415_s3 + $0x378] sm:$0xff]  }
 0x3de   :  { %14612 = vmatprep.subr.bf16.mxu1 %v15975_v33  ;;  %14632 = vmatprep.subr.bf16.mxu0 %v15976_v50  ;;  %v16016_v58 = vld [vmem:[%s19415_s3 + $0x478] sm:$0xff]  }
 0x3e1   :  { %14613 = vmatpush3.bf16.msra.mxu1 %v15975_v33  ;;  %14633 = vmatpush3.bf16.msra.mxu0 %v15976_v50  ;;  %v16017_v33 = vld [vmem:[%s19415_s3 + $0x370] sm:$0xff]  }
 0x3e2   :  { %14614 = vmatprep.subr.bf16.mxu1 %v15977_v51  ;;  %14634 = vmatprep.subr.bf16.mxu0 %v15978_v53  ;;  %v16018_v50 = vld [vmem:[%s19415_s3 + $0x470] sm:$0xff]  }
 0x3e5   :  { %14615 = vmatpush3.bf16.msra.mxu1 %v15977_v51  ;;  %14635 = vmatpush3.bf16.msra.mxu0 %v15978_v53  ;;  %v16019_v51 = vld [vmem:[%s19415_s3 + $0x368] sm:$0xff]  }
 0x3e6   :  { %14616 = vmatprep.subr.bf16.mxu1 %v15979_v55  ;;  %14636 = vmatprep.subr.bf16.mxu0 %v15980_v56  ;;  %v16020_v53 = vld [vmem:[%s19415_s3 + $0x468] sm:$0xff]  }
 0x3e9   :  { %14617 = vmatpush3.bf16.msra.mxu1 %v15979_v55  ;;  %14637 = vmatpush3.bf16.msra.mxu0 %v15980_v56  ;;  %v16022_v55 = vld [vmem:[%s19415_s3 + $0x460] sm:$0xff]   ;;  %v16023_v56 = vld [vmem:[%s19415_s3 + $0x358] sm:$0xff]  }
 0x3ea   :  { %14618 = vmatprep.subr.bf16.mxu1 %v15981_v59  ;;  %14638 = vmatprep.subr.bf16.mxu0 %v15982_v60 }
 0x3ed   :  { %14619 = vmatpush3.bf16.msra.mxu1 %v15981_v59  ;;  %14639 = vmatpush3.bf16.msra.mxu0 %v15982_v60  ;;  %v16025_v59 = vld [vmem:[%s19415_s3 + $0x350] sm:$0xff]  }
 0x3ee   :  { %14644 = vmatprep.subr.bf16.mxu1 %v15983_v62  ;;  %14664 = vmatprep.subr.bf16.mxu0 %v15984_v63  ;;  %v16026_v60 = vld [vmem:[%s19415_s3 + $0x450] sm:$0xff]  }
 0x3f0   :  { %14621 = vmatmul.mubr.bf16.vlgmr.msra.gmra.mxu1 %v16942_v1  ;;  %14641 = vmatmul.mubr.bf16.vlgmr.msra.gmra.mxu0 %v16946_v2 }
 0x3f1   :  { %14645 = vmatpush3.bf16.msra.mxu1 %v15983_v62  ;;  %14665 = vmatpush3.bf16.msra.mxu0 %v15984_v63  ;;  %v16028_v62 = vld [vmem:[%s19415_s3 + $0x448] sm:$0xff]   ;;  %v16029_v63 = vld [vmem:[%s19415_s3 + $0x340] sm:$0xff]  }
 0x3f2   :  { %14680 = vmatprep.mubr.bf16.mxu0 %v16726_v28  ;;  %14646 = vmatprep.subr.bf16.mxu1 %v15985_v10 }
 0x3f3   :  { %14666 = vmatprep.subr.bf16.mxu0 %v15986_v11  ;;  %14660 = vmatprep.mubr.bf16.mxu1 %v16954_v18 }
 0x3f5   :  { %14647 = vmatpush3.bf16.msra.mxu1 %v15985_v10  ;;  %14667 = vmatpush3.bf16.msra.mxu0 %v15986_v11  ;;  %v16031_v10 = vld [vmem:[%s19415_s3 + $0x578] sm:$0xff]  }
 0x3f6   :  { %14648 = vmatprep.subr.bf16.mxu1 %v15987_v3  ;;  %14668 = vmatprep.subr.bf16.mxu0 %v15988_v5  ;;  %v16032_v11 = vld [vmem:[%s19415_s3 + $0x678] sm:$0xff]  }
 0x3f9   :  { %14649 = vmatpush3.bf16.msra.mxu1 %v15987_v3  ;;  %14669 = vmatpush3.bf16.msra.mxu0 %v15988_v5  ;;  %v16033_v3 = vld [vmem:[%s19415_s3 + $0x570] sm:$0xff]  }
 0x3fa   :  { %14650 = vmatprep.subr.bf16.mxu1 %v15989_v6  ;;  %14670 = vmatprep.subr.bf16.mxu0 %v15990_v9 }
 0x3fd   :  { %14651 = vmatpush3.bf16.msra.mxu1 %v15989_v6  ;;  %14671 = vmatpush3.bf16.msra.mxu0 %v15990_v9  ;;  %v16034_v9 = vld [vmem:[%s19415_s3 + $0x670] sm:$0xff]  }
 0x3fe   :  { %14652 = vmatprep.subr.bf16.mxu1 %v15991_v21  ;;  %14672 = vmatprep.subr.bf16.mxu0 %v15992_v22 }
 0x401   :  { %14653 = vmatpush3.bf16.msra.mxu1 %v15991_v21  ;;  %14673 = vmatpush3.bf16.msra.mxu0 %v15992_v22 }
 0x402   :  { %14654 = vmatprep.subr.bf16.mxu1 %v15993_v25  ;;  %14674 = vmatprep.subr.bf16.mxu0 %v15994_v12 }
 0x405   :  { %14655 = vmatpush3.bf16.msra.mxu1 %v15993_v25  ;;  %14675 = vmatpush3.bf16.msra.mxu0 %v15994_v12  ;;  %v16035_v12 = vld [vmem:[%s19415_s3 + $0x568] sm:$0xff]  }
 0x406   :  { %14656 = vmatprep.subr.bf16.mxu1 %v15995_v13  ;;  %14676 = vmatprep.subr.bf16.mxu0 %v15996_v20 }
 0x409   :  { %14657 = vmatpush3.bf16.msra.mxu1 %v15995_v13  ;;  %14677 = vmatpush3.bf16.msra.mxu0 %v15996_v20  ;;  %v16036_v20 = vld [vmem:[%s19415_s3 + $0x668] sm:$0xff]  }
 0x40a   :  { %14658 = vmatprep.subr.bf16.mxu1 %v15997_v26  ;;  %14678 = vmatprep.subr.bf16.mxu0 %v15998_v23 }
 0x40d   :  { %14659 = vmatpush3.bf16.msra.mxu1 %v15997_v26  ;;  %14679 = vmatpush3.bf16.msra.mxu0 %v15998_v23 }
 0x40e   :  { %14684 = vmatprep.subr.bf16.mxu1 %v15999_v27  ;;  %14704 = vmatprep.subr.bf16.mxu0 %v16000_v30 }
 0x410   :  { %14661 = vmatmul.mubr.bf16.vlgmr.msra.gmra.mxu1 %v17004_v31  ;;  %14681 = vmatmul.mubr.bf16.vlgmr.msra.gmra.mxu0 %v16730_v39 }
 0x411   :  { %14685 = vmatpush3.bf16.msra.mxu1 %v15999_v27  ;;  %14700 = vmatprep.mubr.bf16.mxu1 %v16724_v38 }
 0x412   :  { %14705 = vmatpush3.bf16.msra.mxu0 %v16000_v30  ;;  %14720 = vmatprep.mubr.bf16.mxu0 %v16752_v48  ;;  %v16037_v30 = vld [vmem:[%s19415_s3 + $0x560] sm:$0xff]  }
 0x413   :  { %14686 = vmatprep.subr.bf16.mxu1 %v16001_v32  ;;  %14706 = vmatprep.subr.bf16.mxu0 %v16002_v34 }
 0x415   :  { %14687 = vmatpush3.bf16.msra.mxu1 %v16001_v32  ;;  %v16038_v32 = vld [vmem:[%s19415_s3 + $0x660] sm:$0xff]  }
 0x416   :  { %14707 = vmatpush3.bf16.msra.mxu0 %v16002_v34  ;;  %14688 = vmatprep.subr.bf16.mxu1 %v16003_v14  ;;  %v16039_v34 = vld [vmem:[%s19415_s3 + $0x558] sm:$0xff]  }
 0x417   :  { %14708 = vmatprep.subr.bf16.mxu0 %v16004_v15 }
 0x419   :  { %14689 = vmatpush3.bf16.msra.mxu1 %v16003_v14  ;;  %v16040_v14 = vld [vmem:[%s19415_s3 + $0x658] sm:$0xff]  }
 0x41a   :  { %14709 = vmatpush3.bf16.msra.mxu0 %v16004_v15  ;;  %14690 = vmatprep.subr.bf16.mxu1 %v16005_v35  ;;  %v16041_v15 = vld [vmem:[%s19415_s3 + $0x550] sm:$0xff]  }
 0x41b   :  { %14710 = vmatprep.subr.bf16.mxu0 %v16006_v36 }
 0x41d   :  { %14691 = vmatpush3.bf16.msra.mxu1 %v16005_v35  ;;  %v16042_v35 = vld [vmem:[%s19415_s3 + $0x650] sm:$0xff]  }
 0x41e   :  { %14711 = vmatpush3.bf16.msra.mxu0 %v16006_v36  ;;  %14692 = vmatprep.subr.bf16.mxu1 %v16007_v37  ;;  %v16043_v36 = vld [vmem:[%s19415_s3 + $0x548] sm:$0xff]  }
 0x41f   :  { %14712 = vmatprep.subr.bf16.mxu0 %v16008_v24 }
 0x421   :  { %14693 = vmatpush3.bf16.msra.mxu1 %v16007_v37  ;;  %v16044_v37 = vld [vmem:[%s19415_s3 + $0x648] sm:$0xff]  }
 0x422   :  { %14713 = vmatpush3.bf16.msra.mxu0 %v16008_v24  ;;  %14694 = vmatprep.subr.bf16.mxu1 %v16009_v41  ;;  %v16045_v24 = vld [vmem:[%s19415_s3 + $0x540] sm:$0xff]  }
 0x423   :  { %14714 = vmatprep.subr.bf16.mxu0 %v16010_v43 }
 0x425   :  { %14695 = vmatpush3.bf16.msra.mxu1 %v16009_v41  ;;  %v16046_v41 = vld [vmem:[%s19415_s3 + $0x640] sm:$0xff]  }
 0x426   :  { %14715 = vmatpush3.bf16.msra.mxu0 %v16010_v43  ;;  %14696 = vmatprep.subr.bf16.mxu1 %v16011_v16  ;;  %v16047_v43 = vld [vmem:[%s19415_s3 + $0x778] sm:$0xff]  }
 0x427   :  { %14716 = vmatprep.subr.bf16.mxu0 %v16012_v52 }
 0x429   :  { %14697 = vmatpush3.bf16.msra.mxu1 %v16011_v16  ;;  %v16048_v16 = vld [vmem:[%s19415_s3 + $0x878] sm:$0xff]  }
 0x42a   :  { %14717 = vmatpush3.bf16.msra.mxu0 %v16012_v52  ;;  %14698 = vmatprep.subr.bf16.mxu1 %v16013_v17 }
 0x42b   :  { %14718 = vmatprep.subr.bf16.mxu0 %v16014_v42 }
 0x42d   :  { %14699 = vmatpush3.bf16.msra.mxu1 %v16013_v17 }
 0x42e   :  { %14719 = vmatpush3.bf16.msra.mxu0 %v16014_v42  ;;  %14724 = vmatprep.subr.bf16.mxu1 %v16015_v29  ;;  %v16049_v42 = vld [vmem:[%s19415_s3 + $0x770] sm:$0xff]  }
 0x42f   :  { %14744 = vmatprep.subr.bf16.mxu0 %v16016_v58 }
 0x430   :  { %14701 = vmatmul.mubr.bf16.vlgmr.msra.gmra.mxu1 %v16728_v40 }
 0x431   :  { %14721 = vmatmul.mubr.bf16.vlgmr.msra.gmra.mxu0 %v16803_v19  ;;  %14725 = vmatpush3.bf16.msra.mxu1 %v16015_v29 }
 0x432   :  { %14740 = vmatprep.mubr.bf16.mxu1 %v16754_v49  ;;  %14745 = vmatpush3.bf16.msra.mxu0 %v16016_v58 }
 0x433   :  { %14760 = vmatprep.mubr.bf16.mxu0 %v16814_v7  ;;  %14726 = vmatprep.subr.bf16.mxu1 %v16017_v33 }
 0x434   :  { %14746 = vmatprep.subr.bf16.mxu0 %v16018_v50 }
 0x435   :  { %14727 = vmatpush3.bf16.msra.mxu1 %v16017_v33  ;;  %v16050_v33 = vld [vmem:[%s19415_s3 + $0x870] sm:$0xff]  }
 0x436   :  { %14747 = vmatpush3.bf16.msra.mxu0 %v16018_v50  ;;  %14728 = vmatprep.subr.bf16.mxu1 %v16019_v51 }
 0x437   :  { %14748 = vmatprep.subr.bf16.mxu0 %v16020_v53 }
 0x439   :  { %14729 = vmatpush3.bf16.msra.mxu1 %v16019_v51 }
 0x43a   :  { %14749 = vmatpush3.bf16.msra.mxu0 %v16020_v53  ;;  %14730 = vmatprep.subr.bf16.mxu1 %v16021_v54 }
 0x43b   :  { %14750 = vmatprep.subr.bf16.mxu0 %v16022_v55 }
 0x43d   :  { %14731 = vmatpush3.bf16.msra.mxu1 %v16021_v54  ;;  %v16051_v54 = vld [vmem:[%s19415_s3 + $0x768] sm:$0xff]  }
 0x43e   :  { %14751 = vmatpush3.bf16.msra.mxu0 %v16022_v55  ;;  %14732 = vmatprep.subr.bf16.mxu1 %v16023_v56 }
 0x43f   :  { %14752 = vmatprep.subr.bf16.mxu0 %v16024_v57 }
 0x441   :  { %14733 = vmatpush3.bf16.msra.mxu1 %v16023_v56 }
 0x442   :  { %14753 = vmatpush3.bf16.msra.mxu0 %v16024_v57  ;;  %14734 = vmatprep.subr.bf16.mxu1 %v16025_v59  ;;  %v16052_v57 = vld [vmem:[%s19415_s3 + $0x868] sm:$0xff]  }
 0x443   :  { %14754 = vmatprep.subr.bf16.mxu0 %v16026_v60 }
 0x445   :  { %14735 = vmatpush3.bf16.msra.mxu1 %v16025_v59 }
 0x446   :  { %14755 = vmatpush3.bf16.msra.mxu0 %v16026_v60  ;;  %14736 = vmatprep.subr.bf16.mxu1 %v16027_v61 }
 0x447   :  { %14756 = vmatprep.subr.bf16.mxu0 %v16028_v62 }
 0x449   :  { %14737 = vmatpush3.bf16.msra.mxu1 %v16027_v61 }
 0x44a   :  { %14757 = vmatpush3.bf16.msra.mxu0 %v16028_v62  ;;  %14738 = vmatprep.subr.bf16.mxu1 %v16029_v63 }
 0x44b   :  { %14758 = vmatprep.subr.bf16.mxu0 %v16030_v0 }
 0x44d   :  { %14739 = vmatpush3.bf16.msra.mxu1 %v16029_v63  ;;  %v16053_v63 = vld [vmem:[%s19415_s3 + $0x760] sm:$0xff]  }
 0x44e   :  { %14759 = vmatpush3.bf16.msra.mxu0 %v16030_v0  ;;  %14764 = vmatprep.subr.bf16.mxu1 %v16031_v10 }
 0x44f   :  { %14784 = vmatprep.subr.bf16.mxu0 %v16032_v11 }
 0x450   :  { %14741 = vmatmul.mubr.bf16.vlgmr.msra.gmra.mxu1 %v16806_v4  ;;  %v14502_v5 = vpop.f32.mrf.mxu1  ;;  %v14522_v6 = vpop.f32.mrf.mxu0 }
 0x451   :  { %14761 = vmatmul.mubr.bf16.vlgmr.msra.gmra.mxu0 %v16874_v44  ;;  %v1415_v21 = vadd.f32 %v14522_v6, %v14502_v5  ;;  %14765 = vmatpush3.bf16.msra.mxu1 %v16031_v10  ;;  %v16054_v10 = vld [vmem:[%s19415_s3 + $0x860] sm:$0xff]   ;;  %v16057_v5 = vld [vmem:[%s19415_s3 + $0x750] sm:$0xff]  }
 0x452   :  { %14780 = vmatprep.mubr.bf16.mxu1 %v16816_v8  ;;  %14785 = vmatpush3.bf16.msra.mxu0 %v16032_v11  ;;  %v1309_v22 = vpop.f32.mrf.mxu1  ;;  %v1406_v25 = vpop.f32.mrf.mxu0  ;;  %v16055_v11 = vld [vmem:[%s19415_s3 + $0x758] sm:$0xff]   ;;  %v16058_v6 = vld [vmem:[%s19415_s3 + $0x850] sm:$0xff]  }
 0x453   :  { %14800 = vmatprep.mubr.bf16.mxu0 %v16886_v46  ;;  %v17123_v13 = vadd.f32 %v1406_v25, %v1309_v22  ;;  %14766 = vmatprep.subr.bf16.mxu1 %v16033_v3  ;;  %v16061_v22 = vld [vmem:[%s19415_s3 + $0x740] sm:$0xff]  }
 0x454   :  { %14786 = vmatprep.subr.bf16.mxu0 %v16034_v9  ;;  %v14503_v26 = vpop.f32.mrf.mxu1  ;;  %v14523_v23 = vpop.f32.mrf.mxu0  ;;  %v16062_v25 = vld [vmem:[%s19415_s3 + $0x840] sm:$0xff]  }
 0x455   :  { %v17128_v27 = vadd.f32 %v14523_v23, %v14503_v26  ;;  %14767 = vmatpush3.bf16.msra.mxu1 %v16033_v3  ;;  %v16056_v3 = vld [vmem:[%s19415_s3 + $0x858] sm:$0xff]   ;;  %v16065_v23 = vld [vmem:[%s19415_s3 + $0x1b0] sm:$0xff]  }
 0x456   :  { %14787 = vmatpush3.bf16.msra.mxu0 %v16034_v9  ;;  %14768 = vmatprep.subr.bf16.mxu1 %v16035_v12  ;;  %v17166_v52 = vpop.f32.mrf.mxu1  ;;  %v17168_v17 = vpop.f32.mrf.mxu0  ;;  %v16059_v9 = vld [vmem:[%s19415_s3 + $0x748] sm:$0xff]  }
 0x457   :  { %14788 = vmatprep.subr.bf16.mxu0 %v16036_v20 }
 0x459   :  { %14769 = vmatpush3.bf16.msra.mxu1 %v16035_v12  ;;  %v16063_v12 = vld [vmem:[%s19415_s3 + $0x1b8] sm:$0xff]  }
 0x45a   :  { %14789 = vmatpush3.bf16.msra.mxu0 %v16036_v20  ;;  %14770 = vmatprep.subr.bf16.mxu1 %v16037_v30 }
 0x45b   :  { %14790 = vmatprep.subr.bf16.mxu0 %v16038_v32 }
 0x45d   :  { %14771 = vmatpush3.bf16.msra.mxu1 %v16037_v30 }
 0x45e   :  { %14791 = vmatpush3.bf16.msra.mxu0 %v16038_v32  ;;  %14772 = vmatprep.subr.bf16.mxu1 %v16039_v34  ;;  %v16066_v32 = vld [vmem:[%s19415_s3 + $0xb0] sm:$0xff]  }
 0x45f   :  { %14792 = vmatprep.subr.bf16.mxu0 %v16040_v14 }
 0x461   :  { %14773 = vmatpush3.bf16.msra.mxu1 %v16039_v34 }
 0x462   :  { %14793 = vmatpush3.bf16.msra.mxu0 %v16040_v14  ;;  %14774 = vmatprep.subr.bf16.mxu1 %v16041_v15 }
 0x463   :  { %14794 = vmatprep.subr.bf16.mxu0 %v16042_v35 }
 0x465   :  { %14775 = vmatpush3.bf16.msra.mxu1 %v16041_v15 }
 0x466   :  { %14795 = vmatpush3.bf16.msra.mxu0 %v16042_v35  ;;  %14776 = vmatprep.subr.bf16.mxu1 %v16043_v36  ;;  %v16067_v35 = vld [vmem:[%s19415_s3 + $0x1a8] sm:$0xff]  }
 0x467   :  { %14796 = vmatprep.subr.bf16.mxu0 %v16044_v37 }
 0x469   :  { %14777 = vmatpush3.bf16.msra.mxu1 %v16043_v36 }
 0x46a   :  { %14797 = vmatpush3.bf16.msra.mxu0 %v16044_v37  ;;  %14778 = vmatprep.subr.bf16.mxu1 %v16045_v24 }
 0x46b   :  { %14798 = vmatprep.subr.bf16.mxu0 %v16046_v41 }
 0x46d   :  { %14779 = vmatpush3.bf16.msra.mxu1 %v16045_v24  ;;  %v16068_v24 = vld [vmem:[%s19415_s3 + $0xa8] sm:$0xff]  }
 0x46e   :  { %14799 = vmatpush3.bf16.msra.mxu0 %v16046_v41  ;;  %14804 = vmatprep.subr.bf16.mxu1 %v16047_v43 }
 0x46f   :  { %14824 = vmatprep.subr.bf16.mxu0 %v16048_v16 }
 0x470   :  { %v14542_v29 = vpop.f32.mrf.mxu1  ;;  %v14562_v58 = vpop.f32.mrf.mxu0  ;;  %14781 = vmatmul.mubr.bf16.vlgmr.msra.gmra.mxu1 %v16878_v45 }
 0x471   :  { %v1537_v50 = vadd.f32 %v14542_v29, %v1415_v21  ;;  %14801 = vmatmul.mubr.bf16.vlgmr.msra.gmra.mxu0 %v16942_v1  ;;  %14805 = vmatpush3.bf16.msra.mxu1 %v16047_v43  ;;  %v16060_v21 = vld [vmem:[%s19415_s3 + $0x848] sm:$0xff]   ;;  %v16069_v29 = vld [vmem:[%s19415_s3 + $0x1a0] sm:$0xff]  }
 0x472   :  { %14820 = vmatprep.mubr.bf16.mxu1 %v16888_v47  ;;  %14825 = vmatpush3.bf16.msra.mxu0 %v16048_v16  ;;  %v1520_v51 = vpop.f32.mrf.mxu1  ;;  %v1638_v53 = vpop.f32.mrf.mxu0 }
 0x473   :  { %v1655_v55 = vadd.f32 %v14562_v58, %v1537_v50  ;;  %14840 = vmatprep.mubr.bf16.mxu0 %v16954_v18  ;;  %v1535_v56 = vadd.f32 %v1520_v51, %v17123_v13  ;;  %14806 = vmatprep.subr.bf16.mxu1 %v16049_v42  ;;  %v16064_v13 = vld [vmem:[%s19415_s3 + $0xb8] sm:$0xff]  }
 0x474   :  { %v14543_v59 = vpop.f32.mrf.mxu1  ;;  %14826 = vmatprep.subr.bf16.mxu0 %v16050_v33  ;;  %v14563_v62 = vpop.f32.mrf.mxu0  ;;  %v16071_v50 = vld [vmem:[%s19415_s3 + $0x198] sm:$0xff]  }
 0x475   :  { %v1653_v60 = vadd.f32 %v1638_v53, %v1535_v56  ;;  %v1538_v61 = vadd.f32 %v14543_v59, %v17128_v27  ;;  %14807 = vmatpush3.bf16.msra.mxu1 %v16049_v42  ;;  %v16072_v51 = vld [vmem:[%s19415_s3 + $0x98] sm:$0xff]   ;;  %v16073_v53 = vld [vmem:[%s19415_s3 + $0x190] sm:$0xff]   ;;  %v16076_v56 = vld [vmem:[%s19415_s3 + $0x88] sm:$0xff]  }
 0x476   :  { %14827 = vmatpush3.bf16.msra.mxu0 %v16050_v33  ;;  %14808 = vmatprep.subr.bf16.mxu1 %v16051_v54  ;;  %v17224_v20 = vpop.f32.mrf.mxu1  ;;  %v17226_v26 = vpop.f32.mrf.mxu0  ;;  %v16070_v33 = vld [vmem:[%s19415_s3 + $0xa0] sm:$0xff]  }
 0x477   :  { %v1656_v0 = vadd.f32 %v14563_v62, %v1538_v61  ;;  %14828 = vmatprep.subr.bf16.mxu0 %v16052_v57  ;;  %v16078_v59 = vld [vmem:[%s19415_s3 + $0x80] sm:$0xff]   ;;  %v16080_v61 = vld [vmem:[%s19415_s3 + $0x3b8] sm:$0xff]  }
 0x479   :  { %14809 = vmatpush3.bf16.msra.mxu1 %v16051_v54  ;;  %v16074_v54 = vld [vmem:[%s19415_s3 + $0x90] sm:$0xff]  }
 0x47a   :  { %14829 = vmatpush3.bf16.msra.mxu0 %v16052_v57  ;;  %14810 = vmatprep.subr.bf16.mxu1 %v16053_v63  ;;  %v16077_v57 = vld [vmem:[%s19415_s3 + $0x180] sm:$0xff]  }
 0x47b   :  { %14830 = vmatprep.subr.bf16.mxu0 %v16054_v10 }
 0x47d   :  { %14811 = vmatpush3.bf16.msra.mxu1 %v16053_v63 }
 0x47e   :  { %14831 = vmatpush3.bf16.msra.mxu0 %v16054_v10  ;;  %14812 = vmatprep.subr.bf16.mxu1 %v16055_v11 }
 0x47f   :  { %14832 = vmatprep.subr.bf16.mxu0 %v16056_v3 }
 0x481   :  { %14813 = vmatpush3.bf16.msra.mxu1 %v16055_v11 }
 0x482   :  { %14833 = vmatpush3.bf16.msra.mxu0 %v16056_v3  ;;  %14814 = vmatprep.subr.bf16.mxu1 %v16057_v5  ;;  %v16082_v3 = vld [vmem:[%s19415_s3 + $0x3b0] sm:$0xff]  }
 0x483   :  { %14834 = vmatprep.subr.bf16.mxu0 %v16058_v6 }
 0x485   :  { %14815 = vmatpush3.bf16.msra.mxu1 %v16057_v5 }
 0x486   :  { %14835 = vmatpush3.bf16.msra.mxu0 %v16058_v6  ;;  %14816 = vmatprep.subr.bf16.mxu1 %v16059_v9 }
 0x487   :  { %14836 = vmatprep.subr.bf16.mxu0 %v16060_v21 }
 0x489   :  { %14817 = vmatpush3.bf16.msra.mxu1 %v16059_v9 }
 0x48a   :  { %14837 = vmatpush3.bf16.msra.mxu0 %v16060_v21  ;;  %14818 = vmatprep.subr.bf16.mxu1 %v16061_v22  ;;  %v16083_v21 = vld [vmem:[%s19415_s3 + $0x2a8] sm:$0xff]  }
 0x48b   :  { %14838 = vmatprep.subr.bf16.mxu0 %v16062_v25 }
 0x48d   :  { %14819 = vmatpush3.bf16.msra.mxu1 %v16061_v22 }
 0x48e   :  { %14839 = vmatpush3.bf16.msra.mxu0 %v16062_v25  ;;  %14844 = vmatprep.subr.bf16.mxu1 %v16063_v12 }
 0x48f   :  { %14864 = vmatprep.subr.bf16.mxu0 %v16064_v13 }
 0x490   :  { %v14582_v27 = vpop.f32.mrf.mxu1  ;;  %v14602_v30 = vpop.f32.mrf.mxu0  ;;  %14821 = vmatmul.mubr.bf16.vlgmr.msra.gmra.mxu1 %v16946_v2 }
 0x491   :  { %v1773_v34 = vadd.f32 %v14582_v27, %v1655_v55  ;;  %14841 = vmatmul.mubr.bf16.vlgmr.msra.gmra.mxu0 %v17004_v31  ;;  %14845 = vmatpush3.bf16.msra.mxu1 %v16063_v12  ;;  %v16075_v55 = vld [vmem:[%s19415_s3 + $0x188] sm:$0xff]  }
 0x492   :  { %14860 = vmatprep.mubr.bf16.mxu1 %v16726_v28  ;;  %14865 = vmatpush3.bf16.msra.mxu0 %v16064_v13  ;;  %v1756_v14 = vpop.f32.mrf.mxu1  ;;  %v1874_v15 = vpop.f32.mrf.mxu0  ;;  %v16084_v12 = vld [vmem:[%s19415_s3 + $0x3a8] sm:$0xff]  }
 0x493   :  { %v1891_v36 = vadd.f32 %v14602_v30, %v1773_v34  ;;  %14880 = vmatprep.mubr.bf16.mxu0 %v16724_v38  ;;  %v1771_v37 = vadd.f32 %v1756_v14, %v1653_v60  ;;  %14846 = vmatprep.subr.bf16.mxu1 %v16065_v23  ;;  %v16079_v60 = vld [vmem:[%s19415_s3 + $0x2b8] sm:$0xff]   ;;  %v16086_v14 = vld [vmem:[%s19415_s3 + $0x3a0] sm:$0xff]  }
 0x494   :  { %v14583_v41 = vpop.f32.mrf.mxu1  ;;  %14866 = vmatprep.subr.bf16.mxu0 %v16066_v32  ;;  %v14603_v42 = vpop.f32.mrf.mxu0 }
 0x495   :  { %v1889_v43 = vadd.f32 %v1874_v15, %v1771_v37  ;;  %v1774_v16 = vadd.f32 %v14583_v41, %v1656_v0  ;;  %14847 = vmatpush3.bf16.msra.mxu1 %v16065_v23  ;;  %v16081_v0 = vld [vmem:[%s19415_s3 + $0x2b0] sm:$0xff]   ;;  %v16087_v15 = vld [vmem:[%s19415_s3 + $0x298] sm:$0xff]   ;;  %v16092_v41 = vld [vmem:[%s19415_s3 + $0x388] sm:$0xff]  }
 0x496   :  { %14867 = vmatpush3.bf16.msra.mxu0 %v16066_v32  ;;  %14848 = vmatprep.subr.bf16.mxu1 %v16067_v35  ;;  %v17280_v62 = vpop.f32.mrf.mxu1  ;;  %v17282_v63 = vpop.f32.mrf.mxu0  ;;  %v16085_v32 = vld [vmem:[%s19415_s3 + $0x2a0] sm:$0xff]   ;;  %v16090_v37 = vld [vmem:[%s19415_s3 + $0x390] sm:$0xff]  }
 0x497   :  { %v1892_v58 = vadd.f32 %v14603_v42, %v1774_v16  ;;  %14868 = vmatprep.subr.bf16.mxu0 %v16068_v24  ;;  %19439 = vst [vmem:[#allocation2_spill] sm:$0xff] %v17282_v63  ;;  %v16094_v16 = vld [vmem:[%s19415_s3 + $0x380] sm:$0xff]   ;;  %v16095_v42 = vld [vmem:[%s19415_s3 + $0x4b8] sm:$0xff]  }
 0x499   :  { %14849 = vmatpush3.bf16.msra.mxu1 %v16067_v35  ;;  %v16088_v35 = vld [vmem:[%s19415_s3 + $0x398] sm:$0xff]  }
 0x49a   :  { %14869 = vmatpush3.bf16.msra.mxu0 %v16068_v24  ;;  %14850 = vmatprep.subr.bf16.mxu1 %v16069_v29  ;;  %v16091_v24 = vld [vmem:[%s19415_s3 + $0x288] sm:$0xff]  }
 0x49b   :  { %14870 = vmatprep.subr.bf16.mxu0 %v16070_v33 }
 0x49d   :  { %14851 = vmatpush3.bf16.msra.mxu1 %v16069_v29  ;;  %v16096_v29 = vld [vmem:[%s19415_s3 + $0x5b8] sm:$0xff]  }
 0x49e   :  { %14871 = vmatpush3.bf16.msra.mxu0 %v16070_v33  ;;  %14852 = vmatprep.subr.bf16.mxu1 %v16071_v50  ;;  %v16097_v33 = vld [vmem:[%s19415_s3 + $0x4b0] sm:$0xff]  }
 0x49f   :  { %14872 = vmatprep.subr.bf16.mxu0 %v16072_v51 }
 0x4a1   :  { %14853 = vmatpush3.bf16.msra.mxu1 %v16071_v50 }
 0x4a2   :  { %14873 = vmatpush3.bf16.msra.mxu0 %v16072_v51  ;;  %14854 = vmatprep.subr.bf16.mxu1 %v16073_v53  ;;  %v16098_v51 = vld [vmem:[%s19415_s3 + $0x5b0] sm:$0xff]  }
 0x4a3   :  { %14874 = vmatprep.subr.bf16.mxu0 %v16074_v54 }
 0x4a5   :  { %14855 = vmatpush3.bf16.msra.mxu1 %v16073_v53 }
 0x4a6   :  { %14875 = vmatpush3.bf16.msra.mxu0 %v16074_v54  ;;  %14856 = vmatprep.subr.bf16.mxu1 %v16075_v55 }
 0x4a7   :  { %14876 = vmatprep.subr.bf16.mxu0 %v16076_v56 }
 0x4a9   :  { %14857 = vmatpush3.bf16.msra.mxu1 %v16075_v55  ;;  %v16099_v55 = vld [vmem:[%s19415_s3 + $0x4a8] sm:$0xff]  }
 0x4aa   :  { %14877 = vmatpush3.bf16.msra.mxu0 %v16076_v56  ;;  %14858 = vmatprep.subr.bf16.mxu1 %v16077_v57 }
 0x4ab   :  { %14878 = vmatprep.subr.bf16.mxu0 %v16078_v59 }
 0x4ad   :  { %14859 = vmatpush3.bf16.msra.mxu1 %v16077_v57  ;;  %v16100_v57 = vld [vmem:[%s19415_s3 + $0x5a8] sm:$0xff]  }
 0x4ae   :  { %14879 = vmatpush3.bf16.msra.mxu0 %v16078_v59  ;;  %14884 = vmatprep.subr.bf16.mxu1 %v16079_v60 }
 0x4af   :  { %14904 = vmatprep.subr.bf16.mxu0 %v16080_v61 }
 0x4b0   :  { %v14622_v10 = vpop.f32.mrf.mxu1  ;;  %v14642_v11 = vpop.f32.mrf.mxu0  ;;  %14861 = vmatmul.mubr.bf16.vlgmr.msra.gmra.mxu1 %v16730_v39 }
 0x4b1   :  { %v2009_v5 = vadd.f32 %v14622_v10, %v1891_v36  ;;  %14881 = vmatmul.mubr.bf16.vlgmr.msra.gmra.mxu0 %v16728_v40  ;;  %14885 = vmatpush3.bf16.msra.mxu1 %v16079_v60  ;;  %v16089_v36 = vld [vmem:[%s19415_s3 + $0x290] sm:$0xff]   ;;  %v16103_v10 = vld [vmem:[%s19415_s3 + $0x498] sm:$0xff]  }
 0x4b2   :  { %14900 = vmatprep.mubr.bf16.mxu1 %v16752_v48  ;;  %14905 = vmatpush3.bf16.msra.mxu0 %v16080_v61  ;;  %v1992_v6 = vpop.f32.mrf.mxu1  ;;  %v2110_v9 = vpop.f32.mrf.mxu0  ;;  %v16101_v61 = vld [vmem:[%s19415_s3 + $0x4a0] sm:$0xff]  }
 0x4b3   :  { %v2127_v22 = vadd.f32 %v14642_v11, %v2009_v5  ;;  %14920 = vmatprep.mubr.bf16.mxu0 %v16754_v49  ;;  %v2007_v25 = vadd.f32 %v1992_v6, %v1889_v43  ;;  %14886 = vmatprep.subr.bf16.mxu1 %v16081_v0  ;;  %v16093_v43 = vld [vmem:[%s19415_s3 + $0x280] sm:$0xff]   ;;  %v16104_v11 = vld [vmem:[%s19415_s3 + $0x598] sm:$0xff]   ;;  %v16106_v5 = vld [vmem:[%s19415_s3 + $0x590] sm:$0xff]  }
 0x4b4   :  { %v14623_v13 = vpop.f32.mrf.mxu1  ;;  %14906 = vmatprep.subr.bf16.mxu0 %v16082_v3  ;;  %v14643_v30 = vpop.f32.mrf.mxu0 }
 0x4b5   :  { %v2125_v23 = vadd.f32 %v2110_v9, %v2007_v25  ;;  %v2010_v27 = vadd.f32 %v14623_v13, %v1892_v58  ;;  %14887 = vmatpush3.bf16.msra.mxu1 %v16081_v0  ;;  %v16102_v0 = vld [vmem:[%s19415_s3 + $0x5a0] sm:$0xff]   ;;  %v16107_v9 = vld [vmem:[%s19415_s3 + $0x488] sm:$0xff]  }
 0x4b6   :  { %14907 = vmatpush3.bf16.msra.mxu0 %v16082_v3  ;;  %14888 = vmatprep.subr.bf16.mxu1 %v16083_v21  ;;  %v17336_v58 = vpop.f32.mrf.mxu1  ;;  %v16105_v3 = vld [vmem:[%s19415_s3 + $0x490] sm:$0xff]   ;;  %v17378_v6 = vpop.f32.mrf.mxu0  ;;  %v16109_v25 = vld [vmem:[%s19415_s3 + $0x480] sm:$0xff]  }
 0x4b7   :  { %v2128_v34 = vadd.f32 %v14643_v30, %v2010_v27  ;;  %14908 = vmatprep.subr.bf16.mxu0 %v16084_v12  ;;  %19440 = vst [vmem:[#allocation3_spill] sm:$0xff] %v17336_v58  ;;  %19444 = vst [vmem:[#allocation7_spill] sm:$0xff] %v17378_v6  ;;  %v16110_v13 = vld [vmem:[%s19415_s3 + $0x580] sm:$0xff]   ;;  %v16112_v30 = vld [vmem:[%s19415_s3 + $0x7b8] sm:$0xff]   ;;  %v1410_v58 = vadd.f32 %v17168_v17, %v17166_v52 }
 0x4b9   :  { %14889 = vmatpush3.bf16.msra.mxu1 %v16083_v21 }
 0x4ba   :  { %14909 = vmatpush3.bf16.msra.mxu0 %v16084_v12  ;;  %14890 = vmatprep.subr.bf16.mxu1 %v16085_v32 }
 0x4bb   :  { %14910 = vmatprep.subr.bf16.mxu0 %v16086_v14 }
 0x4bd   :  { %14891 = vmatpush3.bf16.msra.mxu1 %v16085_v32 }
 0x4be   :  { %14911 = vmatpush3.bf16.msra.mxu0 %v16086_v14  ;;  %14892 = vmatprep.subr.bf16.mxu1 %v16087_v15  ;;  %v16113_v14 = vld [vmem:[%s19415_s3 + $0x6b0] sm:$0xff]  }
 0x4bf   :  { %14912 = vmatprep.subr.bf16.mxu0 %v16088_v35 }
 0x4c1   :  { %14893 = vmatpush3.bf16.msra.mxu1 %v16087_v15 }
 0x4c2   :  { %14913 = vmatpush3.bf16.msra.mxu0 %v16088_v35  ;;  %14894 = vmatprep.subr.bf16.mxu1 %v16089_v36  ;;  %v16114_v35 = vld [vmem:[%s19415_s3 + $0x7b0] sm:$0xff]  }
 0x4c3   :  { %14914 = vmatprep.subr.bf16.mxu0 %v16090_v37 }
 0x4c5   :  { %14895 = vmatpush3.bf16.msra.mxu1 %v16089_v36 }
 0x4c6   :  { %14915 = vmatpush3.bf16.msra.mxu0 %v16090_v37  ;;  %14896 = vmatprep.subr.bf16.mxu1 %v16091_v24 }
 0x4c7   :  { %14916 = vmatprep.subr.bf16.mxu0 %v16092_v41 }
 0x4c9   :  { %14897 = vmatpush3.bf16.msra.mxu1 %v16091_v24 }
 0x4ca   :  { %14917 = vmatpush3.bf16.msra.mxu0 %v16092_v41  ;;  %14898 = vmatprep.subr.bf16.mxu1 %v16093_v43  ;;  %v16115_v41 = vld [vmem:[%s19415_s3 + $0x6a8] sm:$0xff]  }
 0x4cb   :  { %14918 = vmatprep.subr.bf16.mxu0 %v16094_v16 }
 0x4cd   :  { %14899 = vmatpush3.bf16.msra.mxu1 %v16093_v43 }
 0x4ce   :  { %14919 = vmatpush3.bf16.msra.mxu0 %v16094_v16  ;;  %14924 = vmatprep.subr.bf16.mxu1 %v16095_v42 }
 0x4cf   :  { %14944 = vmatprep.subr.bf16.mxu0 %v16096_v29 }
 0x4d0   :  { %v14662_v50 = vpop.f32.mrf.mxu1  ;;  %14901 = vmatmul.mubr.bf16.vlgmr.msra.gmra.mxu1 %v16803_v19  ;;  %v14682_v21 = vpop.f32.mrf.mxu0 }
 0x4d1   :  { %v17345_v53 = vadd.f32 %v14662_v50, %v2127_v22  ;;  %14921 = vmatmul.mubr.bf16.vlgmr.msra.gmra.mxu0 %v16806_v4  ;;  %14925 = vmatpush3.bf16.msra.mxu1 %v16095_v42  ;;  %v16108_v22 = vld [vmem:[%s19415_s3 + $0x588] sm:$0xff]  }
 0x4d2   :  { %14940 = vmatprep.mubr.bf16.mxu1 %v16814_v7  ;;  %14945 = vmatpush3.bf16.msra.mxu0 %v16096_v29  ;;  %v2228_v54 = vpop.f32.mrf.mxu1  ;;  %v2363_v12 = vpop.f32.mrf.mxu0  ;;  %v16116_v29 = vld [vmem:[%s19415_s3 + $0x7a8] sm:$0xff]  }
 0x4d3   :  { %19441 = vst [vmem:[#allocation4_spill] sm:$0xff] %v17345_v53  ;;  %14960 = vmatprep.mubr.bf16.mxu0 %v16816_v8  ;;  %v17353_v56 = vadd.f32 %v2228_v54, %v2125_v23  ;;  %14926 = vmatprep.subr.bf16.mxu1 %v16097_v33  ;;  %v16111_v23 = vld [vmem:[%s19415_s3 + $0x6b8] sm:$0xff]  }
 0x4d4   :  { %v14663_v59 = vpop.f32.mrf.mxu1  ;;  %14946 = vmatprep.subr.bf16.mxu0 %v16098_v51  ;;  %v14683_v27 = vpop.f32.mrf.mxu0 }
 0x4d5   :  { %19442 = vst [vmem:[#allocation5_spill] sm:$0xff] %v17353_v56  ;;  %v17358_v60 = vadd.f32 %v14663_v59, %v2128_v34  ;;  %14927 = vmatpush3.bf16.msra.mxu1 %v16097_v33  ;;  %v16118_v59 = vld [vmem:[%s19415_s3 + $0x7a0] sm:$0xff]  }
 0x4d6   :  { %14947 = vmatpush3.bf16.msra.mxu0 %v16098_v51  ;;  %14928 = vmatprep.subr.bf16.mxu1 %v16099_v55  ;;  %v17398_v32 = vpop.f32.mrf.mxu1  ;;  %v17400_v34 = vpop.f32.mrf.mxu0 }
 0x4d7   :  { %19443 = vst [vmem:[#allocation6_spill] sm:$0xff] %v17358_v60  ;;  %14948 = vmatprep.subr.bf16.mxu0 %v16100_v57  ;;  %19445 = vst [vmem:[#allocation8_spill] sm:$0xff] %v17398_v32 }
 0x4d9   :  { %14929 = vmatpush3.bf16.msra.mxu1 %v16099_v55  ;;  %v16117_v55 = vld [vmem:[%s19415_s3 + $0x6a0] sm:$0xff]  }
 0x4da   :  { %14949 = vmatpush3.bf16.msra.mxu0 %v16100_v57  ;;  %14930 = vmatprep.subr.bf16.mxu1 %v16101_v61 }
 0x4db   :  { %14950 = vmatprep.subr.bf16.mxu0 %v16102_v0 }
 0x4dd   :  { %14931 = vmatpush3.bf16.msra.mxu1 %v16101_v61  ;;  %v16119_v61 = vld [vmem:[%s19415_s3 + $0x698] sm:$0xff]  }
 0x4de   :  { %14951 = vmatpush3.bf16.msra.mxu0 %v16102_v0  ;;  %14932 = vmatprep.subr.bf16.mxu1 %v16103_v10  ;;  %v16120_v0 = vld [vmem:[%s19415_s3 + $0x798] sm:$0xff]  }
 0x4df   :  { %14952 = vmatprep.subr.bf16.mxu0 %v16104_v11 }
 0x4e1   :  { %14933 = vmatpush3.bf16.msra.mxu1 %v16103_v10  ;;  %v16121_v10 = vld [vmem:[%s19415_s3 + $0x690] sm:$0xff]  }
 0x4e2   :  { %14953 = vmatpush3.bf16.msra.mxu0 %v16104_v11  ;;  %14934 = vmatprep.subr.bf16.mxu1 %v16105_v3  ;;  %v16122_v11 = vld [vmem:[%s19415_s3 + $0x790] sm:$0xff]  }
 0x4e3   :  { %14954 = vmatprep.subr.bf16.mxu0 %v16106_v5 }
 0x4e5   :  { %14935 = vmatpush3.bf16.msra.mxu1 %v16105_v3  ;;  %v16123_v3 = vld [vmem:[%s19415_s3 + $0x688] sm:$0xff]  }
 0x4e6   :  { %14955 = vmatpush3.bf16.msra.mxu0 %v16106_v5  ;;  %14936 = vmatprep.subr.bf16.mxu1 %v16107_v9  ;;  %v16124_v5 = vld [vmem:[%s19415_s3 + $0x788] sm:$0xff]  }
 0x4e7   :  { %14956 = vmatprep.subr.bf16.mxu0 %v16108_v22 }
 0x4e9   :  { %14937 = vmatpush3.bf16.msra.mxu1 %v16107_v9  ;;  %v16125_v9 = vld [vmem:[%s19415_s3 + $0x680] sm:$0xff]  }
 0x4ea   :  { %14957 = vmatpush3.bf16.msra.mxu0 %v16108_v22  ;;  %14938 = vmatprep.subr.bf16.mxu1 %v16109_v25  ;;  %v16127_v22 = vld [vmem:[%s19415_s3 + $0x8b8] sm:$0xff]  }
 0x4eb   :  { %14958 = vmatprep.subr.bf16.mxu0 %v16110_v13 }
 0x4ed   :  { %14939 = vmatpush3.bf16.msra.mxu1 %v16109_v25  ;;  %v16128_v25 = vld [vmem:[%s19415_s3 + $0x1f8] sm:$0xff]  }
 0x4ee   :  { %14959 = vmatpush3.bf16.msra.mxu0 %v16110_v13  ;;  %14964 = vmatprep.subr.bf16.mxu1 %v16111_v23 }
 0x4ef   :  { %14984 = vmatprep.subr.bf16.mxu0 %v16112_v30 }
 0x4f0   :  { %v14702_v15 = vpop.f32.mrf.mxu1  ;;  %14941 = vmatmul.mubr.bf16.vlgmr.msra.gmra.mxu1 %v16874_v44 }
 0x4f1   :  { %v2469_v36 = vadd.f32 %v14702_v15, %v14682_v21  ;;  %v14722_v37 = vpop.f32.mrf.mxu0  ;;  %14961 = vmatmul.mubr.bf16.vlgmr.msra.gmra.mxu0 %v16878_v45  ;;  %14965 = vmatpush3.bf16.msra.mxu1 %v16111_v23  ;;  %v16126_v21 = vld [vmem:[%s19415_s3 + $0x780] sm:$0xff]   ;;  %v16129_v23 = vld [vmem:[%s19415_s3 + $0x8b0] sm:$0xff]  }
 0x4f2   :  { %14980 = vmatprep.mubr.bf16.mxu1 %v16886_v46  ;;  %14985 = vmatpush3.bf16.msra.mxu0 %v16112_v30  ;;  %v2460_v24 = vpop.f32.mrf.mxu1  ;;  %v16130_v30 = vld [vmem:[%s19415_s3 + $0x1f0] sm:$0xff]  }
 0x4f3   :  { %v2591_v43 = vadd.f32 %v14722_v37, %v2469_v36  ;;  %15000 = vmatprep.mubr.bf16.mxu0 %v16888_v47  ;;  %v2461_v16 = vadd.f32 %v2460_v24, %v2363_v12  ;;  %v2574_v42 = vpop.f32.mrf.mxu0  ;;  %14966 = vmatprep.subr.bf16.mxu1 %v16113_v14  ;;  %v16131_v36 = vld [vmem:[%s19415_s3 + $0x8a8] sm:$0xff]  }
 0x4f4   :  { %v14703_v33 = vpop.f32.mrf.mxu1  ;;  %14986 = vmatprep.subr.bf16.mxu0 %v16114_v35 }
 0x4f5   :  { %v2589_v50 = vadd.f32 %v2574_v42, %v2461_v16  ;;  %v2472_v51 = vadd.f32 %v14703_v33, %v14683_v27  ;;  %14967 = vmatpush3.bf16.msra.mxu1 %v16113_v14  ;;  %v14723_v54 = vpop.f32.mrf.mxu0 }
 0x4f6   :  { %14987 = vmatpush3.bf16.msra.mxu0 %v16114_v35  ;;  %14968 = vmatprep.subr.bf16.mxu1 %v16115_v41  ;;  %v17454_v12 = vpop.f32.mrf.mxu1 }
 0x4f7   :  { %v2592_v57 = vadd.f32 %v14723_v54, %v2472_v51  ;;  %14988 = vmatprep.subr.bf16.mxu0 %v16116_v29  ;;  %v17456_v13 = vpop.f32.mrf.mxu0  ;;  %v16133_v51 = vld [vmem:[%s19415_s3 + $0x8a0] sm:$0xff]   ;;  %v16135_v54 = vld [vmem:[%s19415_s3 + $0x898] sm:$0xff]  }
 0x4f9   :  { %14969 = vmatpush3.bf16.msra.mxu1 %v16115_v41 }
 0x4fa   :  { %14989 = vmatpush3.bf16.msra.mxu0 %v16116_v29  ;;  %14970 = vmatprep.subr.bf16.mxu1 %v16117_v55 }
 0x4fb   :  { %14990 = vmatprep.subr.bf16.mxu0 %v16118_v59 }
 0x4fd   :  { %14971 = vmatpush3.bf16.msra.mxu1 %v16117_v55  ;;  %v16136_v55 = vld [vmem:[%s19415_s3 + $0x1d8] sm:$0xff]  }
 0x4fe   :  { %14991 = vmatpush3.bf16.msra.mxu0 %v16118_v59  ;;  %14972 = vmatprep.subr.bf16.mxu1 %v16119_v61  ;;  %v16138_v59 = vld [vmem:[%s19415_s3 + $0x1d0] sm:$0xff]  }
 0x4ff   :  { %14992 = vmatprep.subr.bf16.mxu0 %v16120_v0 }
 0x501   :  { %14973 = vmatpush3.bf16.msra.mxu1 %v16119_v61  ;;  %v16139_v61 = vld [vmem:[%s19415_s3 + $0x888] sm:$0xff]  }
 0x502   :  { %14993 = vmatpush3.bf16.msra.mxu0 %v16120_v0  ;;  %14974 = vmatprep.subr.bf16.mxu1 %v16121_v10  ;;  %v16140_v0 = vld [vmem:[%s19415_s3 + $0x1c8] sm:$0xff]  }
 0x503   :  { %14994 = vmatprep.subr.bf16.mxu0 %v16122_v11 }
 0x505   :  { %14975 = vmatpush3.bf16.msra.mxu1 %v16121_v10  ;;  %v16141_v10 = vld [vmem:[%s19415_s3 + $0x880] sm:$0xff]  }
 0x506   :  { %14995 = vmatpush3.bf16.msra.mxu0 %v16122_v11  ;;  %14976 = vmatprep.subr.bf16.mxu1 %v16123_v3  ;;  %v16142_v11 = vld [vmem:[%s19415_s3 + $0x1c0] sm:$0xff]  }
 0x507   :  { %14996 = vmatprep.subr.bf16.mxu0 %v16124_v5 }
 0x509   :  { %14977 = vmatpush3.bf16.msra.mxu1 %v16123_v3  ;;  %v16143_v3 = vld [vmem:[%s19415_s3 + $0xf8] sm:$0xff]  }
 0x50a   :  { %14997 = vmatpush3.bf16.msra.mxu0 %v16124_v5  ;;  %14978 = vmatprep.subr.bf16.mxu1 %v16125_v9  ;;  %v16144_v5 = vld [vmem:[%s19415_s3 + $0x2f8] sm:$0xff]  }
 0x50b   :  { %14998 = vmatprep.subr.bf16.mxu0 %v16126_v21 }
 0x50d   :  { %14979 = vmatpush3.bf16.msra.mxu1 %v16125_v9 }
 0x50e   :  { %14999 = vmatpush3.bf16.msra.mxu0 %v16126_v21  ;;  %15004 = vmatprep.subr.bf16.mxu1 %v16127_v22 }
 0x50f   :  { %15024 = vmatprep.subr.bf16.mxu0 %v16128_v25 }
 0x510   :  { %v14742_v27 = vpop.f32.mrf.mxu1  ;;  %14981 = vmatmul.mubr.bf16.vlgmr.msra.gmra.mxu1 %v16942_v1 }
 0x511   :  { %v2709_v14 = vadd.f32 %v14742_v27, %v2591_v43  ;;  %v14762_v15 = vpop.f32.mrf.mxu0  ;;  %15001 = vmatmul.mubr.bf16.vlgmr.msra.gmra.mxu0 %v16946_v2  ;;  %15005 = vmatpush3.bf16.msra.mxu1 %v16127_v22  ;;  %v16132_v43 = vld [vmem:[%s19415_s3 + $0x1e8] sm:$0xff]   ;;  %v16145_v22 = vld [vmem:[%s19415_s3 + $0xf0] sm:$0xff]  }
 0x512   :  { %15020 = vmatprep.mubr.bf16.mxu1 %v16954_v18  ;;  %15025 = vmatpush3.bf16.msra.mxu0 %v16128_v25  ;;  %v2692_v35 = vpop.f32.mrf.mxu1 }
 0x513   :  { %v2827_v37 = vadd.f32 %v14762_v15, %v2709_v14  ;;  %15040 = vmatprep.mubr.bf16.mxu0 %v16726_v28  ;;  %v2707_v24 = vadd.f32 %v2692_v35, %v2589_v50  ;;  %v2810_v41 = vpop.f32.mrf.mxu0  ;;  %15006 = vmatprep.subr.bf16.mxu1 %v16129_v23  ;;  %v16134_v50 = vld [vmem:[%s19415_s3 + $0x1e0] sm:$0xff]   ;;  %v16147_v15 = vld [vmem:[%s19415_s3 + $0xe8] sm:$0xff]  }
 0x514   :  { %v14743_v16 = vpop.f32.mrf.mxu1  ;;  %15026 = vmatprep.subr.bf16.mxu0 %v16130_v30 }
 0x515   :  { %v2825_v42 = vadd.f32 %v2810_v41, %v2707_v24  ;;  %v2710_v29 = vadd.f32 %v14743_v16, %v2592_v57  ;;  %15007 = vmatpush3.bf16.msra.mxu1 %v16129_v23  ;;  %v14763_v33 = vpop.f32.mrf.mxu0  ;;  %v16137_v57 = vld [vmem:[%s19415_s3 + $0x890] sm:$0xff]   ;;  %v16149_v16 = vld [vmem:[%s19415_s3 + $0xe0] sm:$0xff]  }
 0x516   :  { %15027 = vmatpush3.bf16.msra.mxu0 %v16130_v30  ;;  %15008 = vmatprep.subr.bf16.mxu1 %v16131_v36  ;;  %v17510_v9 = vpop.f32.mrf.mxu1  ;;  %v16146_v23 = vld [vmem:[%s19415_s3 + $0x2f0] sm:$0xff]  }
 0x517   :  { %v2828_v28 = vadd.f32 %v14763_v33, %v2710_v29  ;;  %15028 = vmatprep.subr.bf16.mxu0 %v16132_v43  ;;  %v17512_v21 = vpop.f32.mrf.mxu0  ;;  %v16151_v29 = vld [vmem:[%s19415_s3 + $0xd8] sm:$0xff]  }
 0x518   :  { %v16152_v33 = vld [vmem:[%s19415_s3 + $0x2d8] sm:$0xff]  }
 0x519   :  { %15009 = vmatpush3.bf16.msra.mxu1 %v16131_v36 }
 0x51a   :  { %15029 = vmatpush3.bf16.msra.mxu0 %v16132_v43  ;;  %15010 = vmatprep.subr.bf16.mxu1 %v16133_v51 }
 0x51b   :  { %15030 = vmatprep.subr.bf16.mxu0 %v16134_v50 }
 0x51d   :  { %15011 = vmatpush3.bf16.msra.mxu1 %v16133_v51  ;;  %v16153_v51 = vld [vmem:[%s19415_s3 + $0xd0] sm:$0xff]  }
 0x51e   :  { %15031 = vmatpush3.bf16.msra.mxu0 %v16134_v50  ;;  %15012 = vmatprep.subr.bf16.mxu1 %v16135_v54  ;;  %v16155_v50 = vld [vmem:[%s19415_s3 + $0xc8] sm:$0xff]  }
 0x51f   :  { %15032 = vmatprep.subr.bf16.mxu0 %v16136_v55 }
 0x521   :  { %15013 = vmatpush3.bf16.msra.mxu1 %v16135_v54  ;;  %v16156_v54 = vld [vmem:[%s19415_s3 + $0x2c8] sm:$0xff]  }
 0x522   :  { %15033 = vmatpush3.bf16.msra.mxu0 %v16136_v55  ;;  %15014 = vmatprep.subr.bf16.mxu1 %v16137_v57  ;;  %v16157_v55 = vld [vmem:[%s19415_s3 + $0xc0] sm:$0xff]  }
 0x523   :  { %15034 = vmatprep.subr.bf16.mxu0 %v16138_v59 }
 0x525   :  { %15015 = vmatpush3.bf16.msra.mxu1 %v16137_v57  ;;  %v16158_v57 = vld [vmem:[%s19415_s3 + $0x2c0] sm:$0xff]  }
 0x526   :  { %15035 = vmatpush3.bf16.msra.mxu0 %v16138_v59  ;;  %15016 = vmatprep.subr.bf16.mxu1 %v16139_v61  ;;  %v16159_v59 = vld [vmem:[%s19415_s3 + $0x3f8] sm:$0xff]  }
 0x527   :  { %15036 = vmatprep.subr.bf16.mxu0 %v16140_v0 }
 0x529   :  { %15017 = vmatpush3.bf16.msra.mxu1 %v16139_v61  ;;  %v16160_v61 = vld [vmem:[%s19415_s3 + $0x4f8] sm:$0xff]  }
 0x52a   :  { %15037 = vmatpush3.bf16.msra.mxu0 %v16140_v0  ;;  %15018 = vmatprep.subr.bf16.mxu1 %v16141_v10 }
 0x52b   :  { %15038 = vmatprep.subr.bf16.mxu0 %v16142_v11 }
 0x52d   :  { %15019 = vmatpush3.bf16.msra.mxu1 %v16141_v10 }
 0x52e   :  { %15039 = vmatpush3.bf16.msra.mxu0 %v16142_v11  ;;  %15044 = vmatprep.subr.bf16.mxu1 %v16143_v3  ;;  %v16161_v11 = vld [vmem:[%s19415_s3 + $0x3f0] sm:$0xff]  }
 0x52f   :  { %15064 = vmatprep.subr.bf16.mxu0 %v16144_v5 }
 0x530   :  { %v14782_v25 = vpop.f32.mrf.mxu1  ;;  %15021 = vmatmul.mubr.bf16.vlgmr.msra.gmra.mxu1 %v17004_v31 }
 0x531   :  { %v2945_v27 = vadd.f32 %v14782_v25, %v2827_v37  ;;  %v14802_v30 = vpop.f32.mrf.mxu0  ;;  %15041 = vmatmul.mubr.bf16.vlgmr.msra.gmra.mxu0 %v16730_v39  ;;  %15045 = vmatpush3.bf16.msra.mxu1 %v16143_v3  ;;  %v16148_v37 = vld [vmem:[%s19415_s3 + $0x2e8] sm:$0xff]  }
 0x532   :  { %15060 = vmatprep.mubr.bf16.mxu1 %v16724_v38  ;;  %15065 = vmatpush3.bf16.msra.mxu0 %v16144_v5  ;;  %v2928_v14 = vpop.f32.mrf.mxu1  ;;  %v16162_v5 = vld [vmem:[%s19415_s3 + $0x4f0] sm:$0xff]  }
 0x533   :  { %v3063_v35 = vadd.f32 %v14802_v30, %v2945_v27  ;;  %15080 = vmatprep.mubr.bf16.mxu0 %v16752_v48  ;;  %v2943_v36 = vadd.f32 %v2928_v14, %v2825_v42  ;;  %v3046_v24 = vpop.f32.mrf.mxu0  ;;  %15046 = vmatprep.subr.bf16.mxu1 %v16145_v22  ;;  %v16150_v42 = vld [vmem:[%s19415_s3 + $0x2e0] sm:$0xff]   ;;  %v16163_v27 = vld [vmem:[%s19415_s3 + $0x3e8] sm:$0xff]  }
 0x534   :  { %v14783_v39 = vpop.f32.mrf.mxu1  ;;  %15066 = vmatprep.subr.bf16.mxu0 %v16146_v23 }
 0x535   :  { %v3061_v41 = vadd.f32 %v3046_v24, %v2943_v36  ;;  %v2946_v38 = vadd.f32 %v14783_v39, %v2828_v28  ;;  %15047 = vmatpush3.bf16.msra.mxu1 %v16145_v22  ;;  %v14803_v43 = vpop.f32.mrf.mxu0  ;;  %v16154_v28 = vld [vmem:[%s19415_s3 + $0x2d0] sm:$0xff]   ;;  %v16167_v39 = vld [vmem:[%s19415_s3 + $0x3d8] sm:$0xff]  }
 0x536   :  { %15067 = vmatpush3.bf16.msra.mxu0 %v16146_v23  ;;  %15048 = vmatprep.subr.bf16.mxu1 %v16147_v15  ;;  %v17566_v0 = vpop.f32.mrf.mxu1 }
 0x537   :  { %v3064_v48 = vadd.f32 %v14803_v43, %v2946_v38  ;;  %15068 = vmatprep.subr.bf16.mxu0 %v16148_v37  ;;  %v17568_v10 = vpop.f32.mrf.mxu0  ;;  %v16169_v38 = vld [vmem:[%s19415_s3 + $0x3d0] sm:$0xff]  }
 0x538   :  { %19446 = vst [vmem:[#allocation9_spill] sm:$0xff] %v17568_v10  ;;  %v16170_v43 = vld [vmem:[%s19415_s3 + $0x4d0] sm:$0xff]  }
 0x539   :  { %15049 = vmatpush3.bf16.msra.mxu1 %v16147_v15 }
 0x53a   :  { %15069 = vmatpush3.bf16.msra.mxu0 %v16148_v37  ;;  %15050 = vmatprep.subr.bf16.mxu1 %v16149_v16  ;;  %v16166_v37 = vld [vmem:[%s19415_s3 + $0x4e0] sm:$0xff]  }
 0x53b   :  { %15070 = vmatprep.subr.bf16.mxu0 %v16150_v42 }
 0x53d   :  { %15051 = vmatpush3.bf16.msra.mxu1 %v16149_v16  ;;  %v16171_v16 = vld [vmem:[%s19415_s3 + $0x3c8] sm:$0xff]  }
 0x53e   :  { %15071 = vmatpush3.bf16.msra.mxu0 %v16150_v42  ;;  %15052 = vmatprep.subr.bf16.mxu1 %v16151_v29  ;;  %v16173_v42 = vld [vmem:[%s19415_s3 + $0x3c0] sm:$0xff]  }
 0x53f   :  { %15072 = vmatprep.subr.bf16.mxu0 %v16152_v33 }
 0x541   :  { %15053 = vmatpush3.bf16.msra.mxu1 %v16151_v29  ;;  %v16174_v29 = vld [vmem:[%s19415_s3 + $0x4c0] sm:$0xff]  }
 0x542   :  { %15073 = vmatpush3.bf16.msra.mxu0 %v16152_v33  ;;  %15054 = vmatprep.subr.bf16.mxu1 %v16153_v51  ;;  %v16175_v33 = vld [vmem:[%s19415_s3 + $0x5f8] sm:$0xff]  }
 0x543   :  { %15074 = vmatprep.subr.bf16.mxu0 %v16154_v28 }
 0x545   :  { %15055 = vmatpush3.bf16.msra.mxu1 %v16153_v51  ;;  %v16176_v51 = vld [vmem:[%s19415_s3 + $0x6f8] sm:$0xff]  }
 0x546   :  { %15075 = vmatpush3.bf16.msra.mxu0 %v16154_v28  ;;  %15056 = vmatprep.subr.bf16.mxu1 %v16155_v50  ;;  %v16177_v28 = vld [vmem:[%s19415_s3 + $0x5f0] sm:$0xff]  }
 0x547   :  { %15076 = vmatprep.subr.bf16.mxu0 %v16156_v54 }
 0x549   :  { %15057 = vmatpush3.bf16.msra.mxu1 %v16155_v50  ;;  %v16178_v50 = vld [vmem:[%s19415_s3 + $0x6f0] sm:$0xff]  }
 0x54a   :  { %15077 = vmatpush3.bf16.msra.mxu0 %v16156_v54  ;;  %15058 = vmatprep.subr.bf16.mxu1 %v16157_v55  ;;  %v16179_v54 = vld [vmem:[%s19415_s3 + $0x5e8] sm:$0xff]  }
 0x54b   :  { %15078 = vmatprep.subr.bf16.mxu0 %v16158_v57 }
 0x54d   :  { %15059 = vmatpush3.bf16.msra.mxu1 %v16157_v55  ;;  %v16184_v55 = vld [vmem:[%s19415_s3 + $0x6d8] sm:$0xff]  }
 0x54e   :  { %15079 = vmatpush3.bf16.msra.mxu0 %v16158_v57  ;;  %15084 = vmatprep.subr.bf16.mxu1 %v16159_v59  ;;  %v16185_v57 = vld [vmem:[%s19415_s3 + $0x5d0] sm:$0xff]  }
 0x54f   :  { %15104 = vmatprep.subr.bf16.mxu0 %v16160_v61 }
 0x550   :  { %v14822_v3 = vpop.f32.mrf.mxu1  ;;  %15061 = vmatmul.mubr.bf16.vlgmr.msra.gmra.mxu1 %v16728_v40 }
 0x551   :  { %v3181_v22 = vadd.f32 %v14822_v3, %v3063_v35  ;;  %v14842_v25 = vpop.f32.mrf.mxu0  ;;  %15081 = vmatmul.mubr.bf16.vlgmr.msra.gmra.mxu0 %v16803_v19  ;;  %15085 = vmatpush3.bf16.msra.mxu1 %v16159_v59  ;;  %v16164_v19 = vld [vmem:[%s19415_s3 + $0x4e8] sm:$0xff]   ;;  %v16186_v59 = vld [vmem:[%s19415_s3 + $0x6d0] sm:$0xff]   ;;  %v16189_v3 = vld [vmem:[%s19415_s3 + $0x5c0] sm:$0xff]  }
 0x552   :  { %15100 = vmatprep.mubr.bf16.mxu1 %v16754_v49  ;;  %15105 = vmatpush3.bf16.msra.mxu0 %v16160_v61  ;;  %v3164_v23 = vpop.f32.mrf.mxu1  ;;  %v16187_v61 = vld [vmem:[%s19415_s3 + $0x5c8] sm:$0xff]  }
 0x553   :  { %v17582_v30 = vadd.f32 %v14842_v25, %v3181_v22  ;;  %15120 = vmatprep.mubr.bf16.mxu0 %v16814_v7  ;;  %v3179_v40 = vadd.f32 %v3164_v23, %v3061_v41  ;;  %v3282_v14 = vpop.f32.mrf.mxu0  ;;  %15086 = vmatprep.subr.bf16.mxu1 %v16161_v11  ;;  %v16165_v7 = vld [vmem:[%s19415_s3 + $0x3e0] sm:$0xff]   ;;  %v16168_v41 = vld [vmem:[%s19415_s3 + $0x4d8] sm:$0xff]   ;;  %v16193_v23 = vld [vmem:[%s19415_s3 + $0x7f0] sm:$0xff]  }
 0x554   :  { %v14823_v15 = vpop.f32.mrf.mxu1  ;;  %15106 = vmatprep.subr.bf16.mxu0 %v16162_v5  ;;  %v16191_v22 = vld [vmem:[%s19415_s3 + $0x7f8] sm:$0xff]  }
 0x555   :  { %19447 = vst [vmem:[#allocation10_spill] sm:$0xff] %v17582_v30  ;;  %v17588_v49 = vadd.f32 %v3282_v14, %v3179_v40  ;;  %v3182_v35 = vadd.f32 %v14823_v15, %v3064_v48  ;;  %15087 = vmatpush3.bf16.msra.mxu1 %v16161_v11  ;;  %v14843_v36 = vpop.f32.mrf.mxu0  ;;  %v16172_v48 = vld [vmem:[%s19415_s3 + $0x4c8] sm:$0xff]   ;;  %v16192_v25 = vld [vmem:[%s19415_s3 + $0x8f8] sm:$0xff]   ;;  %v16202_v15 = vld [vmem:[%s19415_s3 + $0x8d0] sm:$0xff]  }
 0x556   :  { %15107 = vmatpush3.bf16.msra.mxu0 %v16162_v5  ;;  %15088 = vmatprep.subr.bf16.mxu1 %v16163_v27  ;;  %v16188_v11 = vld [vmem:[%s19415_s3 + $0x6c8] sm:$0xff]   ;;  %v16190_v5 = vld [vmem:[%s19415_s3 + $0x6c0] sm:$0xff]   ;;  %v16200_v14 = vld [vmem:[%s19415_s3 + $0x8d8] sm:$0xff]  }
 0x557   :  { %19448 = vst [vmem:[#allocation11_spill] sm:$0xff] %v17588_v49  ;;  %v17593_v24 = vadd.f32 %v14843_v36, %v3182_v35  ;;  %15108 = vmatprep.subr.bf16.mxu0 %v16164_v19  ;;  %v16195_v40 = vld [vmem:[%s19415_s3 + $0x7e8] sm:$0xff]  }
 0x558   :  { %v16203_v35 = vld [vmem:[%s19415_s3 + $0x7c8] sm:$0xff]  }
 0x559   :  { %19449 = vst [vmem:[#allocation12_spill] sm:$0xff] %v17593_v24  ;;  %15089 = vmatpush3.bf16.msra.mxu1 %v16163_v27  ;;  %v16194_v27 = vld [vmem:[%s19415_s3 + $0x8f0] sm:$0xff]   ;;  %v16204_v36 = vld [vmem:[%s19415_s3 + $0x8c8] sm:$0xff]  }
 0x55a   :  { %15109 = vmatpush3.bf16.msra.mxu0 %v16164_v19  ;;  %15090 = vmatprep.subr.bf16.mxu1 %v16165_v7  ;;  %v16201_v19 = vld [vmem:[%s19415_s3 + $0x7d0] sm:$0xff]  }
 0x55b   :  { %15110 = vmatprep.subr.bf16.mxu0 %v16166_v37 }
 0x55d   :  { %15091 = vmatpush3.bf16.msra.mxu1 %v16165_v7  ;;  %v16205_v7 = vld [vmem:[%s19415_s3 + $0x7c0] sm:$0xff]  }
 0x55e   :  { %15111 = vmatpush3.bf16.msra.mxu0 %v16166_v37  ;;  %15092 = vmatprep.subr.bf16.mxu1 %v16167_v39  ;;  %v16206_v37 = vld [vmem:[%s19415_s3 + $0x8c0] sm:$0xff]  }
 0x55f   :  { %15112 = vmatprep.subr.bf16.mxu0 %v16168_v41 }
 0x561   :  { %15093 = vmatpush3.bf16.msra.mxu1 %v16167_v39  ;;  %v17728_v39 = vpop.f32.mrf.mxu1 }
 0x562   :  { %15113 = vmatpush3.bf16.msra.mxu0 %v16168_v41  ;;  %15094 = vmatprep.subr.bf16.mxu1 %v16169_v38  ;;  %19450 = vst [vmem:[#allocation13_spill] sm:$0xff] %v17728_v39  ;;  %v17730_v41 = vpop.f32.mrf.mxu0 }
 0x563   :  { %15114 = vmatprep.subr.bf16.mxu0 %v16170_v43  ;;  %19451 = vst [vmem:[#allocation14_spill] sm:$0xff] %v17730_v41 }
 0x565   :  { %15095 = vmatpush3.bf16.msra.mxu1 %v16169_v38 }
 0x566   :  { %15115 = vmatpush3.bf16.msra.mxu0 %v16170_v43  ;;  %15096 = vmatprep.subr.bf16.mxu1 %v16171_v16 }
 0x567   :  { %15116 = vmatprep.subr.bf16.mxu0 %v16172_v48 }
 0x569   :  { %15097 = vmatpush3.bf16.msra.mxu1 %v16171_v16 }
 0x56a   :  { %15117 = vmatpush3.bf16.msra.mxu0 %v16172_v48  ;;  %15098 = vmatprep.subr.bf16.mxu1 %v16173_v42 }
 0x56b   :  { %15118 = vmatprep.subr.bf16.mxu0 %v16174_v29 }
 0x56d   :  { %15099 = vmatpush3.bf16.msra.mxu1 %v16173_v42 }
 0x56e   :  { %15119 = vmatpush3.bf16.msra.mxu0 %v16174_v29  ;;  %15124 = vmatprep.subr.bf16.mxu1 %v16175_v33 }
 0x56f   :  { %15144 = vmatprep.subr.bf16.mxu0 %v16176_v51 }
 0x570   :  { %15101 = vmatmul.mubr.bf16.vlgmr.msra.gmra.mxu1 %v16806_v4  ;;  %v16180_v4 = vld [vmem:[%s19415_s3 + $0x6e8] sm:$0xff]   ;;  %v14862_v38 = vpop.f32.mrf.mxu1 }
 0x571   :  { %15121 = vmatmul.mubr.bf16.vlgmr.msra.gmra.mxu0 %v16874_v44  ;;  %15125 = vmatpush3.bf16.msra.mxu1 %v16175_v33  ;;  %v16182_v44 = vld [vmem:[%s19415_s3 + $0x6e0] sm:$0xff]   ;;  %v14882_v43 = vpop.f32.mrf.mxu0 }
 0x572   :  { %15140 = vmatprep.mubr.bf16.mxu1 %v16816_v8  ;;  %15145 = vmatpush3.bf16.msra.mxu0 %v16176_v51  ;;  %v16181_v8 = vld [vmem:[%s19415_s3 + $0x5e0] sm:$0xff]   ;;  %v3417_v16 = vpop.f32.mrf.mxu1 }
 0x573   :  { %15160 = vmatprep.mubr.bf16.mxu0 %v16886_v46  ;;  %15126 = vmatprep.subr.bf16.mxu1 %v16177_v28  ;;  %v16183_v46 = vld [vmem:[%s19415_s3 + $0x5d8] sm:$0xff]   ;;  %v3514_v48 = vpop.f32.mrf.mxu0 }
 0x574   :  { %15146 = vmatprep.subr.bf16.mxu0 %v16178_v50  ;;  %v14863_v42 = vpop.f32.mrf.mxu1 }
 0x575   :  { %15127 = vmatpush3.bf16.msra.mxu1 %v16177_v28  ;;  %v14883_v29 = vpop.f32.mrf.mxu0 }
 0x576   :  { %15147 = vmatpush3.bf16.msra.mxu0 %v16178_v50  ;;  %15128 = vmatprep.subr.bf16.mxu1 %v16179_v54  ;;  %v17732_v33 = vpop.f32.mrf.mxu1  ;;  %v3526_v10 = vadd.f32 %v14883_v29, %v14863_v42 }
 0x577   :  { %15148 = vmatprep.subr.bf16.mxu0 %v16180_v4  ;;  %v17734_v51 = vpop.f32.mrf.mxu0 }
 0x579   :  { %15129 = vmatpush3.bf16.msra.mxu1 %v16179_v54 }
 0x57a   :  { %15149 = vmatpush3.bf16.msra.mxu0 %v16180_v4  ;;  %15130 = vmatprep.subr.bf16.mxu1 %v16181_v8 }
 0x57b   :  { %15150 = vmatprep.subr.bf16.mxu0 %v16182_v44 }
 0x57d   :  { %15131 = vmatpush3.bf16.msra.mxu1 %v16181_v8 }
 0x57e   :  { %15151 = vmatpush3.bf16.msra.mxu0 %v16182_v44  ;;  %15132 = vmatprep.subr.bf16.mxu1 %v16183_v46 }
 0x57f   :  { %15152 = vmatprep.subr.bf16.mxu0 %v16184_v55 }
 0x581   :  { %15133 = vmatpush3.bf16.msra.mxu1 %v16183_v46 }
 0x582   :  { %15153 = vmatpush3.bf16.msra.mxu0 %v16184_v55  ;;  %15134 = vmatprep.subr.bf16.mxu1 %v16185_v57 }
 0x583   :  { %15154 = vmatprep.subr.bf16.mxu0 %v16186_v59 }
 0x585   :  { %15135 = vmatpush3.bf16.msra.mxu1 %v16185_v57 }
 0x586   :  { %15155 = vmatpush3.bf16.msra.mxu0 %v16186_v59  ;;  %15136 = vmatprep.subr.bf16.mxu1 %v16187_v61 }
 0x587   :  { %15156 = vmatprep.subr.bf16.mxu0 %v16188_v11 }
 0x589   :  { %15137 = vmatpush3.bf16.msra.mxu1 %v16187_v61 }
 0x58a   :  { %15157 = vmatpush3.bf16.msra.mxu0 %v16188_v11  ;;  %15138 = vmatprep.subr.bf16.mxu1 %v16189_v3 }
 0x58b   :  { %15158 = vmatprep.subr.bf16.mxu0 %v16190_v5 }
 0x58d   :  { %15139 = vmatpush3.bf16.msra.mxu1 %v16189_v3 }
 0x58e   :  { %15159 = vmatpush3.bf16.msra.mxu0 %v16190_v5  ;;  %15164 = vmatprep.subr.bf16.mxu1 %v16191_v22 }
 0x58f   :  { %15184 = vmatprep.subr.bf16.mxu0 %v16192_v25 }
 0x590   :  { %15141 = vmatmul.mubr.bf16.vlgmr.msra.gmra.mxu1 %v16878_v45  ;;  %v16196_v45 = vld [vmem:[%s19415_s3 + $0x8e8] sm:$0xff]   ;;  %v14902_v28 = vpop.f32.mrf.mxu1 }
 0x591   :  { %15161 = vmatmul.mubr.bf16.vlgmr.msra.gmra.mxu0 %v16942_v1  ;;  %15165 = vmatpush3.bf16.msra.mxu1 %v16191_v22  ;;  %v16198_v1 = vld [vmem:[%s19415_s3 + $0x8e0] sm:$0xff]   ;;  %v17736_v50 = vpop.f32.mrf.mxu0 }
 0x592   :  { %15180 = vmatprep.mubr.bf16.mxu1 %v16888_v47  ;;  %15185 = vmatpush3.bf16.msra.mxu0 %v16192_v25  ;;  %v16197_v47 = vld [vmem:[%s19415_s3 + $0x7e0] sm:$0xff]  }
 0x593   :  { %15200 = vmatprep.mubr.bf16.mxu0 %v16954_v18  ;;  %15166 = vmatprep.subr.bf16.mxu1 %v16193_v23  ;;  %v16199_v18 = vld [vmem:[%s19415_s3 + $0x7d8] sm:$0xff]   ;;  %v17738_v54 = vpop.f32.mrf.mxu0 }
 0x594   :  { %15186 = vmatprep.subr.bf16.mxu0 %v16194_v27 }
 0x595   :  { %15167 = vmatpush3.bf16.msra.mxu1 %v16193_v23  ;;  %v17740_v4 = vpop.f32.mrf.mxu0 }
 0x596   :  { %15187 = vmatpush3.bf16.msra.mxu0 %v16194_v27  ;;  %15168 = vmatprep.subr.bf16.mxu1 %v16195_v40 }
 0x597   :  { %15188 = vmatprep.subr.bf16.mxu0 %v16196_v45  ;;  %v17744_v44 = vpop.f32.mrf.mxu0 }
 0x599   :  { %15169 = vmatpush3.bf16.msra.mxu1 %v16195_v40 }
 0x59a   :  { %15189 = vmatpush3.bf16.msra.mxu0 %v16196_v45  ;;  %15170 = vmatprep.subr.bf16.mxu1 %v16197_v47 }
 0x59b   :  { %15190 = vmatprep.subr.bf16.mxu0 %v16198_v1 }
 0x59d   :  { %15171 = vmatpush3.bf16.msra.mxu1 %v16197_v47 }
 0x59e   :  { %15191 = vmatpush3.bf16.msra.mxu0 %v16198_v1  ;;  %15172 = vmatprep.subr.bf16.mxu1 %v16199_v18 }
 0x59f   :  { %15192 = vmatprep.subr.bf16.mxu0 %v16200_v14 }
 0x5a1   :  { %15173 = vmatpush3.bf16.msra.mxu1 %v16199_v18 }
 0x5a2   :  { %15193 = vmatpush3.bf16.msra.mxu0 %v16200_v14  ;;  %15174 = vmatprep.subr.bf16.mxu1 %v16201_v19 }
 0x5a3   :  { %15194 = vmatprep.subr.bf16.mxu0 %v16202_v15 }
 0x5a5   :  { %15175 = vmatpush3.bf16.msra.mxu1 %v16201_v19 }
 0x5a6   :  { %15195 = vmatpush3.bf16.msra.mxu0 %v16202_v15  ;;  %15176 = vmatprep.subr.bf16.mxu1 %v16203_v35 }
 0x5a7   :  { %15196 = vmatprep.subr.bf16.mxu0 %v16204_v36 }
 0x5a9   :  { %15177 = vmatpush3.bf16.msra.mxu1 %v16203_v35 }
 0x5aa   :  { %15197 = vmatpush3.bf16.msra.mxu0 %v16204_v36  ;;  %15178 = vmatprep.subr.bf16.mxu1 %v16205_v7 }
 0x5ab   :  { %15198 = vmatprep.subr.bf16.mxu0 %v16206_v37 }
 0x5ad   :  { %15179 = vmatpush3.bf16.msra.mxu1 %v16205_v7 }
 0x5ae   :  { %15199 = vmatpush3.bf16.msra.mxu0 %v16206_v37 }
 0x5b0   :  { %15181 = vmatmul.mubr.bf16.vlgmr.msra.gmra.mxu1 %v16946_v2  ;;  %v3628_v2 = vpop.f32.mrf.mxu1 }
 0x5b1   :  { %15201 = vmatmul.mubr.bf16.vlgmr.msra.gmra.mxu0 %v17004_v31  ;;  %v17748_v55 = vpop.f32.mrf.mxu0 }
 0x5b2   :  { %v14903_v31 = vpop.f32.mrf.mxu1 }
 0x5b3   :  { %v17752_v59 = vpop.f32.mrf.mxu0 }
 0x5b4   :  { %v17742_v8 = vpop.f32.mrf.mxu1  ;;  %19452 = vst [vmem:[#allocation15_spill] sm:$0xff] %v17752_v59 }
 0x5b5   :  { %v17756_v11 = vpop.f32.mrf.mxu0 }
 0x5b6   :  { %v17746_v46 = vpop.f32.mrf.mxu1  ;;  %19453 = vst [vmem:[#allocation16_spill] sm:$0xff] %v17756_v11  ;;  %v1536_v11 = vadd.f32 %v17224_v20, %v1410_v58 }
 0x5b7   :  { %v17760_v5 = vpop.f32.mrf.mxu0 }
 0x5b8   :  { %v17750_v57 = vpop.f32.mrf.mxu1  ;;  %19455 = vst [vmem:[#allocation18_spill] sm:$0xff] %v17760_v5  ;;  %v3515_v5 = vadd.f32 %v3514_v48, %v3417_v16  ;;  %v1654_v58 = vadd.f32 %v17226_v26, %v1536_v11 }
 0x5ba   :  { %v17754_v61 = vpop.f32.mrf.mxu1 }
 0x5bc   :  { %v17758_v3 = vpop.f32.mrf.mxu1 }
 0x5bd   :  { %19454 = vst [vmem:[#allocation17_spill] sm:$0xff] %v17758_v3 }
 0x5d0   :  { %v17762_v22 = vpop.f32.mrf.mxu1 }
 0x5d1   :  { %19456 = vst [vmem:[#allocation19_spill] sm:$0xff] %v17762_v22  ;;  %v17764_v25 = vpop.f32.mrf.mxu0 }
 0x5d2   :  { %19457 = vst [vmem:[#allocation20_spill] sm:$0xff] %v17764_v25  ;;  %v17766_v23 = vpop.f32.mrf.mxu1 }
 0x5d3   :  { %19458 = vst [vmem:[#allocation21_spill] sm:$0xff] %v17766_v23  ;;  %v17768_v27 = vpop.f32.mrf.mxu0 }
 0x5d4   :  { %19459 = vst [vmem:[#allocation22_spill] sm:$0xff] %v17768_v27  ;;  %v17770_v40 = vpop.f32.mrf.mxu1 }
 0x5d5   :  { %19460 = vst [vmem:[#allocation23_spill] sm:$0xff] %v17770_v40  ;;  %v17772_v45 = vpop.f32.mrf.mxu0 }
 0x5d6   :  { %19461 = vst [vmem:[#allocation24_spill] sm:$0xff] %v17772_v45  ;;  %v17774_v47 = vpop.f32.mrf.mxu1 }
 0x5d7   :  { %19462 = vst [vmem:[#allocation25_spill] sm:$0xff] %v17774_v47  ;;  %v17776_v1 = vpop.f32.mrf.mxu0  ;;  %v3523_v47 = vadd.f32 %v14882_v43, %v14862_v38  ;;  %v3646_v38 = vadd.f32 %v14903_v31, %v3526_v10 }
 0x5d8   :  { %19463 = vst [vmem:[#allocation26_spill] sm:$0xff] %v17776_v1 }
 0x5d9   :  { %v3645_v25 = vadd.f32 %v14902_v28, %v3523_v47  ;;  %v3764_v10 = vadd.f32 %v17740_v4, %v3646_v38  ;;  %v19478_v38 = vld [vmem:[#allocation3_spill] sm:$0xff] }
 0x5db   :  { %v3763_v52 = vadd.f32 %v17736_v50, %v3645_v25  ;;  %v3882_v28 = vadd.f32 %v17754_v61, %v3764_v10  ;;  %v19472_v25 = vld [vmem:[#allocation2_spill] sm:$0xff] }
 0x5f0   :  { %v17778_v18 = vpop.f32.mrf.mxu1 }
 0x5f1   :  { %19464 = vst [vmem:[#allocation27_spill] sm:$0xff] %v17778_v18  ;;  %v15042_v14 = vpop.f32.mrf.mxu0 }
 0x5f2   :  { %v17780_v19 = vpop.f32.mrf.mxu1 }
 0x5f3   :  { %19465 = vst [vmem:[#allocation28_spill] sm:$0xff] %v17780_v19  ;;  %v4471_v15 = vpop.f32.mrf.mxu0 }
 0x5f4   :  { %v17782_v35 = vpop.f32.mrf.mxu1 }
 0x5f5   :  { %19466 = vst [vmem:[#allocation29_spill] sm:$0xff] %v17782_v35  ;;  %v15043_v36 = vpop.f32.mrf.mxu0 }
 0x5f6   :  { %v17784_v7 = vpop.f32.mrf.mxu1 }
 0x5f7   :  { %19467 = vst [vmem:[#allocation30_spill] sm:$0xff] %v17784_v7  ;;  %v4474_v37 = vpop.f32.mrf.mxu0  ;;  %v2464_v7 = vadd.f32 %v17454_v12, %v17400_v34  ;;  %v3518_v34 = vadd.f32 %v17734_v51, %v17732_v33  ;;  %v3643_v12 = vadd.f32 %v3628_v2, %v3515_v5 }
 0x5f9   :  { %v3644_v48 = vadd.f32 %v17742_v8, %v3518_v34  ;;  %v3761_v29 = vadd.f32 %v17738_v54, %v3643_v12  ;;  %v19468_v8 = vld [vmem:[#allocation17_spill] sm:$0xff] }
 0x5fb   :  { %v3762_v51 = vadd.f32 %v17744_v44, %v3644_v48  ;;  %v3879_v26 = vadd.f32 %v17750_v57, %v3761_v29  ;;  %v19470_v44 = vld [vmem:[#allocation15_spill] sm:$0xff]  ;;  %v19471_v57 = vld [vmem:[#allocation16_spill] sm:$0xff] }
 0x5fc   :  { %v19483_v29 = vld [vmem:[#allocation24_spill] sm:$0xff] }
 0x5fd   :  { %v3997_v5 = vadd.f32 %v19470_v44, %v3879_v26 }
 0x610   :  { %v15062_v49 = vpop.f32.mrf.mxu1 }
 0x611   :  { %v15082_v56 = vpop.f32.mrf.mxu0  ;;  %v4577_v35 = vadd.f32 %v15062_v49, %v15042_v14  ;;  %v2590_v49 = vadd.f32 %v17456_v13, %v2464_v7  ;;  %v19475_v14 = vld [vmem:[#allocation21_spill] sm:$0xff] }
 0x612   :  { %v4568_v24 = vpop.f32.mrf.mxu1 }
 0x613   :  { %v4682_v60 = vpop.f32.mrf.mxu0  ;;  %v4569_v40 = vadd.f32 %v4568_v24, %v4471_v15  ;;  %v4699_v59 = vadd.f32 %v15082_v56, %v4577_v35  ;;  %v2708_v16 = vadd.f32 %v17510_v9, %v2590_v49  ;;  %v3881_v56 = vadd.f32 %v17746_v46, %v3763_v52  ;;  %v19469_v46 = vld [vmem:[#allocation19_spill] sm:$0xff] }
 0x614   :  { %v15063_v32 = vpop.f32.mrf.mxu1  ;;  %v19476_v15 = vld [vmem:[#allocation23_spill] sm:$0xff] }
 0x615   :  { %v15083_v41 = vpop.f32.mrf.mxu0  ;;  %v4580_v22 = vadd.f32 %v15063_v32, %v15043_v36  ;;  %v4697_v17 = vadd.f32 %v4682_v60, %v4569_v40  ;;  %v1772_v60 = vadd.f32 %v17280_v62, %v1654_v58  ;;  %v2826_v9 = vadd.f32 %v17512_v21, %v2708_v16  ;;  %v19477_v36 = vld [vmem:[#allocation20_spill] sm:$0xff]  ;;  %v19481_v16 = vld [vmem:[#allocation27_spill] sm:$0xff] }
 0x616   :  { %v4571_v6 = vpop.f32.mrf.mxu1  ;;  %v3999_v50 = vadd.f32 %v17748_v55, %v3881_v56 }
 0x617   :  { %v4685_v1 = vpop.f32.mrf.mxu0  ;;  %v4572_v24 = vadd.f32 %v4571_v6, %v4474_v37  ;;  %v4700_v32 = vadd.f32 %v15083_v41, %v4580_v22  ;;  %v2944_v62 = vadd.f32 %v17566_v0, %v2826_v9  ;;  %v4000_v22 = vadd.f32 %v19471_v57, %v3882_v28  ;;  %v19474_v0 = vld [vmem:[#allocation18_spill] sm:$0xff]  ;;  %v19491_v57 = vld [vmem:[#allocation8_spill] sm:$0xff] }
 0x618   :  { %v1890_v40 = vadd.f32 %v19472_v25, %v1772_v60 }
 0x619   :  { %v4698_v6 = vadd.f32 %v4685_v1, %v4572_v24 }
 0x630   :  { %v15102_v30 = vpop.f32.mrf.mxu1 }
 0x631   :  { %v15122_v53 = vpop.f32.mrf.mxu0  ;;  %v4817_v43 = vadd.f32 %v15102_v30, %v4699_v59  ;;  %v4117_v59 = vadd.f32 %v19469_v46, %v3999_v50  ;;  %v19486_v50 = vld [vmem:[#allocation7_spill] sm:$0xff] }
 0x632   :  { %v4800_v45 = vpop.f32.mrf.mxu1 }
 0x633   :  { %v4918_v27 = vpop.f32.mrf.mxu0  ;;  %v4815_v13 = vadd.f32 %v4800_v45, %v4697_v17  ;;  %v4935_v30 = vadd.f32 %v15122_v53, %v4817_v43  ;;  %v3880_v53 = vadd.f32 %v19468_v8, %v3762_v51  ;;  %v19473_v45 = vld [vmem:[#allocation9_spill] sm:$0xff]  ;;  %v4235_v7 = vadd.f32 %v19477_v36, %v4117_v59  ;;  %v19489_v8 = vld [vmem:[#allocation28_spill] sm:$0xff] }
 0x634   :  { %v15103_v19 = vpop.f32.mrf.mxu1  ;;  %v3062_v47 = vadd.f32 %v19473_v45, %v2944_v62  ;;  %v19480_v17 = vld [vmem:[#allocation25_spill] sm:$0xff] }
 0x635   :  { %v15123_v18 = vpop.f32.mrf.mxu0  ;;  %v4818_v33 = vadd.f32 %v15103_v19, %v4700_v32  ;;  %v4933_v2 = vadd.f32 %v4918_v27, %v4815_v13  ;;  %v3998_v1 = vadd.f32 %v19474_v0, %v3880_v53  ;;  %v4115_v19 = vadd.f32 %v19475_v14, %v3997_v5  ;;  %v19482_v13 = vld [vmem:[#allocation22_spill] sm:$0xff]  ;;  %v19490_v59 = vld [vmem:[#allocation29_spill] sm:$0xff] }
 0x636   :  { %v4803_v39 = vpop.f32.mrf.mxu1  ;;  %v17822_v48 = vadd.f32 %v19481_v16, %v4235_v7 }
 0x637   :  { %v4921_v23 = vpop.f32.mrf.mxu0  ;;  %v4816_v54 = vadd.f32 %v4803_v39, %v4698_v6  ;;  %v4936_v21 = vadd.f32 %v15123_v18, %v4818_v33  ;;  %v4118_v18 = vadd.f32 %v19476_v15, %v4000_v22  ;;  %v4116_v24 = vadd.f32 %v19480_v17, %v3998_v1  ;;  %v19484_v6 = vld [vmem:[#allocation4_spill] sm:$0xff]  ;;  %v19495_v15 = vld [vmem:[#allocation5_spill] sm:$0xff] }
 0x639   :  { %v4934_v55 = vadd.f32 %v4921_v23, %v4816_v54  ;;  %v2008_v23 = vadd.f32 %v19478_v38, %v1890_v40  ;;  %v4236_v10 = vadd.f32 %v19483_v29, %v4118_v18  ;;  %v19487_v54 = vld [vmem:[#allocation14_spill] sm:$0xff]  ;;  %v19496_v18 = vld [vmem:[#allocation11_spill] sm:$0xff] }
 0x650   :  { %v15142_v63 = vpop.f32.mrf.mxu1 }
 0x651   :  { %v15162_v3 = vpop.f32.mrf.mxu0  ;;  %v5053_v31 = vadd.f32 %v15142_v63, %v4935_v30  ;;  %v19485_v30 = vld [vmem:[#allocation10_spill] sm:$0xff] }
 0x652   :  { %v5036_v20 = vpop.f32.mrf.mxu1  ;;  %v5421_v33 = vadd.f32 %v19485_v30, %v19484_v6 }
 0x653   :  { %v5154_v42 = vpop.f32.mrf.mxu0  ;;  %v5051_v11 = vadd.f32 %v5036_v20, %v4933_v2  ;;  %v5171_v27 = vadd.f32 %v15162_v3, %v5053_v31  ;;  %v19479_v3 = vld [vmem:[#allocation13_spill] sm:$0xff]  ;;  %v2126_v2 = vadd.f32 %v19486_v50, %v2008_v23 }
 0x654   :  { %v15143_v41 = vpop.f32.mrf.mxu1  ;;  %v3180_v52 = vadd.f32 %v19479_v3, %v3062_v47 }
 0x655   :  { %v15163_v4 = vpop.f32.mrf.mxu0  ;;  %v5054_v39 = vadd.f32 %v15143_v41, %v4936_v21  ;;  %v5169_v37 = vadd.f32 %v5154_v42, %v5051_v11  ;;  %v4233_v42 = vadd.f32 %v19482_v13, %v4115_v19  ;;  %v17843_v21 = vadd.f32 %v19490_v59, %v4236_v10 }
 0x656   :  { %v5039_v61 = vpop.f32.mrf.mxu1  ;;  %v17836_v31 = vadd.f32 %v19487_v54, %v3180_v52  ;;  %v17848_v22 = vadd.f32 %v19491_v57, %v2126_v2 }
 0x657   :  { %v5157_v63 = vpop.f32.mrf.mxu0  ;;  %v5052_v49 = vadd.f32 %v5039_v61, %v4934_v55  ;;  %v5172_v20 = vadd.f32 %v15163_v4, %v5054_v39  ;;  %v19488_v4 = vld [vmem:[#allocation26_spill] sm:$0xff]  ;;  %v17840_v53 = vadd.f32 %v19489_v8, %v4233_v42 }
 0x658   :  { %v4234_v62 = vadd.f32 %v19488_v4, %v4116_v24  ;;  %v19492_v61 = vld [vmem:[#allocation30_spill] sm:$0xff]  ;;  %v5420_v14 = vadd.f32 %v17836_v31, %v17848_v22 }
 0x659   :  { %v5170_v9 = vadd.f32 %v5157_v63, %v5052_v49  ;;  %v19493_v55 = vld [vmem:[#allocation6_spill] sm:$0xff] }
 0x65a   :  { %v17851_v25 = vadd.f32 %v19492_v61, %v4234_v62 }
 0x670   :  { %v15182_v35 = vpop.f32.mrf.mxu1 }
 0x671   :  { %v5289_v34 = vadd.f32 %v15182_v35, %v5171_v27  ;;  %v15202_v12 = vpop.f32.mrf.mxu0  ;;  %v19494_v27 = vld [vmem:[#allocation12_spill] sm:$0xff]  ;;  %v5419_v35 = vadd.f32 %v19496_v18, %v19495_v15 }
 0x672   :  { %v5272_v43 = vpop.f32.mrf.mxu1  ;;  %v5422_v39 = vadd.f32 %v19494_v27, %v19493_v55 }
 0x673   :  { %v17824_v58 = vadd.f32 %v15202_v12, %v5289_v34  ;;  %v5287_v56 = vadd.f32 %v5272_v43, %v5169_v37  ;;  %v5390_v32 = vpop.f32.mrf.mxu0 }
 0x674   :  { %v15183_v60 = vpop.f32.mrf.mxu1 }
 0x675   :  { %v17830_v51 = vadd.f32 %v5390_v32, %v5287_v56  ;;  %v5290_v26 = vadd.f32 %v15183_v60, %v5172_v20  ;;  %v15203_v28 = vpop.f32.mrf.mxu0  ;;  %v5425_v41 = vadd.f32 %v17824_v58, %v17822_v48 }
 0x676   :  { %v5275_v46 = vpop.f32.mrf.mxu1 }
 0x677   :  { %v17845_v11 = vadd.f32 %v15203_v28, %v5290_v26  ;;  %v5288_v44 = vadd.f32 %v5275_v46, %v5170_v9  ;;  %v5429_v5 = vadd.f32 %v5425_v41, %v5421_v33  ;;  %v5393_v40 = vpop.f32.mrf.mxu0  ;;  %v5423_v0 = vadd.f32 %v17830_v51, %v17840_v53 }
 0x679   :  { %v17855_v63 = vadd.f32 %v5393_v40, %v5288_v44  ;;  %v5437_v45 = vsel %vm57_vm0, %v5429_v5, 0.0  ;;  %v5426_v47 = vadd.f32 %v17845_v11, %v17843_v21  ;;  %v5427_v37 = vadd.f32 %v5423_v0, %v5419_v35 }
 0x67a   :  { %5438 = vadd.xlane.f32.xlu1 %v5437_v45 }
 0x67b   :  { %v5430_v1 = vadd.f32 %v5426_v47, %v5422_v39  ;;  %v5424_v19 = vadd.f32 %v17855_v63, %v17851_v25  ;;  %v5431_v34 = vsel %vm57_vm0, %v5427_v37, 0.0 }
 0x67d   :  { %v5440_v36 = vsel %vm57_vm0, %v5430_v1, 0.0  ;;  %v5428_v7 = vadd.f32 %v5424_v19, %v5420_v14 }
 0x67e   :  { %5441 = vadd.xlane.f32.xlu0 %v5440_v36 }
 0x67f   :  { %v5434_v49 = vsel %vm57_vm0, %v5428_v7, 0.0 }
 0x680   :  { %5435 = vadd.xlane.f32.xlu1 %v5434_v49 }
 0x682   :  { %5432 = vadd.xlane.f32.xlu0 %v5431_v34 }
 0x703   :  { %v5439_v12 = vpop.xlane.xlu1 %5438 }
 0x704   :  { %v17871_v38 = vmul.f32 0.0078125, %v5439_v12 }
 0x706   :  { %v5450_v23 = vsub.f32 %v19484_v6, %v17871_v38  ;;  %v5470_v3 = vsub.f32 %v19485_v30, %v17871_v38  ;;  %v5494_v16 = vsub.f32 %v17822_v48, %v17871_v38  ;;  %v5518_v60 = vsub.f32 %v17824_v58, %v17871_v38 }
 0x707   :  { %v5442_v52 = vpop.xlane.xlu0 %5441 }
 0x708   :  { %v17877_v17 = vmul.f32 0.0078125, %v5442_v52  ;;  %v5454_v24 = vmul.f32 %v5450_v23, %v5450_v23  ;;  %v5474_v43 = vmul.f32 %v5470_v3, %v5470_v3  ;;  %v5498_v10 = vmul.f32 %v5494_v16, %v5494_v16 }
 0x709   :  { %v5436_v33 = vpop.xlane.xlu1 %5435  ;;  %v5522_v54 = vmul.f32 %v5518_v60, %v5518_v60 }
 0x70a   :  { %v5462_v20 = vsel %vm57_vm0, %v5454_v24, 0.0  ;;  %v5451_v56 = vsub.f32 %v19493_v55, %v17877_v17  ;;  %v5471_v13 = vsub.f32 %v19494_v27, %v17877_v17  ;;  %v5482_v29 = vsel %vm57_vm0, %v5474_v43, 0.0 }
 0x70b   :  { %5463 = vadd.xlane.f32.xlu0 %v5462_v20  ;;  %v5433_v32 = vpop.xlane.xlu0 %5432  ;;  %v5495_v41 = vsub.f32 %v17843_v21, %v17877_v17  ;;  %v17894_v50 = vmul.f32 0.0078125, %v5436_v33  ;;  %v5506_v2 = vsel %vm57_vm0, %v5498_v10, 0.0  ;;  %v5519_v8 = vsub.f32 %v17845_v11, %v17877_v17 }
 0x70c   :  { %v5455_v42 = vmul.f32 %v5451_v56, %v5451_v56  ;;  %v17889_v9 = vmul.f32 0.0078125, %v5433_v32  ;;  %v5475_v28 = vmul.f32 %v5471_v13, %v5471_v13  ;;  %v5530_v59 = vsel %vm57_vm0, %v5522_v54, 0.0 }
 0x70d   :  { %v5499_v62 = vmul.f32 %v5495_v41, %v5495_v41  ;;  %v5449_v44 = vsub.f32 %v17848_v22, %v17894_v50  ;;  %v5523_v57 = vmul.f32 %v5519_v8, %v5519_v8  ;;  %v5469_v45 = vsub.f32 %v17836_v31, %v17894_v50 }
 0x70e   :  { %v5465_v26 = vsel %vm57_vm0, %v5455_v42, 0.0  ;;  %v5485_v4 = vsel %vm57_vm0, %v5475_v28, 0.0  ;;  %v5448_v46 = vsub.f32 %v19495_v15, %v17889_v9  ;;  %v5468_v40 = vsub.f32 %v19496_v18, %v17889_v9 }
 0x70f   :  { %5466 = vadd.xlane.f32.xlu1 %v5465_v26  ;;  %5483 = vadd.xlane.f32.xlu0 %v5482_v29  ;;  %v5509_v5 = vsel %vm57_vm0, %v5499_v62, 0.0  ;;  %v5453_v39 = vmul.f32 %v5449_v44, %v5449_v44  ;;  %v5533_v47 = vsel %vm57_vm0, %v5523_v57, 0.0  ;;  %v5492_v14 = vsub.f32 %v17840_v53, %v17889_v9 }
 0x710   :  { %v5452_v61 = vmul.f32 %v5448_v46, %v5448_v46  ;;  %v5472_v1 = vmul.f32 %v5468_v40, %v5468_v40  ;;  %v5473_v19 = vmul.f32 %v5469_v45, %v5469_v45  ;;  %v5493_v35 = vsub.f32 %v17851_v25, %v17894_v50 }
 0x711   :  { %v5459_v36 = vsel %vm57_vm0, %v5453_v39, 0.0  ;;  %v5496_v37 = vmul.f32 %v5492_v14, %v5492_v14  ;;  %v5516_v49 = vsub.f32 %v17830_v51, %v17889_v9  ;;  %v5517_v52 = vsub.f32 %v17855_v63, %v17894_v50 }
 0x712   :  { %v5456_v0 = vsel %vm57_vm0, %v5452_v61, 0.0  ;;  %v5476_v7 = vsel %vm57_vm0, %v5472_v1, 0.0  ;;  %v5479_v34 = vsel %vm57_vm0, %v5473_v19, 0.0  ;;  %v5497_v23 = vmul.f32 %v5493_v35, %v5493_v35  ;;  %v13087_v19 = vld [vmem:[%s19413_s6 + $0x50] sm:$0xff] }
 0x713   :  { %5486 = vadd.xlane.f32.xlu1 %v5485_v4  ;;  %5507 = vadd.xlane.f32.xlu0 %v5506_v2  ;;  %v5500_v12 = vsel %vm57_vm0, %v5496_v37, 0.0  ;;  %v5520_v3 = vmul.f32 %v5516_v49, %v5516_v49  ;;  %v5521_v16 = vmul.f32 %v5517_v52, %v5517_v52 }
 0x714   :  { %v5503_v24 = vsel %vm57_vm0, %v5497_v23, 0.0 }
 0x715   :  { %v5524_v43 = vsel %vm57_vm0, %v5520_v3, 0.0  ;;  %v5527_v20 = vsel %vm57_vm0, %v5521_v16, 0.0 }
 0x717   :  { %5510 = vadd.xlane.f32.xlu1 %v5509_v5  ;;  %5531 = vadd.xlane.f32.xlu0 %v5530_v59 }
 0x71b   :  { %5534 = vadd.xlane.f32.xlu1 %v5533_v47  ;;  %5457 = vadd.xlane.f32.xlu0 %v5456_v0 }
 0x71f   :  { %5460 = vadd.xlane.f32.xlu1 %v5459_v36  ;;  %5477 = vadd.xlane.f32.xlu0 %v5476_v7 }
 0x723   :  { %5480 = vadd.xlane.f32.xlu1 %v5479_v34  ;;  %5501 = vadd.xlane.f32.xlu0 %v5500_v12 }
 0x727   :  { %5504 = vadd.xlane.f32.xlu1 %v5503_v24  ;;  %5525 = vadd.xlane.f32.xlu0 %v5524_v43  ;;  %v13085_v24 = vld [vmem:[%s19413_s6 + $0x40] sm:$0xff]  ;;  %v13088_v43 = vld [vmem:[%s19413_s6 + $0x58] sm:$0xff] }
 0x72b   :  { %5528 = vadd.xlane.f32.xlu1 %v5527_v20 }
 0x794   :  { %v5464_v56 = vpop.xlane.xlu0 %5463 }
 0x798   :  { %v5467_v32 = vpop.xlane.xlu1 %5466  ;;  %v5484_v13 = vpop.xlane.xlu0 %5483 }
 0x799   :  { %v5490_v10 = vadd.f32 %v5484_v13, %v5464_v56 }
 0x79c   :  { %v5487_v42 = vpop.xlane.xlu1 %5486  ;;  %v5508_v29 = vpop.xlane.xlu0 %5507 }
 0x79d   :  { %v5514_v60 = vadd.f32 %v5508_v29, %v5490_v10  ;;  %v5491_v4 = vadd.f32 %v5487_v42, %v5467_v32  ;;  %v13086_v32 = vld [vmem:[%s19413_s6 + $0x48] sm:$0xff] }
 0x7a0   :  { %v5511_v33 = vpop.xlane.xlu1 %5510  ;;  %v5532_v26 = vpop.xlane.xlu0 %5531 }
 0x7a1   :  { %v5538_v28 = vadd.f32 %v5532_v26, %v5514_v60  ;;  %v5515_v8 = vadd.f32 %v5511_v33, %v5491_v4  ;;  %v13092_v60 = vld [vmem:[%s19413_s6 + $0x78] sm:$0xff]  ;;  %v13091_v33 = vld [vmem:[%s19413_s6 + $0x70] sm:$0xff] }
 0x7a3   :  { %v5542_v41 = vmul.f32 0.0078125, %v5538_v28 }
 0x7a4   :  { %v5535_v2 = vpop.xlane.xlu1 %5534  ;;  %v5458_v54 = vpop.xlane.xlu0 %5457 }
 0x7a5   :  { %v5546_v62 = vadd.f32 1e-05, %v5542_v41  ;;  %v5539_v44 = vadd.f32 %v5535_v2, %v5515_v8 }
 0x7a7   :  { %16323 = vrsqrt.f32 %v5546_v62  ;;  %v5543_v61 = vmul.f32 0.0078125, %v5539_v44 }
 0x7a8   :  { %v5461_v46 = vpop.xlane.xlu1 %5460  ;;  %v5478_v59 = vpop.xlane.xlu0 %5477 }
 0x7a9   :  { %v5488_v40 = vadd.f32 %v5478_v59, %v5458_v54  ;;  %v5547_v0 = vadd.f32 1e-05, %v5543_v61 }
 0x7ab   :  { %16325 = vrsqrt.f32 %v5547_v0 }
 0x7ac   :  { %v5481_v5 = vpop.xlane.xlu1 %5480  ;;  %v5502_v57 = vpop.xlane.xlu0 %5501 }
 0x7ad   :  { %v5512_v39 = vadd.f32 %v5502_v57, %v5488_v40  ;;  %v5489_v1 = vadd.f32 %v5481_v5, %v5461_v46 }
 0x7b0   :  { %v5505_v45 = vpop.xlane.xlu1 %5504  ;;  %v5526_v47 = vpop.xlane.xlu0 %5525 }
 0x7b1   :  { %v5536_v14 = vadd.f32 %v5526_v47, %v5512_v39  ;;  %v5513_v35 = vadd.f32 %v5505_v45, %v5489_v1 }
 0x7b3   :  { %v5540_v36 = vmul.f32 0.0078125, %v5536_v14 }
 0x7b4   :  { %v16324_v7 = vpop.eup %16323  ;;  %v5529_v37 = vpop.xlane.xlu1 %5528 }
 0x7b5   :  { %v5544_v49 = vadd.f32 1e-05, %v5540_v36  ;;  %v5537_v34 = vadd.f32 %v5529_v37, %v5513_v35  ;;  %v5554_v12 = vmul.f32 %v16324_v7, %v13087_v19 }
 0x7b7   :  { %16327 = vrsqrt.f32 %v5544_v49  ;;  %v5541_v23 = vmul.f32 0.0078125, %v5537_v34  ;;  %5576 = vperm.xlu0 %15889, %v5554_v12   ;;  %v5558_v10 = vmul.f32 %v5554_v12, %v17871_v38  ;;  %v13090_v38 = vld [vmem:[%s19413_s6 + $0x68] sm:$0xff] }
 0x7b8   :  { %v16326_v52 = vpop.eup %16325 }
 0x7b9   :  { %v5545_v3 = vadd.f32 1e-05, %v5541_v23  ;;  %v5555_v56 = vmul.f32 %v16326_v52, %v13088_v43  ;;  %v5562_v28 = vsub.f32 %v13091_v33, %v5558_v10 }
 0x7bb   :  { %16329 = vrsqrt.f32 %v5545_v3  ;;  %v5559_v29 = vmul.f32 %v5555_v56, %v17877_v17  ;;  %v13089_v17 = vld [vmem:[%s19413_s6 + $0x60] sm:$0xff] }
 0x7bd   :  { %v5563_v26 = vsub.f32 %v13092_v60, %v5559_v29 }
 0x7c4   :  { %v16328_v16 = vpop.eup %16327 }
 0x7c5   :  { %v5552_v20 = vmul.f32 %v16328_v16, %v13085_v24 }
 0x7c7   :  { %5566 = vperm.xlu1 %15890, %v5552_v20   ;;  %v5556_v2 = vmul.f32 %v5552_v20, %v17889_v9  ;;  %v16208_v9 = vld [vmem:[%s19414_s2 + $0xa0] sm:$0xff]  }
 0x7c8   :  { %v16330_v13 = vpop.eup %16329  ;;  %15216 = vmatprep.mubr.msk.bf16.mxu0 %vm57_vm0, %v16208_v9 }
 0x7c9   :  { %v5553_v42 = vmul.f32 %v16330_v13, %v13086_v32  ;;  %v5560_v4 = vsub.f32 %v13089_v17, %v5556_v2 }
 0x7cb   :  { %5571 = vperm.xlu0 %15889, %v5553_v42   ;;  %5581 = vperm.xlu1 %15890, %v5555_v56   ;;  %v5557_v41 = vmul.f32 %v5553_v42, %v17894_v50  ;;  %v16207_v50 = vld [vmem:[%s19414_s2 + $0x90] sm:$0xff]  }
 0x7cc   :  { %15208 = vmatprep.mubr.msk.bf16.mxu1 %vm57_vm0, %v16207_v50 }
 0x7cd   :  { %v5561_v54 = vsub.f32 %v13090_v38, %v5557_v41 }
 0x7cf   :  { %5605 = vperm.xlu0 %15889, %v5563_v26   ;;  %5600 = vperm.xlu1 %15890, %v5562_v28  }
 0x7d3   :  { %5595 = vperm.xlu0 %15889, %v5561_v54   ;;  %5590 = vperm.xlu1 %15890, %v5560_v4  }
 0x832   :  { %v5577_v62 = vpop.permute.xlu0 %5576 }
 0x833   :  { %v5586_v44 = vmul.f32 %v5577_v62, %v19484_v6  ;;  %v5618_v5 = vmul.f32 %v5577_v62, %v19485_v30  ;;  %v5630_v57 = vmul.f32 %v5577_v62, %v17822_v48  ;;  %v5642_v61 = vmul.f32 %v5577_v62, %v17824_v58 }
 0x842   :  { %v5567_v8 = vpop.permute.xlu1 %5566 }
 0x843   :  { %v5584_v40 = vmul.f32 %v5567_v8, %v19495_v15  ;;  %v5616_v39 = vmul.f32 %v5567_v8, %v19496_v18  ;;  %v5628_v45 = vmul.f32 %v5567_v8, %v17840_v53  ;;  %v5640_v47 = vmul.f32 %v5567_v8, %v17830_v51 }
 0x846   :  { %v5582_v46 = vpop.permute.xlu1 %5581  ;;  %v5572_v59 = vpop.permute.xlu0 %5571 }
 0x847   :  { %v5587_v0 = vmul.f32 %v5582_v46, %v19493_v55  ;;  %v5619_v1 = vmul.f32 %v5582_v46, %v19494_v27  ;;  %v5631_v6 = vmul.f32 %v5582_v46, %v17843_v21  ;;  %v5643_v30 = vmul.f32 %v5582_v46, %v17845_v11 }
 0x848   :  { %v5585_v48 = vmul.f32 %v5572_v59, %v17848_v22  ;;  %v5617_v58 = vmul.f32 %v5572_v59, %v17836_v31  ;;  %v5629_v15 = vmul.f32 %v5572_v59, %v17851_v25  ;;  %v5641_v18 = vmul.f32 %v5572_v59, %v17855_v63 }
 0x84a   :  { %v5601_v14 = vpop.permute.xlu1 %5600  ;;  %v5606_v53 = vpop.permute.xlu0 %5605 }
 0x84b   :  { %v5610_v19 = vadd.f32 %v5601_v14, %v5586_v44  ;;  %v5622_v51 = vadd.f32 %v5618_v5, %v5601_v14  ;;  %v5634_v35 = vadd.f32 %v5630_v57, %v5601_v14  ;;  %v5646_v55 = vadd.f32 %v5642_v61, %v5601_v14  ;;  %v16209_v57 = vld [vmem:[%s19414_s2 + $0x98] sm:$0xff]   ;;  %v16210_v61 = vld [vmem:[%s19414_s2 + $0xa8] sm:$0xff]   ;;  %v16223_v14 = vld [vmem:[%s19414_s2 + $0x110] sm:$0xff]  }
 0x84c   :  { %v5611_v36 = vadd.f32 %v5606_v53, %v5587_v0  ;;  %v5623_v27 = vadd.f32 %v5619_v1, %v5606_v53  ;;  %v5635_v7 = vadd.f32 %v5631_v6, %v5606_v53  ;;  %v5647_v21 = vadd.f32 %v5643_v30, %v5606_v53  ;;  %v16215_v0 = vld [vmem:[%s19414_s2 + $0xd0] sm:$0xff]   ;;  %v16216_v1 = vld [vmem:[%s19414_s2 + $0xe0] sm:$0xff]   ;;  %v16217_v6 = vld [vmem:[%s19414_s2 + $0xd8] sm:$0xff]  }
 0x84d   :  { %v5614_v37 = vmax.f32 %v5610_v19, 0.0  ;;  %v5626_v11 = vmax.f32 %v5622_v51, 0.0  ;;  %v5638_v49 = vmax.f32 %v5634_v35, 0.0  ;;  %v5650_v22 = vmax.f32 %v5646_v55, 0.0  ;;  %v16218_v30 = vld [vmem:[%s19414_s2 + $0xe8] sm:$0xff]   ;;  %v16224_v53 = vld [vmem:[%s19414_s2 + $0x118] sm:$0xff]  }
 0x84e   :  { %v5615_v34 = vmax.f32 %v5611_v36, 0.0  ;;  %v5627_v31 = vmax.f32 %v5623_v27, 0.0  ;;  %v5639_v12 = vmax.f32 %v5635_v7, 0.0  ;;  %v5651_v25 = vmax.f32 %v5647_v21, 0.0  ;;  %v5591_v23 = vpop.permute.xlu1 %5590  ;;  %v5596_v63 = vpop.permute.xlu0 %5595  ;;  %v16225_v19 = vld [vmem:[%s19416_s4 + $0x48] sm:$0xff]   ;;  %v16227_v35 = vld [vmem:[%s19416_s4 + $0x40] sm:$0xff]  }
 0x84f   :  { %v5654_v3 = vmax.f32 %v5614_v37, %v5626_v11  ;;  %v5658_v52 = vmax.f32 %v5638_v49, %v5650_v22  ;;  %v5608_v24 = vadd.f32 %v5591_v23, %v5584_v40  ;;  %v5620_v43 = vadd.f32 %v5616_v39, %v5591_v23  ;;  %v16211_v40 = vld [vmem:[%s19414_s2 + $0xb0] sm:$0xff]   ;;  %v16212_v39 = vld [vmem:[%s19414_s2 + $0xc0] sm:$0xff]   ;;  %v16226_v51 = vld [vmem:[%s19416_s4 + $0x8] sm:$0xff]  }
 0x850   :  { %v5655_v16 = vmax.f32 %v5615_v34, %v5627_v31  ;;  %v5659_v20 = vmax.f32 %v5639_v12, %v5651_v25  ;;  %v5632_v56 = vadd.f32 %v5628_v45, %v5591_v23  ;;  %v5644_v32 = vadd.f32 %v5640_v47, %v5591_v23  ;;  %v16213_v45 = vld [vmem:[%s19414_s2 + $0xb8] sm:$0xff]   ;;  %v16214_v47 = vld [vmem:[%s19414_s2 + $0xc8] sm:$0xff]   ;;  %v16228_v55 = vld [vmem:[%s19416_s4] sm:$0xff]  }
 0x851   :  { %v5662_v13 = vmax.f32 %v5654_v3, %v5658_v52  ;;  %v5612_v42 = vmax.f32 %v5608_v24, 0.0  ;;  %v5624_v29 = vmax.f32 %v5620_v43, 0.0  ;;  %v5609_v10 = vadd.f32 %v5596_v63, %v5585_v48  ;;  %v16219_v48 = vld [vmem:[%s19414_s2 + $0xf0] sm:$0xff]   ;;  %v16229_v36 = vld [vmem:[%s19416_s4 + $0x88] sm:$0xff]   ;;  %v16231_v24 = vld [vmem:[%s19416_s4 + $0x80] sm:$0xff]  }
 0x852   :  { %v5663_v60 = vmax.f32 %v5655_v16, %v5659_v20  ;;  %v5636_v33 = vmax.f32 %v5632_v56, 0.0  ;;  %v5648_v26 = vmax.f32 %v5644_v32, 0.0  ;;  %v5621_v28 = vadd.f32 %v5617_v58, %v5596_v63  ;;  %v16220_v58 = vld [vmem:[%s19414_s2 + $0x100] sm:$0xff]   ;;  %v16230_v27 = vld [vmem:[%s19416_s4 + $0xc8] sm:$0xff]  }
 0x853   :  { %v5652_v41 = vmax.f32 %v5612_v42, %v5624_v29  ;;  %v5613_v2 = vmax.f32 %v5609_v10, 0.0  ;;  %v5633_v38 = vadd.f32 %v5629_v15, %v5596_v63  ;;  %v5645_v17 = vadd.f32 %v5641_v18, %v5596_v63  ;;  %v16221_v15 = vld [vmem:[%s19414_s2 + $0xf8] sm:$0xff]   ;;  %v16222_v18 = vld [vmem:[%s19414_s2 + $0x108] sm:$0xff]   ;;  %v16232_v43 = vld [vmem:[%s19416_s4 + $0xc0] sm:$0xff]  }
 0x854   :  { %v17979_v54 = vpack.c.bf16 %v5663_v60, %v5662_v13  ;;  %v5656_v4 = vmax.f32 %v5636_v33, %v5648_v26  ;;  %v5625_v50 = vmax.f32 %v5621_v28, 0.0  ;;  %v16233_v13 = vld [vmem:[%s19416_s4 + $0x108] sm:$0xff]  }
 0x855   :  { %v5637_v9 = vmax.f32 %v5633_v38, 0.0  ;;  %v5649_v62 = vmax.f32 %v5645_v17, 0.0  ;;  %v16234_v42 = vld [vmem:[%s19416_s4 + $0x148] sm:$0xff]   ;;  %v16235_v38 = vld [vmem:[%s19416_s4 + $0x100] sm:$0xff]  }
 0x856   :  { %v5653_v8 = vmax.f32 %v5613_v2, %v5625_v50  ;;  %15204 = vmatprep.subr.bf16.mxu1 %v17979_v54  ;;  %15212 = vmatprep.subr.bf16.mxu0 %v17979_v54  ;;  %v5660_v46 = vmax.f32 %v5652_v41, %v5656_v4  ;;  %v16236_v17 = vld [vmem:[%s19416_s4 + $0x140] sm:$0xff]  }
 0x857   :  { %v5657_v59 = vmax.f32 %v5637_v9, %v5649_v62  ;;  %15205 = vmatpush3.bf16.msra.mxu1 %v17979_v54  ;;  %15213 = vmatpush3.bf16.msra.mxu0 %v17979_v54  ;;  %v16237_v62 = vld [vmem:[%s19416_s4 + $0x188] sm:$0xff]  }
 0x859   :  { %v5661_v44 = vmax.f32 %v5653_v8, %v5657_v59  ;;  %v16238_v8 = vld [vmem:[%s19416_s4 + $0x1c8] sm:$0xff]  }
 0x85b   :  { %v5664_v5 = vpack.c.bf16 %v5661_v44, %v5660_v46 }
 0x85d   :  { %15206 = vmatprep.subr.bf16.mxu1 %v5664_v5  ;;  %15214 = vmatprep.subr.bf16.mxu0 %v5664_v5 }
 0x85e   :  { %15207 = vmatpush3.bf16.msra.mxu1 %v5664_v5  ;;  %15215 = vmatpush3.bf16.msra.mxu0 %v5664_v5 }
 0x85f   :  { %15220 = vmatprep.subr.bf16.mxu1 %v17979_v54  ;;  %15228 = vmatprep.subr.bf16.mxu0 %v17979_v54 }
 0x861   :  { %15209 = vmatmul.mubr.msk.bf16.vlgmr.msra.gmra.mxu1 %vm57_vm0, %v16209_v57  ;;  %15217 = vmatmul.mubr.msk.bf16.vlgmr.msra.gmra.mxu0 %vm57_vm0, %v16210_v61 }
 0x862   :  { %15221 = vmatpush3.bf16.msra.mxu1 %v17979_v54  ;;  %15229 = vmatpush3.bf16.msra.mxu0 %v17979_v54 }
 0x863   :  { %15222 = vmatprep.subr.bf16.mxu1 %v5664_v5  ;;  %15230 = vmatprep.subr.bf16.mxu0 %v5664_v5 }
 0x864   :  { %15224 = vmatprep.mubr.msk.bf16.mxu1 %vm57_vm0, %v16211_v40  ;;  %15232 = vmatprep.mubr.msk.bf16.mxu0 %vm57_vm0, %v16212_v39 }
 0x866   :  { %15223 = vmatpush3.bf16.msra.mxu1 %v5664_v5  ;;  %15231 = vmatpush3.bf16.msra.mxu0 %v5664_v5 }
 0x867   :  { %15236 = vmatprep.subr.bf16.mxu1 %v17979_v54  ;;  %15244 = vmatprep.subr.bf16.mxu0 %v17979_v54 }
 0x869   :  { %15225 = vmatmul.mubr.msk.bf16.vlgmr.msra.gmra.mxu1 %vm57_vm0, %v16213_v45  ;;  %15233 = vmatmul.mubr.msk.bf16.vlgmr.msra.gmra.mxu0 %vm57_vm0, %v16214_v47  ;;  %v16239_v45 = vld [vmem:[%s19416_s4 + $0x180] sm:$0xff]  }
 0x86a   :  { %15237 = vmatpush3.bf16.msra.mxu1 %v17979_v54  ;;  %15245 = vmatpush3.bf16.msra.mxu0 %v17979_v54  ;;  %v16240_v47 = vld [vmem:[%s19416_s4 + $0x1c0] sm:$0xff]  }
 0x86b   :  { %15238 = vmatprep.subr.bf16.mxu1 %v5664_v5  ;;  %15246 = vmatprep.subr.bf16.mxu0 %v5664_v5 }
 0x86c   :  { %15240 = vmatprep.mubr.msk.bf16.mxu1 %vm57_vm0, %v16215_v0  ;;  %15248 = vmatprep.mubr.msk.bf16.mxu0 %vm57_vm0, %v16216_v1 }
 0x86e   :  { %15239 = vmatpush3.bf16.msra.mxu1 %v5664_v5  ;;  %15247 = vmatpush3.bf16.msra.mxu0 %v5664_v5 }
 0x86f   :  { %15252 = vmatprep.subr.bf16.mxu1 %v17979_v54  ;;  %15260 = vmatprep.subr.bf16.mxu0 %v17979_v54 }
 0x871   :  { %15241 = vmatmul.mubr.msk.bf16.vlgmr.msra.gmra.mxu1 %vm57_vm0, %v16217_v6  ;;  %15249 = vmatmul.mubr.msk.bf16.vlgmr.msra.gmra.mxu0 %vm57_vm0, %v16218_v30 }
 0x872   :  { %15253 = vmatpush3.bf16.msra.mxu1 %v17979_v54  ;;  %15261 = vmatpush3.bf16.msra.mxu0 %v17979_v54 }
 0x873   :  { %15254 = vmatprep.subr.bf16.mxu1 %v5664_v5  ;;  %15262 = vmatprep.subr.bf16.mxu0 %v5664_v5 }
 0x874   :  { %15256 = vmatprep.mubr.msk.bf16.mxu1 %vm57_vm0, %v16219_v48  ;;  %15264 = vmatprep.mubr.msk.bf16.mxu0 %vm57_vm0, %v16220_v58  ;;  %v16241_v48 = vld [vmem:[%s19416_s4 + $0x208] sm:$0xff]   ;;  %v16242_v58 = vld [vmem:[%s19416_s4 + $0x58] sm:$0xff]  }
 0x876   :  { %15255 = vmatpush3.bf16.msra.mxu1 %v5664_v5  ;;  %15263 = vmatpush3.bf16.msra.mxu0 %v5664_v5 }
 0x877   :  { %15268 = vmatprep.subr.bf16.mxu1 %v17979_v54  ;;  %15276 = vmatprep.subr.bf16.mxu0 %v16225_v19 }
 0x879   :  { %15257 = vmatmul.mubr.msk.bf16.vlgmr.msra.gmra.mxu1 %vm57_vm0, %v16221_v15  ;;  %15265 = vmatmul.mubr.msk.bf16.vlgmr.msra.gmra.mxu0 %vm57_vm0, %v16222_v18 }
 0x87a   :  { %15269 = vmatpush3.bf16.msra.mxu1 %v17979_v54  ;;  %15272 = vmatprep.mubr.msk.bf16.mxu1 %vm57_vm0, %v16223_v14 }
 0x87b   :  { %15270 = vmatprep.subr.bf16.mxu1 %v5664_v5  ;;  %15277 = vmatpush3.bf16.msra.mxu0 %v16225_v19 }
 0x87c   :  { %15278 = vmatprep.subr.bf16.mxu0 %v16227_v35 }
 0x87e   :  { %15271 = vmatpush3.bf16.msra.mxu1 %v5664_v5 }
 0x87f   :  { %15284 = vmatprep.subr.bf16.mxu1 %v16226_v51  ;;  %15279 = vmatpush3.bf16.msra.mxu0 %v16227_v35 }
 0x880   :  { %15292 = vmatprep.subr.bf16.mxu0 %v16229_v36 }
 0x881   :  { %15273 = vmatmul.mubr.msk.bf16.vlgmr.msra.gmra.mxu1 %vm57_vm0, %v16224_v53 }
 0x882   :  { %15285 = vmatpush3.bf16.msra.mxu1 %v16226_v51 }
 0x883   :  { %15286 = vmatprep.subr.bf16.mxu1 %v16228_v55 }
 0x886   :  { %15287 = vmatpush3.bf16.msra.mxu1 %v16228_v55  ;;  %v16243_v55 = vld [vmem:[%s19416_s4 + $0x200] sm:$0xff]  }
 0x887   :  { %15300 = vmatprep.subr.bf16.mxu1 %v16230_v27 }
 0x921   :  { %v15210_v7 = vpop.f32.mrf.mxu1  ;;  %v15218_v21 = vpop.f32.mrf.mxu0 }
 0x923   :  { %v5721_v37 = vpop.f32.mrf.mxu1  ;;  %v5793_v11 = vpop.f32.mrf.mxu0 }
 0x925   :  { %v15211_v49 = vpop.f32.mrf.mxu1  ;;  %v15219_v22 = vpop.f32.mrf.mxu0 }
 0x926   :  { %v18085_v23 = vpack.c.bf16 %v15211_v49, %v15210_v7  ;;  %v18087_v63 = vpack.c.bf16 %v15219_v22, %v15218_v21  ;;  %v16245_v21 = vld [vmem:[%s19416_s4 + $0x18] sm:$0xff]  }
 0x927   :  { %v5724_v34 = vpop.f32.mrf.mxu1  ;;  %v5796_v31 = vpop.f32.mrf.mxu0 }
 0x928   :  { %v18081_v12 = vpack.c.bf16 %v5724_v34, %v5721_v37  ;;  %v18083_v25 = vpack.c.bf16 %v5796_v31, %v5793_v11  ;;  %v16246_v37 = vld [vmem:[%s19416_s4 + $0x98] sm:$0xff]   ;;  %v16247_v34 = vld [vmem:[%s19416_s4 + $0x10] sm:$0xff]  }
 0x929   :  { %v15226_v3 = vpop.f32.mrf.mxu1  ;;  %v15234_v52 = vpop.f32.mrf.mxu0  ;;  %v16248_v31 = vld [vmem:[%s19416_s4 + $0x90] sm:$0xff]  }
 0x92a   :  { %15280 = vmatprep.mubr.msk.bf16.mxu0 %vm57_vm0, %v18083_v25  ;;  %15288 = vmatprep.mubr.msk.bf16.mxu1 %vm57_vm0, %v18081_v12 }
 0x92b   :  { %v5865_v16 = vpop.f32.mrf.mxu1  ;;  %v5937_v20 = vpop.f32.mrf.mxu0  ;;  %15281 = vmatmul.mubr.msk.bf16.vlgmr.msra.gmra.mxu0 %vm57_vm0, %v18087_v63  ;;  %15289 = vmatmul.mubr.msk.bf16.vlgmr.msra.gmra.mxu1 %vm57_vm0, %v18085_v23 }
 0x92c   :  { %15293 = vmatpush3.bf16.msra.mxu0 %v16229_v36  ;;  %15301 = vmatpush3.bf16.msra.mxu1 %v16230_v27  ;;  %v16244_v36 = vld [vmem:[%s19416_s4 + $0x50] sm:$0xff]  }
 0x92d   :  { %v15227_v56 = vpop.f32.mrf.mxu1  ;;  %v15235_v32 = vpop.f32.mrf.mxu0  ;;  %15294 = vmatprep.subr.bf16.mxu0 %v16231_v24  ;;  %15302 = vmatprep.subr.bf16.mxu1 %v16232_v43 }
 0x92e   :  { %v18113_v26 = vpack.c.bf16 %v15227_v56, %v15226_v3  ;;  %v18115_v28 = vpack.c.bf16 %v15235_v32, %v15234_v52  ;;  %v16249_v3 = vld [vmem:[%s19416_s4 + $0xd8] sm:$0xff]   ;;  %v16255_v56 = vld [vmem:[%s19416_s4 + $0x150] sm:$0xff]  }
 0x92f   :  { %v5868_v29 = vpop.f32.mrf.mxu1  ;;  %v5940_v10 = vpop.f32.mrf.mxu0  ;;  %v16250_v52 = vld [vmem:[%s19416_s4 + $0x118] sm:$0xff]   ;;  %v16256_v32 = vld [vmem:[%s19416_s4 + $0x190] sm:$0xff]  }
 0x930   :  { %v18109_v60 = vpack.c.bf16 %v5868_v29, %v5865_v16  ;;  %v18111_v33 = vpack.c.bf16 %v5940_v10, %v5937_v20  ;;  %15295 = vmatpush3.bf16.msra.mxu0 %v16231_v24  ;;  %15303 = vmatpush3.bf16.msra.mxu1 %v16232_v43  ;;  %v16251_v24 = vld [vmem:[%s19416_s4 + $0xd0] sm:$0xff]   ;;  %v16253_v16 = vld [vmem:[%s19416_s4 + $0x158] sm:$0xff]  }
 0x931   :  { %v15242_v41 = vpop.f32.mrf.mxu1  ;;  %v15250_v2 = vpop.f32.mrf.mxu0  ;;  %15308 = vmatprep.subr.bf16.mxu0 %v16233_v13  ;;  %15316 = vmatprep.subr.bf16.mxu1 %v16234_v42  ;;  %v16252_v43 = vld [vmem:[%s19416_s4 + $0x110] sm:$0xff]   ;;  %v16254_v20 = vld [vmem:[%s19416_s4 + $0x198] sm:$0xff]  }
 0x932   :  { %15296 = vmatprep.mubr.msk.bf16.mxu0 %vm57_vm0, %v18109_v60  ;;  %15304 = vmatprep.mubr.msk.bf16.mxu1 %vm57_vm0, %v18111_v33  ;;  %v16259_v29 = vld [vmem:[%s19416_s4 + $0x1d0] sm:$0xff]  }
 0x933   :  { %v6009_v54 = vpop.f32.mrf.mxu1  ;;  %v6081_v4 = vpop.f32.mrf.mxu0  ;;  %15297 = vmatmul.mubr.msk.bf16.vlgmr.msra.gmra.mxu0 %vm57_vm0, %v18113_v26  ;;  %15305 = vmatmul.mubr.msk.bf16.vlgmr.msra.gmra.mxu1 %vm57_vm0, %v18115_v28  ;;  %v16260_v10 = vld [vmem:[%s19416_s4 + $0x210] sm:$0xff]  }
 0x934   :  { %15309 = vmatpush3.bf16.msra.mxu0 %v16233_v13  ;;  %15317 = vmatpush3.bf16.msra.mxu1 %v16234_v42  ;;  %v16257_v13 = vld [vmem:[%s19416_s4 + $0x1d8] sm:$0xff]  }
 0x935   :  { %v15243_v50 = vpop.f32.mrf.mxu1  ;;  %v15251_v9 = vpop.f32.mrf.mxu0  ;;  %15310 = vmatprep.subr.bf16.mxu0 %v16235_v38  ;;  %15318 = vmatprep.subr.bf16.mxu1 %v16236_v17  ;;  %v16258_v42 = vld [vmem:[%s19416_s4 + $0x218] sm:$0xff]  }
 0x936   :  { %v18141_v57 = vpack.c.bf16 %v15243_v50, %v15242_v41  ;;  %v18143_v61 = vpack.c.bf16 %v15251_v9, %v15250_v2  ;;  %v16261_v41 = vld [vmem:[%s19416_s4 + $0x68] sm:$0xff]   ;;  %v16267_v50 = vld [vmem:[%s19416_s4 + $0xa0] sm:$0xff]  }
 0x937   :  { %v6012_v46 = vpop.f32.mrf.mxu1  ;;  %v6084_v59 = vpop.f32.mrf.mxu0  ;;  %v16262_v2 = vld [vmem:[%s19416_s4 + $0x28] sm:$0xff]   ;;  %v16268_v9 = vld [vmem:[%s19416_s4 + $0xe0] sm:$0xff]  }
 0x938   :  { %v18137_v44 = vpack.c.bf16 %v6012_v46, %v6009_v54  ;;  %v18139_v5 = vpack.c.bf16 %v6084_v59, %v6081_v4  ;;  %15311 = vmatpush3.bf16.msra.mxu0 %v16235_v38  ;;  %15319 = vmatpush3.bf16.msra.mxu1 %v16236_v17  ;;  %v16263_v38 = vld [vmem:[%s19416_s4 + $0x60] sm:$0xff]   ;;  %v16265_v54 = vld [vmem:[%s19416_s4 + $0xa8] sm:$0xff]  }
 0x939   :  { %v15258_v40 = vpop.f32.mrf.mxu1  ;;  %v15266_v39 = vpop.f32.mrf.mxu0  ;;  %15324 = vmatprep.subr.bf16.mxu0 %v16237_v62  ;;  %15332 = vmatprep.subr.bf16.mxu1 %v16238_v8  ;;  %v16264_v17 = vld [vmem:[%s19416_s4 + $0x20] sm:$0xff]   ;;  %v16266_v4 = vld [vmem:[%s19416_s4 + $0xe8] sm:$0xff]  }
 0x93a   :  { %15312 = vmatprep.mubr.msk.bf16.mxu0 %vm57_vm0, %v18137_v44  ;;  %15320 = vmatprep.mubr.msk.bf16.mxu1 %vm57_vm0, %v18139_v5  ;;  %v16271_v46 = vld [vmem:[%s19416_s4 + $0x120] sm:$0xff]  }
 0x93b   :  { %v6153_v0 = vpop.f32.mrf.mxu1  ;;  %v6225_v1 = vpop.f32.mrf.mxu0  ;;  %15313 = vmatmul.mubr.msk.bf16.vlgmr.msra.gmra.mxu0 %vm57_vm0, %v18141_v57  ;;  %15321 = vmatmul.mubr.msk.bf16.vlgmr.msra.gmra.mxu1 %vm57_vm0, %v18143_v61  ;;  %v16272_v59 = vld [vmem:[%s19416_s4 + $0x160] sm:$0xff]  }
 0x93c   :  { %15325 = vmatpush3.bf16.msra.mxu0 %v16237_v62  ;;  %15333 = vmatpush3.bf16.msra.mxu1 %v16238_v8  ;;  %v16269_v62 = vld [vmem:[%s19416_s4 + $0x128] sm:$0xff]  }
 0x93d   :  { %v15259_v6 = vpop.f32.mrf.mxu1  ;;  %v15267_v30 = vpop.f32.mrf.mxu0  ;;  %15326 = vmatprep.subr.bf16.mxu0 %v16239_v45  ;;  %15334 = vmatprep.subr.bf16.mxu1 %v16240_v47  ;;  %v16270_v8 = vld [vmem:[%s19416_s4 + $0x168] sm:$0xff]  }
 0x93e   :  { %v18169_v19 = vpack.c.bf16 %v15259_v6, %v15258_v40  ;;  %v18171_v51 = vpack.c.bf16 %v15267_v30, %v15266_v39  ;;  %v16273_v40 = vld [vmem:[%s19416_s4 + $0x1a8] sm:$0xff]   ;;  %v16279_v6 = vld [vmem:[%s19416_s4 + $0x220] sm:$0xff]   ;;  %v16280_v30 = vld [vmem:[%s19416_s4 + $0x70] sm:$0xff]  }
 0x93f   :  { %v6156_v15 = vpop.f32.mrf.mxu1  ;;  %v6228_v18 = vpop.f32.mrf.mxu0  ;;  %v16274_v39 = vld [vmem:[%s19416_s4 + $0x1e8] sm:$0xff]  }
 0x940   :  { %v18165_v14 = vpack.c.bf16 %v6156_v15, %v6153_v0  ;;  %v18167_v53 = vpack.c.bf16 %v6228_v18, %v6225_v1  ;;  %15327 = vmatpush3.bf16.msra.mxu0 %v16239_v45  ;;  %15335 = vmatpush3.bf16.msra.mxu1 %v16240_v47  ;;  %v16275_v45 = vld [vmem:[%s19416_s4 + $0x1a0] sm:$0xff]   ;;  %v16277_v0 = vld [vmem:[%s19416_s4 + $0x228] sm:$0xff]   ;;  %v16278_v1 = vld [vmem:[%s19416_s4 + $0x78] sm:$0xff]  }
 0x941   :  { %v15274_v35 = vpop.f32.mrf.mxu1  ;;  %15340 = vmatprep.subr.bf16.mxu0 %v16241_v48  ;;  %15348 = vmatprep.subr.bf16.mxu1 %v16242_v58  ;;  %v16276_v47 = vld [vmem:[%s19416_s4 + $0x1e0] sm:$0xff]   ;;  %v16283_v15 = vld [vmem:[%s19416_s4 + $0x30] sm:$0xff]   ;;  %v16285_v18 = vld [vmem:[%s19416_s4 + $0xf8] sm:$0xff]  }
 0x942   :  { %15328 = vmatprep.mubr.msk.bf16.mxu0 %vm57_vm0, %v18165_v14  ;;  %15336 = vmatprep.mubr.msk.bf16.mxu1 %vm57_vm0, %v18167_v53 }
 0x943   :  { %v6297_v27 = vpop.f32.mrf.mxu1  ;;  %15329 = vmatmul.mubr.msk.bf16.vlgmr.msra.gmra.mxu0 %vm57_vm0, %v18169_v19  ;;  %15337 = vmatmul.mubr.msk.bf16.vlgmr.msra.gmra.mxu1 %vm57_vm0, %v18171_v51 }
 0x944   :  { %15341 = vmatpush3.bf16.msra.mxu0 %v16241_v48  ;;  %15349 = vmatpush3.bf16.msra.mxu1 %v16242_v58  ;;  %v16281_v48 = vld [vmem:[%s19416_s4 + $0x38] sm:$0xff]  }
 0x945   :  { %15352 = vmatprep.mubr.msk.bf16.mxu1 %vm57_vm0, %v18083_v25  ;;  %v15275_v7 = vpop.f32.mrf.mxu1  ;;  %15342 = vmatprep.subr.bf16.mxu0 %v16243_v55  ;;  %v16282_v58 = vld [vmem:[%s19416_s4 + $0xb8] sm:$0xff]  }
 0x946   :  { %15350 = vmatprep.subr.bf16.mxu1 %v16244_v36  ;;  %v18197_v22 = vpack.c.bf16 %v15275_v7, %v15274_v35  ;;  %v16286_v35 = vld [vmem:[%s19416_s4 + $0x138] sm:$0xff]  }
 0x947   :  { %v6300_v11 = vpop.f32.mrf.mxu1 }
 0x948   :  { %v18195_v49 = vpack.c.bf16 %v6300_v11, %v6297_v27  ;;  %15343 = vmatpush3.bf16.msra.mxu0 %v16243_v55  ;;  %15351 = vmatpush3.bf16.msra.mxu1 %v16244_v36 }
 0x949   :  { %15356 = vmatprep.subr.bf16.mxu0 %v16245_v21  ;;  %15364 = vmatprep.subr.bf16.mxu1 %v16246_v37 }
 0x94a   :  { %15344 = vmatprep.mubr.msk.bf16.mxu0 %vm57_vm0, %v18195_v49 }
 0x94b   :  { %15345 = vmatmul.mubr.msk.bf16.vlgmr.msra.gmra.mxu0 %vm57_vm0, %v18197_v22  ;;  %15353 = vmatmul.mubr.msk.bf16.vlgmr.msra.gmra.mxu1 %vm57_vm0, %v18087_v63 }
 0x94c   :  { %15357 = vmatpush3.bf16.msra.mxu0 %v16245_v21  ;;  %15360 = vmatprep.mubr.msk.bf16.mxu0 %vm57_vm0, %v18081_v12 }
 0x94d   :  { %15365 = vmatpush3.bf16.msra.mxu1 %v16246_v37  ;;  %15368 = vmatprep.mubr.msk.bf16.mxu1 %vm57_vm0, %v18109_v60 }
 0x94e   :  { %15358 = vmatprep.subr.bf16.mxu0 %v16247_v34  ;;  %15366 = vmatprep.subr.bf16.mxu1 %v16248_v31 }
 0x950   :  { %15359 = vmatpush3.bf16.msra.mxu0 %v16247_v34 }
 0x951   :  { %15367 = vmatpush3.bf16.msra.mxu1 %v16248_v31  ;;  %15372 = vmatprep.subr.bf16.mxu0 %v16249_v3 }
 0x952   :  { %15380 = vmatprep.subr.bf16.mxu1 %v16250_v52 }
 0x953   :  { %15361 = vmatmul.mubr.msk.bf16.vlgmr.msra.gmra.mxu0 %vm57_vm0, %v18085_v23 }
 0x954   :  { %15369 = vmatmul.mubr.msk.bf16.vlgmr.msra.gmra.mxu1 %vm57_vm0, %v18113_v26  ;;  %15373 = vmatpush3.bf16.msra.mxu0 %v16249_v3 }
 0x955   :  { %15376 = vmatprep.mubr.msk.bf16.mxu0 %vm57_vm0, %v18111_v33  ;;  %15381 = vmatpush3.bf16.msra.mxu1 %v16250_v52 }
 0x956   :  { %15384 = vmatprep.mubr.msk.bf16.mxu1 %vm57_vm0, %v18137_v44  ;;  %15374 = vmatprep.subr.bf16.mxu0 %v16251_v24 }
 0x957   :  { %15382 = vmatprep.subr.bf16.mxu1 %v16252_v43 }
 0x958   :  { %15375 = vmatpush3.bf16.msra.mxu0 %v16251_v24 }
 0x959   :  { %15383 = vmatpush3.bf16.msra.mxu1 %v16252_v43  ;;  %15388 = vmatprep.subr.bf16.mxu0 %v16253_v16 }
 0x95a   :  { %15396 = vmatprep.subr.bf16.mxu1 %v16254_v20 }
 0x95b   :  { %15377 = vmatmul.mubr.msk.bf16.vlgmr.msra.gmra.mxu0 %vm57_vm0, %v18115_v28 }
 0x95c   :  { %15385 = vmatmul.mubr.msk.bf16.vlgmr.msra.gmra.mxu1 %vm57_vm0, %v18141_v57  ;;  %15389 = vmatpush3.bf16.msra.mxu0 %v16253_v16 }
 0x95d   :  { %15392 = vmatprep.mubr.msk.bf16.mxu0 %vm57_vm0, %v18139_v5  ;;  %15397 = vmatpush3.bf16.msra.mxu1 %v16254_v20 }
 0x95e   :  { %15400 = vmatprep.mubr.msk.bf16.mxu1 %vm57_vm0, %v18165_v14  ;;  %15390 = vmatprep.subr.bf16.mxu0 %v16255_v56 }
 0x95f   :  { %15398 = vmatprep.subr.bf16.mxu1 %v16256_v32 }
 0x960   :  { %15391 = vmatpush3.bf16.msra.mxu0 %v16255_v56 }
 0x961   :  { %15399 = vmatpush3.bf16.msra.mxu1 %v16256_v32  ;;  %15404 = vmatprep.subr.bf16.mxu0 %v16257_v13 }
 0x962   :  { %15412 = vmatprep.subr.bf16.mxu1 %v16258_v42 }
 0x963   :  { %15393 = vmatmul.mubr.msk.bf16.vlgmr.msra.gmra.mxu0 %vm57_vm0, %v18143_v61 }
 0x964   :  { %15401 = vmatmul.mubr.msk.bf16.vlgmr.msra.gmra.mxu1 %vm57_vm0, %v18169_v19  ;;  %15405 = vmatpush3.bf16.msra.mxu0 %v16257_v13 }
 0x965   :  { %15408 = vmatprep.mubr.msk.bf16.mxu0 %vm57_vm0, %v18167_v53  ;;  %15413 = vmatpush3.bf16.msra.mxu1 %v16258_v42 }
 0x966   :  { %15416 = vmatprep.mubr.msk.bf16.mxu1 %vm57_vm0, %v18195_v49  ;;  %15406 = vmatprep.subr.bf16.mxu0 %v16259_v29 }
 0x967   :  { %15414 = vmatprep.subr.bf16.mxu1 %v16260_v10 }
 0x968   :  { %15407 = vmatpush3.bf16.msra.mxu0 %v16259_v29 }
 0x969   :  { %15415 = vmatpush3.bf16.msra.mxu1 %v16260_v10  ;;  %15420 = vmatprep.subr.bf16.mxu0 %v16261_v41 }
 0x96a   :  { %15428 = vmatprep.subr.bf16.mxu1 %v16262_v2 }
 0x96b   :  { %15409 = vmatmul.mubr.msk.bf16.vlgmr.msra.gmra.mxu0 %vm57_vm0, %v18171_v51 }
 0x96c   :  { %15417 = vmatmul.mubr.msk.bf16.vlgmr.msra.gmra.mxu1 %vm57_vm0, %v18197_v22  ;;  %15421 = vmatpush3.bf16.msra.mxu0 %v16261_v41 }
 0x96d   :  { %15424 = vmatprep.mubr.msk.bf16.mxu0 %vm57_vm0, %v18083_v25  ;;  %15429 = vmatpush3.bf16.msra.mxu1 %v16262_v2 }
 0x96e   :  { %15432 = vmatprep.mubr.msk.bf16.mxu1 %vm57_vm0, %v18081_v12  ;;  %15422 = vmatprep.subr.bf16.mxu0 %v16263_v38 }
 0x96f   :  { %15430 = vmatprep.subr.bf16.mxu1 %v16264_v17 }
 0x970   :  { %15423 = vmatpush3.bf16.msra.mxu0 %v16263_v38 }
 0x971   :  { %15431 = vmatpush3.bf16.msra.mxu1 %v16264_v17  ;;  %15436 = vmatprep.subr.bf16.mxu0 %v16265_v54 }
 0x972   :  { %15444 = vmatprep.subr.bf16.mxu1 %v16266_v4 }
 0x973   :  { %15425 = vmatmul.mubr.msk.bf16.vlgmr.msra.gmra.mxu0 %vm57_vm0, %v18087_v63 }
 0x974   :  { %15433 = vmatmul.mubr.msk.bf16.vlgmr.msra.gmra.mxu1 %vm57_vm0, %v18085_v23  ;;  %15437 = vmatpush3.bf16.msra.mxu0 %v16265_v54 }
 0x975   :  { %15440 = vmatprep.mubr.msk.bf16.mxu0 %vm57_vm0, %v18109_v60  ;;  %15445 = vmatpush3.bf16.msra.mxu1 %v16266_v4 }
 0x976   :  { %15448 = vmatprep.mubr.msk.bf16.mxu1 %vm57_vm0, %v18111_v33  ;;  %15438 = vmatprep.subr.bf16.mxu0 %v16267_v50 }
 0x977   :  { %15446 = vmatprep.subr.bf16.mxu1 %v16268_v9 }
 0x978   :  { %15439 = vmatpush3.bf16.msra.mxu0 %v16267_v50 }
 0x979   :  { %15447 = vmatpush3.bf16.msra.mxu1 %v16268_v9  ;;  %15452 = vmatprep.subr.bf16.mxu0 %v16269_v62 }
 0x97a   :  { %15460 = vmatprep.subr.bf16.mxu1 %v16270_v8 }
 0x97b   :  { %15441 = vmatmul.mubr.msk.bf16.vlgmr.msra.gmra.mxu0 %vm57_vm0, %v18113_v26 }
 0x97c   :  { %15449 = vmatmul.mubr.msk.bf16.vlgmr.msra.gmra.mxu1 %vm57_vm0, %v18115_v28  ;;  %15453 = vmatpush3.bf16.msra.mxu0 %v16269_v62 }
 0x97d   :  { %15456 = vmatprep.mubr.msk.bf16.mxu0 %vm57_vm0, %v18137_v44  ;;  %15461 = vmatpush3.bf16.msra.mxu1 %v16270_v8 }
 0x97e   :  { %15464 = vmatprep.mubr.msk.bf16.mxu1 %vm57_vm0, %v18139_v5  ;;  %15454 = vmatprep.subr.bf16.mxu0 %v16271_v46 }
 0x97f   :  { %15462 = vmatprep.subr.bf16.mxu1 %v16272_v59 }
 0x980   :  { %15455 = vmatpush3.bf16.msra.mxu0 %v16271_v46 }
 0x981   :  { %15463 = vmatpush3.bf16.msra.mxu1 %v16272_v59  ;;  %15468 = vmatprep.subr.bf16.mxu0 %v16273_v40 }
 0x982   :  { %15476 = vmatprep.subr.bf16.mxu1 %v16274_v39 }
 0x983   :  { %15457 = vmatmul.mubr.msk.bf16.vlgmr.msra.gmra.mxu0 %vm57_vm0, %v18141_v57 }
 0x984   :  { %15465 = vmatmul.mubr.msk.bf16.vlgmr.msra.gmra.mxu1 %vm57_vm0, %v18143_v61  ;;  %15469 = vmatpush3.bf16.msra.mxu0 %v16273_v40 }
 0x985   :  { %15472 = vmatprep.mubr.msk.bf16.mxu0 %vm57_vm0, %v18165_v14  ;;  %15477 = vmatpush3.bf16.msra.mxu1 %v16274_v39 }
 0x986   :  { %15480 = vmatprep.mubr.msk.bf16.mxu1 %vm57_vm0, %v18167_v53  ;;  %15470 = vmatprep.subr.bf16.mxu0 %v16275_v45 }
 0x987   :  { %15478 = vmatprep.subr.bf16.mxu1 %v16276_v47 }
 0x988   :  { %15471 = vmatpush3.bf16.msra.mxu0 %v16275_v45 }
 0x989   :  { %15479 = vmatpush3.bf16.msra.mxu1 %v16276_v47  ;;  %15484 = vmatprep.subr.bf16.mxu0 %v16277_v0 }
 0x98a   :  { %15492 = vmatprep.subr.bf16.mxu1 %v16278_v1 }
 0x98b   :  { %15473 = vmatmul.mubr.msk.bf16.vlgmr.msra.gmra.mxu0 %vm57_vm0, %v18169_v19 }
 0x98c   :  { %15481 = vmatmul.mubr.msk.bf16.vlgmr.msra.gmra.mxu1 %vm57_vm0, %v18171_v51  ;;  %15485 = vmatpush3.bf16.msra.mxu0 %v16277_v0 }
 0x98d   :  { %15488 = vmatprep.mubr.msk.bf16.mxu0 %vm57_vm0, %v18195_v49  ;;  %15493 = vmatpush3.bf16.msra.mxu1 %v16278_v1 }
 0x98e   :  { %15496 = vmatprep.mubr.msk.bf16.mxu1 %vm57_vm0, %v18083_v25  ;;  %15486 = vmatprep.subr.bf16.mxu0 %v16279_v6  ;;  %v16284_v25 = vld [vmem:[%s19416_s4 + $0xb0] sm:$0xff]  }
 0x98f   :  { %15494 = vmatprep.subr.bf16.mxu1 %v16280_v30 }
 0x990   :  { %15487 = vmatpush3.bf16.msra.mxu0 %v16279_v6 }
 0x991   :  { %15495 = vmatpush3.bf16.msra.mxu1 %v16280_v30  ;;  %15500 = vmatprep.subr.bf16.mxu0 %v16281_v48 }
 0x992   :  { %15508 = vmatprep.subr.bf16.mxu1 %v16282_v58 }
 0x993   :  { %15489 = vmatmul.mubr.msk.bf16.vlgmr.msra.gmra.mxu0 %vm57_vm0, %v18197_v22 }
 0x994   :  { %15497 = vmatmul.mubr.msk.bf16.vlgmr.msra.gmra.mxu1 %vm57_vm0, %v18087_v63  ;;  %15501 = vmatpush3.bf16.msra.mxu0 %v16281_v48  ;;  %v16288_v63 = vld [vmem:[%s19416_s4 + $0x130] sm:$0xff]  }
 0x995   :  { %15504 = vmatprep.mubr.msk.bf16.mxu0 %vm57_vm0, %v18081_v12  ;;  %15509 = vmatpush3.bf16.msra.mxu1 %v16282_v58  ;;  %v16287_v12 = vld [vmem:[%s19416_s4 + $0xf0] sm:$0xff]  }
 0x996   :  { %15512 = vmatprep.mubr.msk.bf16.mxu1 %vm57_vm0, %v18109_v60  ;;  %15502 = vmatprep.subr.bf16.mxu0 %v16283_v15  ;;  %v16289_v60 = vld [vmem:[%s19416_s4 + $0x178] sm:$0xff]  }
 0x997   :  { %15510 = vmatprep.subr.bf16.mxu1 %v16284_v25 }
 0x998   :  { %15503 = vmatpush3.bf16.msra.mxu0 %v16283_v15 }
 0x999   :  { %15511 = vmatpush3.bf16.msra.mxu1 %v16284_v25  ;;  %15516 = vmatprep.subr.bf16.mxu0 %v16285_v18 }
 0x99a   :  { %15524 = vmatprep.subr.bf16.mxu1 %v16286_v35 }
 0x99b   :  { %15505 = vmatmul.mubr.msk.bf16.vlgmr.msra.gmra.mxu0 %vm57_vm0, %v18085_v23  ;;  %v16290_v23 = vld [vmem:[%s19416_s4 + $0x1b8] sm:$0xff]  }
 0x99c   :  { %15513 = vmatmul.mubr.msk.bf16.vlgmr.msra.gmra.mxu1 %vm57_vm0, %v18113_v26  ;;  %15517 = vmatpush3.bf16.msra.mxu0 %v16285_v18  ;;  %v16292_v26 = vld [vmem:[%s19416_s4 + $0x1b0] sm:$0xff]  }
 0x99d   :  { %15520 = vmatprep.mubr.msk.bf16.mxu0 %vm57_vm0, %v18111_v33  ;;  %15525 = vmatpush3.bf16.msra.mxu1 %v16286_v35  ;;  %v16291_v33 = vld [vmem:[%s19416_s4 + $0x170] sm:$0xff]  }
 0x99e   :  { %15528 = vmatprep.mubr.msk.bf16.mxu1 %vm57_vm0, %v18137_v44  ;;  %15518 = vmatprep.subr.bf16.mxu0 %v16287_v12  ;;  %v16293_v44 = vld [vmem:[%s19416_s4 + $0x1f8] sm:$0xff]  }
 0x99f   :  { %15526 = vmatprep.subr.bf16.mxu1 %v16288_v63 }
 0x9a0   :  { %15519 = vmatpush3.bf16.msra.mxu0 %v16287_v12 }
 0x9a1   :  { %15527 = vmatpush3.bf16.msra.mxu1 %v16288_v63  ;;  %15532 = vmatprep.subr.bf16.mxu0 %v16289_v60 }
 0x9a2   :  { %15540 = vmatprep.subr.bf16.mxu1 %v16290_v23 }
 0x9a3   :  { %15521 = vmatmul.mubr.msk.bf16.vlgmr.msra.gmra.mxu0 %vm57_vm0, %v18115_v28  ;;  %v16294_v28 = vld [vmem:[%s19416_s4 + $0x238] sm:$0xff]  }
 0x9a4   :  { %15529 = vmatmul.mubr.msk.bf16.vlgmr.msra.gmra.mxu1 %vm57_vm0, %v18141_v57  ;;  %15533 = vmatpush3.bf16.msra.mxu0 %v16289_v60  ;;  %v16296_v57 = vld [vmem:[%s19416_s4 + $0x230] sm:$0xff]  }
 0x9a5   :  { %15536 = vmatprep.mubr.msk.bf16.mxu0 %vm57_vm0, %v18139_v5  ;;  %15541 = vmatpush3.bf16.msra.mxu1 %v16290_v23  ;;  %v16295_v5 = vld [vmem:[%s19416_s4 + $0x1f0] sm:$0xff]  }
 0x9a6   :  { %15544 = vmatprep.mubr.msk.bf16.mxu1 %vm57_vm0, %v18165_v14  ;;  %15534 = vmatprep.subr.bf16.mxu0 %v16291_v33 }
 0x9a7   :  { %15542 = vmatprep.subr.bf16.mxu1 %v16292_v26 }
 0x9a8   :  { %15535 = vmatpush3.bf16.msra.mxu0 %v16291_v33 }
 0x9a9   :  { %15543 = vmatpush3.bf16.msra.mxu1 %v16292_v26  ;;  %15548 = vmatprep.subr.bf16.mxu0 %v16293_v44 }
 0x9aa   :  { %15556 = vmatprep.subr.bf16.mxu1 %v16294_v28 }
 0x9ab   :  { %15537 = vmatmul.mubr.msk.bf16.vlgmr.msra.gmra.mxu0 %vm57_vm0, %v18143_v61 }
 0x9ac   :  { %15545 = vmatmul.mubr.msk.bf16.vlgmr.msra.gmra.mxu1 %vm57_vm0, %v18169_v19  ;;  %15549 = vmatpush3.bf16.msra.mxu0 %v16293_v44 }
 0x9ad   :  { %15552 = vmatprep.mubr.msk.bf16.mxu0 %vm57_vm0, %v18167_v53  ;;  %15557 = vmatpush3.bf16.msra.mxu1 %v16294_v28 }
 0x9ae   :  { %15560 = vmatprep.mubr.msk.bf16.mxu1 %vm57_vm0, %v18195_v49  ;;  %15550 = vmatprep.subr.bf16.mxu0 %v16295_v5 }
 0x9af   :  { %15558 = vmatprep.subr.bf16.mxu1 %v16296_v57 }
 0x9b0   :  { %15551 = vmatpush3.bf16.msra.mxu0 %v16295_v5 }
 0x9b1   :  { %15559 = vmatpush3.bf16.msra.mxu1 %v16296_v57 }
 0x9b3   :  { %15553 = vmatmul.mubr.msk.bf16.vlgmr.msra.gmra.mxu0 %vm57_vm0, %v18171_v51 }
 0x9b4   :  { %15561 = vmatmul.mubr.msk.bf16.vlgmr.msra.gmra.mxu1 %vm57_vm0, %v18197_v22 }
 0x9eb   :  { %v15282_v61 = vpop.f32.mrf.mxu0  ;;  %v15290_v14 = vpop.f32.mrf.mxu1 }
 0x9ec   :  { %v6451_v19 = vadd.f32 %v15290_v14, %v15282_v61 }
 0x9ed   :  { %v6375_v55 = vpop.f32.mrf.mxu0  ;;  %v6442_v36 = vpop.f32.mrf.mxu1 }
 0x9ee   :  { %v6443_v53 = vadd.f32 %v6442_v36, %v6375_v55 }
 0x9ef   :  { %v15283_v27 = vpop.f32.mrf.mxu0  ;;  %v15291_v7 = vpop.f32.mrf.mxu1 }
 0x9f0   :  { %v6454_v21 = vadd.f32 %v15291_v7, %v15283_v27 }
 0x9f1   :  { %v18459_v37 = vpop.f32.mrf.mxu0  ;;  %v18461_v11 = vpop.f32.mrf.mxu1 }
 0x9f3   :  { %v15298_v49 = vpop.f32.mrf.mxu0  ;;  %v15306_v34 = vpop.f32.mrf.mxu1 }
 0x9f4   :  { %v6531_v31 = vadd.f32 %v15298_v49, %v6451_v19 }
 0x9f5   :  { %v6514_v51 = vpop.f32.mrf.mxu0  ;;  %v6590_v3 = vpop.f32.mrf.mxu1 }
 0x9f6   :  { %v6607_v52 = vadd.f32 %v15306_v34, %v6531_v31  ;;  %v6529_v22 = vadd.f32 %v6514_v51, %v6443_v53 }
 0x9f7   :  { %v15299_v24 = vpop.f32.mrf.mxu0  ;;  %v15307_v43 = vpop.f32.mrf.mxu1 }
 0x9f8   :  { %v6605_v16 = vadd.f32 %v6590_v3, %v6529_v22  ;;  %v6532_v20 = vadd.f32 %v15299_v24, %v6454_v21 }
 0x9f9   :  { %v18463_v56 = vpop.f32.mrf.mxu0  ;;  %v18465_v32 = vpop.f32.mrf.mxu1 }
 0x9fa   :  { %v6608_v13 = vadd.f32 %v15307_v43, %v6532_v20 }
 0x9fb   :  { %v15314_v42 = vpop.f32.mrf.mxu0  ;;  %v15322_v29 = vpop.f32.mrf.mxu1 }
 0x9fc   :  { %v6683_v10 = vadd.f32 %v15314_v42, %v6607_v52 }
 0x9fd   :  { %v6666_v41 = vpop.f32.mrf.mxu0  ;;  %v6742_v2 = vpop.f32.mrf.mxu1 }
 0x9fe   :  { %v6759_v38 = vadd.f32 %v15322_v29, %v6683_v10  ;;  %v6681_v17 = vadd.f32 %v6666_v41, %v6605_v16 }
 0x9ff   :  { %v15315_v54 = vpop.f32.mrf.mxu0  ;;  %v15323_v4 = vpop.f32.mrf.mxu1 }
 0xa00   :  { %v6757_v50 = vadd.f32 %v6742_v2, %v6681_v17  ;;  %v6684_v9 = vadd.f32 %v15315_v54, %v6608_v13 }
 0xa01   :  { %v18467_v62 = vpop.f32.mrf.mxu0  ;;  %v18469_v8 = vpop.f32.mrf.mxu1 }
 0xa02   :  { %v6760_v46 = vadd.f32 %v15323_v4, %v6684_v9 }
 0xa03   :  { %v15330_v59 = vpop.f32.mrf.mxu0  ;;  %v15338_v40 = vpop.f32.mrf.mxu1 }
 0xa04   :  { %v6835_v39 = vadd.f32 %v15330_v59, %v6759_v38 }
 0xa05   :  { %v6818_v45 = vpop.f32.mrf.mxu0  ;;  %v6894_v47 = vpop.f32.mrf.mxu1 }
 0xa06   :  { %v6911_v0 = vadd.f32 %v15338_v40, %v6835_v39  ;;  %v6833_v1 = vadd.f32 %v6818_v45, %v6757_v50 }
 0xa07   :  { %v15331_v6 = vpop.f32.mrf.mxu0  ;;  %v15339_v30 = vpop.f32.mrf.mxu1 }
 0xa08   :  { %v6909_v48 = vadd.f32 %v6894_v47, %v6833_v1  ;;  %v6836_v58 = vadd.f32 %v15331_v6, %v6760_v46 }
 0xa09   :  { %v18471_v15 = vpop.f32.mrf.mxu0  ;;  %v18473_v25 = vpop.f32.mrf.mxu1 }
 0xa0a   :  { %19497 = vst [vmem:[#allocation17_spill] sm:$0xff] %v18471_v15  ;;  %19498 = vst [vmem:[#allocation19_spill] sm:$0xff] %v18473_v25  ;;  %v6912_v18 = vadd.f32 %v15339_v30, %v6836_v58 }
 0xa0b   :  { %v15346_v35 = vpop.f32.mrf.mxu0  ;;  %v15354_v12 = vpop.f32.mrf.mxu1 }
 0xa0c   :  { %v18475_v63 = vadd.f32 %v15346_v35, %v6911_v0 }
 0xa0d   :  { %v6970_v60 = vpop.f32.mrf.mxu0  ;;  %v7045_v23 = vpop.f32.mrf.mxu1 }
 0xa0e   :  { %19499 = vst [vmem:[#allocation15_spill] sm:$0xff] %v18475_v63  ;;  %v18477_v33 = vadd.f32 %v6970_v60, %v6909_v48 }
 0xa0f   :  { %v15347_v26 = vpop.f32.mrf.mxu0  ;;  %v15355_v44 = vpop.f32.mrf.mxu1 }
 0xa10   :  { %19500 = vst [vmem:[#allocation16_spill] sm:$0xff] %v18477_v33  ;;  %v18479_v28 = vadd.f32 %v15347_v26, %v6912_v18 }
 0xa11   :  { %v18481_v5 = vpop.f32.mrf.mxu0  ;;  %v18483_v57 = vpop.f32.mrf.mxu1 }
 0xa12   :  { %19501 = vst [vmem:[#allocation2_spill] sm:$0xff] %v18479_v28  ;;  %19502 = vst [vmem:[#allocation9_spill] sm:$0xff] %v18481_v5 }
 0xa13   :  { %v15362_v61 = vpop.f32.mrf.mxu0 }
 0xa14   :  { %v7115_v14 = vadd.f32 %v15362_v61, %v15354_v12  ;;  %v15370_v19 = vpop.f32.mrf.mxu1 }
 0xa15   :  { %v7106_v55 = vpop.f32.mrf.mxu0 }
 0xa16   :  { %v7189_v36 = vadd.f32 %v15370_v19, %v7115_v14  ;;  %v7107_v53 = vadd.f32 %v7106_v55, %v7045_v23  ;;  %v7172_v27 = vpop.f32.mrf.mxu1 }
 0xa17   :  { %v15363_v7 = vpop.f32.mrf.mxu0 }
 0xa18   :  { %v7187_v21 = vadd.f32 %v7172_v27, %v7107_v53  ;;  %v7118_v49 = vadd.f32 %v15363_v7, %v15355_v44  ;;  %v15371_v34 = vpop.f32.mrf.mxu1 }
 0xa19   :  { %v18485_v31 = vpop.f32.mrf.mxu0 }
 0xa1a   :  { %v7190_v51 = vadd.f32 %v15371_v34, %v7118_v49  ;;  %v18487_v3 = vpop.f32.mrf.mxu1 }
 0xa1b   :  { %v15378_v52 = vpop.f32.mrf.mxu0 }
 0xa1c   :  { %v7259_v22 = vadd.f32 %v15378_v52, %v7189_v36  ;;  %v15386_v24 = vpop.f32.mrf.mxu1 }
 0xa1d   :  { %v7242_v43 = vpop.f32.mrf.mxu0 }
 0xa1e   :  { %v7329_v16 = vadd.f32 %v15386_v24, %v7259_v22  ;;  %v7257_v20 = vadd.f32 %v7242_v43, %v7187_v21  ;;  %v7312_v13 = vpop.f32.mrf.mxu1 }
 0xa1f   :  { %v15379_v42 = vpop.f32.mrf.mxu0 }
 0xa20   :  { %v7327_v29 = vadd.f32 %v7312_v13, %v7257_v20  ;;  %v7260_v10 = vadd.f32 %v15379_v42, %v7190_v51  ;;  %v15387_v41 = vpop.f32.mrf.mxu1 }
 0xa21   :  { %v18489_v2 = vpop.f32.mrf.mxu0 }
 0xa22   :  { %v7330_v38 = vadd.f32 %v15387_v41, %v7260_v10  ;;  %v18491_v17 = vpop.f32.mrf.mxu1 }
 0xa23   :  { %v15394_v54 = vpop.f32.mrf.mxu0 }
 0xa24   :  { %v7399_v4 = vadd.f32 %v15394_v54, %v7329_v16  ;;  %v15402_v50 = vpop.f32.mrf.mxu1 }
 0xa25   :  { %v7382_v9 = vpop.f32.mrf.mxu0 }
 0xa26   :  { %v7469_v46 = vadd.f32 %v15402_v50, %v7399_v4  ;;  %v7397_v59 = vadd.f32 %v7382_v9, %v7327_v29  ;;  %v7452_v40 = vpop.f32.mrf.mxu1 }
 0xa27   :  { %v15395_v39 = vpop.f32.mrf.mxu0 }
 0xa28   :  { %v7467_v45 = vadd.f32 %v7452_v40, %v7397_v59  ;;  %v7400_v47 = vadd.f32 %v15395_v39, %v7330_v38  ;;  %v15403_v0 = vpop.f32.mrf.mxu1 }
 0xa29   :  { %v18493_v1 = vpop.f32.mrf.mxu0 }
 0xa2a   :  { %v7470_v6 = vadd.f32 %v15403_v0, %v7400_v47  ;;  %v18495_v30 = vpop.f32.mrf.mxu1 }
 0xa2b   :  { %19503 = vst [vmem:[#allocation18_spill] sm:$0xff] %v18495_v30  ;;  %v15410_v48 = vpop.f32.mrf.mxu0 }
 0xa2c   :  { %v7539_v58 = vadd.f32 %v15410_v48, %v7469_v46  ;;  %v15418_v18 = vpop.f32.mrf.mxu1 }
 0xa2d   :  { %v7522_v35 = vpop.f32.mrf.mxu0 }
 0xa2e   :  { %v18497_v12 = vadd.f32 %v15418_v18, %v7539_v58  ;;  %v7537_v60 = vadd.f32 %v7522_v35, %v7467_v45  ;;  %v7592_v23 = vpop.f32.mrf.mxu1 }
 0xa2f   :  { %v15411_v26 = vpop.f32.mrf.mxu0 }
 0xa30   :  { %19504 = vst [vmem:[#allocation21_spill] sm:$0xff] %v18497_v12  ;;  %v18499_v44 = vadd.f32 %v7592_v23, %v7537_v60  ;;  %v7540_v61 = vadd.f32 %v15411_v26, %v7470_v6  ;;  %v15419_v14 = vpop.f32.mrf.mxu1 }
 0xa31   :  { %v18501_v19 = vpop.f32.mrf.mxu0 }
 0xa32   :  { %19505 = vst [vmem:[#allocation23_spill] sm:$0xff] %v18499_v44  ;;  %19506 = vst [vmem:[#allocation20_spill] sm:$0xff] %v18501_v19  ;;  %v18503_v55 = vadd.f32 %v15419_v14, %v7540_v61  ;;  %v18505_v36 = vpop.f32.mrf.mxu1 }
 0xa33   :  { %19508 = vst [vmem:[#allocation13_spill] sm:$0xff] %v18505_v36  ;;  %v15426_v53 = vpop.f32.mrf.mxu0 }
 0xa34   :  { %19507 = vst [vmem:[#allocation3_spill] sm:$0xff] %v18503_v55  ;;  %v15434_v27 = vpop.f32.mrf.mxu1 }
 0xa35   :  { %v7667_v7 = vpop.f32.mrf.mxu0 }
 0xa36   :  { %v7728_v21 = vpop.f32.mrf.mxu1 }
 0xa37   :  { %v15427_v49 = vpop.f32.mrf.mxu0 }
 0xa38   :  { %v15435_v34 = vpop.f32.mrf.mxu1 }
 0xa39   :  { %v7670_v51 = vpop.f32.mrf.mxu0  ;;  %v7740_v19 = vadd.f32 %v15435_v34, %v15427_v49 }
 0xa3a   :  { %v7731_v52 = vpop.f32.mrf.mxu1 }
 0xa3b   :  { %v15442_v22 = vpop.f32.mrf.mxu0 }
 0xa3c   :  { %v15450_v24 = vpop.f32.mrf.mxu1 }
 0xa3d   :  { %v7794_v43 = vpop.f32.mrf.mxu0 }
 0xa3e   :  { %v18507_v16 = vpop.f32.mrf.mxu1 }
 0xa3f   :  { %v15443_v20 = vpop.f32.mrf.mxu0 }
 0xa40   :  { %v18509_v13 = vpop.f32.mrf.mxu1 }
 0xa41   :  { %v7797_v42 = vpop.f32.mrf.mxu0 }
 0xa42   :  { %v18511_v29 = vpop.f32.mrf.mxu1 }
 0xa43   :  { %v15458_v10 = vpop.f32.mrf.mxu0 }
 0xa44   :  { %v18513_v41 = vpop.f32.mrf.mxu1 }
 0xa45   :  { %v18515_v38 = vpop.f32.mrf.mxu0 }
 0xa46   :  { %v18517_v54 = vpop.f32.mrf.mxu1 }
 0xa47   :  { %v18519_v4 = vpop.f32.mrf.mxu0 }
 0xa48   :  { %v18521_v50 = vpop.f32.mrf.mxu1 }
 0xa49   :  { %v18523_v9 = vpop.f32.mrf.mxu0 }
 0xa4a   :  { %v18525_v46 = vpop.f32.mrf.mxu1 }
 0xa4b   :  { %19509 = vst [vmem:[#allocation25_spill] sm:$0xff] %v18525_v46  ;;  %v18527_v59 = vpop.f32.mrf.mxu0 }
 0xa4c   :  { %v18529_v40 = vpop.f32.mrf.mxu1 }
 0xa4d   :  { %19510 = vst [vmem:[#allocation27_spill] sm:$0xff] %v18529_v40  ;;  %v18531_v39 = vpop.f32.mrf.mxu0 }
 0xa4e   :  { %19511 = vst [vmem:[#allocation22_spill] sm:$0xff] %v18531_v39  ;;  %v18533_v45 = vpop.f32.mrf.mxu1 }
 0xa4f   :  { %19512 = vst [vmem:[#allocation24_spill] sm:$0xff] %v18533_v45  ;;  %v18535_v47 = vpop.f32.mrf.mxu0 }
 0xa50   :  { %19513 = vst [vmem:[#allocation4_spill] sm:$0xff] %v18535_v47  ;;  %v18537_v0 = vpop.f32.mrf.mxu1 }
 0xa51   :  { %19514 = vst [vmem:[#allocation10_spill] sm:$0xff] %v18537_v0  ;;  %v18539_v6 = vpop.f32.mrf.mxu0 }
 0xa52   :  { %19515 = vst [vmem:[#allocation7_spill] sm:$0xff] %v18539_v6  ;;  %v18541_v48 = vpop.f32.mrf.mxu1  ;;  %v7729_v6 = vadd.f32 %v7728_v21, %v7667_v7 }
 0xa53   :  { %19516 = vst [vmem:[#allocation14_spill] sm:$0xff] %v18541_v48  ;;  %v18543_v58 = vpop.f32.mrf.mxu0  ;;  %v7737_v48 = vadd.f32 %v15434_v27, %v15426_v53  ;;  %v7732_v27 = vadd.f32 %v7731_v52, %v7670_v51 }
 0xa54   :  { %19517 = vst [vmem:[#allocation26_spill] sm:$0xff] %v18543_v58  ;;  %v15498_v18 = vpop.f32.mrf.mxu1 }
 0xa55   :  { %v18545_v35 = vpop.f32.mrf.mxu0  ;;  %v7811_v45 = vadd.f32 %v15442_v22, %v7737_v48  ;;  %v7810_v21 = vadd.f32 %v7797_v42, %v7732_v27 }
 0xa56   :  { %19518 = vst [vmem:[#allocation28_spill] sm:$0xff] %v18545_v35  ;;  %v8289_v60 = vpop.f32.mrf.mxu1  ;;  %v7110_v35 = vadd.f32 %v18485_v31, %v18483_v57  ;;  %v7812_v57 = vadd.f32 %v15443_v20, %v7740_v19 }
 0xa57   :  { %v18547_v23 = vpop.f32.mrf.mxu0  ;;  %v7881_v46 = vadd.f32 %v15450_v24, %v7811_v45 }
 0xa58   :  { %19519 = vst [vmem:[#allocation29_spill] sm:$0xff] %v18547_v23  ;;  %v15499_v26 = vpop.f32.mrf.mxu1  ;;  %v6446_v23 = vadd.f32 %v18461_v11, %v18459_v37  ;;  %v7882_v19 = vadd.f32 %v18509_v13, %v7812_v57 }
 0xa59   :  { %v18549_v61 = vpop.f32.mrf.mxu0 }
 0xa5a   :  { %19520 = vst [vmem:[#allocation8_spill] sm:$0xff] %v18549_v61  ;;  %v8292_v14 = vpop.f32.mrf.mxu1  ;;  %v6530_v40 = vadd.f32 %v18463_v56, %v6446_v23 }
 0xa5b   :  { %v15506_v44 = vpop.f32.mrf.mxu0 }
 0xa5c   :  { %v15514_v33 = vpop.f32.mrf.mxu1  ;;  %v8359_v12 = vadd.f32 %v15506_v44, %v15498_v18  ;;  %v7188_v44 = vadd.f32 %v18487_v3, %v7110_v35  ;;  %v7809_v18 = vadd.f32 %v7794_v43, %v7729_v6  ;;  %v6606_v56 = vadd.f32 %v18465_v32, %v6530_v40  ;;  %v19523_v35 = vld [vmem:[#allocation22_spill] sm:$0xff] }
 0xa5d   :  { %v8350_v55 = vpop.f32.mrf.mxu0  ;;  %v7880_v43 = vadd.f32 %v18511_v29, %v7810_v21 }
 0xa5e   :  { %v8416_v28 = vpop.f32.mrf.mxu1  ;;  %v8351_v61 = vadd.f32 %v8350_v55, %v8289_v60  ;;  %v8433_v47 = vadd.f32 %v15514_v33, %v8359_v12  ;;  %v7258_v7 = vadd.f32 %v18489_v2, %v7188_v44  ;;  %v7951_v33 = vadd.f32 %v15458_v10, %v7881_v46  ;;  %v19524_v60 = vld [vmem:[#allocation4_spill] sm:$0xff] }
 0xa5f   :  { %v15507_v5 = vpop.f32.mrf.mxu0  ;;  %v7879_v3 = vadd.f32 %v18507_v16, %v7809_v18  ;;  %v19527_v18 = vld [vmem:[#allocation20_spill] sm:$0xff] }
 0xa60   :  { %v15515_v36 = vpop.f32.mrf.mxu1  ;;  %v8362_v39 = vadd.f32 %v15507_v5, %v15499_v26  ;;  %v8431_v30 = vadd.f32 %v8416_v28, %v8351_v61  ;;  %v6682_v28 = vadd.f32 %v18467_v62, %v6606_v56  ;;  %v7328_v2 = vadd.f32 %v18491_v17, %v7258_v7  ;;  %v19525_v61 = vld [vmem:[#allocation27_spill] sm:$0xff] }
 0xa61   :  { %v8353_v25 = vpop.f32.mrf.mxu0  ;;  %v7949_v32 = vadd.f32 %v18515_v38, %v7879_v3 }
 0xa62   :  { %v8419_v63 = vpop.f32.mrf.mxu1  ;;  %v8354_v37 = vadd.f32 %v8353_v25, %v8292_v14  ;;  %v8434_v5 = vadd.f32 %v15515_v36, %v8362_v39  ;;  %v8021_v36 = vadd.f32 %v18513_v41, %v7951_v33  ;;  %v7398_v62 = vadd.f32 %v18493_v1, %v7328_v2  ;;  %v19521_v1 = vld [vmem:[#allocation18_spill] sm:$0xff] }
 0xa63   :  { %v15522_v0 = vpop.f32.mrf.mxu0  ;;  %v8019_v38 = vadd.f32 %v18517_v54, %v7949_v32  ;;  %v6758_v41 = vadd.f32 %v18469_v8, %v6682_v28  ;;  %v19526_v8 = vld [vmem:[#allocation17_spill] sm:$0xff]  ;;  %v19534_v32 = vld [vmem:[#allocation19_spill] sm:$0xff] }
 0xa64   :  { %v15530_v58 = vpop.f32.mrf.mxu1  ;;  %v8503_v11 = vadd.f32 %v15522_v0, %v8433_v47  ;;  %v8432_v25 = vadd.f32 %v8419_v63, %v8354_v37  ;;  %v7950_v63 = vadd.f32 %v18523_v9, %v7880_v43  ;;  %v8091_v17 = vadd.f32 %v18527_v59, %v8021_v36  ;;  %v19522_v9 = vld [vmem:[#allocation25_spill] sm:$0xff] }
 0xa65   :  { %v8486_v15 = vpop.f32.mrf.mxu0  ;;  %v7468_v48 = vadd.f32 %v19521_v1, %v7398_v62  ;;  %v8089_v59 = vadd.f32 %v19523_v35, %v8019_v38  ;;  %v6834_v27 = vadd.f32 %v19526_v8, %v6758_v41  ;;  %v19533_v28 = vld [vmem:[#allocation21_spill] sm:$0xff] }
 0xa66   :  { %v8556_v53 = vpop.f32.mrf.mxu1  ;;  %v8501_v12 = vadd.f32 %v8486_v15, %v8431_v30  ;;  %v8573_v52 = vadd.f32 %v15530_v58, %v8503_v11  ;;  %v7952_v15 = vadd.f32 %v18519_v4, %v7882_v19  ;;  %v8020_v58 = vadd.f32 %v19522_v9, %v7950_v63  ;;  %v19538_v63 = vld [vmem:[#allocation29_spill] sm:$0xff] }
 0xa67   :  { %v15523_v31 = vpop.f32.mrf.mxu0  ;;  %v8161_v54 = vadd.f32 %v19525_v61, %v8091_v17  ;;  %v7538_v57 = vadd.f32 %v19527_v18, %v7468_v48 }
 0xa68   :  { %v15531_v55 = vpop.f32.mrf.mxu1  ;;  %v8504_v22 = vadd.f32 %v15523_v31, %v8434_v5  ;;  %v8571_v16 = vadd.f32 %v8556_v53, %v8501_v12  ;;  %v8022_v4 = vadd.f32 %v18521_v50, %v7952_v15  ;;  %v19528_v31 = vld [vmem:[#allocation7_spill] sm:$0xff]  ;;  %v19530_v5 = vld [vmem:[#allocation24_spill] sm:$0xff]  ;;  %v6910_v15 = vadd.f32 %v19534_v32, %v6834_v27 }
 0xa69   :  { %v8489_v49 = vpop.f32.mrf.mxu0  ;;  %v8090_v37 = vadd.f32 %v19528_v31, %v8020_v58  ;;  %v8159_v12 = vadd.f32 %v19530_v5, %v8089_v59 }
 0xa6a   :  { %v8559_v34 = vpop.f32.mrf.mxu1  ;;  %v8502_v20 = vadd.f32 %v8489_v49, %v8432_v25  ;;  %v8574_v46 = vadd.f32 %v15531_v55, %v8504_v22  ;;  %v8092_v23 = vadd.f32 %v19524_v60, %v8022_v4  ;;  %v19529_v55 = vld [vmem:[#allocation26_spill] sm:$0xff]  ;;  %v19540_v4 = vld [vmem:[#allocation8_spill] sm:$0xff] }
 0xa6b   :  { %v15538_v51 = vpop.f32.mrf.mxu0  ;;  %v18582_v7 = vadd.f32 %v19529_v55, %v8161_v54  ;;  %v19543_v60 = vld [vmem:[#allocation16_spill] sm:$0xff] }
 0xa6c   :  { %v15546_v24 = vpop.f32.mrf.mxu1  ;;  %v8643_v13 = vadd.f32 %v15538_v51, %v8573_v52  ;;  %v8572_v45 = vadd.f32 %v8559_v34, %v8502_v20  ;;  %v19531_v34 = vld [vmem:[#allocation10_spill] sm:$0xff]  ;;  %v19532_v51 = vld [vmem:[#allocation15_spill] sm:$0xff] }
 0xa6d   :  { %v8626_v30 = vpop.f32.mrf.mxu0  ;;  %v8162_v3 = vadd.f32 %v19531_v34, %v8092_v23  ;;  %v8867_v25 = vadd.f32 %v19533_v28, %v19532_v51  ;;  %v19544_v23 = vld [vmem:[#allocation23_spill] sm:$0xff] }
 0xa6e   :  { %v8696_v42 = vpop.f32.mrf.mxu1  ;;  %v8641_v29 = vadd.f32 %v8626_v30, %v8571_v16  ;;  %v8713_v47 = vadd.f32 %v15546_v24, %v8643_v13  ;;  %v19535_v30 = vld [vmem:[#allocation13_spill] sm:$0xff]  ;;  %v19536_v16 = vld [vmem:[#allocation14_spill] sm:$0xff]  ;;  %v19537_v13 = vld [vmem:[#allocation28_spill] sm:$0xff] }
 0xa6f   :  { %v15539_v10 = vpop.f32.mrf.mxu0  ;;  %v18596_v36 = vadd.f32 %v19535_v30, %v7538_v57  ;;  %v8160_v20 = vadd.f32 %v19536_v16, %v8090_v37 }
 0xa70   :  { %v15547_v40 = vpop.f32.mrf.mxu1  ;;  %v8644_v0 = vadd.f32 %v15539_v10, %v8574_v46  ;;  %v8711_v14 = vadd.f32 %v8696_v42, %v8641_v29  ;;  %v18600_v42 = vadd.f32 %v19537_v13, %v8159_v12  ;;  %v18603_v10 = vadd.f32 %v19538_v63, %v8162_v3 }
 0xa71   :  { %v8629_v39 = vpop.f32.mrf.mxu0 }
 0xa72   :  { %v8699_v6 = vpop.f32.mrf.mxu1  ;;  %v8642_v50 = vadd.f32 %v8629_v39, %v8572_v45  ;;  %v8714_v21 = vadd.f32 %v15547_v40, %v8644_v0  ;;  %v19539_v40 = vld [vmem:[#allocation9_spill] sm:$0xff]  ;;  %v18611_v39 = vadd.f32 %v19540_v4, %v8160_v20  ;;  %v19541_v45 = vld [vmem:[#allocation2_spill] sm:$0xff] }
 0xa73   :  { %v15554_v26 = vpop.f32.mrf.mxu0  ;;  %v18608_v38 = vadd.f32 %v19539_v40, %v6910_v15 }
 0xa74   :  { %v8783_v53 = vadd.f32 %v15554_v26, %v8713_v47  ;;  %v15562_v44 = vpop.f32.mrf.mxu1  ;;  %v8712_v52 = vadd.f32 %v8699_v6, %v8642_v50  ;;  %v19542_v47 = vld [vmem:[#allocation3_spill] sm:$0xff]  ;;  %v8865_v26 = vadd.f32 %v19544_v23, %v19543_v60 }
 0xa75   :  { %v8766_v11 = vpop.f32.mrf.mxu0  ;;  %v8868_v0 = vadd.f32 %v19542_v47, %v19541_v45  ;;  %v8866_v35 = vadd.f32 %v18596_v36, %v18608_v38 }
 0xa76   :  { %v18584_v49 = vadd.f32 %v15562_v44, %v8783_v53  ;;  %v8781_v56 = vadd.f32 %v8766_v11, %v8711_v14  ;;  %v8836_v33 = vpop.f32.mrf.mxu1 }
 0xa77   :  { %v15555_v19 = vpop.f32.mrf.mxu0 }
 0xa78   :  { %v18590_v22 = vadd.f32 %v8836_v33, %v8781_v56  ;;  %v8784_v24 = vadd.f32 %v15555_v19, %v8714_v21  ;;  %v15563_v2 = vpop.f32.mrf.mxu1  ;;  %v8871_v43 = vadd.f32 %v18584_v49, %v18582_v7 }
 0xa79   :  { %v8769_v62 = vpop.f32.mrf.mxu0 }
 0xa7a   :  { %v18605_v17 = vadd.f32 %v15563_v2, %v8784_v24  ;;  %v8782_v46 = vadd.f32 %v8769_v62, %v8712_v52  ;;  %v8875_v29 = vadd.f32 %v8871_v43, %v8867_v25  ;;  %v8839_v41 = vpop.f32.mrf.mxu1  ;;  %v8869_v9 = vadd.f32 %v18590_v22, %v18600_v42 }
 0xa7c   :  { %v18615_v6 = vadd.f32 %v8839_v41, %v8782_v46  ;;  %v8884_v1 = vsel %vm8877_vm1, %v8875_v29, 0.0  ;;  %v8872_v48 = vadd.f32 %v18605_v17, %v18603_v10  ;;  %v8873_v14 = vadd.f32 %v8869_v9, %v8865_v26 }
 0xa7d   :  { %8885 = vadd.xlane.f32.xlu1 %v8884_v1 }
 0xa7e   :  { %v8876_v58 = vadd.f32 %v8872_v48, %v8868_v0  ;;  %v8870_v59 = vadd.f32 %v18615_v6, %v18611_v39  ;;  %v8878_v53 = vsel %vm8877_vm1, %v8873_v14, 0.0 }
 0xa80   :  { %v8887_v61 = vsel %vm8877_vm1, %v8876_v58, 0.0  ;;  %v8874_v54 = vadd.f32 %v8870_v59, %v8866_v35 }
 0xa81   :  { %8888 = vadd.xlane.f32.xlu0 %v8887_v61 }
 0xa82   :  { %v8881_v50 = vsel %vm8877_vm1, %v8874_v54, 0.0 }
 0xa83   :  { %8882 = vadd.xlane.f32.xlu1 %v8881_v50 }
 0xa85   :  { %8879 = vadd.xlane.f32.xlu0 %v8878_v53 }
 0xb06   :  { %v8886_v44 = vpop.xlane.xlu1 %8885 }
 0xb07   :  { %v18631_v8 = vmul.f32 0.03125, %v8886_v44 }
 0xb09   :  { %v8897_v27 = vsub.f32 %v19532_v51, %v18631_v8  ;;  %v8917_v18 = vsub.f32 %v19533_v28, %v18631_v8  ;;  %v8941_v55 = vsub.f32 %v18582_v7, %v18631_v8  ;;  %v8965_v19 = vsub.f32 %v18584_v49, %v18631_v8 }
 0xb0a   :  { %v8889_v57 = vpop.xlane.xlu0 %8888 }
 0xb0b   :  { %v18637_v31 = vmul.f32 0.03125, %v8889_v57  ;;  %v8901_v37 = vmul.f32 %v8897_v27, %v8897_v27  ;;  %v8921_v11 = vmul.f32 %v8917_v18, %v8917_v18  ;;  %v8945_v3 = vmul.f32 %v8941_v55, %v8941_v55 }
 0xb0c   :  { %v8883_v25 = vpop.xlane.xlu1 %8882  ;;  %v8969_v30 = vmul.f32 %v8965_v19, %v8965_v19 }
 0xb0d   :  { %v8909_v21 = vsel %vm8877_vm1, %v8901_v37, 0.0  ;;  %v8898_v56 = vsub.f32 %v19541_v45, %v18637_v31  ;;  %v8918_v5 = vsub.f32 %v19542_v47, %v18637_v31  ;;  %v8929_v34 = vsel %vm8877_vm1, %v8921_v11, 0.0 }
 0xb0e   :  { %8910 = vadd.xlane.f32.xlu0 %v8909_v21  ;;  %v8880_v33 = vpop.xlane.xlu0 %8879  ;;  %v8942_v43 = vsub.f32 %v18603_v10, %v18637_v31  ;;  %v18654_v32 = vmul.f32 0.03125, %v8883_v25  ;;  %v8953_v15 = vsel %vm8877_vm1, %v8945_v3, 0.0  ;;  %v8966_v13 = vsub.f32 %v18605_v17, %v18637_v31 }
 0xb0f   :  { %v8902_v12 = vmul.f32 %v8898_v56, %v8898_v56  ;;  %v18649_v52 = vmul.f32 0.03125, %v8880_v33  ;;  %v8922_v2 = vmul.f32 %v8918_v5, %v8918_v5  ;;  %v8977_v63 = vsel %vm8877_vm1, %v8969_v30, 0.0 }
 0xb10   :  { %v8946_v20 = vmul.f32 %v8942_v43, %v8942_v43  ;;  %v8896_v46 = vsub.f32 %v18608_v38, %v18654_v32  ;;  %v8970_v40 = vmul.f32 %v8966_v13, %v8966_v13  ;;  %v8916_v1 = vsub.f32 %v18596_v36, %v18654_v32 }
 0xb11   :  { %v8912_v24 = vsel %vm8877_vm1, %v8902_v12, 0.0  ;;  %v8932_v16 = vsel %vm8877_vm1, %v8922_v2, 0.0  ;;  %v8895_v62 = vsub.f32 %v19543_v60, %v18649_v52  ;;  %v8915_v41 = vsub.f32 %v19544_v23, %v18649_v52 }
 0xb12   :  { %8913 = vadd.xlane.f32.xlu1 %v8912_v24  ;;  %8930 = vadd.xlane.f32.xlu0 %v8929_v34  ;;  %v8956_v29 = vsel %vm8877_vm1, %v8946_v20, 0.0  ;;  %v8900_v0 = vmul.f32 %v8896_v46, %v8896_v46  ;;  %v8980_v48 = vsel %vm8877_vm1, %v8970_v40, 0.0  ;;  %v8939_v35 = vsub.f32 %v18600_v42, %v18649_v52 }
 0xb13   :  { %v8899_v4 = vmul.f32 %v8895_v62, %v8895_v62  ;;  %v8919_v58 = vmul.f32 %v8915_v41, %v8915_v41  ;;  %v8920_v59 = vmul.f32 %v8916_v1, %v8916_v1  ;;  %v8940_v26 = vsub.f32 %v18611_v39, %v18654_v32 }
 0xb14   :  { %v8906_v61 = vsel %vm8877_vm1, %v8900_v0, 0.0  ;;  %v8943_v14 = vmul.f32 %v8939_v35, %v8939_v35  ;;  %v8963_v50 = vsub.f32 %v18590_v22, %v18649_v52  ;;  %v8964_v57 = vsub.f32 %v18615_v6, %v18654_v32 }
 0xb15   :  { %v8903_v9 = vsel %vm8877_vm1, %v8899_v4, 0.0  ;;  %v8923_v54 = vsel %vm8877_vm1, %v8919_v58, 0.0  ;;  %v8926_v53 = vsel %vm8877_vm1, %v8920_v59, 0.0  ;;  %v8944_v27 = vmul.f32 %v8940_v26, %v8940_v26  ;;  %v13451_v59 = vld [vmem:[%s19413_s6 + $0x90] sm:$0xff] }
 0xb16   :  { %8933 = vadd.xlane.f32.xlu1 %v8932_v16  ;;  %8954 = vadd.xlane.f32.xlu0 %v8953_v15  ;;  %v8947_v44 = vsel %vm8877_vm1, %v8943_v14, 0.0  ;;  %v8967_v18 = vmul.f32 %v8963_v50, %v8963_v50  ;;  %v8968_v55 = vmul.f32 %v8964_v57, %v8964_v57 }
 0xb17   :  { %v8950_v37 = vsel %vm8877_vm1, %v8944_v27, 0.0 }
 0xb18   :  { %v8971_v11 = vsel %vm8877_vm1, %v8967_v18, 0.0  ;;  %v8974_v21 = vsel %vm8877_vm1, %v8968_v55, 0.0 }
 0xb1a   :  { %8957 = vadd.xlane.f32.xlu1 %v8956_v29  ;;  %8978 = vadd.xlane.f32.xlu0 %v8977_v63 }
 0xb1e   :  { %8981 = vadd.xlane.f32.xlu1 %v8980_v48  ;;  %8904 = vadd.xlane.f32.xlu0 %v8903_v9 }
 0xb22   :  { %8907 = vadd.xlane.f32.xlu1 %v8906_v61  ;;  %8924 = vadd.xlane.f32.xlu0 %v8923_v54 }
 0xb26   :  { %8927 = vadd.xlane.f32.xlu1 %v8926_v53  ;;  %8948 = vadd.xlane.f32.xlu0 %v8947_v44 }
 0xb2a   :  { %8951 = vadd.xlane.f32.xlu1 %v8950_v37  ;;  %8972 = vadd.xlane.f32.xlu0 %v8971_v11  ;;  %v13449_v37 = vld [vmem:[%s19413_s6 + $0x80] sm:$0xff]  ;;  %v13452_v11 = vld [vmem:[%s19413_s6 + $0x98] sm:$0xff] }
 0xb2e   :  { %8975 = vadd.xlane.f32.xlu1 %v8974_v21 }
 0xb97   :  { %v8911_v56 = vpop.xlane.xlu0 %8910 }
 0xb9b   :  { %v8914_v33 = vpop.xlane.xlu1 %8913  ;;  %v8931_v5 = vpop.xlane.xlu0 %8930 }
 0xb9c   :  { %v8937_v3 = vadd.f32 %v8931_v5, %v8911_v56 }
 0xb9f   :  { %v8934_v12 = vpop.xlane.xlu1 %8933  ;;  %v8955_v34 = vpop.xlane.xlu0 %8954 }
 0xba0   :  { %v8961_v19 = vadd.f32 %v8955_v34, %v8937_v3  ;;  %v8938_v16 = vadd.f32 %v8934_v12, %v8914_v33  ;;  %v13450_v33 = vld [vmem:[%s19413_s6 + $0x88] sm:$0xff] }
 0xba3   :  { %v8958_v25 = vpop.xlane.xlu1 %8957  ;;  %v8979_v24 = vpop.xlane.xlu0 %8978 }
 0xba4   :  { %v8985_v2 = vadd.f32 %v8979_v24, %v8961_v19  ;;  %v8962_v13 = vadd.f32 %v8958_v25, %v8938_v16  ;;  %v13456_v19 = vld [vmem:[%s19413_s6 + $0xb8] sm:$0xff]  ;;  %v13455_v25 = vld [vmem:[%s19413_s6 + $0xb0] sm:$0xff] }
 0xba6   :  { %v8989_v43 = vmul.f32 0.03125, %v8985_v2 }
 0xba7   :  { %v8982_v15 = vpop.xlane.xlu1 %8981  ;;  %v8905_v30 = vpop.xlane.xlu0 %8904 }
 0xba8   :  { %v8993_v20 = vadd.f32 1e-05, %v8989_v43  ;;  %v8986_v46 = vadd.f32 %v8982_v15, %v8962_v13 }
 0xbaa   :  { %16331 = vrsqrt.f32 %v8993_v20  ;;  %v8990_v4 = vmul.f32 0.03125, %v8986_v46 }
 0xbab   :  { %v8908_v62 = vpop.xlane.xlu1 %8907  ;;  %v8925_v63 = vpop.xlane.xlu0 %8924 }
 0xbac   :  { %v8935_v41 = vadd.f32 %v8925_v63, %v8905_v30  ;;  %v8994_v9 = vadd.f32 1e-05, %v8990_v4 }
 0xbae   :  { %16333 = vrsqrt.f32 %v8994_v9 }
 0xbaf   :  { %v8928_v29 = vpop.xlane.xlu1 %8927  ;;  %v8949_v40 = vpop.xlane.xlu0 %8948 }
 0xbb0   :  { %v8959_v0 = vadd.f32 %v8949_v40, %v8935_v41  ;;  %v8936_v58 = vadd.f32 %v8928_v29, %v8908_v62 }
 0xbb3   :  { %v8952_v1 = vpop.xlane.xlu1 %8951  ;;  %v8973_v48 = vpop.xlane.xlu0 %8972 }
 0xbb4   :  { %v8983_v35 = vadd.f32 %v8973_v48, %v8959_v0  ;;  %v8960_v26 = vadd.f32 %v8952_v1, %v8936_v58 }
 0xbb6   :  { %v8987_v61 = vmul.f32 0.03125, %v8983_v35 }
 0xbb7   :  { %v16332_v54 = vpop.eup %16331  ;;  %v8976_v14 = vpop.xlane.xlu1 %8975 }
 0xbb8   :  { %v8991_v50 = vadd.f32 1e-05, %v8987_v61  ;;  %v8984_v53 = vadd.f32 %v8976_v14, %v8960_v26  ;;  %v9001_v44 = vmul.f32 %v16332_v54, %v13451_v59 }
 0xbba   :  { %16335 = vrsqrt.f32 %v8991_v50  ;;  %v8988_v27 = vmul.f32 0.03125, %v8984_v53  ;;  %9023 = vperm.xlu0 %15889, %v9001_v44   ;;  %v9005_v3 = vmul.f32 %v9001_v44, %v18631_v8  ;;  %v13454_v8 = vld [vmem:[%s19413_s6 + $0xa8] sm:$0xff] }
 0xbbb   :  { %v16334_v57 = vpop.eup %16333 }
 0xbbc   :  { %v8992_v18 = vadd.f32 1e-05, %v8988_v27  ;;  %v9002_v56 = vmul.f32 %v16334_v57, %v13452_v11  ;;  %v9009_v2 = vsub.f32 %v13455_v25, %v9005_v3 }
 0xbbe   :  { %16337 = vrsqrt.f32 %v8992_v18  ;;  %v9006_v34 = vmul.f32 %v9002_v56, %v18637_v31  ;;  %v13453_v31 = vld [vmem:[%s19413_s6 + $0xa0] sm:$0xff] }
 0xbc0   :  { %v9010_v24 = vsub.f32 %v13456_v19, %v9006_v34 }
 0xbc7   :  { %v16336_v55 = vpop.eup %16335 }
 0xbc8   :  { %v8999_v21 = vmul.f32 %v16336_v55, %v13449_v37 }
 0xbca   :  { %9013 = vperm.xlu1 %15890, %v8999_v21   ;;  %v9003_v15 = vmul.f32 %v8999_v21, %v18649_v52  ;;  %v16298_v52 = vld [vmem:[%s19414_s2 + $0x130] sm:$0xff]  }
 0xbcb   :  { %v16338_v5 = vpop.eup %16337  ;;  %15576 = vmatprep.mubr.msk.bf16.mxu1 %vm57_vm0, %v16298_v52 }
 0xbcc   :  { %v9000_v12 = vmul.f32 %v16338_v5, %v13450_v33  ;;  %v9007_v16 = vsub.f32 %v13453_v31, %v9003_v15 }
 0xbce   :  { %9018 = vperm.xlu0 %15889, %v9000_v12   ;;  %9028 = vperm.xlu1 %15890, %v9002_v56   ;;  %v9004_v43 = vmul.f32 %v9000_v12, %v18654_v32  ;;  %v16297_v32 = vld [vmem:[%s19414_s2 + $0x120] sm:$0xff]  }
 0xbcf   :  { %15568 = vmatprep.mubr.msk.bf16.mxu0 %vm57_vm0, %v16297_v32 }
 0xbd0   :  { %v9008_v30 = vsub.f32 %v13454_v8, %v9004_v43 }
 0xbd2   :  { %9052 = vperm.xlu0 %15889, %v9010_v24   ;;  %9047 = vperm.xlu1 %15890, %v9009_v2  }
 0xbd6   :  { %9042 = vperm.xlu0 %15889, %v9008_v30   ;;  %9037 = vperm.xlu1 %15890, %v9007_v16  }
 0xc35   :  { %v9024_v20 = vpop.permute.xlu0 %9023 }
 0xc36   :  { %v9033_v46 = vmul.f32 %v9024_v20, %v19532_v51  ;;  %v9065_v29 = vmul.f32 %v9024_v20, %v19533_v28  ;;  %v9077_v40 = vmul.f32 %v9024_v20, %v18582_v7  ;;  %v9089_v4 = vmul.f32 %v9024_v20, %v18584_v49 }
 0xc45   :  { %v9014_v13 = vpop.permute.xlu1 %9013 }
 0xc46   :  { %v9031_v41 = vmul.f32 %v9014_v13, %v19543_v60  ;;  %v9063_v0 = vmul.f32 %v9014_v13, %v19544_v23  ;;  %v9075_v1 = vmul.f32 %v9014_v13, %v18600_v42  ;;  %v9087_v48 = vmul.f32 %v9014_v13, %v18590_v22 }
 0xc49   :  { %v9029_v62 = vpop.permute.xlu1 %9028  ;;  %v9019_v63 = vpop.permute.xlu0 %9018 }
 0xc4a   :  { %v9034_v9 = vmul.f32 %v9029_v62, %v19541_v45  ;;  %v9066_v58 = vmul.f32 %v9029_v62, %v19542_v47  ;;  %v9078_v51 = vmul.f32 %v9029_v62, %v18603_v10  ;;  %v9090_v28 = vmul.f32 %v9029_v62, %v18605_v17 }
 0xc4b   :  { %v9032_v7 = vmul.f32 %v9019_v63, %v18608_v38  ;;  %v9064_v49 = vmul.f32 %v9019_v63, %v18596_v36  ;;  %v9076_v60 = vmul.f32 %v9019_v63, %v18611_v39  ;;  %v9088_v23 = vmul.f32 %v9019_v63, %v18615_v6 }
 0xc4d   :  { %v9048_v35 = vpop.permute.xlu1 %9047  ;;  %v9053_v42 = vpop.permute.xlu0 %9052 }
 0xc4e   :  { %v9057_v59 = vadd.f32 %v9048_v35, %v9033_v46  ;;  %v9069_v22 = vadd.f32 %v9065_v29, %v9048_v35  ;;  %v9081_v26 = vadd.f32 %v9077_v40, %v9048_v35  ;;  %v9093_v45 = vadd.f32 %v9089_v4, %v9048_v35  ;;  %v16299_v40 = vld [vmem:[%s19414_s2 + $0x128] sm:$0xff]   ;;  %v16300_v4 = vld [vmem:[%s19414_s2 + $0x138] sm:$0xff]   ;;  %v16313_v35 = vld [vmem:[%s19414_s2 + $0x1a0] sm:$0xff]  }
 0xc4f   :  { %v9058_v61 = vadd.f32 %v9053_v42, %v9034_v9  ;;  %v9070_v47 = vadd.f32 %v9066_v58, %v9053_v42  ;;  %v9082_v54 = vadd.f32 %v9078_v51, %v9053_v42  ;;  %v9094_v10 = vadd.f32 %v9090_v28, %v9053_v42  ;;  %v16305_v9 = vld [vmem:[%s19414_s2 + $0x160] sm:$0xff]   ;;  %v16306_v58 = vld [vmem:[%s19414_s2 + $0x170] sm:$0xff]   ;;  %v16307_v51 = vld [vmem:[%s19414_s2 + $0x168] sm:$0xff]  }
 0xc50   :  { %v9061_v14 = vmax.f32 %v9057_v59, 0.0  ;;  %v9073_v17 = vmax.f32 %v9069_v22, 0.0  ;;  %v9085_v50 = vmax.f32 %v9081_v26, 0.0  ;;  %v9097_v38 = vmax.f32 %v9093_v45, 0.0  ;;  %v16308_v28 = vld [vmem:[%s19414_s2 + $0x178] sm:$0xff]   ;;  %v16314_v42 = vld [vmem:[%s19414_s2 + $0x1a8] sm:$0xff]  }
 0xc51   :  { %v9062_v53 = vmax.f32 %v9058_v61, 0.0  ;;  %v9074_v36 = vmax.f32 %v9070_v47, 0.0  ;;  %v9086_v44 = vmax.f32 %v9082_v54, 0.0  ;;  %v9098_v39 = vmax.f32 %v9094_v10, 0.0  ;;  %v9038_v27 = vpop.permute.xlu1 %9037  ;;  %v9043_v6 = vpop.permute.xlu0 %9042  ;;  %v13529_v59 = vld [vmem:[%s19417_s5 + $0x10] sm:$0xf] }
 0xc52   :  { %v9101_v18 = vmax.f32 %v9061_v14, %v9073_v17  ;;  %v9105_v57 = vmax.f32 %v9085_v50, %v9097_v38  ;;  %v9055_v37 = vadd.f32 %v9038_v27, %v9031_v41  ;;  %v9067_v11 = vadd.f32 %v9063_v0, %v9038_v27  ;;  %v16301_v41 = vld [vmem:[%s19414_s2 + $0x140] sm:$0xff]   ;;  %v16302_v0 = vld [vmem:[%s19414_s2 + $0x150] sm:$0xff]  }
 0xc53   :  { %v9102_v55 = vmax.f32 %v9062_v53, %v9074_v36  ;;  %v9106_v21 = vmax.f32 %v9086_v44, %v9098_v39  ;;  %v9079_v56 = vadd.f32 %v9075_v1, %v9038_v27  ;;  %v9091_v33 = vadd.f32 %v9087_v48, %v9038_v27  ;;  %v16303_v1 = vld [vmem:[%s19414_s2 + $0x148] sm:$0xff]   ;;  %v16304_v48 = vld [vmem:[%s19414_s2 + $0x158] sm:$0xff]   ;;  %v9761_v26 = vld [vmem:[%s19417_s5] sm:$0xf] }
 0xc54   :  { %v9109_v5 = vmax.f32 %v9101_v18, %v9105_v57  ;;  %v9059_v12 = vmax.f32 %v9055_v37, 0.0  ;;  %v9071_v34 = vmax.f32 %v9067_v11, 0.0  ;;  %v9056_v3 = vadd.f32 %v9043_v6, %v9032_v7  ;;  %v16309_v7 = vld [vmem:[%s19414_s2 + $0x180] sm:$0xff]   ;;  %v13537_v47 = vld [vmem:[%s19417_s5 + $0x30] sm:$0xf] }
 0xc55   :  { %v9110_v19 = vmax.f32 %v9102_v55, %v9106_v21  ;;  %v9083_v25 = vmax.f32 %v9079_v56, 0.0  ;;  %v9095_v24 = vmax.f32 %v9091_v33, 0.0  ;;  %v9068_v2 = vadd.f32 %v9064_v49, %v9043_v6  ;;  %v16310_v49 = vld [vmem:[%s19414_s2 + $0x190] sm:$0xff]   ;;  %v13534_v61 = vld [vmem:[%s19417_s5 + $0x20] sm:$0xf] }
 0xc56   :  { %v9099_v43 = vmax.f32 %v9059_v12, %v9071_v34  ;;  %v9060_v15 = vmax.f32 %v9056_v3, 0.0  ;;  %v9080_v8 = vadd.f32 %v9076_v60, %v9043_v6  ;;  %v9092_v31 = vadd.f32 %v9088_v23, %v9043_v6  ;;  %v16311_v60 = vld [vmem:[%s19414_s2 + $0x188] sm:$0xff]   ;;  %v16312_v23 = vld [vmem:[%s19414_s2 + $0x198] sm:$0xff]   ;;  %v13540_v55 = vld [vmem:[%s19417_s5 + $0x40] sm:$0xf] }
 0xc57   :  { %v18739_v30 = vpack.c.bf16 %v9110_v19, %v9109_v5  ;;  %v9103_v16 = vmax.f32 %v9083_v25, %v9095_v24  ;;  %v9072_v32 = vmax.f32 %v9068_v2, 0.0  ;;  %v9772_v22 = vsel %vm9770_vm2, %v13529_v59, 0  ;;  %v13543_v21 = vld [vmem:[%s19417_s5 + $0x50] sm:$0xf] }
 0xc58   :  { %v9084_v52 = vmax.f32 %v9080_v8, 0.0  ;;  %v9096_v20 = vmax.f32 %v9092_v31, 0.0  ;;  %v9830_v45 = vsel %vm9770_vm2, %v9761_v26, 0  ;;  %v9890_v37 = vsel %vm9770_vm2, %v13534_v61, 0 }
 0xc59   :  { %v9100_v13 = vmax.f32 %v9060_v15, %v9072_v32  ;;  %15564 = vmatprep.subr.bf16.mxu0 %v18739_v30  ;;  %15572 = vmatprep.subr.bf16.mxu1 %v18739_v30  ;;  %v9107_v62 = vmax.f32 %v9099_v43, %v9103_v16  ;;  %v9954_v11 = vsel %vm9770_vm2, %v13537_v47, 0  ;;  %v10018_v8 = vsel %vm9770_vm2, %v13540_v55, 0  ;;  %v13549_v16 = vld [vmem:[%s19417_s5 + $0x70] sm:$0xf] }
 0xc5a   :  { %v9104_v63 = vmax.f32 %v9084_v52, %v9096_v20  ;;  %15565 = vmatpush3.bf16.msra.mxu0 %v18739_v30  ;;  %15573 = vmatpush3.bf16.msra.mxu1 %v18739_v30  ;;  %v10082_v31 = vsel %vm9770_vm2, %v13543_v21, 0 }
 0xc5c   :  { %v9108_v46 = vmax.f32 %v9100_v13, %v9104_v63 }
 0xc5e   :  { %v9111_v29 = vpack.c.bf16 %v9108_v46, %v9107_v62 }
 0xc60   :  { %15566 = vmatprep.subr.bf16.mxu0 %v9111_v29  ;;  %15574 = vmatprep.subr.bf16.mxu1 %v9111_v29 }
 0xc61   :  { %15567 = vmatpush3.bf16.msra.mxu0 %v9111_v29  ;;  %15575 = vmatpush3.bf16.msra.mxu1 %v9111_v29 }
 0xc62   :  { %15580 = vmatprep.subr.bf16.mxu0 %v18739_v30  ;;  %15588 = vmatprep.subr.bf16.mxu1 %v18739_v30 }
 0xc64   :  { %15569 = vmatmul.mubr.msk.bf16.vlgmr.msra.gmra.mxu0 %vm57_vm0, %v16299_v40  ;;  %15577 = vmatmul.mubr.msk.bf16.vlgmr.msra.gmra.mxu1 %vm57_vm0, %v16300_v4 }
 0xc65   :  { %15581 = vmatpush3.bf16.msra.mxu0 %v18739_v30  ;;  %15589 = vmatpush3.bf16.msra.mxu1 %v18739_v30 }
 0xc66   :  { %15582 = vmatprep.subr.bf16.mxu0 %v9111_v29  ;;  %15590 = vmatprep.subr.bf16.mxu1 %v9111_v29 }
 0xc67   :  { %15584 = vmatprep.mubr.msk.bf16.mxu0 %vm57_vm0, %v16301_v41  ;;  %15592 = vmatprep.mubr.msk.bf16.mxu1 %vm57_vm0, %v16302_v0 }
 0xc69   :  { %15583 = vmatpush3.bf16.msra.mxu0 %v9111_v29  ;;  %15591 = vmatpush3.bf16.msra.mxu1 %v9111_v29 }
 0xc6a   :  { %15596 = vmatprep.subr.bf16.mxu0 %v18739_v30  ;;  %15604 = vmatprep.subr.bf16.mxu1 %v18739_v30 }
 0xc6c   :  { %15585 = vmatmul.mubr.msk.bf16.vlgmr.msra.gmra.mxu0 %vm57_vm0, %v16303_v1  ;;  %15593 = vmatmul.mubr.msk.bf16.vlgmr.msra.gmra.mxu1 %vm57_vm0, %v16304_v48  ;;  %v10210_v48 = vsel %vm9770_vm2, %v13549_v16, 0 }
 0xc6d   :  { %15597 = vmatpush3.bf16.msra.mxu0 %v18739_v30  ;;  %15605 = vmatpush3.bf16.msra.mxu1 %v18739_v30 }
 0xc6e   :  { %15598 = vmatprep.subr.bf16.mxu0 %v9111_v29  ;;  %15606 = vmatprep.subr.bf16.mxu1 %v9111_v29 }
 0xc6f   :  { %15600 = vmatprep.mubr.msk.bf16.mxu0 %vm57_vm0, %v16305_v9  ;;  %15608 = vmatprep.mubr.msk.bf16.mxu1 %vm57_vm0, %v16306_v58  ;;  %v13552_v9 = vld [vmem:[%s19417_s5 + $0x80] sm:$0xf]  ;;  %v13556_v58 = vld [vmem:[%s19417_s5 + $0x14] sm:$0xf] }
 0xc71   :  { %15599 = vmatpush3.bf16.msra.mxu0 %v9111_v29  ;;  %15607 = vmatpush3.bf16.msra.mxu1 %v9111_v29 }
 0xc72   :  { %15612 = vmatprep.subr.bf16.mxu0 %v18739_v30  ;;  %15620 = vmatprep.subr.bf16.mxu1 %v18739_v30 }
 0xc74   :  { %15601 = vmatmul.mubr.msk.bf16.vlgmr.msra.gmra.mxu0 %vm57_vm0, %v16307_v51  ;;  %15609 = vmatmul.mubr.msk.bf16.vlgmr.msra.gmra.mxu1 %vm57_vm0, %v16308_v28 }
 0xc75   :  { %15613 = vmatpush3.bf16.msra.mxu0 %v18739_v30  ;;  %15621 = vmatpush3.bf16.msra.mxu1 %v18739_v30 }
 0xc76   :  { %15614 = vmatprep.subr.bf16.mxu0 %v9111_v29  ;;  %15622 = vmatprep.subr.bf16.mxu1 %v9111_v29 }
 0xc77   :  { %15616 = vmatprep.mubr.msk.bf16.mxu0 %vm57_vm0, %v16309_v7  ;;  %15624 = vmatprep.mubr.msk.bf16.mxu1 %vm57_vm0, %v16310_v49 }
 0xc79   :  { %15615 = vmatpush3.bf16.msra.mxu0 %v9111_v29  ;;  %15623 = vmatpush3.bf16.msra.mxu1 %v9111_v29 }
 0xc7a   :  { %15628 = vmatprep.subr.bf16.mxu0 %v18739_v30  ;;  %15852 = vmatprep.subr.msk.bf16.mxu1 %vm9770_vm2, %v13529_v59 }
 0xc7c   :  { %15617 = vmatmul.mubr.msk.bf16.vlgmr.msra.gmra.mxu0 %vm57_vm0, %v16311_v60  ;;  %15625 = vmatmul.mubr.msk.bf16.vlgmr.msra.gmra.mxu1 %vm57_vm0, %v16312_v23 }
 0xc7d   :  { %15629 = vmatpush3.bf16.msra.mxu0 %v18739_v30  ;;  %15632 = vmatprep.mubr.msk.bf16.mxu0 %vm57_vm0, %v16313_v35  ;;  %v13546_v30 = vld [vmem:[%s19417_s5 + $0x60] sm:$0xf] }
 0xc7e   :  { %15630 = vmatprep.subr.bf16.mxu0 %v9111_v29  ;;  %15637 = vmatpush3.bf16.msra.mxu1 %v9772_v22  ;;  %v10146_v1 = vsel %vm9770_vm2, %v13546_v30, 0 }
 0xc7f   :  { %15854 = vmatprep.subr.msk.bf16.mxu1 %vm9770_vm2, %v13534_v61  ;;  %v10334_v61 = vsel %vm9770_vm2, %v13556_v58, 0 }
 0xc81   :  { %15631 = vmatpush3.bf16.msra.mxu0 %v9111_v29 }
 0xc82   :  { %15853 = vmatprep.subr.msk.bf16.mxu0 %vm9770_vm2, %v9761_v26 }
 0xc84   :  { %15633 = vmatmul.mubr.msk.bf16.vlgmr.msra.gmra.mxu0 %vm57_vm0, %v16314_v42 }
 0xc85   :  { %15643 = vmatpush3.bf16.msra.mxu0 %v9830_v45  ;;  %v10274_v45 = vsel %vm9770_vm2, %v13552_v9, 0 }
 0xc86   :  { %15855 = vmatprep.subr.msk.bf16.mxu0 %vm9770_vm2, %v13537_v47  ;;  %v13555_v47 = vld [vmem:[%s19417_s5 + $0x4] sm:$0xf] }
 0xd24   :  { %v15570_v54 = vpop.f32.mrf.mxu0  ;;  %v15578_v10 = vpop.f32.mrf.mxu1 }
 0xd26   :  { %v9168_v14 = vpop.f32.mrf.mxu0  ;;  %v9240_v17 = vpop.f32.mrf.mxu1 }
 0xd28   :  { %v15571_v50 = vpop.f32.mrf.mxu0  ;;  %v15579_v38 = vpop.f32.mrf.mxu1 }
 0xd29   :  { %v18845_v27 = vpack.c.bf16 %v15571_v50, %v15570_v54  ;;  %v18847_v6 = vpack.c.bf16 %v15579_v38, %v15578_v10  ;;  %v13561_v10 = vld [vmem:[%s19417_s5 + $0x24] sm:$0xf] }
 0xd2a   :  { %v9171_v53 = vpop.f32.mrf.mxu0  ;;  %v9243_v36 = vpop.f32.mrf.mxu1 }
 0xd2b   :  { %v18841_v44 = vpack.c.bf16 %v9171_v53, %v9168_v14  ;;  %v18843_v39 = vpack.c.bf16 %v9243_v36, %v9240_v17  ;;  %v10386_v53 = vsel %vm9770_vm2, %v13555_v47, 0  ;;  %v10440_v36 = vsel %vm9770_vm2, %v13561_v10, 0 }
 0xd2c   :  { %v15586_v18 = vpop.f32.mrf.mxu0  ;;  %v15594_v57 = vpop.f32.mrf.mxu1 }
 0xd2d   :  { %15638 = vmatprep.mubr.msk.bf16.mxu1 %vm8877_vm1, %v18843_v39  ;;  %15644 = vmatprep.mubr.msk.bf16.mxu0 %vm8877_vm1, %v18841_v44 }
 0xd2e   :  { %v9312_v56 = vpop.f32.mrf.mxu0  ;;  %v9384_v33 = vpop.f32.mrf.mxu1  ;;  %15639 = vmatmul.mubr.msk.bf16.vlgmr.msra.gmra.mxu1 %vm8877_vm1, %v18847_v6  ;;  %15645 = vmatmul.mubr.msk.bf16.vlgmr.msra.gmra.mxu0 %vm8877_vm1, %v18845_v27 }
 0xd2f   :  { %15649 = vmatpush3.bf16.msra.mxu1 %v9890_v37  ;;  %15655 = vmatpush3.bf16.msra.mxu0 %v9954_v11 }
 0xd30   :  { %v15587_v5 = vpop.f32.mrf.mxu0  ;;  %v15595_v12 = vpop.f32.mrf.mxu1  ;;  %15856 = vmatprep.subr.msk.bf16.mxu1 %vm9770_vm2, %v13540_v55  ;;  %15857 = vmatprep.subr.msk.bf16.mxu0 %vm9770_vm2, %v13543_v21  ;;  %v13570_v55 = vld [vmem:[%s19417_s5 + $0x54] sm:$0xf]  ;;  %v13573_v21 = vld [vmem:[%s19417_s5 + $0x64] sm:$0xf] }
 0xd31   :  { %v18871_v24 = vpack.c.bf16 %v15587_v5, %v15586_v18  ;;  %v18873_v2 = vpack.c.bf16 %v15595_v12, %v15594_v57  ;;  %v13564_v18 = vld [vmem:[%s19417_s5 + $0x34] sm:$0xf]  ;;  %v13567_v57 = vld [vmem:[%s19417_s5 + $0x44] sm:$0xf] }
 0xd32   :  { %v9315_v34 = vpop.f32.mrf.mxu0  ;;  %v9387_v3 = vpop.f32.mrf.mxu1  ;;  %v10498_v37 = vsel %vm9770_vm2, %v13564_v18, 0  ;;  %v10556_v11 = vsel %vm9770_vm2, %v13567_v57, 0  ;;  %v13576_v5 = vld [vmem:[%s19417_s5 + $0x74] sm:$0xf]  ;;  %v13579_v12 = vld [vmem:[%s19417_s5 + $0x84] sm:$0xf] }
 0xd33   :  { %v18867_v19 = vpack.c.bf16 %v9315_v34, %v9312_v56  ;;  %v18869_v25 = vpack.c.bf16 %v9387_v3, %v9384_v33  ;;  %v10614_v56 = vsel %vm9770_vm2, %v13570_v55, 0  ;;  %v10672_v33 = vsel %vm9770_vm2, %v13573_v21, 0 }
 0xd34   :  { %v15602_v43 = vpop.f32.mrf.mxu0  ;;  %v15610_v15 = vpop.f32.mrf.mxu1  ;;  %v10730_v34 = vsel %vm9770_vm2, %v13576_v5, 0  ;;  %v10788_v3 = vsel %vm9770_vm2, %v13579_v12, 0 }
 0xd35   :  { %15650 = vmatprep.mubr.msk.bf16.mxu1 %vm8877_vm1, %v18867_v19  ;;  %15656 = vmatprep.mubr.msk.bf16.mxu0 %vm8877_vm1, %v18869_v25 }
 0xd36   :  { %v9456_v32 = vpop.f32.mrf.mxu0  ;;  %v9528_v52 = vpop.f32.mrf.mxu1  ;;  %15651 = vmatmul.mubr.msk.bf16.vlgmr.msra.gmra.mxu1 %vm8877_vm1, %v18871_v24  ;;  %15657 = vmatmul.mubr.msk.bf16.vlgmr.msra.gmra.mxu0 %vm8877_vm1, %v18873_v2 }
 0xd37   :  { %15661 = vmatpush3.bf16.msra.mxu1 %v10018_v8  ;;  %15667 = vmatpush3.bf16.msra.mxu0 %v10082_v31 }
 0xd38   :  { %v15603_v20 = vpop.f32.mrf.mxu0  ;;  %v15611_v13 = vpop.f32.mrf.mxu1  ;;  %15858 = vmatprep.subr.msk.bf16.mxu1 %vm9770_vm2, %v13546_v30  ;;  %15859 = vmatprep.subr.msk.bf16.mxu0 %vm9770_vm2, %v13549_v16  ;;  %v13588_v30 = vld [vmem:[%s19417_s5 + $0x28] sm:$0xf]  ;;  %v13591_v16 = vld [vmem:[%s19417_s5 + $0x38] sm:$0xf] }
 0xd39   :  { %v18897_v40 = vpack.c.bf16 %v15603_v20, %v15602_v43  ;;  %v18899_v4 = vpack.c.bf16 %v15611_v13, %v15610_v15  ;;  %v13583_v43 = vld [vmem:[%s19417_s5 + $0x18] sm:$0xf]  ;;  %v13582_v15 = vld [vmem:[%s19417_s5 + $0x8] sm:$0xf] }
 0xd3a   :  { %v9459_v62 = vpop.f32.mrf.mxu0  ;;  %v9531_v63 = vpop.f32.mrf.mxu1  ;;  %v10848_v8 = vsel %vm9770_vm2, %v13583_v43, 0  ;;  %v10900_v31 = vsel %vm9770_vm2, %v13582_v15, 0  ;;  %v13594_v20 = vld [vmem:[%s19417_s5 + $0x48] sm:$0xf]  ;;  %v13597_v13 = vld [vmem:[%s19417_s5 + $0x58] sm:$0xf] }
 0xd3b   :  { %v18893_v46 = vpack.c.bf16 %v9459_v62, %v9456_v32  ;;  %v18895_v29 = vpack.c.bf16 %v9531_v63, %v9528_v52  ;;  %v10954_v32 = vsel %vm9770_vm2, %v13588_v30, 0  ;;  %v11012_v52 = vsel %vm9770_vm2, %v13591_v16, 0 }
 0xd3c   :  { %v15618_v41 = vpop.f32.mrf.mxu0  ;;  %v15626_v0 = vpop.f32.mrf.mxu1  ;;  %v11070_v62 = vsel %vm9770_vm2, %v13594_v20, 0  ;;  %v11128_v63 = vsel %vm9770_vm2, %v13597_v13, 0 }
 0xd3d   :  { %15662 = vmatprep.mubr.msk.bf16.mxu1 %vm8877_vm1, %v18893_v46  ;;  %15668 = vmatprep.mubr.msk.bf16.mxu0 %vm8877_vm1, %v18895_v29 }
 0xd3e   :  { %v9600_v51 = vpop.f32.mrf.mxu0  ;;  %v9672_v28 = vpop.f32.mrf.mxu1  ;;  %15663 = vmatmul.mubr.msk.bf16.vlgmr.msra.gmra.mxu1 %vm8877_vm1, %v18897_v40  ;;  %15669 = vmatmul.mubr.msk.bf16.vlgmr.msra.gmra.mxu0 %vm8877_vm1, %v18899_v4 }
 0xd3f   :  { %15673 = vmatpush3.bf16.msra.mxu1 %v10146_v1  ;;  %15679 = vmatpush3.bf16.msra.mxu0 %v10210_v48 }
 0xd40   :  { %v15619_v7 = vpop.f32.mrf.mxu0  ;;  %v15627_v49 = vpop.f32.mrf.mxu1  ;;  %15860 = vmatprep.subr.msk.bf16.mxu1 %vm9770_vm2, %v13552_v9  ;;  %15861 = vmatprep.subr.msk.bf16.mxu0 %vm9770_vm2, %v13556_v58  ;;  %v13606_v9 = vld [vmem:[%s19417_s5 + $0x88] sm:$0xf]  ;;  %v13610_v58 = vld [vmem:[%s19417_s5 + $0x1c] sm:$0xf] }
 0xd41   :  { %v18923_v59 = vpack.c.bf16 %v15619_v7, %v15618_v41  ;;  %v18925_v22 = vpack.c.bf16 %v15627_v49, %v15626_v0  ;;  %v13600_v41 = vld [vmem:[%s19417_s5 + $0x68] sm:$0xf]  ;;  %v13603_v0 = vld [vmem:[%s19417_s5 + $0x78] sm:$0xf]  ;;  %v13609_v7 = vld [vmem:[%s19417_s5 + $0xc] sm:$0xf] }
 0xd42   :  { %v9603_v60 = vpop.f32.mrf.mxu0  ;;  %v9675_v23 = vpop.f32.mrf.mxu1  ;;  %v11186_v1 = vsel %vm9770_vm2, %v13600_v41, 0  ;;  %v11244_v48 = vsel %vm9770_vm2, %v13603_v0, 0  ;;  %v13615_v49 = vld [vmem:[%s19417_s5 + $0x2c] sm:$0xf] }
 0xd43   :  { %v18919_v35 = vpack.c.bf16 %v9603_v60, %v9600_v51  ;;  %v18921_v42 = vpack.c.bf16 %v9675_v23, %v9672_v28  ;;  %v11302_v51 = vsel %vm9770_vm2, %v13606_v9, 0  ;;  %v11362_v28 = vsel %vm9770_vm2, %v13610_v58, 0 }
 0xd44   :  { %v15634_v26 = vpop.f32.mrf.mxu0  ;;  %v11414_v60 = vsel %vm9770_vm2, %v13609_v7, 0  ;;  %v11468_v23 = vsel %vm9770_vm2, %v13615_v49, 0 }
 0xd45   :  { %15674 = vmatprep.mubr.msk.bf16.mxu1 %vm8877_vm1, %v18919_v35  ;;  %15680 = vmatprep.mubr.msk.bf16.mxu0 %vm8877_vm1, %v18921_v42 }
 0xd46   :  { %v9744_v54 = vpop.f32.mrf.mxu0  ;;  %15675 = vmatmul.mubr.msk.bf16.vlgmr.msra.gmra.mxu1 %vm8877_vm1, %v18923_v59  ;;  %15681 = vmatmul.mubr.msk.bf16.vlgmr.msra.gmra.mxu0 %vm8877_vm1, %v18925_v22 }
 0xd47   :  { %15685 = vmatpush3.bf16.msra.mxu1 %v10274_v45  ;;  %15692 = vmatprep.mubr.msk.bf16.mxu0 %vm8877_vm1, %v18843_v39 }
 0xd48   :  { %v15635_v14 = vpop.f32.mrf.mxu0  ;;  %15691 = vmatpush3.bf16.msra.mxu0 %v10334_v61  ;;  %15862 = vmatprep.subr.msk.bf16.mxu1 %vm9770_vm2, %v13555_v47 }
 0xd49   :  { %15863 = vmatprep.subr.msk.bf16.mxu0 %vm9770_vm2, %v13561_v10  ;;  %v18949_v38 = vpack.c.bf16 %v15635_v14, %v15634_v26  ;;  %v13618_v26 = vld [vmem:[%s19417_s5 + $0x3c] sm:$0xf] }
 0xd4a   :  { %v9747_v17 = vpop.f32.mrf.mxu0 }
 0xd4b   :  { %v18947_v50 = vpack.c.bf16 %v9747_v17, %v9744_v54 }
 0xd4d   :  { %15686 = vmatprep.mubr.msk.bf16.mxu1 %vm8877_vm1, %v18947_v50 }
 0xd4e   :  { %15687 = vmatmul.mubr.msk.bf16.vlgmr.msra.gmra.mxu1 %vm8877_vm1, %v18949_v38  ;;  %15693 = vmatmul.mubr.msk.bf16.vlgmr.msra.gmra.mxu0 %vm8877_vm1, %v18847_v6 }
 0xd4f   :  { %15697 = vmatpush3.bf16.msra.mxu1 %v10386_v53  ;;  %15698 = vmatprep.mubr.msk.bf16.mxu1 %vm8877_vm1, %v18841_v44 }
 0xd50   :  { %15704 = vmatprep.mubr.msk.bf16.mxu0 %vm8877_vm1, %v18867_v19  ;;  %15703 = vmatpush3.bf16.msra.mxu0 %v10440_v36 }
 0xd51   :  { %15864 = vmatprep.subr.msk.bf16.mxu1 %vm9770_vm2, %v13564_v18  ;;  %15865 = vmatprep.subr.msk.bf16.mxu0 %vm9770_vm2, %v13567_v57 }
 0xd56   :  { %15699 = vmatmul.mubr.msk.bf16.vlgmr.msra.gmra.mxu1 %vm8877_vm1, %v18845_v27  ;;  %15705 = vmatmul.mubr.msk.bf16.vlgmr.msra.gmra.mxu0 %vm8877_vm1, %v18871_v24 }
 0xd57   :  { %15709 = vmatpush3.bf16.msra.mxu1 %v10498_v37  ;;  %15710 = vmatprep.mubr.msk.bf16.mxu1 %vm8877_vm1, %v18869_v25 }
 0xd58   :  { %15716 = vmatprep.mubr.msk.bf16.mxu0 %vm8877_vm1, %v18893_v46  ;;  %15715 = vmatpush3.bf16.msra.mxu0 %v10556_v11 }
 0xd59   :  { %15866 = vmatprep.subr.msk.bf16.mxu1 %vm9770_vm2, %v13570_v55  ;;  %15867 = vmatprep.subr.msk.bf16.mxu0 %vm9770_vm2, %v13573_v21 }
 0xd5e   :  { %15711 = vmatmul.mubr.msk.bf16.vlgmr.msra.gmra.mxu1 %vm8877_vm1, %v18873_v2  ;;  %15717 = vmatmul.mubr.msk.bf16.vlgmr.msra.gmra.mxu0 %vm8877_vm1, %v18897_v40 }
 0xd5f   :  { %15721 = vmatpush3.bf16.msra.mxu1 %v10614_v56  ;;  %15722 = vmatprep.mubr.msk.bf16.mxu1 %vm8877_vm1, %v18895_v29 }
 0xd60   :  { %15728 = vmatprep.mubr.msk.bf16.mxu0 %vm8877_vm1, %v18919_v35  ;;  %15727 = vmatpush3.bf16.msra.mxu0 %v10672_v33 }
 0xd61   :  { %15868 = vmatprep.subr.msk.bf16.mxu1 %vm9770_vm2, %v13576_v5  ;;  %15869 = vmatprep.subr.msk.bf16.mxu0 %vm9770_vm2, %v13579_v12 }
 0xd66   :  { %15723 = vmatmul.mubr.msk.bf16.vlgmr.msra.gmra.mxu1 %vm8877_vm1, %v18899_v4  ;;  %15729 = vmatmul.mubr.msk.bf16.vlgmr.msra.gmra.mxu0 %vm8877_vm1, %v18923_v59 }
 0xd67   :  { %15733 = vmatpush3.bf16.msra.mxu1 %v10730_v34  ;;  %15734 = vmatprep.mubr.msk.bf16.mxu1 %vm8877_vm1, %v18921_v42 }
 0xd68   :  { %15740 = vmatprep.mubr.msk.bf16.mxu0 %vm8877_vm1, %v18947_v50  ;;  %15739 = vmatpush3.bf16.msra.mxu0 %v10788_v3 }
 0xd69   :  { %15870 = vmatprep.subr.msk.bf16.mxu1 %vm9770_vm2, %v13583_v43  ;;  %15871 = vmatprep.subr.msk.bf16.mxu0 %vm9770_vm2, %v13582_v15 }
 0xd6e   :  { %15735 = vmatmul.mubr.msk.bf16.vlgmr.msra.gmra.mxu1 %vm8877_vm1, %v18925_v22  ;;  %15741 = vmatmul.mubr.msk.bf16.vlgmr.msra.gmra.mxu0 %vm8877_vm1, %v18949_v38 }
 0xd6f   :  { %15745 = vmatpush3.bf16.msra.mxu1 %v10848_v8  ;;  %15746 = vmatprep.mubr.msk.bf16.mxu1 %vm8877_vm1, %v18843_v39 }
 0xd70   :  { %15752 = vmatprep.mubr.msk.bf16.mxu0 %vm8877_vm1, %v18841_v44  ;;  %15751 = vmatpush3.bf16.msra.mxu0 %v10900_v31 }
 0xd71   :  { %15872 = vmatprep.subr.msk.bf16.mxu1 %vm9770_vm2, %v13588_v30  ;;  %15873 = vmatprep.subr.msk.bf16.mxu0 %vm9770_vm2, %v13591_v16 }
 0xd76   :  { %15747 = vmatmul.mubr.msk.bf16.vlgmr.msra.gmra.mxu1 %vm8877_vm1, %v18847_v6  ;;  %15753 = vmatmul.mubr.msk.bf16.vlgmr.msra.gmra.mxu0 %vm8877_vm1, %v18845_v27 }
 0xd77   :  { %15757 = vmatpush3.bf16.msra.mxu1 %v10954_v32  ;;  %15758 = vmatprep.mubr.msk.bf16.mxu1 %vm8877_vm1, %v18867_v19 }
 0xd78   :  { %15764 = vmatprep.mubr.msk.bf16.mxu0 %vm8877_vm1, %v18869_v25  ;;  %15763 = vmatpush3.bf16.msra.mxu0 %v11012_v52 }
 0xd79   :  { %15874 = vmatprep.subr.msk.bf16.mxu1 %vm9770_vm2, %v13594_v20  ;;  %15875 = vmatprep.subr.msk.bf16.mxu0 %vm9770_vm2, %v13597_v13 }
 0xd7e   :  { %15759 = vmatmul.mubr.msk.bf16.vlgmr.msra.gmra.mxu1 %vm8877_vm1, %v18871_v24  ;;  %15765 = vmatmul.mubr.msk.bf16.vlgmr.msra.gmra.mxu0 %vm8877_vm1, %v18873_v2 }
 0xd7f   :  { %15769 = vmatpush3.bf16.msra.mxu1 %v11070_v62  ;;  %15770 = vmatprep.mubr.msk.bf16.mxu1 %vm8877_vm1, %v18893_v46 }
 0xd80   :  { %15776 = vmatprep.mubr.msk.bf16.mxu0 %vm8877_vm1, %v18895_v29  ;;  %15775 = vmatpush3.bf16.msra.mxu0 %v11128_v63 }
 0xd81   :  { %15876 = vmatprep.subr.msk.bf16.mxu1 %vm9770_vm2, %v13600_v41  ;;  %15877 = vmatprep.subr.msk.bf16.mxu0 %vm9770_vm2, %v13603_v0 }
 0xd86   :  { %15771 = vmatmul.mubr.msk.bf16.vlgmr.msra.gmra.mxu1 %vm8877_vm1, %v18897_v40  ;;  %15777 = vmatmul.mubr.msk.bf16.vlgmr.msra.gmra.mxu0 %vm8877_vm1, %v18899_v4 }
 0xd87   :  { %15781 = vmatpush3.bf16.msra.mxu1 %v11186_v1  ;;  %15782 = vmatprep.mubr.msk.bf16.mxu1 %vm8877_vm1, %v18919_v35 }
 0xd88   :  { %15788 = vmatprep.mubr.msk.bf16.mxu0 %vm8877_vm1, %v18921_v42  ;;  %15787 = vmatpush3.bf16.msra.mxu0 %v11244_v48 }
 0xd89   :  { %15878 = vmatprep.subr.msk.bf16.mxu1 %vm9770_vm2, %v13606_v9  ;;  %15879 = vmatprep.subr.msk.bf16.mxu0 %vm9770_vm2, %v13610_v58 }
 0xd8e   :  { %15783 = vmatmul.mubr.msk.bf16.vlgmr.msra.gmra.mxu1 %vm8877_vm1, %v18923_v59  ;;  %15789 = vmatmul.mubr.msk.bf16.vlgmr.msra.gmra.mxu0 %vm8877_vm1, %v18925_v22 }
 0xd8f   :  { %15793 = vmatpush3.bf16.msra.mxu1 %v11302_v51  ;;  %15794 = vmatprep.mubr.msk.bf16.mxu1 %vm8877_vm1, %v18947_v50 }
 0xd90   :  { %15800 = vmatprep.mubr.msk.bf16.mxu0 %vm8877_vm1, %v18843_v39  ;;  %15799 = vmatpush3.bf16.msra.mxu0 %v11362_v28  ;;  %v13621_v39 = vld [vmem:[%s19417_s5 + $0x4c] sm:$0xf] }
 0xd91   :  { %15880 = vmatprep.subr.msk.bf16.mxu1 %vm9770_vm2, %v13609_v7  ;;  %15881 = vmatprep.subr.msk.bf16.mxu0 %vm9770_vm2, %v13615_v49  ;;  %v11584_v45 = vsel %vm9770_vm2, %v13621_v39, 0 }
 0xd96   :  { %15795 = vmatmul.mubr.msk.bf16.vlgmr.msra.gmra.mxu1 %vm8877_vm1, %v18949_v38  ;;  %15801 = vmatmul.mubr.msk.bf16.vlgmr.msra.gmra.mxu0 %vm8877_vm1, %v18847_v6  ;;  %v11526_v6 = vsel %vm9770_vm2, %v13618_v26, 0 }
 0xd97   :  { %15805 = vmatpush3.bf16.msra.mxu1 %v11414_v60  ;;  %15806 = vmatprep.mubr.msk.bf16.mxu1 %vm8877_vm1, %v18841_v44  ;;  %v13624_v44 = vld [vmem:[%s19417_s5 + $0x5c] sm:$0xf] }
 0xd98   :  { %15812 = vmatprep.mubr.msk.bf16.mxu0 %vm8877_vm1, %v18867_v19  ;;  %15811 = vmatpush3.bf16.msra.mxu0 %v11468_v23  ;;  %v13627_v19 = vld [vmem:[%s19417_s5 + $0x6c] sm:$0xf] }
 0xd99   :  { %15882 = vmatprep.subr.msk.bf16.mxu1 %vm9770_vm2, %v13618_v26  ;;  %15883 = vmatprep.subr.msk.bf16.mxu0 %vm9770_vm2, %v13621_v39 }
 0xd9e   :  { %15807 = vmatmul.mubr.msk.bf16.vlgmr.msra.gmra.mxu1 %vm8877_vm1, %v18845_v27  ;;  %15813 = vmatmul.mubr.msk.bf16.vlgmr.msra.gmra.mxu0 %vm8877_vm1, %v18871_v24  ;;  %v11642_v27 = vsel %vm9770_vm2, %v13624_v44, 0  ;;  %v11700_v24 = vsel %vm9770_vm2, %v13627_v19, 0 }
 0xd9f   :  { %15817 = vmatpush3.bf16.msra.mxu1 %v11526_v6  ;;  %15818 = vmatprep.mubr.msk.bf16.mxu1 %vm8877_vm1, %v18869_v25  ;;  %v13630_v25 = vld [vmem:[%s19417_s5 + $0x7c] sm:$0xf] }
 0xda0   :  { %15824 = vmatprep.mubr.msk.bf16.mxu0 %vm8877_vm1, %v18893_v46  ;;  %15823 = vmatpush3.bf16.msra.mxu0 %v11584_v45  ;;  %v13633_v46 = vld [vmem:[%s19417_s5 + $0x8c] sm:$0xf] }
 0xda1   :  { %15884 = vmatprep.subr.msk.bf16.mxu1 %vm9770_vm2, %v13624_v44  ;;  %15885 = vmatprep.subr.msk.bf16.mxu0 %vm9770_vm2, %v13627_v19 }
 0xda6   :  { %15819 = vmatmul.mubr.msk.bf16.vlgmr.msra.gmra.mxu1 %vm8877_vm1, %v18873_v2  ;;  %15825 = vmatmul.mubr.msk.bf16.vlgmr.msra.gmra.mxu0 %vm8877_vm1, %v18897_v40  ;;  %v11758_v2 = vsel %vm9770_vm2, %v13630_v25, 0  ;;  %v11816_v40 = vsel %vm9770_vm2, %v13633_v46, 0 }
 0xda7   :  { %15829 = vmatpush3.bf16.msra.mxu1 %v11642_v27  ;;  %15830 = vmatprep.mubr.msk.bf16.mxu1 %vm8877_vm1, %v18895_v29 }
 0xda8   :  { %15836 = vmatprep.mubr.msk.bf16.mxu0 %vm8877_vm1, %v18919_v35  ;;  %15835 = vmatpush3.bf16.msra.mxu0 %v11700_v24 }
 0xda9   :  { %15886 = vmatprep.subr.msk.bf16.mxu1 %vm9770_vm2, %v13630_v25  ;;  %15887 = vmatprep.subr.msk.bf16.mxu0 %vm9770_vm2, %v13633_v46 }
 0xdae   :  { %15831 = vmatmul.mubr.msk.bf16.vlgmr.msra.gmra.mxu1 %vm8877_vm1, %v18899_v4  ;;  %15837 = vmatmul.mubr.msk.bf16.vlgmr.msra.gmra.mxu0 %vm8877_vm1, %v18923_v59 }
 0xdaf   :  { %15841 = vmatpush3.bf16.msra.mxu1 %v11758_v2  ;;  %15842 = vmatprep.mubr.msk.bf16.mxu1 %vm8877_vm1, %v18921_v42 }
 0xdb0   :  { %15848 = vmatprep.mubr.msk.bf16.mxu0 %vm8877_vm1, %v18947_v50  ;;  %15847 = vmatpush3.bf16.msra.mxu0 %v11816_v40 }
 0xdb6   :  { %15843 = vmatmul.mubr.msk.bf16.vlgmr.msra.gmra.mxu1 %vm8877_vm1, %v18925_v22  ;;  %15849 = vmatmul.mubr.msk.bf16.vlgmr.msra.gmra.mxu0 %vm8877_vm1, %v18949_v38 }
 0xdee   :  { %v15640_v29 = vpop.f32.mrf.mxu1  ;;  %v15646_v35 = vpop.f32.mrf.mxu0 }
 0xdef   :  { %v9875_v4 = vadd.f32 %v15646_v35, %v15640_v29 }
 0xdf0   :  { %v9808_v61 = vpop.f32.mrf.mxu1  ;;  %v9866_v47 = vpop.f32.mrf.mxu0 }
 0xdf1   :  { %v9867_v59 = vadd.f32 %v9866_v47, %v9808_v61 }
 0xdf2   :  { %v15641_v54 = vpop.f32.mrf.mxu1  ;;  %v15647_v10 = vpop.f32.mrf.mxu0 }
 0xdf3   :  { %v9878_v14 = vadd.f32 %v15647_v10, %v15641_v54 }
 0xdf4   :  { %v9811_v42 = vpop.f32.mrf.mxu1  ;;  %v9869_v17 = vpop.f32.mrf.mxu0 }
 0xdf5   :  { %v9870_v53 = vadd.f32 %v9869_v17, %v9811_v42 }
 0xdf6   :  { %v15652_v50 = vpop.f32.mrf.mxu1  ;;  %v15658_v36 = vpop.f32.mrf.mxu0 }
 0xdf7   :  { %v9943_v18 = vadd.f32 %v15652_v50, %v9875_v4 }
 0xdf8   :  { %v9926_v57 = vpop.f32.mrf.mxu1  ;;  %v9990_v22 = vpop.f32.mrf.mxu0 }
 0xdf9   :  { %v10007_v37 = vadd.f32 %v15658_v36, %v9943_v18  ;;  %v9941_v11 = vadd.f32 %v9926_v57, %v9867_v59 }
 0xdfa   :  { %v15653_v38 = vpop.f32.mrf.mxu1  ;;  %v15659_v55 = vpop.f32.mrf.mxu0 }
 0xdfb   :  { %v10005_v21 = vadd.f32 %v9990_v22, %v9941_v11  ;;  %v9944_v56 = vadd.f32 %v15653_v38, %v9878_v14 }
 0xdfc   :  { %v9929_v33 = vpop.f32.mrf.mxu1  ;;  %v9993_v5 = vpop.f32.mrf.mxu0 }
 0xdfd   :  { %v10008_v12 = vadd.f32 %v15659_v55, %v9944_v56  ;;  %v9942_v34 = vadd.f32 %v9929_v33, %v9870_v53 }
 0xdfe   :  { %v15664_v3 = vpop.f32.mrf.mxu1  ;;  %v15670_v43 = vpop.f32.mrf.mxu0 }
 0xdff   :  { %v10006_v15 = vadd.f32 %v9993_v5, %v9942_v34  ;;  %v10071_v8 = vadd.f32 %v15664_v3, %v10007_v37 }
 0xe00   :  { %v10054_v31 = vpop.f32.mrf.mxu1  ;;  %v10118_v30 = vpop.f32.mrf.mxu0 }
 0xe01   :  { %v10135_v16 = vadd.f32 %v15670_v43, %v10071_v8  ;;  %v10069_v32 = vadd.f32 %v10054_v31, %v10005_v21 }
 0xe02   :  { %v15665_v52 = vpop.f32.mrf.mxu1  ;;  %v15671_v20 = vpop.f32.mrf.mxu0 }
 0xe03   :  { %v10133_v13 = vadd.f32 %v10118_v30, %v10069_v32  ;;  %v10072_v62 = vadd.f32 %v15665_v52, %v10008_v12 }
 0xe04   :  { %v10057_v63 = vpop.f32.mrf.mxu1  ;;  %v10121_v41 = vpop.f32.mrf.mxu0 }
 0xe05   :  { %v10136_v0 = vadd.f32 %v15671_v20, %v10072_v62  ;;  %v10070_v1 = vadd.f32 %v10057_v63, %v10006_v15 }
 0xe06   :  { %v15676_v48 = vpop.f32.mrf.mxu1  ;;  %v15682_v9 = vpop.f32.mrf.mxu0 }
 0xe07   :  { %v10134_v58 = vadd.f32 %v10121_v41, %v10070_v1  ;;  %v10199_v51 = vadd.f32 %v15676_v48, %v10135_v16 }
 0xe08   :  { %v10182_v28 = vpop.f32.mrf.mxu1  ;;  %v10246_v7 = vpop.f32.mrf.mxu0 }
 0xe09   :  { %v10263_v49 = vadd.f32 %v15682_v9, %v10199_v51  ;;  %v10197_v60 = vadd.f32 %v10182_v28, %v10133_v13 }
 0xe0a   :  { %v15677_v23 = vpop.f32.mrf.mxu1  ;;  %v15683_v26 = vpop.f32.mrf.mxu0 }
 0xe0b   :  { %v10261_v39 = vadd.f32 %v10246_v7, %v10197_v60  ;;  %v10200_v6 = vadd.f32 %v15677_v23, %v10136_v0 }
 0xe0c   :  { %v10185_v45 = vpop.f32.mrf.mxu1  ;;  %v10249_v44 = vpop.f32.mrf.mxu0 }
 0xe0d   :  { %v10264_v19 = vadd.f32 %v15683_v26, %v10200_v6  ;;  %v10198_v27 = vadd.f32 %v10185_v45, %v10134_v58 }
 0xe0e   :  { %v15688_v24 = vpop.f32.mrf.mxu1  ;;  %v15694_v25 = vpop.f32.mrf.mxu0 }
 0xe0f   :  { %v10262_v46 = vadd.f32 %v10249_v44, %v10198_v27  ;;  %v19183_v2 = vadd.f32 %v15688_v24, %v10263_v49 }
 0xe10   :  { %v10310_v40 = vpop.f32.mrf.mxu1  ;;  %v10370_v29 = vpop.f32.mrf.mxu0 }
 0xe11   :  { %19545 = vst [vmem:[#allocation30_spill] sm:$0xff] %v19183_v2  ;;  %v19185_v35 = vadd.f32 %v10310_v40, %v10261_v39 }
 0xe12   :  { %v15689_v4 = vpop.f32.mrf.mxu1  ;;  %v15695_v61 = vpop.f32.mrf.mxu0 }
 0xe13   :  { %19546 = vst [vmem:[#allocation6_spill] sm:$0xff] %v19185_v35  ;;  %v19187_v47 = vadd.f32 %v15689_v4, %v10264_v19 }
 0xe14   :  { %v10313_v59 = vpop.f32.mrf.mxu1  ;;  %v10373_v54 = vpop.f32.mrf.mxu0 }
 0xe15   :  { %19547 = vst [vmem:[#allocation12_spill] sm:$0xff] %v19187_v47  ;;  %v19189_v10 = vadd.f32 %v10313_v59, %v10262_v46 }
 0xe16   :  { %v15700_v14 = vpop.f32.mrf.mxu1  ;;  %v15706_v42 = vpop.f32.mrf.mxu0 }
 0xe17   :  { %19548 = vst [vmem:[#allocation5_spill] sm:$0xff] %v19189_v10  ;;  %v10431_v17 = vadd.f32 %v15700_v14, %v15694_v25 }
 0xe18   :  { %v10422_v53 = vpop.f32.mrf.mxu1  ;;  %v10476_v50 = vpop.f32.mrf.mxu0 }
 0xe19   :  { %v10493_v36 = vadd.f32 %v15706_v42, %v10431_v17  ;;  %v10423_v18 = vadd.f32 %v10422_v53, %v10370_v29 }
 0xe1a   :  { %v15701_v57 = vpop.f32.mrf.mxu1  ;;  %v15707_v22 = vpop.f32.mrf.mxu0 }
 0xe1b   :  { %v10491_v37 = vadd.f32 %v10476_v50, %v10423_v18  ;;  %v10434_v11 = vadd.f32 %v15701_v57, %v15695_v61 }
 0xe1c   :  { %v10425_v38 = vpop.f32.mrf.mxu1  ;;  %v10479_v55 = vpop.f32.mrf.mxu0 }
 0xe1d   :  { %v10494_v21 = vadd.f32 %v15707_v22, %v10434_v11  ;;  %v10426_v56 = vadd.f32 %v10425_v38, %v10373_v54 }
 0xe1e   :  { %v15712_v33 = vpop.f32.mrf.mxu1  ;;  %v15718_v5 = vpop.f32.mrf.mxu0 }
 0xe1f   :  { %v10492_v12 = vadd.f32 %v10479_v55, %v10426_v56  ;;  %v10551_v34 = vadd.f32 %v15712_v33, %v10493_v36 }
 0xe20   :  { %v10534_v3 = vpop.f32.mrf.mxu1  ;;  %v10592_v43 = vpop.f32.mrf.mxu0 }
 0xe21   :  { %v10609_v15 = vadd.f32 %v15718_v5, %v10551_v34  ;;  %v10549_v8 = vadd.f32 %v10534_v3, %v10491_v37 }
 0xe22   :  { %v15713_v31 = vpop.f32.mrf.mxu1  ;;  %v15719_v30 = vpop.f32.mrf.mxu0 }
 0xe23   :  { %v10607_v16 = vadd.f32 %v10592_v43, %v10549_v8  ;;  %v10552_v32 = vadd.f32 %v15713_v31, %v10494_v21 }
 0xe24   :  { %v10537_v52 = vpop.f32.mrf.mxu1  ;;  %v10595_v20 = vpop.f32.mrf.mxu0 }
 0xe25   :  { %v10610_v13 = vadd.f32 %v15719_v30, %v10552_v32  ;;  %v10550_v62 = vadd.f32 %v10537_v52, %v10492_v12 }
 0xe26   :  { %v15724_v63 = vpop.f32.mrf.mxu1  ;;  %v15730_v41 = vpop.f32.mrf.mxu0 }
 0xe27   :  { %v10608_v0 = vadd.f32 %v10595_v20, %v10550_v62  ;;  %v10667_v1 = vadd.f32 %v15724_v63, %v10609_v15 }
 0xe28   :  { %v10650_v48 = vpop.f32.mrf.mxu1  ;;  %v10708_v9 = vpop.f32.mrf.mxu0 }
 0xe29   :  { %v10725_v58 = vadd.f32 %v15730_v41, %v10667_v1  ;;  %v10665_v51 = vadd.f32 %v10650_v48, %v10607_v16 }
 0xe2a   :  { %v15725_v28 = vpop.f32.mrf.mxu1  ;;  %v15731_v7 = vpop.f32.mrf.mxu0 }
 0xe2b   :  { %v10723_v49 = vadd.f32 %v10708_v9, %v10665_v51  ;;  %v10668_v60 = vadd.f32 %v15725_v28, %v10610_v13 }
 0xe2c   :  { %v10653_v23 = vpop.f32.mrf.mxu1  ;;  %v10711_v26 = vpop.f32.mrf.mxu0 }
 0xe2d   :  { %v10726_v39 = vadd.f32 %v15731_v7, %v10668_v60  ;;  %v10666_v6 = vadd.f32 %v10653_v23, %v10608_v0 }
 0xe2e   :  { %v15736_v45 = vpop.f32.mrf.mxu1  ;;  %v15742_v44 = vpop.f32.mrf.mxu0 }
 0xe2f   :  { %v10724_v19 = vadd.f32 %v10711_v26, %v10666_v6  ;;  %v10783_v27 = vadd.f32 %v15736_v45, %v10725_v58 }
 0xe30   :  { %v10766_v24 = vpop.f32.mrf.mxu1  ;;  %v10824_v25 = vpop.f32.mrf.mxu0 }
 0xe31   :  { %v19191_v46 = vadd.f32 %v15742_v44, %v10783_v27  ;;  %v10781_v40 = vadd.f32 %v10766_v24, %v10723_v49 }
 0xe32   :  { %v15737_v29 = vpop.f32.mrf.mxu1  ;;  %v15743_v4 = vpop.f32.mrf.mxu0 }
 0xe33   :  { %19549 = vst [vmem:[#allocation11_spill] sm:$0xff] %v19191_v46  ;;  %v19193_v61 = vadd.f32 %v10824_v25, %v10781_v40  ;;  %v10784_v59 = vadd.f32 %v15737_v29, %v10726_v39 }
 0xe34   :  { %v10769_v54 = vpop.f32.mrf.mxu1  ;;  %v10827_v14 = vpop.f32.mrf.mxu0 }
 0xe35   :  { %19550 = vst [vmem:[#allocation18_spill] sm:$0xff] %v19193_v61  ;;  %v19195_v42 = vadd.f32 %v15743_v4, %v10784_v59  ;;  %v10782_v17 = vadd.f32 %v10769_v54, %v10724_v19 }
 0xe36   :  { %v15748_v53 = vpop.f32.mrf.mxu1  ;;  %v15754_v50 = vpop.f32.mrf.mxu0 }
 0xe37   :  { %19551 = vst [vmem:[#allocation25_spill] sm:$0xff] %v19195_v42  ;;  %v19197_v36 = vadd.f32 %v10827_v14, %v10782_v17 }
 0xe38   :  { %v10884_v18 = vpop.f32.mrf.mxu1  ;;  %v10936_v57 = vpop.f32.mrf.mxu0 }
 0xe39   :  { %19552 = vst [vmem:[#allocation22_spill] sm:$0xff] %v19197_v36  ;;  %v10937_v29 = vadd.f32 %v10936_v57, %v10884_v18  ;;  %v10945_v36 = vadd.f32 %v15754_v50, %v15748_v53 }
 0xe3a   :  { %v15749_v22 = vpop.f32.mrf.mxu1  ;;  %v15755_v37 = vpop.f32.mrf.mxu0 }
 0xe3b   :  { %v10948_v54 = vadd.f32 %v15755_v37, %v15749_v22 }
 0xe3c   :  { %v10887_v11 = vpop.f32.mrf.mxu1  ;;  %v10939_v38 = vpop.f32.mrf.mxu0 }
 0xe3d   :  { %v10940_v10 = vadd.f32 %v10939_v38, %v10887_v11 }
 0xe3e   :  { %v15760_v55 = vpop.f32.mrf.mxu1  ;;  %v19199_v21 = vpop.f32.mrf.mxu0 }
 0xe40   :  { %v10990_v56 = vpop.f32.mrf.mxu1  ;;  %v11048_v33 = vpop.f32.mrf.mxu0 }
 0xe41   :  { %v11005_v46 = vadd.f32 %v10990_v56, %v10937_v29 }
 0xe42   :  { %v15761_v5 = vpop.f32.mrf.mxu1  ;;  %v15767_v12 = vpop.f32.mrf.mxu0 }
 0xe43   :  { %v11063_v18 = vadd.f32 %v11048_v33, %v11005_v46 }
 0xe44   :  { %v10993_v34 = vpop.f32.mrf.mxu1  ;;  %v19201_v3 = vpop.f32.mrf.mxu0 }
 0xe46   :  { %v19203_v43 = vpop.f32.mrf.mxu1  ;;  %v19205_v15 = vpop.f32.mrf.mxu0 }
 0xe48   :  { %v11106_v8 = vpop.f32.mrf.mxu1  ;;  %v19207_v31 = vpop.f32.mrf.mxu0 }
 0xe4a   :  { %v15773_v30 = vpop.f32.mrf.mxu1  ;;  %v19209_v16 = vpop.f32.mrf.mxu0 }
 0xe4c   :  { %v19211_v32 = vpop.f32.mrf.mxu1  ;;  %v19213_v52 = vpop.f32.mrf.mxu0 }
 0xe4e   :  { %v19215_v20 = vpop.f32.mrf.mxu1  ;;  %v19217_v13 = vpop.f32.mrf.mxu0 }
 0xe4f   :  { %19553 = vst [vmem:[#allocation4_spill] sm:$0xff] %v19217_v13 }
 0xe50   :  { %v19219_v62 = vpop.f32.mrf.mxu1  ;;  %v19221_v63 = vpop.f32.mrf.mxu0 }
 0xe52   :  { %v19223_v41 = vpop.f32.mrf.mxu1  ;;  %v19225_v0 = vpop.f32.mrf.mxu0 }
 0xe54   :  { %v19227_v1 = vpop.f32.mrf.mxu1  ;;  %v19229_v48 = vpop.f32.mrf.mxu0 }
 0xe55   :  { %19554 = vst [vmem:[#allocation27_spill] sm:$0xff] %v19229_v48  ;;  %v11006_v48 = vadd.f32 %v10993_v34, %v10940_v10 }
 0xe56   :  { %v19231_v9 = vpop.f32.mrf.mxu1  ;;  %v15802_v58 = vpop.f32.mrf.mxu0 }
 0xe57   :  { %19555 = vst [vmem:[#allocation17_spill] sm:$0xff] %v19231_v9  ;;  %v11064_v38 = vadd.f32 %v19201_v3, %v11006_v48 }
 0xe58   :  { %v19233_v51 = vpop.f32.mrf.mxu1  ;;  %v11398_v28 = vpop.f32.mrf.mxu0 }
 0xe59   :  { %19556 = vst [vmem:[#allocation20_spill] sm:$0xff] %v19233_v51  ;;  %v11122_v46 = vadd.f32 %v19211_v32, %v11064_v38 }
 0xe5a   :  { %v19235_v7 = vpop.f32.mrf.mxu1  ;;  %v15803_v49 = vpop.f32.mrf.mxu0 }
 0xe5b   :  { %19557 = vst [vmem:[#allocation7_spill] sm:$0xff] %v19235_v7  ;;  %v11007_v7 = vadd.f32 %v15760_v55, %v10945_v36 }
 0xe5c   :  { %v19237_v60 = vpop.f32.mrf.mxu1  ;;  %v11401_v23 = vpop.f32.mrf.mxu0 }
 0xe5d   :  { %19558 = vst [vmem:[#allocation26_spill] sm:$0xff] %v19237_v60  ;;  %v11008_v60 = vadd.f32 %v15761_v5, %v10948_v54  ;;  %v11065_v11 = vadd.f32 %v19199_v21, %v11007_v7 }
 0xe5e   :  { %v15808_v26 = vpop.f32.mrf.mxu1  ;;  %v15814_v39 = vpop.f32.mrf.mxu0 }
 0xe5f   :  { %v11459_v4 = vadd.f32 %v15808_v26, %v15802_v58  ;;  %v11066_v37 = vadd.f32 %v15767_v12, %v11008_v60 }
 0xe60   :  { %v11450_v6 = vpop.f32.mrf.mxu1  ;;  %v11504_v45 = vpop.f32.mrf.mxu0 }
 0xe61   :  { %v11451_v59 = vadd.f32 %v11450_v6, %v11398_v28  ;;  %v11521_v9 = vadd.f32 %v15814_v39, %v11459_v4  ;;  %v11124_v5 = vadd.f32 %v15773_v30, %v11066_v37  ;;  %v19560_v4 = vld [vmem:[#allocation4_spill] sm:$0xff] }
 0xe62   :  { %v15809_v44 = vpop.f32.mrf.mxu1  ;;  %v15815_v19 = vpop.f32.mrf.mxu0 }
 0xe63   :  { %v11462_v2 = vadd.f32 %v15809_v44, %v15803_v49  ;;  %v11519_v61 = vadd.f32 %v11504_v45, %v11451_v59  ;;  %v11121_v49 = vadd.f32 %v11106_v8, %v11063_v18  ;;  %v11182_v21 = vadd.f32 %v19209_v16, %v11124_v5  ;;  %v19561_v59 = vld [vmem:[#allocation27_spill] sm:$0xff]  ;;  %v19563_v18 = vld [vmem:[#allocation6_spill] sm:$0xff] }
 0xe64   :  { %v11453_v27 = vpop.f32.mrf.mxu1  ;;  %v11507_v24 = vpop.f32.mrf.mxu0  ;;  %v19568_v5 = vld [vmem:[#allocation26_spill] sm:$0xff] }
 0xe65   :  { %v11454_v35 = vadd.f32 %v11453_v27, %v11401_v23  ;;  %v11522_v57 = vadd.f32 %v15815_v19, %v11462_v2  ;;  %v11123_v2 = vadd.f32 %v19203_v43, %v11065_v11  ;;  %v11179_v12 = vadd.f32 %v19207_v31, %v11121_v49  ;;  %v19567_v11 = vld [vmem:[#allocation25_spill] sm:$0xff] }
 0xe66   :  { %v15820_v25 = vpop.f32.mrf.mxu1  ;;  %v15826_v40 = vpop.f32.mrf.mxu0  ;;  %v11180_v43 = vadd.f32 %v19213_v52, %v11122_v46  ;;  %v11240_v32 = vadd.f32 %v19223_v41, %v11182_v21  ;;  %v19572_v21 = vld [vmem:[#allocation11_spill] sm:$0xff] }
 0xe67   :  { %v11579_v58 = vadd.f32 %v15820_v25, %v11521_v9  ;;  %v11520_v53 = vadd.f32 %v11507_v24, %v11454_v35  ;;  %v11237_v48 = vadd.f32 %v19219_v62, %v11179_v12  ;;  %v19559_v24 = vld [vmem:[#allocation20_spill] sm:$0xff] }
 0xe68   :  { %v11562_v14 = vpop.f32.mrf.mxu1  ;;  %v11620_v17 = vpop.f32.mrf.mxu0  ;;  %v11238_v16 = vadd.f32 %v19227_v1, %v11180_v43  ;;  %v11298_v52 = vadd.f32 %v19225_v0, %v11240_v32 }
 0xe69   :  { %v11577_v22 = vadd.f32 %v11562_v14, %v11519_v61  ;;  %v11637_v10 = vadd.f32 %v15826_v40, %v11579_v58  ;;  %v11295_v62 = vadd.f32 %v19221_v63, %v11237_v48  ;;  %v19562_v14 = vld [vmem:[#allocation7_spill] sm:$0xff] }
 0xe6a   :  { %v15821_v42 = vpop.f32.mrf.mxu1  ;;  %v15827_v47 = vpop.f32.mrf.mxu0  ;;  %v11296_v54 = vadd.f32 %v19561_v59, %v11238_v16  ;;  %v19261_v63 = vadd.f32 %v19562_v14, %v11298_v52 }
 0xe6b   :  { %v11580_v50 = vadd.f32 %v15821_v42, %v11522_v57  ;;  %v11635_v55 = vadd.f32 %v11620_v17, %v11577_v22  ;;  %v19254_v25 = vadd.f32 %v19559_v24, %v11295_v62  ;;  %v19564_v57 = vld [vmem:[#allocation18_spill] sm:$0xff] }
 0xe6c   :  { %v11565_v13 = vpop.f32.mrf.mxu1  ;;  %v11623_v51 = vpop.f32.mrf.mxu0  ;;  %v11881_v0 = vadd.f32 %v19564_v57, %v19563_v18 }
 0xe6d   :  { %v11578_v34 = vadd.f32 %v11565_v13, %v11520_v53  ;;  %v11638_v35 = vadd.f32 %v15827_v47, %v11580_v50  ;;  %v11181_v13 = vadd.f32 %v19205_v15, %v11123_v2  ;;  %v19566_v50 = vld [vmem:[#allocation12_spill] sm:$0xff]  ;;  %v19570_v2 = vld [vmem:[#allocation22_spill] sm:$0xff] }
 0xe6e   :  { %v15832_v28 = vpop.f32.mrf.mxu1  ;;  %v15838_v56 = vpop.f32.mrf.mxu0  ;;  %v11884_v38 = vadd.f32 %v19567_v11, %v19566_v50 }
 0xe6f   :  { %v11695_v42 = vadd.f32 %v15832_v28, %v11637_v10  ;;  %v11636_v9 = vadd.f32 %v11623_v51, %v11578_v34  ;;  %v11239_v6 = vadd.f32 %v19215_v20, %v11181_v13  ;;  %v19569_v34 = vld [vmem:[#allocation5_spill] sm:$0xff] }
 0xe70   :  { %v11678_v23 = vpop.f32.mrf.mxu1  ;;  %v11736_v36 = vpop.f32.mrf.mxu0  ;;  %v11882_v46 = vadd.f32 %v19570_v2, %v19569_v34 }
 0xe71   :  { %v11693_v8 = vadd.f32 %v11678_v23, %v11635_v55  ;;  %v11753_v31 = vadd.f32 %v15838_v56, %v11695_v42  ;;  %v11297_v1 = vadd.f32 %v19560_v4, %v11239_v6  ;;  %v19565_v56 = vld [vmem:[#allocation17_spill] sm:$0xff]  ;;  %v19277_v23 = vadd.f32 %v19568_v5, %v11296_v54 }
 0xe72   :  { %v15833_v61 = vpop.f32.mrf.mxu1  ;;  %v15839_v33 = vpop.f32.mrf.mxu0 }
 0xe73   :  { %v11696_v7 = vadd.f32 %v15833_v61, %v11638_v35  ;;  %v11751_v47 = vadd.f32 %v11736_v36, %v11693_v8  ;;  %v19272_v49 = vadd.f32 %v19565_v56, %v11297_v1  ;;  %v19571_v8 = vld [vmem:[#allocation30_spill] sm:$0xff] }
 0xe74   :  { %v11681_v3 = vpop.f32.mrf.mxu1  ;;  %v11739_v30 = vpop.f32.mrf.mxu0 }
 0xe75   :  { %v11694_v39 = vadd.f32 %v11681_v3, %v11636_v9  ;;  %v11754_v51 = vadd.f32 %v15839_v33, %v11696_v7  ;;  %v11883_v3 = vadd.f32 %v19572_v21, %v19571_v8 }
 0xe76   :  { %v15844_v60 = vpop.f32.mrf.mxu1  ;;  %v15850_v26 = vpop.f32.mrf.mxu0 }
 0xe77   :  { %v11811_v19 = vadd.f32 %v15844_v60, %v11753_v31  ;;  %v11752_v40 = vadd.f32 %v11739_v30, %v11694_v39 }
 0xe78   :  { %v11794_v45 = vpop.f32.mrf.mxu1  ;;  %v11852_v44 = vpop.f32.mrf.mxu0 }
 0xe79   :  { %v11809_v15 = vadd.f32 %v11794_v45, %v11751_v47  ;;  %v19265_v58 = vadd.f32 %v15850_v26, %v11811_v19 }
 0xe7a   :  { %v15845_v27 = vpop.f32.mrf.mxu1  ;;  %v15851_v41 = vpop.f32.mrf.mxu0 }
 0xe7b   :  { %v19256_v29 = vadd.f32 %v11852_v44, %v11809_v15  ;;  %v11812_v20 = vadd.f32 %v15845_v27, %v11754_v51  ;;  %v11887_v35 = vadd.f32 %v19265_v58, %v19272_v49 }
 0xe7c   :  { %v11797_v17 = vpop.f32.mrf.mxu1  ;;  %v11855_v53 = vpop.f32.mrf.mxu0 }
 0xe7d   :  { %v19267_v22 = vadd.f32 %v15851_v41, %v11812_v20  ;;  %v11810_v37 = vadd.f32 %v11797_v17, %v11752_v40  ;;  %v11885_v28 = vadd.f32 %v19256_v29, %v19254_v25  ;;  %v11891_v9 = vadd.f32 %v11887_v35, %v11883_v3 }
 0xe7f   :  { %v19279_v36 = vadd.f32 %v11855_v53, %v11810_v37  ;;  %v11889_v10 = vadd.f32 %v11885_v28, %v11881_v0  ;;  %v11888_v55 = vadd.f32 %v19267_v22, %v19261_v63  ;;  %v11900_v7 = vsel %vm11893_vm3, %v11891_v9, 0.0 }
 0xe81   :  { %v11894_v61 = vsel %vm11893_vm3, %v11889_v10, 0.0  ;;  %v11886_v33 = vadd.f32 %v19279_v36, %v19277_v23  ;;  %v11892_v12 = vadd.f32 %v11888_v55, %v11884_v38 }
 0xe82   :  { %11895 = vadd.xlane.f32.xlu1 %v11894_v61 }
 0xe83   :  { %v11890_v42 = vadd.f32 %v11886_v33, %v11882_v46  ;;  %v11903_v48 = vsel %vm11893_vm3, %v11892_v12, 0.0 }
 0xe85   :  { %v11897_v30 = vsel %vm11893_vm3, %v11890_v42, 0.0 }
 0xe86   :  { %11898 = vadd.xlane.f32.xlu0 %v11897_v30  ;;  %11904 = vadd.xlane.f32.xlu1 %v11903_v48 }
 0xe8a   :  { %11901 = vadd.xlane.f32.xlu0 %v11900_v7 }
 0xf0b   :  { %v11896_v13 = vpop.xlane.xlu1 %11895 }
 0xf0c   :  { %v19312_v52 = vmul.f32 0.125, %v11896_v13 }
 0xf0e   :  { %v11911_v1 = vsub.f32 %v19563_v18, %v19312_v52  ;;  %v11931_v28 = vsub.f32 %v19564_v57, %v19312_v52  ;;  %v11955_v55 = vsub.f32 %v19254_v25, %v19312_v52  ;;  %v11979_v42 = vsub.f32 %v19256_v29, %v19312_v52 }
 0xf0f   :  { %v11899_v43 = vpop.xlane.xlu0 %11898  ;;  %v11905_v32 = vpop.xlane.xlu1 %11904 }
 0xf10   :  { %v19295_v60 = vmul.f32 0.125, %v11905_v32  ;;  %v19303_v16 = vmul.f32 0.125, %v11899_v43  ;;  %v11915_v37 = vmul.f32 %v11911_v1, %v11911_v1  ;;  %v11935_v10 = vmul.f32 %v11931_v28, %v11931_v28 }
 0xf11   :  { %v11959_v35 = vmul.f32 %v11955_v55, %v11955_v55  ;;  %v11983_v7 = vmul.f32 %v11979_v42, %v11979_v42 }
 0xf12   :  { %v11914_v26 = vsub.f32 %v19566_v50, %v19295_v60  ;;  %v11934_v31 = vsub.f32 %v19567_v11, %v19295_v60  ;;  %v11958_v45 = vsub.f32 %v19261_v63, %v19295_v60  ;;  %v11912_v41 = vsub.f32 %v19569_v34, %v19303_v16 }
 0xf13   :  { %v11902_v47 = vpop.xlane.xlu0 %11901  ;;  %v11932_v59 = vsub.f32 %v19570_v2, %v19303_v16  ;;  %v11956_v5 = vsub.f32 %v19277_v23, %v19303_v16  ;;  %v11919_v46 = vsel %vm11893_vm3, %v11915_v37, 0.0  ;;  %v11980_v12 = vsub.f32 %v19279_v36, %v19303_v16 }
 0xf14   :  { %v19301_v39 = vmul.f32 0.125, %v11902_v47  ;;  %v11918_v6 = vmul.f32 %v11914_v26, %v11914_v26  ;;  %v11938_v51 = vmul.f32 %v11934_v31, %v11934_v31  ;;  %v11962_v27 = vmul.f32 %v11958_v45, %v11958_v45 }
 0xf15   :  { %v11916_v0 = vmul.f32 %v11912_v41, %v11912_v41  ;;  %v11936_v38 = vmul.f32 %v11932_v59, %v11932_v59  ;;  %v11960_v33 = vmul.f32 %v11956_v5, %v11956_v5  ;;  %v11939_v3 = vsel %vm11893_vm3, %v11935_v10, 0.0 }
 0xf16   :  { %v11928_v44 = vsel %vm11893_vm3, %v11918_v6, 0.0  ;;  %v11913_v62 = vsub.f32 %v19571_v8, %v19301_v39  ;;  %v11933_v19 = vsub.f32 %v19572_v21, %v19301_v39  ;;  %v11948_v40 = vsel %vm11893_vm3, %v11938_v51, 0.0 }
 0xf17   :  { %11929 = vadd.xlane.f32.xlu1 %v11928_v44  ;;  %v11957_v4 = vsub.f32 %v19272_v49, %v19301_v39  ;;  %v11972_v14 = vsel %vm11893_vm3, %v11962_v27, 0.0  ;;  %v11922_v53 = vsel %vm11893_vm3, %v11916_v0, 0.0  ;;  %v11942_v61 = vsel %vm11893_vm3, %v11936_v38, 0.0 }
 0xf18   :  { %v11917_v15 = vmul.f32 %v11913_v62, %v11913_v62  ;;  %v11937_v20 = vmul.f32 %v11933_v19, %v11933_v19  ;;  %v11966_v30 = vsel %vm11893_vm3, %v11960_v33, 0.0  ;;  %v11984_v48 = vmul.f32 %v11980_v12, %v11980_v12 }
 0xf19   :  { %v11961_v17 = vmul.f32 %v11957_v4, %v11957_v4  ;;  %v11982_v9 = vsub.f32 %v19267_v22, %v19295_v60  ;;  %v11963_v13 = vsel %vm11893_vm3, %v11959_v35, 0.0  ;;  %v11981_v26 = vsub.f32 %v19265_v58, %v19301_v39 }
 0xf1a   :  { %v11925_v24 = vsel %vm11893_vm3, %v11917_v15, 0.0  ;;  %v11945_v54 = vsel %vm11893_vm3, %v11937_v20, 0.0  ;;  %v11990_v43 = vsel %vm11893_vm3, %v11984_v48, 0.0  ;;  %v11987_v31 = vsel %vm11893_vm3, %v11983_v7, 0.0 }
 0xf1b   :  { %11926 = vadd.xlane.f32.xlu0 %v11925_v24  ;;  %11949 = vadd.xlane.f32.xlu1 %v11948_v40  ;;  %v11969_v56 = vsel %vm11893_vm3, %v11961_v17, 0.0  ;;  %v11986_v32 = vmul.f32 %v11982_v9, %v11982_v9  ;;  %v11985_v6 = vmul.f32 %v11981_v26, %v11981_v26 }
 0xf1d   :  { %v11996_v47 = vsel %vm11893_vm3, %v11986_v32, 0.0  ;;  %v11993_v45 = vsel %vm11893_vm3, %v11985_v6, 0.0  ;;  %v13637_v32 = vld [vmem:[%s19413_s6 + $0xc8] sm:$0xff] }
 0xf1f   :  { %11946 = vadd.xlane.f32.xlu0 %v11945_v54  ;;  %11973 = vadd.xlane.f32.xlu1 %v11972_v14 }
 0xf23   :  { %11970 = vadd.xlane.f32.xlu0 %v11969_v56  ;;  %11923 = vadd.xlane.f32.xlu1 %v11922_v53 }
 0xf27   :  { %11920 = vadd.xlane.f32.xlu0 %v11919_v46  ;;  %11943 = vadd.xlane.f32.xlu1 %v11942_v61 }
 0xf2b   :  { %11940 = vadd.xlane.f32.xlu0 %v11939_v3  ;;  %11967 = vadd.xlane.f32.xlu1 %v11966_v30 }
 0xf2f   :  { %11964 = vadd.xlane.f32.xlu0 %v11963_v13  ;;  %11991 = vadd.xlane.f32.xlu1 %v11990_v43  ;;  %v13636_v43 = vld [vmem:[%s19413_s6 + $0xc0] sm:$0xff] }
 0xf33   :  { %11988 = vadd.xlane.f32.xlu0 %v11987_v31  ;;  %11997 = vadd.xlane.f32.xlu1 %v11996_v47 }
 0xf37   :  { %11994 = vadd.xlane.f32.xlu0 %v11993_v45  ;;  %v13638_v45 = vld [vmem:[%s19413_s6 + $0xd0] sm:$0xff] }
 0xfa0   :  { %v11930_v44 = vpop.xlane.xlu1 %11929 }
 0xfa4   :  { %v11927_v62 = vpop.xlane.xlu0 %11926  ;;  %v11950_v51 = vpop.xlane.xlu1 %11949 }
 0xfa5   :  { %v11954_v17 = vadd.f32 %v11950_v51, %v11930_v44  ;;  %v13639_v44 = vld [vmem:[%s19413_s6 + $0xd8] sm:$0xff] }
 0xfa8   :  { %v11947_v19 = vpop.xlane.xlu0 %11946  ;;  %v11974_v15 = vpop.xlane.xlu1 %11973 }
 0xfa9   :  { %v11978_v28 = vadd.f32 %v11974_v15, %v11954_v17  ;;  %v11953_v10 = vadd.f32 %v11947_v19, %v11927_v62 }
 0xfac   :  { %v11971_v27 = vpop.xlane.xlu0 %11970  ;;  %v11924_v41 = vpop.xlane.xlu1 %11923 }
 0xfad   :  { %v11977_v33 = vadd.f32 %v11971_v27, %v11953_v10  ;;  %v13641_v27 = vld [vmem:[%s19413_s6 + $0xe8] sm:$0xff] }
 0xfb0   :  { %v11921_v24 = vpop.xlane.xlu0 %11920  ;;  %v11944_v40 = vpop.xlane.xlu1 %11943 }
 0xfb1   :  { %v11952_v1 = vadd.f32 %v11944_v40, %v11924_v41 }
 0xfb4   :  { %v11941_v20 = vpop.xlane.xlu0 %11940  ;;  %v11968_v4 = vpop.xlane.xlu1 %11967 }
 0xfb5   :  { %v11976_v59 = vadd.f32 %v11968_v4, %v11952_v1  ;;  %v11951_v0 = vadd.f32 %v11941_v20, %v11921_v24  ;;  %v13640_v20 = vld [vmem:[%s19413_s6 + $0xe0] sm:$0xff]  ;;  %v13643_v4 = vld [vmem:[%s19413_s6 + $0xf8] sm:$0xff] }
 0xfb8   :  { %v11965_v54 = vpop.xlane.xlu0 %11964  ;;  %v11992_v14 = vpop.xlane.xlu1 %11991 }
 0xfb9   :  { %v12000_v37 = vadd.f32 %v11992_v14, %v11976_v59  ;;  %v11975_v56 = vadd.f32 %v11965_v54, %v11951_v0 }
 0xfbb   :  { %v12004_v53 = vmul.f32 0.125, %v12000_v37 }
 0xfbc   :  { %v11989_v38 = vpop.xlane.xlu0 %11988  ;;  %v11998_v5 = vpop.xlane.xlu1 %11997 }
 0xfbd   :  { %v12008_v55 = vadd.f32 1e-05, %v12004_v53  ;;  %v11999_v46 = vadd.f32 %v11989_v38, %v11975_v56  ;;  %v12002_v61 = vadd.f32 %v11998_v5, %v11978_v28 }
 0xfbf   :  { %v12003_v12 = vmul.f32 0.125, %v11999_v46  ;;  %v12006_v35 = vmul.f32 0.125, %v12002_v61  ;;  %16339 = vrsqrt.f32 %v12008_v55 }
 0xfc0   :  { %v11995_v42 = vpop.xlane.xlu0 %11994 }
 0xfc1   :  { %v12007_v3 = vadd.f32 1e-05, %v12003_v12  ;;  %v12010_v30 = vadd.f32 1e-05, %v12006_v35  ;;  %v12001_v48 = vadd.f32 %v11995_v42, %v11977_v33 }
 0xfc3   :  { %16341 = vrsqrt.f32 %v12007_v3  ;;  %v12005_v9 = vmul.f32 0.125, %v12001_v48 }
 0xfc4   :  { %16343 = vrsqrt.f32 %v12010_v30 }
 0xfc5   :  { %v12009_v7 = vadd.f32 1e-05, %v12005_v9 }
 0xfc7   :  { %16345 = vrsqrt.f32 %v12009_v7 }
 0xfcc   :  { %v16340_v13 = vpop.eup %16339 }
 0xfcd   :  { %v12016_v47 = vmul.f32 %v16340_v13, %v13637_v32 }
 0xfcf   :  { %v12020_v15 = vmul.f32 %v12016_v47, %v19303_v16 }
 0xfd0   :  { %v16342_v26 = vpop.eup %16341 }
 0xfd1   :  { %v12015_v31 = vmul.f32 %v16342_v26, %v13636_v43  ;;  %v16344_v6 = vpop.eup %16343  ;;  %v12024_v41 = vsub.f32 %v13641_v27, %v12020_v15 }
 0xfd2   :  { %v12018_v19 = vmul.f32 %v16344_v6, %v13639_v44 }
 0xfd3   :  { %12029 = vperm.xlu0 %15889, %v12015_v31   ;;  %v12019_v24 = vmul.f32 %v12015_v31, %v19312_v52  ;;  %v13642_v52 = vld [vmem:[%s19413_s6 + $0xf0] sm:$0xff] }
 0xfd4   :  { %v16346_v62 = vpop.eup %16345  ;;  %v12022_v40 = vmul.f32 %v12018_v19, %v19295_v60 }
 0xfd5   :  { %v12017_v51 = vmul.f32 %v16346_v62, %v13638_v45  ;;  %v12023_v16 = vsub.f32 %v13640_v20, %v12019_v24 }
 0xfd6   :  { %v12026_v1 = vsub.f32 %v13643_v4, %v12022_v40 }
 0xfd7   :  { %12039 = vperm.xlu1 %15890, %v12017_v51   ;;  %12044 = vperm.xlu0 %15889, %v12018_v19   ;;  %v12021_v59 = vmul.f32 %v12017_v51, %v19301_v39 }
 0xfd9   :  { %v12025_v60 = vsub.f32 %v13642_v52, %v12021_v59 }
 0xfdb   :  { %12034 = vperm.xlu1 %15890, %v12016_v47   ;;  %12058 = vperm.xlu0 %15889, %v12024_v41  }
 0xfdf   :  { %12053 = vperm.xlu1 %15890, %v12023_v16   ;;  %12068 = vperm.xlu0 %15889, %v12026_v1  }
 0xfe3   :  { %12063 = vperm.xlu1 %15890, %v12025_v60  }
0x104e   :  { %v12030_v54 = vpop.permute.xlu0 %12029 }
0x104f   :  { %v12047_v0 = vmul.f32 %v12030_v54, %v19563_v18  ;;  %v12079_v37 = vmul.f32 %v12030_v54, %v19564_v57  ;;  %v12091_v28 = vmul.f32 %v12030_v54, %v19254_v25  ;;  %v12103_v56 = vmul.f32 %v12030_v54, %v19256_v29 }
0x1052   :  { %v12045_v14 = vpop.permute.xlu0 %12044  ;;  %v12040_v17 = vpop.permute.xlu1 %12039 }
0x1053   :  { %v12050_v46 = vmul.f32 %v12045_v14, %v19566_v50  ;;  %v12082_v18 = vmul.f32 %v12045_v14, %v19567_v11  ;;  %v12094_v57 = vmul.f32 %v12045_v14, %v19261_v63  ;;  %v12106_v25 = vmul.f32 %v12045_v14, %v19267_v22 }
0x1054   :  { %v12105_v50 = vmul.f32 %v12040_v17, %v19265_v58 }
0x1056   :  { %v12059_v39 = vpop.permute.xlu0 %12058  ;;  %v12035_v53 = vpop.permute.xlu1 %12034 }
0x1057   :  { %v12048_v38 = vmul.f32 %v12035_v53, %v19569_v34  ;;  %v12080_v5 = vmul.f32 %v12035_v53, %v19570_v2  ;;  %v12092_v10 = vmul.f32 %v12035_v53, %v19277_v23  ;;  %v12104_v55 = vmul.f32 %v12035_v53, %v19279_v36 }
0x1058   :  { %v12049_v2 = vmul.f32 %v12040_v17, %v19571_v8  ;;  %v12081_v23 = vmul.f32 %v12040_v17, %v19572_v21  ;;  %v12093_v36 = vmul.f32 %v12040_v17, %v19272_v49 }
0x1059   :  { %v12072_v61 = vadd.f32 %v12059_v39, %v12048_v38  ;;  %v12084_v29 = vadd.f32 %v12080_v5, %v12059_v39  ;;  %v12096_v33 = vadd.f32 %v12092_v10, %v12059_v39  ;;  %v12108_v12 = vadd.f32 %v12104_v55, %v12059_v39 }
0x105a   :  { %v12069_v35 = vpop.permute.xlu0 %12068  ;;  %v12054_v34 = vpop.permute.xlu1 %12053 }
0x105b   :  { %v12076_v42 = vmax.f32 %v12072_v61, 0.0  ;;  %v12088_v11 = vmax.f32 %v12084_v29, 0.0  ;;  %v12100_v3 = vmax.f32 %v12096_v33, 0.0  ;;  %v12112_v63 = vmax.f32 %v12108_v12, 0.0 }
0x105c   :  { %v12074_v30 = vadd.f32 %v12069_v35, %v12050_v46  ;;  %v12086_v22 = vadd.f32 %v12082_v18, %v12069_v35  ;;  %v12098_v48 = vadd.f32 %v12094_v57, %v12069_v35  ;;  %v12110_v9 = vadd.f32 %v12106_v25, %v12069_v35 }
0x105d   :  { %v12116_v7 = vmax.f32 %v12076_v42, %v12088_v11  ;;  %v12120_v13 = vmax.f32 %v12100_v3, %v12112_v63  ;;  %v12071_v43 = vadd.f32 %v12054_v34, %v12047_v0  ;;  %v12083_v32 = vadd.f32 %v12079_v37, %v12054_v34 }
0x105e   :  { %v12078_v26 = vmax.f32 %v12074_v30, 0.0  ;;  %v12090_v8 = vmax.f32 %v12086_v22, 0.0  ;;  %v12102_v31 = vmax.f32 %v12098_v48, 0.0  ;;  %v12114_v21 = vmax.f32 %v12110_v9, 0.0  ;;  %v12064_v47 = vpop.permute.xlu1 %12063 }
0x105f   :  { %v12124_v49 = vmax.f32 %v12116_v7, %v12120_v13  ;;  %v12075_v6 = vmax.f32 %v12071_v43, 0.0  ;;  %v12087_v58 = vmax.f32 %v12083_v32, 0.0  ;;  %v12095_v45 = vadd.f32 %v12091_v28, %v12054_v34 }
0x1060   :  { %v12118_v44 = vmax.f32 %v12078_v26, %v12090_v8  ;;  %v12122_v62 = vmax.f32 %v12102_v31, %v12114_v21  ;;  %v12107_v51 = vadd.f32 %v12103_v56, %v12054_v34  ;;  %v12073_v19 = vadd.f32 %v12064_v47, %v12049_v2 }
0x1061   :  { %12128 = vst.msk [vmem:[%s19418_s7 + $0x8] sm:$0xff] %vm11893_vm3, %v12124_v49  ;;  %v12099_v15 = vmax.f32 %v12095_v45, 0.0  ;;  %v12115_v27 = vmax.f32 %v12075_v6, %v12087_v58  ;;  %v12085_v41 = vadd.f32 %v12081_v23, %v12064_v47  ;;  %v12097_v24 = vadd.f32 %v12093_v36, %v12064_v47 }
0x1062   :  { %v12126_v40 = vmax.f32 %v12118_v44, %v12122_v62  ;;  %v12111_v20 = vmax.f32 %v12107_v51, 0.0  ;;  %v12077_v4 = vmax.f32 %v12073_v19, 0.0  ;;  %v12109_v16 = vadd.f32 %v12105_v50, %v12064_v47 }
0x1063   :  { %v12089_v1 = vmax.f32 %v12085_v41, 0.0  ;;  %v12101_v59 = vmax.f32 %v12097_v24, 0.0 }
0x1064   :  { %12130 = vst.msk [vmem:[%s19418_s7 + $0x18] sm:$0xff] %vm11893_vm3, %v12126_v40  ;;  %v12119_v52 = vmax.f32 %v12099_v15, %v12111_v20  ;;  %v12113_v60 = vmax.f32 %v12109_v16, 0.0 }
0x1065   :  { %v12117_v54 = vmax.f32 %v12077_v4, %v12089_v1 }
0x1066   :  { %v12123_v14 = vmax.f32 %v12115_v27, %v12119_v52  ;;  %v12121_v17 = vmax.f32 %v12101_v59, %v12113_v60 }
0x1068   :  { %12127 = vst.msk [vmem:[%s19418_s7] sm:$0xff] %vm11893_vm3, %v12123_v14  ;;  %v12125_v0 = vmax.f32 %v12117_v54, %v12121_v17 }
0x106a   :  { %12129 = vst.msk [vmem:[%s19418_s7 + $0x10] sm:$0xff] %vm11893_vm3, %v12125_v0 }

</bundles_post_ra>
